<compile_context>
chip_gen: v7x
topology: tpu7x:2x2x1
jax: 0.10.0
libtpu: 0.0.40
codegen_flags: <defaults>
</compile_context>

<pallas_src>
import functools

import jax
import jax.numpy as jnp
from jax.experimental import pallas as pl
from jax.experimental.pallas import tpu as pltpu

_EPS = 1e-5  # torch.nn.InstanceNorm2d default eps


# --------------------------------------------------------------------------
# Tile-size helpers
# --------------------------------------------------------------------------
def _pick_m_tile(hw, k_dim, cap_rows=1024, bytes_budget=4 << 20):
    """Rows per matmul tile: multiple of 8 (or the full HW), bounded by a
    per-buffer VMEM budget for the bf16 lhs block (safe on v5e/v7x)."""
    budget_rows = max(8, (bytes_budget // (k_dim * 2)) // 8 * 8)
    max_rows = min(cap_rows, budget_rows)
    if hw <= max_rows:
        return hw                       # single full block (always legal)
    d = max_rows - max_rows % 8
    while d >= 8:                       # prefer a divisor (no ragged tile)
        if hw % d == 0:
            return d
        d -= 8
    return max(8, max_rows - max_rows % 8)   # ragged; in-kernel mask handles it


def _pick_in_chunk(rows, lanes, bytes_budget=2 << 20):
    """Rows per InstanceNorm-apply chunk (bf16 blocks)."""
    budget_rows = max(8, (bytes_budget // (lanes * 2)) // 8 * 8)
    if rows <= budget_rows:
        return rows
    return budget_rows


# --------------------------------------------------------------------------
# Pallas conv matmul kernels (bf16 operands, fp32 accumulate, fused bias,
# optional fused InstanceNorm statistics epilogue)
# --------------------------------------------------------------------------
def _conv_kernel(a_ref, w_ref, bias_ref, o_ref):
    acc = jnp.dot(a_ref[0], w_ref[...], preferred_element_type=jnp.float32)
    o_ref[0] = (acc + bias_ref[...]).astype(o_ref.dtype)


def _make_conv_stats_kernel(hw, tm):
    ragged = (hw % tm) != 0

    def kernel(a_ref, w_ref, bias_ref, o_ref, sum_ref, ssq_ref):
        i = pl.program_id(1)
        acc = jnp.dot(a_ref[0], w_ref[...], preferred_element_type=jnp.float32)
        y = acc + bias_ref[...]                       # (tm, Cout) fp32
        o_ref[0] = y.astype(o_ref.dtype)

        @pl.when(i == 0)
        def _():
            sum_ref[...] = jnp.zeros_like(sum_ref)
            ssq_ref[...] = jnp.zeros_like(ssq_ref)

        yf = y
        if ragged:  # mask rows past the real HW so stats stay exact
            row = i * tm + jax.lax.broadcasted_iota(jnp.int32, (tm, 1), 0)
            yf = jnp.where(row < hw, y, 0.0)
        sum_ref[...] += jnp.sum(yf, axis=0, keepdims=True)[None]
        ssq_ref[...] += jnp.sum(yf * yf, axis=0, keepdims=True)[None]

    return kernel


def conv2d(x, w, bias, *, stride=1, reflect_pad=0, with_stats=True,
           out_dtype=jnp.bfloat16):
    """x: NHWC (bf16), w: (Cout, Cin, kH, kW) torch layout, bias: (Cout,).

    Returns (y, sum, ssq): y is (N, Ho, Wo, Cout); sum/ssq are per-sample
    per-channel fp32 statistics of y (None when with_stats=False).
    """
    Cout, Cin, kH, kW = w.shape
    N, H, W, C = x.shape
    assert C == Cin
    if reflect_pad > 0:
        p = reflect_pad
        x = jnp.pad(x, ((0, 0), (p, p), (p, p), (0, 0)), mode="reflect")
    Hp, Wp = x.shape[1], x.shape[2]
    Ho = (Hp - kH) // stride + 1
    Wo = (Wp - kW) // stride + 1
    K = kH * kW * Cin
    HW = Ho * Wo

    # TODO(synk): bf16 im2col is still materialized in HBM; fold the tap
    # decomposition into the kernel via shifted-window index_maps next.
    cols = []
    for ki in range(kH):
        for kj in range(kW):
            cols.append(x[:, ki:ki + (Ho - 1) * stride + 1:stride,
                           kj:kj + (Wo - 1) * stride + 1:stride, :])
    patches = jnp.stack(cols, axis=3).reshape(N, HW, K)          # bf16
    wm = jnp.transpose(w, (2, 3, 1, 0)).reshape(K, Cout).astype(jnp.bfloat16)
    bias2 = bias.reshape(1, Cout).astype(jnp.float32)

    tm = _pick_m_tile(HW, K)
    hw_tiles = pl.cdiv(HW, tm)
    grid = (N, hw_tiles)

    a_spec = pl.BlockSpec((1, tm, K), lambda n, i: (n, i, 0))     # streamed lhs
    w_spec = pl.BlockSpec((K, Cout), lambda n, i: (0, 0))         # resident rhs
    b_spec = pl.BlockSpec((1, Cout), lambda n, i: (0, 0))         # resident bias
    y_spec = pl.BlockSpec((1, tm, Cout), lambda n, i: (n, i, 0))
    s_spec = pl.BlockSpec((1, 1, Cout), lambda n, i: (n, 0, 0))   # stats accum

    if with_stats:
        y, s, q = pl.pallas_call(
            _make_conv_stats_kernel(HW, tm),
            out_shape=(jax.ShapeDtypeStruct((N, HW, Cout), out_dtype),
                       jax.ShapeDtypeStruct((N, 1, Cout), jnp.float32),
                       jax.ShapeDtypeStruct((N, 1, Cout), jnp.float32)),
            grid=grid,
            in_specs=[a_spec, w_spec, b_spec],
            out_specs=(y_spec, s_spec, s_spec),
            compiler_params=pltpu.CompilerParams(
                dimension_semantics=("parallel", "arbitrary")),
        )(patches, wm, bias2)
        return y.reshape(N, Ho, Wo, Cout), s, q

    y = pl.pallas_call(
        _conv_kernel,
        out_shape=jax.ShapeDtypeStruct((N, HW, Cout), out_dtype),
        grid=grid,
        in_specs=[a_spec, w_spec, b_spec],
        out_specs=y_spec,
        compiler_params=pltpu.CompilerParams(
            dimension_semantics=("parallel", "parallel")),
    )(patches, wm, bias2)
    return y.reshape(N, Ho, Wo, Cout), None, None


# --------------------------------------------------------------------------
# Pallas InstanceNorm apply (scale/shift + ReLU or residual), lane-dense
# --------------------------------------------------------------------------
def _in_apply_relu_kernel(x_ref, sc_ref, sh_ref, o_ref):
    y = x_ref[...].astype(jnp.float32) * sc_ref[...] + sh_ref[...]
    o_ref[...] = jnp.maximum(y, 0.0).astype(o_ref.dtype)


def _in_apply_residual_kernel(x_ref, sc_ref, sh_ref, r_ref, o_ref):
    y = (x_ref[...].astype(jnp.float32) * sc_ref[...] + sh_ref[...]
         + r_ref[...].astype(jnp.float32))
    o_ref[...] = y.astype(o_ref.dtype)


def instance_norm_apply(y, s, q, gamma, beta, *, relu=False, residual=None,
                        out_dtype=jnp.bfloat16):
    """y: (N,H,W,C) conv output (bf16); s,q: fused (N,1,C) fp32 sum / sumsq."""
    N, H, W, C = y.shape
    HW = H * W

    # Tiny per-(n,c) math: fold mean/var/gamma/beta into scale & shift (fp32).
    inv_hw = 1.0 / HW
    mean = s * inv_hw
    var = jnp.maximum(q * inv_hw - mean * mean, 0.0)   # biased var, clamped >=0
    rstd = jax.lax.rsqrt(var + _EPS)
    g = gamma.reshape(1, 1, C).astype(jnp.float32)
    b = beta.reshape(1, 1, C).astype(jnp.float32)
    scale = rstd * g
    shift = b - mean * scale

    # Lane-dense packing for narrow channel counts (C=32 -> f=4, C=64 -> f=2).
    f = 1
    if C < 128 and 128 % C == 0:
        f = 128 // C
        while f > 1 and HW % f != 0:
            f //= 2
    CL, HWf = C * f, HW // f
    y2 = y.reshape(N, HWf, CL)                         # free row-major reshape
    scale2 = jnp.tile(scale, (1, 1, f))
    shift2 = jnp.tile(shift, (1, 1, f))

    chunk = _pick_in_chunk(HWf, CL)
    n_chunks = pl.cdiv(HWf, chunk)

    x_spec = pl.BlockSpec((1, chunk, CL), lambda n, i: (n, i, 0))
    c_spec = pl.BlockSpec((1, 1, CL), lambda n, i: (n, 0, 0))
    cp = pltpu.CompilerParams(dimension_semantics=("parallel", "parallel"))
    out_shape = jax.ShapeDtypeStruct((N, HWf, CL), out_dtype)

    if residual is not None:
        r2 = residual.reshape(N, HWf, CL)
        out = pl.pallas_call(
            _in_apply_residual_kernel, out_shape=out_shape, grid=(N, n_chunks),
            in_specs=[x_spec, c_spec, c_spec, x_spec], out_specs=x_spec,
            compiler_params=cp,
        )(y2, scale2, shift2, r2)
    else:
        assert relu, "all non-residual InstanceNorms in TransformerNet use ReLU"
        out = pl.pallas_call(
            _in_apply_relu_kernel, out_shape=out_shape, grid=(N, n_chunks),
            in_specs=[x_spec, c_spec, c_spec], out_specs=x_spec,
            compiler_params=cp,
        )(y2, scale2, shift2)
    return out.reshape(N, H, W, C)


# --------------------------------------------------------------------------
# Layer glue
# --------------------------------------------------------------------------
def upsample_nearest(x, factor):
    N, H, W, C = x.shape
    x = jnp.broadcast_to(x[:, :, None, :, None, :], (N, H, factor, W, factor, C))
    return x.reshape(N, H * factor, W * factor, C)


def conv_in_relu(x, w, b, gamma, beta, *, stride=1):
    """ConvLayer(reflect-pad + conv) -> InstanceNorm (fused stats) -> ReLU."""
    y, s, q = conv2d(x, w, b, stride=stride, reflect_pad=w.shape[2] // 2,
                     with_stats=True)
    return instance_norm_apply(y, s, q, gamma, beta, relu=True)


def residual_block(x, p):
    y, s, q = conv2d(x, p["c1_w"], p["c1_b"], stride=1, reflect_pad=1,
                     with_stats=True)
    y = instance_norm_apply(y, s, q, p["in1_g"], p["in1_b"], relu=True)
    y, s, q = conv2d(y, p["c2_w"], p["c2_b"], stride=1, reflect_pad=1,
                     with_stats=True)
    return instance_norm_apply(y, s, q, p["in2_g"], p["in2_b"], residual=x)


def upsample_conv_in_relu(x, w, b, gamma, beta, *, upsample=2):
    x = upsample_nearest(x, upsample)                  # bf16 upsample
    return conv_in_relu(x, w, b, gamma, beta, stride=1)


# --------------------------------------------------------------------------
# TransformerNet forward
# --------------------------------------------------------------------------
def transformer_net_forward(params, X):
    """X: (N, 3, H, W) NCHW float32. Returns (N, 3, H, W) float32."""
    x = jnp.transpose(X, (0, 2, 3, 1)).astype(jnp.bfloat16)       # NHWC bf16

    y = conv_in_relu(x, params["conv1_w"], params["conv1_b"],
                     params["in1_g"], params["in1_b"], stride=1)
    y = conv_in_relu(y, params["conv2_w"], params["conv2_b"],
                     params["in2_g"], params["in2_b"], stride=2)
    y = conv_in_relu(y, params["conv3_w"], params["conv3_b"],
                     params["in3_g"], params["in3_b"], stride=2)

    for i in range(1, 6):
        y = residual_block(y, params[f"res{i}"])

    y = upsample_conv_in_relu(y, params["deconv1_w"], params["deconv1_b"],
                              params["in4_g"], params["in4_b"], upsample=2)
    y = upsample_conv_in_relu(y, params["deconv2_w"], params["deconv2_b"],
                              params["in5_g"], params["in5_b"], upsample=2)

    # Final conv: no InstanceNorm / activation; emit fp32 output directly.
    y, _, _ = conv2d(y, params["deconv3_w"], params["deconv3_b"], stride=1,
                     reflect_pad=params["deconv3_w"].shape[2] // 2,
                     with_stats=False, out_dtype=jnp.float32)
    return jnp.transpose(y, (0, 3, 1, 2))                         # NCHW fp32


# --------------------------------------------------------------------------
# Deterministic parameter construction (synthetic; shapes from __init__)
# --------------------------------------------------------------------------
def init_params(key):
    def nxt():
        nonlocal key
        key, sub = jax.random.split(key)
        return sub

    def w(shape, scale=0.05):
        return scale * jax.random.normal(nxt(), shape, dtype=jnp.float32)

    def in_affine(c):
        g = 1.0 + 0.1 * jax.random.normal(nxt(), (c,), dtype=jnp.float32)
        b = 0.1 * jax.random.normal(nxt(), (c,), dtype=jnp.float32)
        return g, b

    p = {}
    p["conv1_w"] = w((32, 3, 9, 9));   p["conv1_b"] = w((32,), 0.01)
    p["in1_g"], p["in1_b"] = in_affine(32)
    p["conv2_w"] = w((64, 32, 3, 3));  p["conv2_b"] = w((64,), 0.01)
    p["in2_g"], p["in2_b"] = in_affine(64)
    p["conv3_w"] = w((128, 64, 3, 3)); p["conv3_b"] = w((128,), 0.01)
    p["in3_g"], p["in3_b"] = in_affine(128)
    for i in range(1, 6):
        rb = {}
        rb["c1_w"] = w((128, 128, 3, 3)); rb["c1_b"] = w((128,), 0.01)
        rb["in1_g"], rb["in1_b"] = in_affine(128)
        rb["c2_w"] = w((128, 128, 3, 3)); rb["c2_b"] = w((128,), 0.01)
        rb["in2_g"], rb["in2_b"] = in_affine(128)
        p[f"res{i}"] = rb
    p["deconv1_w"] = w((64, 128, 3, 3)); p["deconv1_b"] = w((64,), 0.01)
    p["in4_g"], p["in4_b"] = in_affine(64)
    p["deconv2_w"] = w((32, 64, 3, 3));  p["deconv2_b"] = w((32,), 0.01)
    p["in5_g"], p["in5_b"] = in_affine(32)
    p["deconv3_w"] = w((3, 32, 9, 9));   p["deconv3_b"] = w((3,), 0.01)
    return p


if __name__ == "__main__":
    key = jax.random.PRNGKey(0)
    kp, kx = jax.random.split(key)

    params = init_params(kp)
    X = jax.random.normal(kx, (2, 3, 16, 16), dtype=jnp.float32)   # NCHW

    fwd = jax.jit(functools.partial(transformer_net_forward, params))
    out = jax.block_until_ready(fwd(X))

    assert out.shape == (2, 3, 16, 16), out.shape
    assert bool(jnp.all(jnp.isfinite(out)))
    print("KERNEL_OK")
</pallas_src>

<mosaic_0001>
module attributes {stable_mosaic.version = 11 : i64} {
  func.func @kernel(%arg0: i32, %arg1: i32, %arg2: memref<1x256x243xbf16, #tpu.memory_space<vmem>>, %arg3: memref<243x32xbf16, #tpu.memory_space<vmem>>, %arg4: memref<1x32xf32, #tpu.memory_space<vmem>>, %arg5: memref<1x256x32xbf16, #tpu.memory_space<vmem>>, %arg6: memref<1x1x32xf32, #tpu.memory_space<vmem>>, %arg7: memref<1x1x32xf32, #tpu.memory_space<vmem>>) attributes {dimension_semantics = [#tpu.dimension_semantics<parallel>, #tpu.dimension_semantics<arbitrary>], iteration_bounds = array<i64: 2, 1>, scalar_prefetch = 0 : i64, scratch_operands = 0 : i64, tpu.core_type = #tpu.core_type<tc>, window_params = [{transform_indices = @transform_0, window_bounds = array<i64: 1, 256, 243>}, {pipeline_mode = #tpu.pipeline_mode<synchronous>, transform_indices = @transform_1, window_bounds = array<i64: 243, 32>}, {pipeline_mode = #tpu.pipeline_mode<synchronous>, transform_indices = @transform_2, window_bounds = array<i64: 1, 32>}, {transform_indices = @transform_3, window_bounds = array<i64: 1, 256, 32>}, {transform_indices = @transform_4, window_bounds = array<i64: 1, 1, 32>}, {transform_indices = @transform_5, window_bounds = array<i64: 1, 1, 32>}]} {
    %c0 = arith.constant 0 : index
    %c0_0 = arith.constant 0 : index
    %c0_1 = arith.constant 0 : index
    %0 = vector.load %arg2[%c0, %c0_0, %c0_1] : memref<1x256x243xbf16, #tpu.memory_space<vmem>>, vector<1x256x243xbf16>
    %1 = vector.shape_cast %0 : vector<1x256x243xbf16> to vector<256x243xbf16>
    %c0_2 = arith.constant 0 : index
    %c0_3 = arith.constant 0 : index
    %2 = vector.load %arg3[%c0_2, %c0_3] : memref<243x32xbf16, #tpu.memory_space<vmem>>, vector<243x32xbf16>
    %cst = arith.constant dense<0.000000e+00> : vector<256x32xf32>
    %3 = tpu.matmul %1, %2, %cst {dimension_numbers = #tpu.dot_dimension_numbers<[1], [0], [0], [1], [0, 0, 1, 1], [], []>} : vector<256x243xbf16>, vector<243x32xbf16>, vector<256x32xf32> -> vector<256x32xf32>
    %c0_4 = arith.constant 0 : index
    %c0_5 = arith.constant 0 : index
    %4 = vector.load %arg4[%c0_4, %c0_5] : memref<1x32xf32, #tpu.memory_space<vmem>>, vector<1x32xf32>
    %5 = vector.broadcast %4 : vector<1x32xf32> to vector<256x32xf32>
    %6 = arith.addf %3, %5 : vector<256x32xf32>
    %7 = arith.truncf %6 : vector<256x32xf32> to vector<256x32xbf16>
    %c0_6 = arith.constant 0 : index
    %c0_7 = arith.constant 0 : index
    %c0_8 = arith.constant 0 : index
    %8 = vector.load %arg5[%c0_6, %c0_7, %c0_8] : memref<1x256x32xbf16, #tpu.memory_space<vmem>>, vector<1x256x32xbf16>
    %9 = vector.shape_cast %8 : vector<1x256x32xbf16> to vector<256x32xbf16>
    %10 = vector.shape_cast %7 : vector<256x32xbf16> to vector<1x256x32xbf16>
    tpu.vector_store %arg5[%c0_6, %c0_7, %c0_8], %10 {strides = array<i32>} : memref<1x256x32xbf16, #tpu.memory_space<vmem>>, vector<1x256x32xbf16>,
    %c0_i32 = arith.constant 0 : i32
    %11 = arith.cmpi eq, %arg1, %c0_i32 : i32
    %12 = arith.extui %11 : i1 to i32
    %c0_i32_9 = arith.constant 0 : i32
    %13 = arith.cmpi ne, %12, %c0_i32_9 : i32
    scf.if %13 {
      %cst_24 = arith.constant 0.000000e+00 : f32
      %27 = vector.broadcast %cst_24 : f32 to vector<1x1x32xf32>
      %c0_25 = arith.constant 0 : index
      %c0_26 = arith.constant 0 : index
      %c0_27 = arith.constant 0 : index
      %28 = vector.load %arg6[%c0_25, %c0_26, %c0_27] : memref<1x1x32xf32, #tpu.memory_space<vmem>>, vector<1x1x32xf32>
      tpu.vector_store %arg6[%c0_25, %c0_26, %c0_27], %27 {strides = array<i32>} : memref<1x1x32xf32, #tpu.memory_space<vmem>>, vector<1x1x32xf32>,
      %cst_28 = arith.constant 0.000000e+00 : f32
      %29 = vector.broadcast %cst_28 : f32 to vector<1x1x32xf32>
      %c0_29 = arith.constant 0 : index
      %c0_30 = arith.constant 0 : index
      %c0_31 = arith.constant 0 : index
      %30 = vector.load %arg7[%c0_29, %c0_30, %c0_31] : memref<1x1x32xf32, #tpu.memory_space<vmem>>, vector<1x1x32xf32>
      tpu.vector_store %arg7[%c0_29, %c0_30, %c0_31], %29 {strides = array<i32>} : memref<1x1x32xf32, #tpu.memory_space<vmem>>, vector<1x1x32xf32>,
    } else {
    }
    %c0_10 = arith.constant 0 : index
    %c0_11 = arith.constant 0 : index
    %c0_12 = arith.constant 0 : index
    %14 = vector.load %arg6[%c0_10, %c0_11, %c0_12] : memref<1x1x32xf32, #tpu.memory_space<vmem>>, vector<1x1x32xf32>
    %cst_13 = arith.constant dense<0.000000e+00> : vector<32xf32>
    %15 = vector.multi_reduction <add>, %6, %cst_13 [0] : vector<256x32xf32> to vector<32xf32>
    %16 = vector.shape_cast %15 : vector<32xf32> to vector<1x32xf32>
    %17 = vector.shape_cast %16 : vector<1x32xf32> to vector<1x1x32xf32>
    %18 = arith.addf %14, %17 : vector<1x1x32xf32>
    %c0_14 = arith.constant 0 : index
    %c0_15 = arith.constant 0 : index
    %c0_16 = arith.constant 0 : index
    %19 = vector.load %arg6[%c0_14, %c0_15, %c0_16] : memref<1x1x32xf32, #tpu.memory_space<vmem>>, vector<1x1x32xf32>
    tpu.vector_store %arg6[%c0_14, %c0_15, %c0_16], %18 {strides = array<i32>} : memref<1x1x32xf32, #tpu.memory_space<vmem>>, vector<1x1x32xf32>,
    %c0_17 = arith.constant 0 : index
    %c0_18 = arith.constant 0 : index
    %c0_19 = arith.constant 0 : index
    %20 = vector.load %arg7[%c0_17, %c0_18, %c0_19] : memref<1x1x32xf32, #tpu.memory_space<vmem>>, vector<1x1x32xf32>
    %21 = arith.mulf %6, %6 : vector<256x32xf32>
    %cst_20 = arith.constant dense<0.000000e+00> : vector<32xf32>
    %22 = vector.multi_reduction <add>, %21, %cst_20 [0] : vector<256x32xf32> to vector<32xf32>
    %23 = vector.shape_cast %22 : vector<32xf32> to vector<1x32xf32>
    %24 = vector.shape_cast %23 : vector<1x32xf32> to vector<1x1x32xf32>
    %25 = arith.addf %20, %24 : vector<1x1x32xf32>
    %c0_21 = arith.constant 0 : index
    %c0_22 = arith.constant 0 : index
    %c0_23 = arith.constant 0 : index
    %26 = vector.load %arg7[%c0_21, %c0_22, %c0_23] : memref<1x1x32xf32, #tpu.memory_space<vmem>>, vector<1x1x32xf32>
    tpu.vector_store %arg7[%c0_21, %c0_22, %c0_23], %25 {strides = array<i32>} : memref<1x1x32xf32, #tpu.memory_space<vmem>>, vector<1x1x32xf32>,
    return
  }
  func.func @transform_0(%arg0: i32, %arg1: i32) -> (i32, i32, i32) {
    %c0_i32 = arith.constant 0 : i32
    %c0_i32_0 = arith.constant 0 : i32
    return %arg0, %arg1, %c0_i32 : i32, i32, i32
  }
  func.func @transform_1(%arg0: i32, %arg1: i32) -> (i32, i32) {
    %c0_i32 = arith.constant 0 : i32
    %c0_i32_0 = arith.constant 0 : i32
    %c0_i32_1 = arith.constant 0 : i32
    return %c0_i32, %c0_i32_0 : i32, i32
  }
  func.func @transform_2(%arg0: i32, %arg1: i32) -> (i32, i32) {
    %c0_i32 = arith.constant 0 : i32
    %c0_i32_0 = arith.constant 0 : i32
    %c0_i32_1 = arith.constant 0 : i32
    return %c0_i32, %c0_i32_0 : i32, i32
  }
  func.func @transform_3(%arg0: i32, %arg1: i32) -> (i32, i32, i32) {
    %c0_i32 = arith.constant 0 : i32
    %c0_i32_0 = arith.constant 0 : i32
    return %arg0, %arg1, %c0_i32 : i32, i32, i32
  }
  func.func @transform_4(%arg0: i32, %arg1: i32) -> (i32, i32, i32) {
    %c0_i32 = arith.constant 0 : i32
    %c0_i32_0 = arith.constant 0 : i32
    %c0_i32_1 = arith.constant 0 : i32
    return %arg0, %c0_i32, %c0_i32_0 : i32, i32, i32
  }
  func.func @transform_5(%arg0: i32, %arg1: i32) -> (i32, i32, i32) {
    %c0_i32 = arith.constant 0 : i32
    %c0_i32_0 = arith.constant 0 : i32
    %c0_i32_1 = arith.constant 0 : i32
    return %arg0, %c0_i32, %c0_i32_0 : i32, i32, i32
  }
}

module attributes {stable_mosaic.version = 11 : i64} {
  func.func @_in_apply_relu_kernel(%arg0: i32, %arg1: i32, %arg2: memref<1x64x128xbf16, #tpu.memory_space<vmem>>, %arg3: memref<1x1x128xf32, #tpu.memory_space<vmem>>, %arg4: memref<1x1x128xf32, #tpu.memory_space<vmem>>, %arg5: memref<1x64x128xbf16, #tpu.memory_space<vmem>>) attributes {dimension_semantics = [#tpu.dimension_semantics<parallel>, #tpu.dimension_semantics<parallel>], iteration_bounds = array<i64: 2, 1>, scalar_prefetch = 0 : i64, scratch_operands = 0 : i64, tpu.core_type = #tpu.core_type<tc>, window_params = [{transform_indices = @transform_0, window_bounds = array<i64: 1, 64, 128>}, {transform_indices = @transform_1, window_bounds = array<i64: 1, 1, 128>}, {transform_indices = @transform_2, window_bounds = array<i64: 1, 1, 128>}, {transform_indices = @transform_3, window_bounds = array<i64: 1, 64, 128>}]} {
    %c0 = arith.constant 0 : index
    %c0_0 = arith.constant 0 : index
    %c0_1 = arith.constant 0 : index
    %0 = vector.load %arg2[%c0, %c0_0, %c0_1] : memref<1x64x128xbf16, #tpu.memory_space<vmem>>, vector<1x64x128xbf16>
    %1 = arith.extf %0 : vector<1x64x128xbf16> to vector<1x64x128xf32>
    %c0_2 = arith.constant 0 : index
    %c0_3 = arith.constant 0 : index
    %c0_4 = arith.constant 0 : index
    %2 = vector.load %arg3[%c0_2, %c0_3, %c0_4] : memref<1x1x128xf32, #tpu.memory_space<vmem>>, vector<1x1x128xf32>
    %3 = vector.broadcast %2 : vector<1x1x128xf32> to vector<1x64x128xf32>
    %4 = arith.mulf %1, %3 : vector<1x64x128xf32>
    %c0_5 = arith.constant 0 : index
    %c0_6 = arith.constant 0 : index
    %c0_7 = arith.constant 0 : index
    %5 = vector.load %arg4[%c0_5, %c0_6, %c0_7] : memref<1x1x128xf32, #tpu.memory_space<vmem>>, vector<1x1x128xf32>
    %6 = vector.broadcast %5 : vector<1x1x128xf32> to vector<1x64x128xf32>
    %7 = arith.addf %4, %6 : vector<1x64x128xf32>
    %cst = arith.constant 0.000000e+00 : f32
    %8 = vector.broadcast %cst : f32 to vector<1x64x128xf32>
    %9 = arith.maximumf %7, %8 : vector<1x64x128xf32>
    %10 = arith.truncf %9 : vector<1x64x128xf32> to vector<1x64x128xbf16>
    %c0_8 = arith.constant 0 : index
    %c0_9 = arith.constant 0 : index
    %c0_10 = arith.constant 0 : index
    %11 = vector.load %arg5[%c0_8, %c0_9, %c0_10] : memref<1x64x128xbf16, #tpu.memory_space<vmem>>, vector<1x64x128xbf16>
    tpu.vector_store %arg5[%c0_8, %c0_9, %c0_10], %10 {strides = array<i32>} : memref<1x64x128xbf16, #tpu.memory_space<vmem>>, vector<1x64x128xbf16>,
    return
  }
  func.func @transform_0(%arg0: i32, %arg1: i32) -> (i32, i32, i32) {
    %c0_i32 = arith.constant 0 : i32
    %c0_i32_0 = arith.constant 0 : i32
    return %arg0, %arg1, %c0_i32 : i32, i32, i32
  }
  func.func @transform_1(%arg0: i32, %arg1: i32) -> (i32, i32, i32) {
    %c0_i32 = arith.constant 0 : i32
    %c0_i32_0 = arith.constant 0 : i32
    %c0_i32_1 = arith.constant 0 : i32
    return %arg0, %c0_i32, %c0_i32_0 : i32, i32, i32
  }
  func.func @transform_2(%arg0: i32, %arg1: i32) -> (i32, i32, i32) {
    %c0_i32 = arith.constant 0 : i32
    %c0_i32_0 = arith.constant 0 : i32
    %c0_i32_1 = arith.constant 0 : i32
    return %arg0, %c0_i32, %c0_i32_0 : i32, i32, i32
  }
  func.func @transform_3(%arg0: i32, %arg1: i32) -> (i32, i32, i32) {
    %c0_i32 = arith.constant 0 : i32
    %c0_i32_0 = arith.constant 0 : i32
    return %arg0, %arg1, %c0_i32 : i32, i32, i32
  }
}

module attributes {stable_mosaic.version = 11 : i64} {
  func.func @kernel(%arg0: i32, %arg1: i32, %arg2: memref<1x64x288xbf16, #tpu.memory_space<vmem>>, %arg3: memref<288x64xbf16, #tpu.memory_space<vmem>>, %arg4: memref<1x64xf32, #tpu.memory_space<vmem>>, %arg5: memref<1x64x64xbf16, #tpu.memory_space<vmem>>, %arg6: memref<1x1x64xf32, #tpu.memory_space<vmem>>, %arg7: memref<1x1x64xf32, #tpu.memory_space<vmem>>) attributes {dimension_semantics = [#tpu.dimension_semantics<parallel>, #tpu.dimension_semantics<arbitrary>], iteration_bounds = array<i64: 2, 1>, scalar_prefetch = 0 : i64, scratch_operands = 0 : i64, tpu.core_type = #tpu.core_type<tc>, window_params = [{transform_indices = @transform_0, window_bounds = array<i64: 1, 64, 288>}, {pipeline_mode = #tpu.pipeline_mode<synchronous>, transform_indices = @transform_1, window_bounds = array<i64: 288, 64>}, {pipeline_mode = #tpu.pipeline_mode<synchronous>, transform_indices = @transform_2, window_bounds = array<i64: 1, 64>}, {transform_indices = @transform_3, window_bounds = array<i64: 1, 64, 64>}, {transform_indices = @transform_4, window_bounds = array<i64: 1, 1, 64>}, {transform_indices = @transform_5, window_bounds = array<i64: 1, 1, 64>}]} {
    %c0 = arith.constant 0 : index
    %c0_0 = arith.constant 0 : index
    %c0_1 = arith.constant 0 : index
    %0 = vector.load %arg2[%c0, %c0_0, %c0_1] : memref<1x64x288xbf16, #tpu.memory_space<vmem>>, vector<1x64x288xbf16>
    %1 = vector.shape_cast %0 : vector<1x64x288xbf16> to vector<64x288xbf16>
    %c0_2 = arith.constant 0 : index
    %c0_3 = arith.constant 0 : index
    %2 = vector.load %arg3[%c0_2, %c0_3] : memref<288x64xbf16, #tpu.memory_space<vmem>>, vector<288x64xbf16>
    %cst = arith.constant dense<0.000000e+00> : vector<64x64xf32>
    %3 = tpu.matmul %1, %2, %cst {dimension_numbers = #tpu.dot_dimension_numbers<[1], [0], [0], [1], [0, 0, 1, 1], [], []>} : vector<64x288xbf16>, vector<288x64xbf16>, vector<64x64xf32> -> vector<64x64xf32>
    %c0_4 = arith.constant 0 : index
    %c0_5 = arith.constant 0 : index
    %4 = vector.load %arg4[%c0_4, %c0_5] : memref<1x64xf32, #tpu.memory_space<vmem>>, vector<1x64xf32>
    %5 = vector.broadcast %4 : vector<1x64xf32> to vector<64x64xf32>
    %6 = arith.addf %3, %5 : vector<64x64xf32>
    %7 = arith.truncf %6 : vector<64x64xf32> to vector<64x64xbf16>
    %c0_6 = arith.constant 0 : index
    %c0_7 = arith.constant 0 : index
    %c0_8 = arith.constant 0 : index
    %8 = vector.load %arg5[%c0_6, %c0_7, %c0_8] : memref<1x64x64xbf16, #tpu.memory_space<vmem>>, vector<1x64x64xbf16>
    %9 = vector.shape_cast %8 : vector<1x64x64xbf16> to vector<64x64xbf16>
    %10 = vector.shape_cast %7 : vector<64x64xbf16> to vector<1x64x64xbf16>
    tpu.vector_store %arg5[%c0_6, %c0_7, %c0_8], %10 {strides = array<i32>} : memref<1x64x64xbf16, #tpu.memory_space<vmem>>, vector<1x64x64xbf16>,
    %c0_i32 = arith.constant 0 : i32
    %11 = arith.cmpi eq, %arg1, %c0_i32 : i32
    %12 = arith.extui %11 : i1 to i32
    %c0_i32_9 = arith.constant 0 : i32
    %13 = arith.cmpi ne, %12, %c0_i32_9 : i32
    scf.if %13 {
      %cst_24 = arith.constant 0.000000e+00 : f32
      %27 = vector.broadcast %cst_24 : f32 to vector<1x1x64xf32>
      %c0_25 = arith.constant 0 : index
      %c0_26 = arith.constant 0 : index
      %c0_27 = arith.constant 0 : index
      %28 = vector.load %arg6[%c0_25, %c0_26, %c0_27] : memref<1x1x64xf32, #tpu.memory_space<vmem>>, vector<1x1x64xf32>
      tpu.vector_store %arg6[%c0_25, %c0_26, %c0_27], %27 {strides = array<i32>} : memref<1x1x64xf32, #tpu.memory_space<vmem>>, vector<1x1x64xf32>,
      %cst_28 = arith.constant 0.000000e+00 : f32
      %29 = vector.broadcast %cst_28 : f32 to vector<1x1x64xf32>
      %c0_29 = arith.constant 0 : index
      %c0_30 = arith.constant 0 : index
      %c0_31 = arith.constant 0 : index
      %30 = vector.load %arg7[%c0_29, %c0_30, %c0_31] : memref<1x1x64xf32, #tpu.memory_space<vmem>>, vector<1x1x64xf32>
      tpu.vector_store %arg7[%c0_29, %c0_30, %c0_31], %29 {strides = array<i32>} : memref<1x1x64xf32, #tpu.memory_space<vmem>>, vector<1x1x64xf32>,
    } else {
    }
    %c0_10 = arith.constant 0 : index
    %c0_11 = arith.constant 0 : index
    %c0_12 = arith.constant 0 : index
    %14 = vector.load %arg6[%c0_10, %c0_11, %c0_12] : memref<1x1x64xf32, #tpu.memory_space<vmem>>, vector<1x1x64xf32>
    %cst_13 = arith.constant dense<0.000000e+00> : vector<64xf32>
    %15 = vector.multi_reduction <add>, %6, %cst_13 [0] : vector<64x64xf32> to vector<64xf32>
    %16 = vector.shape_cast %15 : vector<64xf32> to vector<1x64xf32>
    %17 = vector.shape_cast %16 : vector<1x64xf32> to vector<1x1x64xf32>
    %18 = arith.addf %14, %17 : vector<1x1x64xf32>
    %c0_14 = arith.constant 0 : index
    %c0_15 = arith.constant 0 : index
    %c0_16 = arith.constant 0 : index
    %19 = vector.load %arg6[%c0_14, %c0_15, %c0_16] : memref<1x1x64xf32, #tpu.memory_space<vmem>>, vector<1x1x64xf32>
    tpu.vector_store %arg6[%c0_14, %c0_15, %c0_16], %18 {strides = array<i32>} : memref<1x1x64xf32, #tpu.memory_space<vmem>>, vector<1x1x64xf32>,
    %c0_17 = arith.constant 0 : index
    %c0_18 = arith.constant 0 : index
    %c0_19 = arith.constant 0 : index
    %20 = vector.load %arg7[%c0_17, %c0_18, %c0_19] : memref<1x1x64xf32, #tpu.memory_space<vmem>>, vector<1x1x64xf32>
    %21 = arith.mulf %6, %6 : vector<64x64xf32>
    %cst_20 = arith.constant dense<0.000000e+00> : vector<64xf32>
    %22 = vector.multi_reduction <add>, %21, %cst_20 [0] : vector<64x64xf32> to vector<64xf32>
    %23 = vector.shape_cast %22 : vector<64xf32> to vector<1x64xf32>
    %24 = vector.shape_cast %23 : vector<1x64xf32> to vector<1x1x64xf32>
    %25 = arith.addf %20, %24 : vector<1x1x64xf32>
    %c0_21 = arith.constant 0 : index
    %c0_22 = arith.constant 0 : index
    %c0_23 = arith.constant 0 : index
    %26 = vector.load %arg7[%c0_21, %c0_22, %c0_23] : memref<1x1x64xf32, #tpu.memory_space<vmem>>, vector<1x1x64xf32>
    tpu.vector_store %arg7[%c0_21, %c0_22, %c0_23], %25 {strides = array<i32>} : memref<1x1x64xf32, #tpu.memory_space<vmem>>, vector<1x1x64xf32>,
    return
  }
  func.func @transform_0(%arg0: i32, %arg1: i32) -> (i32, i32, i32) {
    %c0_i32 = arith.constant 0 : i32
    %c0_i32_0 = arith.constant 0 : i32
    return %arg0, %arg1, %c0_i32 : i32, i32, i32
  }
  func.func @transform_1(%arg0: i32, %arg1: i32) -> (i32, i32) {
    %c0_i32 = arith.constant 0 : i32
    %c0_i32_0 = arith.constant 0 : i32
    %c0_i32_1 = arith.constant 0 : i32
    return %c0_i32, %c0_i32_0 : i32, i32
  }
  func.func @transform_2(%arg0: i32, %arg1: i32) -> (i32, i32) {
    %c0_i32 = arith.constant 0 : i32
    %c0_i32_0 = arith.constant 0 : i32
    %c0_i32_1 = arith.constant 0 : i32
    return %c0_i32, %c0_i32_0 : i32, i32
  }
  func.func @transform_3(%arg0: i32, %arg1: i32) -> (i32, i32, i32) {
    %c0_i32 = arith.constant 0 : i32
    %c0_i32_0 = arith.constant 0 : i32
    return %arg0, %arg1, %c0_i32 : i32, i32, i32
  }
  func.func @transform_4(%arg0: i32, %arg1: i32) -> (i32, i32, i32) {
    %c0_i32 = arith.constant 0 : i32
    %c0_i32_0 = arith.constant 0 : i32
    %c0_i32_1 = arith.constant 0 : i32
    return %arg0, %c0_i32, %c0_i32_0 : i32, i32, i32
  }
  func.func @transform_5(%arg0: i32, %arg1: i32) -> (i32, i32, i32) {
    %c0_i32 = arith.constant 0 : i32
    %c0_i32_0 = arith.constant 0 : i32
    %c0_i32_1 = arith.constant 0 : i32
    return %arg0, %c0_i32, %c0_i32_0 : i32, i32, i32
  }
}

module attributes {stable_mosaic.version = 11 : i64} {
  func.func @_in_apply_relu_kernel(%arg0: i32, %arg1: i32, %arg2: memref<1x32x128xbf16, #tpu.memory_space<vmem>>, %arg3: memref<1x1x128xf32, #tpu.memory_space<vmem>>, %arg4: memref<1x1x128xf32, #tpu.memory_space<vmem>>, %arg5: memref<1x32x128xbf16, #tpu.memory_space<vmem>>) attributes {dimension_semantics = [#tpu.dimension_semantics<parallel>, #tpu.dimension_semantics<parallel>], iteration_bounds = array<i64: 2, 1>, scalar_prefetch = 0 : i64, scratch_operands = 0 : i64, tpu.core_type = #tpu.core_type<tc>, window_params = [{transform_indices = @transform_0, window_bounds = array<i64: 1, 32, 128>}, {transform_indices = @transform_1, window_bounds = array<i64: 1, 1, 128>}, {transform_indices = @transform_2, window_bounds = array<i64: 1, 1, 128>}, {transform_indices = @transform_3, window_bounds = array<i64: 1, 32, 128>}]} {
    %c0 = arith.constant 0 : index
    %c0_0 = arith.constant 0 : index
    %c0_1 = arith.constant 0 : index
    %0 = vector.load %arg2[%c0, %c0_0, %c0_1] : memref<1x32x128xbf16, #tpu.memory_space<vmem>>, vector<1x32x128xbf16>
    %1 = arith.extf %0 : vector<1x32x128xbf16> to vector<1x32x128xf32>
    %c0_2 = arith.constant 0 : index
    %c0_3 = arith.constant 0 : index
    %c0_4 = arith.constant 0 : index
    %2 = vector.load %arg3[%c0_2, %c0_3, %c0_4] : memref<1x1x128xf32, #tpu.memory_space<vmem>>, vector<1x1x128xf32>
    %3 = vector.broadcast %2 : vector<1x1x128xf32> to vector<1x32x128xf32>
    %4 = arith.mulf %1, %3 : vector<1x32x128xf32>
    %c0_5 = arith.constant 0 : index
    %c0_6 = arith.constant 0 : index
    %c0_7 = arith.constant 0 : index
    %5 = vector.load %arg4[%c0_5, %c0_6, %c0_7] : memref<1x1x128xf32, #tpu.memory_space<vmem>>, vector<1x1x128xf32>
    %6 = vector.broadcast %5 : vector<1x1x128xf32> to vector<1x32x128xf32>
    %7 = arith.addf %4, %6 : vector<1x32x128xf32>
    %cst = arith.constant 0.000000e+00 : f32
    %8 = vector.broadcast %cst : f32 to vector<1x32x128xf32>
    %9 = arith.maximumf %7, %8 : vector<1x32x128xf32>
    %10 = arith.truncf %9 : vector<1x32x128xf32> to vector<1x32x128xbf16>
    %c0_8 = arith.constant 0 : index
    %c0_9 = arith.constant 0 : index
    %c0_10 = arith.constant 0 : index
    %11 = vector.load %arg5[%c0_8, %c0_9, %c0_10] : memref<1x32x128xbf16, #tpu.memory_space<vmem>>, vector<1x32x128xbf16>
    tpu.vector_store %arg5[%c0_8, %c0_9, %c0_10], %10 {strides = array<i32>} : memref<1x32x128xbf16, #tpu.memory_space<vmem>>, vector<1x32x128xbf16>,
    return
  }
  func.func @transform_0(%arg0: i32, %arg1: i32) -> (i32, i32, i32) {
    %c0_i32 = arith.constant 0 : i32
    %c0_i32_0 = arith.constant 0 : i32
    return %arg0, %arg1, %c0_i32 : i32, i32, i32
  }
  func.func @transform_1(%arg0: i32, %arg1: i32) -> (i32, i32, i32) {
    %c0_i32 = arith.constant 0 : i32
    %c0_i32_0 = arith.constant 0 : i32
    %c0_i32_1 = arith.constant 0 : i32
    return %arg0, %c0_i32, %c0_i32_0 : i32, i32, i32
  }
  func.func @transform_2(%arg0: i32, %arg1: i32) -> (i32, i32, i32) {
    %c0_i32 = arith.constant 0 : i32
    %c0_i32_0 = arith.constant 0 : i32
    %c0_i32_1 = arith.constant 0 : i32
    return %arg0, %c0_i32, %c0_i32_0 : i32, i32, i32
  }
  func.func @transform_3(%arg0: i32, %arg1: i32) -> (i32, i32, i32) {
    %c0_i32 = arith.constant 0 : i32
    %c0_i32_0 = arith.constant 0 : i32
    return %arg0, %arg1, %c0_i32 : i32, i32, i32
  }
}

module attributes {stable_mosaic.version = 11 : i64} {
  func.func @kernel(%arg0: i32, %arg1: i32, %arg2: memref<1x16x576xbf16, #tpu.memory_space<vmem>>, %arg3: memref<576x128xbf16, #tpu.memory_space<vmem>>, %arg4: memref<1x128xf32, #tpu.memory_space<vmem>>, %arg5: memref<1x16x128xbf16, #tpu.memory_space<vmem>>, %arg6: memref<1x1x128xf32, #tpu.memory_space<vmem>>, %arg7: memref<1x1x128xf32, #tpu.memory_space<vmem>>) attributes {dimension_semantics = [#tpu.dimension_semantics<parallel>, #tpu.dimension_semantics<arbitrary>], iteration_bounds = array<i64: 2, 1>, scalar_prefetch = 0 : i64, scratch_operands = 0 : i64, tpu.core_type = #tpu.core_type<tc>, window_params = [{transform_indices = @transform_0, window_bounds = array<i64: 1, 16, 576>}, {pipeline_mode = #tpu.pipeline_mode<synchronous>, transform_indices = @transform_1, window_bounds = array<i64: 576, 128>}, {pipeline_mode = #tpu.pipeline_mode<synchronous>, transform_indices = @transform_2, window_bounds = array<i64: 1, 128>}, {transform_indices = @transform_3, window_bounds = array<i64: 1, 16, 128>}, {transform_indices = @transform_4, window_bounds = array<i64: 1, 1, 128>}, {transform_indices = @transform_5, window_bounds = array<i64: 1, 1, 128>}]} {
    %c0 = arith.constant 0 : index
    %c0_0 = arith.constant 0 : index
    %c0_1 = arith.constant 0 : index
    %0 = vector.load %arg2[%c0, %c0_0, %c0_1] : memref<1x16x576xbf16, #tpu.memory_space<vmem>>, vector<1x16x576xbf16>
    %1 = vector.shape_cast %0 : vector<1x16x576xbf16> to vector<16x576xbf16>
    %c0_2 = arith.constant 0 : index
    %c0_3 = arith.constant 0 : index
    %2 = vector.load %arg3[%c0_2, %c0_3] : memref<576x128xbf16, #tpu.memory_space<vmem>>, vector<576x128xbf16>
    %cst = arith.constant dense<0.000000e+00> : vector<16x128xf32>
    %3 = tpu.matmul %1, %2, %cst {dimension_numbers = #tpu.dot_dimension_numbers<[1], [0], [0], [1], [0, 0, 1, 1], [], []>} : vector<16x576xbf16>, vector<576x128xbf16>, vector<16x128xf32> -> vector<16x128xf32>
    %c0_4 = arith.constant 0 : index
    %c0_5 = arith.constant 0 : index
    %4 = vector.load %arg4[%c0_4, %c0_5] : memref<1x128xf32, #tpu.memory_space<vmem>>, vector<1x128xf32>
    %5 = vector.broadcast %4 : vector<1x128xf32> to vector<16x128xf32>
    %6 = arith.addf %3, %5 : vector<16x128xf32>
    %7 = arith.truncf %6 : vector<16x128xf32> to vector<16x128xbf16>
    %c0_6 = arith.constant 0 : index
    %c0_7 = arith.constant 0 : index
    %c0_8 = arith.constant 0 : index
    %8 = vector.load %arg5[%c0_6, %c0_7, %c0_8] : memref<1x16x128xbf16, #tpu.memory_space<vmem>>, vector<1x16x128xbf16>
    %9 = vector.shape_cast %8 : vector<1x16x128xbf16> to vector<16x128xbf16>
    %10 = vector.shape_cast %7 : vector<16x128xbf16> to vector<1x16x128xbf16>
    tpu.vector_store %arg5[%c0_6, %c0_7, %c0_8], %10 {strides = array<i32>} : memref<1x16x128xbf16, #tpu.memory_space<vmem>>, vector<1x16x128xbf16>,
    %c0_i32 = arith.constant 0 : i32
    %11 = arith.cmpi eq, %arg1, %c0_i32 : i32
    %12 = arith.extui %11 : i1 to i32
    %c0_i32_9 = arith.constant 0 : i32
    %13 = arith.cmpi ne, %12, %c0_i32_9 : i32
    scf.if %13 {
      %cst_24 = arith.constant 0.000000e+00 : f32
      %27 = vector.broadcast %cst_24 : f32 to vector<1x1x128xf32>
      %c0_25 = arith.constant 0 : index
      %c0_26 = arith.constant 0 : index
      %c0_27 = arith.constant 0 : index
      %28 = vector.load %arg6[%c0_25, %c0_26, %c0_27] : memref<1x1x128xf32, #tpu.memory_space<vmem>>, vector<1x1x128xf32>
      tpu.vector_store %arg6[%c0_25, %c0_26, %c0_27], %27 {strides = array<i32>} : memref<1x1x128xf32, #tpu.memory_space<vmem>>, vector<1x1x128xf32>,
      %cst_28 = arith.constant 0.000000e+00 : f32
      %29 = vector.broadcast %cst_28 : f32 to vector<1x1x128xf32>
      %c0_29 = arith.constant 0 : index
      %c0_30 = arith.constant 0 : index
      %c0_31 = arith.constant 0 : index
      %30 = vector.load %arg7[%c0_29, %c0_30, %c0_31] : memref<1x1x128xf32, #tpu.memory_space<vmem>>, vector<1x1x128xf32>
      tpu.vector_store %arg7[%c0_29, %c0_30, %c0_31], %29 {strides = array<i32>} : memref<1x1x128xf32, #tpu.memory_space<vmem>>, vector<1x1x128xf32>,
    } else {
    }
    %c0_10 = arith.constant 0 : index
    %c0_11 = arith.constant 0 : index
    %c0_12 = arith.constant 0 : index
    %14 = vector.load %arg6[%c0_10, %c0_11, %c0_12] : memref<1x1x128xf32, #tpu.memory_space<vmem>>, vector<1x1x128xf32>
    %cst_13 = arith.constant dense<0.000000e+00> : vector<128xf32>
    %15 = vector.multi_reduction <add>, %6, %cst_13 [0] : vector<16x128xf32> to vector<128xf32>
    %16 = vector.shape_cast %15 : vector<128xf32> to vector<1x128xf32>
    %17 = vector.shape_cast %16 : vector<1x128xf32> to vector<1x1x128xf32>
    %18 = arith.addf %14, %17 : vector<1x1x128xf32>
    %c0_14 = arith.constant 0 : index
    %c0_15 = arith.constant 0 : index
    %c0_16 = arith.constant 0 : index
    %19 = vector.load %arg6[%c0_14, %c0_15, %c0_16] : memref<1x1x128xf32, #tpu.memory_space<vmem>>, vector<1x1x128xf32>
    tpu.vector_store %arg6[%c0_14, %c0_15, %c0_16], %18 {strides = array<i32>} : memref<1x1x128xf32, #tpu.memory_space<vmem>>, vector<1x1x128xf32>,
    %c0_17 = arith.constant 0 : index
    %c0_18 = arith.constant 0 : index
    %c0_19 = arith.constant 0 : index
    %20 = vector.load %arg7[%c0_17, %c0_18, %c0_19] : memref<1x1x128xf32, #tpu.memory_space<vmem>>, vector<1x1x128xf32>
    %21 = arith.mulf %6, %6 : vector<16x128xf32>
    %cst_20 = arith.constant dense<0.000000e+00> : vector<128xf32>
    %22 = vector.multi_reduction <add>, %21, %cst_20 [0] : vector<16x128xf32> to vector<128xf32>
    %23 = vector.shape_cast %22 : vector<128xf32> to vector<1x128xf32>
    %24 = vector.shape_cast %23 : vector<1x128xf32> to vector<1x1x128xf32>
    %25 = arith.addf %20, %24 : vector<1x1x128xf32>
    %c0_21 = arith.constant 0 : index
    %c0_22 = arith.constant 0 : index
    %c0_23 = arith.constant 0 : index
    %26 = vector.load %arg7[%c0_21, %c0_22, %c0_23] : memref<1x1x128xf32, #tpu.memory_space<vmem>>, vector<1x1x128xf32>
    tpu.vector_store %arg7[%c0_21, %c0_22, %c0_23], %25 {strides = array<i32>} : memref<1x1x128xf32, #tpu.memory_space<vmem>>, vector<1x1x128xf32>,
    return
  }
  func.func @transform_0(%arg0: i32, %arg1: i32) -> (i32, i32, i32) {
    %c0_i32 = arith.constant 0 : i32
    %c0_i32_0 = arith.constant 0 : i32
    return %arg0, %arg1, %c0_i32 : i32, i32, i32
  }
  func.func @transform_1(%arg0: i32, %arg1: i32) -> (i32, i32) {
    %c0_i32 = arith.constant 0 : i32
    %c0_i32_0 = arith.constant 0 : i32
    %c0_i32_1 = arith.constant 0 : i32
    return %c0_i32, %c0_i32_0 : i32, i32
  }
  func.func @transform_2(%arg0: i32, %arg1: i32) -> (i32, i32) {
    %c0_i32 = arith.constant 0 : i32
    %c0_i32_0 = arith.constant 0 : i32
    %c0_i32_1 = arith.constant 0 : i32
    return %c0_i32, %c0_i32_0 : i32, i32
  }
  func.func @transform_3(%arg0: i32, %arg1: i32) -> (i32, i32, i32) {
    %c0_i32 = arith.constant 0 : i32
    %c0_i32_0 = arith.constant 0 : i32
    return %arg0, %arg1, %c0_i32 : i32, i32, i32
  }
  func.func @transform_4(%arg0: i32, %arg1: i32) -> (i32, i32, i32) {
    %c0_i32 = arith.constant 0 : i32
    %c0_i32_0 = arith.constant 0 : i32
    %c0_i32_1 = arith.constant 0 : i32
    return %arg0, %c0_i32, %c0_i32_0 : i32, i32, i32
  }
  func.func @transform_5(%arg0: i32, %arg1: i32) -> (i32, i32, i32) {
    %c0_i32 = arith.constant 0 : i32
    %c0_i32_0 = arith.constant 0 : i32
    %c0_i32_1 = arith.constant 0 : i32
    return %arg0, %c0_i32, %c0_i32_0 : i32, i32, i32
  }
}

module attributes {stable_mosaic.version = 11 : i64} {
  func.func @_in_apply_relu_kernel(%arg0: i32, %arg1: i32, %arg2: memref<1x16x128xbf16, #tpu.memory_space<vmem>>, %arg3: memref<1x1x128xf32, #tpu.memory_space<vmem>>, %arg4: memref<1x1x128xf32, #tpu.memory_space<vmem>>, %arg5: memref<1x16x128xbf16, #tpu.memory_space<vmem>>) attributes {dimension_semantics = [#tpu.dimension_semantics<parallel>, #tpu.dimension_semantics<parallel>], iteration_bounds = array<i64: 2, 1>, scalar_prefetch = 0 : i64, scratch_operands = 0 : i64, tpu.core_type = #tpu.core_type<tc>, window_params = [{transform_indices = @transform_0, window_bounds = array<i64: 1, 16, 128>}, {transform_indices = @transform_1, window_bounds = array<i64: 1, 1, 128>}, {transform_indices = @transform_2, window_bounds = array<i64: 1, 1, 128>}, {transform_indices = @transform_3, window_bounds = array<i64: 1, 16, 128>}]} {
    %c0 = arith.constant 0 : index
    %c0_0 = arith.constant 0 : index
    %c0_1 = arith.constant 0 : index
    %0 = vector.load %arg2[%c0, %c0_0, %c0_1] : memref<1x16x128xbf16, #tpu.memory_space<vmem>>, vector<1x16x128xbf16>
    %1 = arith.extf %0 : vector<1x16x128xbf16> to vector<1x16x128xf32>
    %c0_2 = arith.constant 0 : index
    %c0_3 = arith.constant 0 : index
    %c0_4 = arith.constant 0 : index
    %2 = vector.load %arg3[%c0_2, %c0_3, %c0_4] : memref<1x1x128xf32, #tpu.memory_space<vmem>>, vector<1x1x128xf32>
    %3 = vector.broadcast %2 : vector<1x1x128xf32> to vector<1x16x128xf32>
    %4 = arith.mulf %1, %3 : vector<1x16x128xf32>
    %c0_5 = arith.constant 0 : index
    %c0_6 = arith.constant 0 : index
    %c0_7 = arith.constant 0 : index
    %5 = vector.load %arg4[%c0_5, %c0_6, %c0_7] : memref<1x1x128xf32, #tpu.memory_space<vmem>>, vector<1x1x128xf32>
    %6 = vector.broadcast %5 : vector<1x1x128xf32> to vector<1x16x128xf32>
    %7 = arith.addf %4, %6 : vector<1x16x128xf32>
    %cst = arith.constant 0.000000e+00 : f32
    %8 = vector.broadcast %cst : f32 to vector<1x16x128xf32>
    %9 = arith.maximumf %7, %8 : vector<1x16x128xf32>
    %10 = arith.truncf %9 : vector<1x16x128xf32> to vector<1x16x128xbf16>
    %c0_8 = arith.constant 0 : index
    %c0_9 = arith.constant 0 : index
    %c0_10 = arith.constant 0 : index
    %11 = vector.load %arg5[%c0_8, %c0_9, %c0_10] : memref<1x16x128xbf16, #tpu.memory_space<vmem>>, vector<1x16x128xbf16>
    tpu.vector_store %arg5[%c0_8, %c0_9, %c0_10], %10 {strides = array<i32>} : memref<1x16x128xbf16, #tpu.memory_space<vmem>>, vector<1x16x128xbf16>,
    return
  }
  func.func @transform_0(%arg0: i32, %arg1: i32) -> (i32, i32, i32) {
    %c0_i32 = arith.constant 0 : i32
    %c0_i32_0 = arith.constant 0 : i32
    return %arg0, %arg1, %c0_i32 : i32, i32, i32
  }
  func.func @transform_1(%arg0: i32, %arg1: i32) -> (i32, i32, i32) {
    %c0_i32 = arith.constant 0 : i32
    %c0_i32_0 = arith.constant 0 : i32
    %c0_i32_1 = arith.constant 0 : i32
    return %arg0, %c0_i32, %c0_i32_0 : i32, i32, i32
  }
  func.func @transform_2(%arg0: i32, %arg1: i32) -> (i32, i32, i32) {
    %c0_i32 = arith.constant 0 : i32
    %c0_i32_0 = arith.constant 0 : i32
    %c0_i32_1 = arith.constant 0 : i32
    return %arg0, %c0_i32, %c0_i32_0 : i32, i32, i32
  }
  func.func @transform_3(%arg0: i32, %arg1: i32) -> (i32, i32, i32) {
    %c0_i32 = arith.constant 0 : i32
    %c0_i32_0 = arith.constant 0 : i32
    return %arg0, %arg1, %c0_i32 : i32, i32, i32
  }
}

module attributes {stable_mosaic.version = 11 : i64} {
  func.func @kernel(%arg0: i32, %arg1: i32, %arg2: memref<1x16x1152xbf16, #tpu.memory_space<vmem>>, %arg3: memref<1152x128xbf16, #tpu.memory_space<vmem>>, %arg4: memref<1x128xf32, #tpu.memory_space<vmem>>, %arg5: memref<1x16x128xbf16, #tpu.memory_space<vmem>>, %arg6: memref<1x1x128xf32, #tpu.memory_space<vmem>>, %arg7: memref<1x1x128xf32, #tpu.memory_space<vmem>>) attributes {dimension_semantics = [#tpu.dimension_semantics<parallel>, #tpu.dimension_semantics<arbitrary>], iteration_bounds = array<i64: 2, 1>, scalar_prefetch = 0 : i64, scratch_operands = 0 : i64, tpu.core_type = #tpu.core_type<tc>, window_params = [{transform_indices = @transform_0, window_bounds = array<i64: 1, 16, 1152>}, {pipeline_mode = #tpu.pipeline_mode<synchronous>, transform_indices = @transform_1, window_bounds = array<i64: 1152, 128>}, {pipeline_mode = #tpu.pipeline_mode<synchronous>, transform_indices = @transform_2, window_bounds = array<i64: 1, 128>}, {transform_indices = @transform_3, window_bounds = array<i64: 1, 16, 128>}, {transform_indices = @transform_4, window_bounds = array<i64: 1, 1, 128>}, {transform_indices = @transform_5, window_bounds = array<i64: 1, 1, 128>}]} {
    %c0 = arith.constant 0 : index
    %c0_0 = arith.constant 0 : index
    %c0_1 = arith.constant 0 : index
    %0 = vector.load %arg2[%c0, %c0_0, %c0_1] : memref<1x16x1152xbf16, #tpu.memory_space<vmem>>, vector<1x16x1152xbf16>
    %1 = vector.shape_cast %0 : vector<1x16x1152xbf16> to vector<16x1152xbf16>
    %c0_2 = arith.constant 0 : index
    %c0_3 = arith.constant 0 : index
    %2 = vector.load %arg3[%c0_2, %c0_3] : memref<1152x128xbf16, #tpu.memory_space<vmem>>, vector<1152x128xbf16>
    %cst = arith.constant dense<0.000000e+00> : vector<16x128xf32>
    %3 = tpu.matmul %1, %2, %cst {dimension_numbers = #tpu.dot_dimension_numbers<[1], [0], [0], [1], [0, 0, 1, 1], [], []>} : vector<16x1152xbf16>, vector<1152x128xbf16>, vector<16x128xf32> -> vector<16x128xf32>
    %c0_4 = arith.constant 0 : index
    %c0_5 = arith.constant 0 : index
    %4 = vector.load %arg4[%c0_4, %c0_5] : memref<1x128xf32, #tpu.memory_space<vmem>>, vector<1x128xf32>
    %5 = vector.broadcast %4 : vector<1x128xf32> to vector<16x128xf32>
    %6 = arith.addf %3, %5 : vector<16x128xf32>
    %7 = arith.truncf %6 : vector<16x128xf32> to vector<16x128xbf16>
    %c0_6 = arith.constant 0 : index
    %c0_7 = arith.constant 0 : index
    %c0_8 = arith.constant 0 : index
    %8 = vector.load %arg5[%c0_6, %c0_7, %c0_8] : memref<1x16x128xbf16, #tpu.memory_space<vmem>>, vector<1x16x128xbf16>
    %9 = vector.shape_cast %8 : vector<1x16x128xbf16> to vector<16x128xbf16>
    %10 = vector.shape_cast %7 : vector<16x128xbf16> to vector<1x16x128xbf16>
    tpu.vector_store %arg5[%c0_6, %c0_7, %c0_8], %10 {strides = array<i32>} : memref<1x16x128xbf16, #tpu.memory_space<vmem>>, vector<1x16x128xbf16>,
    %c0_i32 = arith.constant 0 : i32
    %11 = arith.cmpi eq, %arg1, %c0_i32 : i32
    %12 = arith.extui %11 : i1 to i32
    %c0_i32_9 = arith.constant 0 : i32
    %13 = arith.cmpi ne, %12, %c0_i32_9 : i32
    scf.if %13 {
      %cst_24 = arith.constant 0.000000e+00 : f32
      %27 = vector.broadcast %cst_24 : f32 to vector<1x1x128xf32>
      %c0_25 = arith.constant 0 : index
      %c0_26 = arith.constant 0 : index
      %c0_27 = arith.constant 0 : index
      %28 = vector.load %arg6[%c0_25, %c0_26, %c0_27] : memref<1x1x128xf32, #tpu.memory_space<vmem>>, vector<1x1x128xf32>
      tpu.vector_store %arg6[%c0_25, %c0_26, %c0_27], %27 {strides = array<i32>} : memref<1x1x128xf32, #tpu.memory_space<vmem>>, vector<1x1x128xf32>,
      %cst_28 = arith.constant 0.000000e+00 : f32
      %29 = vector.broadcast %cst_28 : f32 to vector<1x1x128xf32>
      %c0_29 = arith.constant 0 : index
      %c0_30 = arith.constant 0 : index
      %c0_31 = arith.constant 0 : index
      %30 = vector.load %arg7[%c0_29, %c0_30, %c0_31] : memref<1x1x128xf32, #tpu.memory_space<vmem>>, vector<1x1x128xf32>
      tpu.vector_store %arg7[%c0_29, %c0_30, %c0_31], %29 {strides = array<i32>} : memref<1x1x128xf32, #tpu.memory_space<vmem>>, vector<1x1x128xf32>,
    } else {
    }
    %c0_10 = arith.constant 0 : index
    %c0_11 = arith.constant 0 : index
    %c0_12 = arith.constant 0 : index
    %14 = vector.load %arg6[%c0_10, %c0_11, %c0_12] : memref<1x1x128xf32, #tpu.memory_space<vmem>>, vector<1x1x128xf32>
    %cst_13 = arith.constant dense<0.000000e+00> : vector<128xf32>
    %15 = vector.multi_reduction <add>, %6, %cst_13 [0] : vector<16x128xf32> to vector<128xf32>
    %16 = vector.shape_cast %15 : vector<128xf32> to vector<1x128xf32>
    %17 = vector.shape_cast %16 : vector<1x128xf32> to vector<1x1x128xf32>
    %18 = arith.addf %14, %17 : vector<1x1x128xf32>
    %c0_14 = arith.constant 0 : index
    %c0_15 = arith.constant 0 : index
    %c0_16 = arith.constant 0 : index
    %19 = vector.load %arg6[%c0_14, %c0_15, %c0_16] : memref<1x1x128xf32, #tpu.memory_space<vmem>>, vector<1x1x128xf32>
    tpu.vector_store %arg6[%c0_14, %c0_15, %c0_16], %18 {strides = array<i32>} : memref<1x1x128xf32, #tpu.memory_space<vmem>>, vector<1x1x128xf32>,
    %c0_17 = arith.constant 0 : index
    %c0_18 = arith.constant 0 : index
    %c0_19 = arith.constant 0 : index
    %20 = vector.load %arg7[%c0_17, %c0_18, %c0_19] : memref<1x1x128xf32, #tpu.memory_space<vmem>>, vector<1x1x128xf32>
    %21 = arith.mulf %6, %6 : vector<16x128xf32>
    %cst_20 = arith.constant dense<0.000000e+00> : vector<128xf32>
    %22 = vector.multi_reduction <add>, %21, %cst_20 [0] : vector<16x128xf32> to vector<128xf32>
    %23 = vector.shape_cast %22 : vector<128xf32> to vector<1x128xf32>
    %24 = vector.shape_cast %23 : vector<1x128xf32> to vector<1x1x128xf32>
    %25 = arith.addf %20, %24 : vector<1x1x128xf32>
    %c0_21 = arith.constant 0 : index
    %c0_22 = arith.constant 0 : index
    %c0_23 = arith.constant 0 : index
    %26 = vector.load %arg7[%c0_21, %c0_22, %c0_23] : memref<1x1x128xf32, #tpu.memory_space<vmem>>, vector<1x1x128xf32>
    tpu.vector_store %arg7[%c0_21, %c0_22, %c0_23], %25 {strides = array<i32>} : memref<1x1x128xf32, #tpu.memory_space<vmem>>, vector<1x1x128xf32>,
    return
  }
  func.func @transform_0(%arg0: i32, %arg1: i32) -> (i32, i32, i32) {
    %c0_i32 = arith.constant 0 : i32
    %c0_i32_0 = arith.constant 0 : i32
    return %arg0, %arg1, %c0_i32 : i32, i32, i32
  }
  func.func @transform_1(%arg0: i32, %arg1: i32) -> (i32, i32) {
    %c0_i32 = arith.constant 0 : i32
    %c0_i32_0 = arith.constant 0 : i32
    %c0_i32_1 = arith.constant 0 : i32
    return %c0_i32, %c0_i32_0 : i32, i32
  }
  func.func @transform_2(%arg0: i32, %arg1: i32) -> (i32, i32) {
    %c0_i32 = arith.constant 0 : i32
    %c0_i32_0 = arith.constant 0 : i32
    %c0_i32_1 = arith.constant 0 : i32
    return %c0_i32, %c0_i32_0 : i32, i32
  }
  func.func @transform_3(%arg0: i32, %arg1: i32) -> (i32, i32, i32) {
    %c0_i32 = arith.constant 0 : i32
    %c0_i32_0 = arith.constant 0 : i32
    return %arg0, %arg1, %c0_i32 : i32, i32, i32
  }
  func.func @transform_4(%arg0: i32, %arg1: i32) -> (i32, i32, i32) {
    %c0_i32 = arith.constant 0 : i32
    %c0_i32_0 = arith.constant 0 : i32
    %c0_i32_1 = arith.constant 0 : i32
    return %arg0, %c0_i32, %c0_i32_0 : i32, i32, i32
  }
  func.func @transform_5(%arg0: i32, %arg1: i32) -> (i32, i32, i32) {
    %c0_i32 = arith.constant 0 : i32
    %c0_i32_0 = arith.constant 0 : i32
    %c0_i32_1 = arith.constant 0 : i32
    return %arg0, %c0_i32, %c0_i32_0 : i32, i32, i32
  }
}

module attributes {stable_mosaic.version = 11 : i64} {
  func.func @_in_apply_residual_kernel(%arg0: i32, %arg1: i32, %arg2: memref<1x16x128xbf16, #tpu.memory_space<vmem>>, %arg3: memref<1x1x128xf32, #tpu.memory_space<vmem>>, %arg4: memref<1x1x128xf32, #tpu.memory_space<vmem>>, %arg5: memref<1x16x128xbf16, #tpu.memory_space<vmem>>, %arg6: memref<1x16x128xbf16, #tpu.memory_space<vmem>>) attributes {dimension_semantics = [#tpu.dimension_semantics<parallel>, #tpu.dimension_semantics<parallel>], iteration_bounds = array<i64: 2, 1>, scalar_prefetch = 0 : i64, scratch_operands = 0 : i64, tpu.core_type = #tpu.core_type<tc>, window_params = [{transform_indices = @transform_0, window_bounds = array<i64: 1, 16, 128>}, {transform_indices = @transform_1, window_bounds = array<i64: 1, 1, 128>}, {transform_indices = @transform_2, window_bounds = array<i64: 1, 1, 128>}, {transform_indices = @transform_3, window_bounds = array<i64: 1, 16, 128>}, {transform_indices = @transform_4, window_bounds = array<i64: 1, 16, 128>}]} {
    %c0 = arith.constant 0 : index
    %c0_0 = arith.constant 0 : index
    %c0_1 = arith.constant 0 : index
    %0 = vector.load %arg2[%c0, %c0_0, %c0_1] : memref<1x16x128xbf16, #tpu.memory_space<vmem>>, vector<1x16x128xbf16>
    %1 = arith.extf %0 : vector<1x16x128xbf16> to vector<1x16x128xf32>
    %c0_2 = arith.constant 0 : index
    %c0_3 = arith.constant 0 : index
    %c0_4 = arith.constant 0 : index
    %2 = vector.load %arg3[%c0_2, %c0_3, %c0_4] : memref<1x1x128xf32, #tpu.memory_space<vmem>>, vector<1x1x128xf32>
    %3 = vector.broadcast %2 : vector<1x1x128xf32> to vector<1x16x128xf32>
    %4 = arith.mulf %1, %3 : vector<1x16x128xf32>
    %c0_5 = arith.constant 0 : index
    %c0_6 = arith.constant 0 : index
    %c0_7 = arith.constant 0 : index
    %5 = vector.load %arg4[%c0_5, %c0_6, %c0_7] : memref<1x1x128xf32, #tpu.memory_space<vmem>>, vector<1x1x128xf32>
    %6 = vector.broadcast %5 : vector<1x1x128xf32> to vector<1x16x128xf32>
    %7 = arith.addf %4, %6 : vector<1x16x128xf32>
    %c0_8 = arith.constant 0 : index
    %c0_9 = arith.constant 0 : index
    %c0_10 = arith.constant 0 : index
    %8 = vector.load %arg5[%c0_8, %c0_9, %c0_10] : memref<1x16x128xbf16, #tpu.memory_space<vmem>>, vector<1x16x128xbf16>
    %9 = arith.extf %8 : vector<1x16x128xbf16> to vector<1x16x128xf32>
    %10 = arith.addf %7, %9 : vector<1x16x128xf32>
    %11 = arith.truncf %10 : vector<1x16x128xf32> to vector<1x16x128xbf16>
    %c0_11 = arith.constant 0 : index
    %c0_12 = arith.constant 0 : index
    %c0_13 = arith.constant 0 : index
    %12 = vector.load %arg6[%c0_11, %c0_12, %c0_13] : memref<1x16x128xbf16, #tpu.memory_space<vmem>>, vector<1x16x128xbf16>
    tpu.vector_store %arg6[%c0_11, %c0_12, %c0_13], %11 {strides = array<i32>} : memref<1x16x128xbf16, #tpu.memory_space<vmem>>, vector<1x16x128xbf16>,
    return
  }
  func.func @transform_0(%arg0: i32, %arg1: i32) -> (i32, i32, i32) {
    %c0_i32 = arith.constant 0 : i32
    %c0_i32_0 = arith.constant 0 : i32
    return %arg0, %arg1, %c0_i32 : i32, i32, i32
  }
  func.func @transform_1(%arg0: i32, %arg1: i32) -> (i32, i32, i32) {
    %c0_i32 = arith.constant 0 : i32
    %c0_i32_0 = arith.constant 0 : i32
    %c0_i32_1 = arith.constant 0 : i32
    return %arg0, %c0_i32, %c0_i32_0 : i32, i32, i32
  }
  func.func @transform_2(%arg0: i32, %arg1: i32) -> (i32, i32, i32) {
    %c0_i32 = arith.constant 0 : i32
    %c0_i32_0 = arith.constant 0 : i32
    %c0_i32_1 = arith.constant 0 : i32
    return %arg0, %c0_i32, %c0_i32_0 : i32, i32, i32
  }
  func.func @transform_3(%arg0: i32, %arg1: i32) -> (i32, i32, i32) {
    %c0_i32 = arith.constant 0 : i32
    %c0_i32_0 = arith.constant 0 : i32
    return %arg0, %arg1, %c0_i32 : i32, i32, i32
  }
  func.func @transform_4(%arg0: i32, %arg1: i32) -> (i32, i32, i32) {
    %c0_i32 = arith.constant 0 : i32
    %c0_i32_0 = arith.constant 0 : i32
    return %arg0, %arg1, %c0_i32 : i32, i32, i32
  }
}

module attributes {stable_mosaic.version = 11 : i64} {
  func.func @kernel(%arg0: i32, %arg1: i32, %arg2: memref<1x64x1152xbf16, #tpu.memory_space<vmem>>, %arg3: memref<1152x64xbf16, #tpu.memory_space<vmem>>, %arg4: memref<1x64xf32, #tpu.memory_space<vmem>>, %arg5: memref<1x64x64xbf16, #tpu.memory_space<vmem>>, %arg6: memref<1x1x64xf32, #tpu.memory_space<vmem>>, %arg7: memref<1x1x64xf32, #tpu.memory_space<vmem>>) attributes {dimension_semantics = [#tpu.dimension_semantics<parallel>, #tpu.dimension_semantics<arbitrary>], iteration_bounds = array<i64: 2, 1>, scalar_prefetch = 0 : i64, scratch_operands = 0 : i64, tpu.core_type = #tpu.core_type<tc>, window_params = [{transform_indices = @transform_0, window_bounds = array<i64: 1, 64, 1152>}, {pipeline_mode = #tpu.pipeline_mode<synchronous>, transform_indices = @transform_1, window_bounds = array<i64: 1152, 64>}, {pipeline_mode = #tpu.pipeline_mode<synchronous>, transform_indices = @transform_2, window_bounds = array<i64: 1, 64>}, {transform_indices = @transform_3, window_bounds = array<i64: 1, 64, 64>}, {transform_indices = @transform_4, window_bounds = array<i64: 1, 1, 64>}, {transform_indices = @transform_5, window_bounds = array<i64: 1, 1, 64>}]} {
    %c0 = arith.constant 0 : index
    %c0_0 = arith.constant 0 : index
    %c0_1 = arith.constant 0 : index
    %0 = vector.load %arg2[%c0, %c0_0, %c0_1] : memref<1x64x1152xbf16, #tpu.memory_space<vmem>>, vector<1x64x1152xbf16>
    %1 = vector.shape_cast %0 : vector<1x64x1152xbf16> to vector<64x1152xbf16>
    %c0_2 = arith.constant 0 : index
    %c0_3 = arith.constant 0 : index
    %2 = vector.load %arg3[%c0_2, %c0_3] : memref<1152x64xbf16, #tpu.memory_space<vmem>>, vector<1152x64xbf16>
    %cst = arith.constant dense<0.000000e+00> : vector<64x64xf32>
    %3 = tpu.matmul %1, %2, %cst {dimension_numbers = #tpu.dot_dimension_numbers<[1], [0], [0], [1], [0, 0, 1, 1], [], []>} : vector<64x1152xbf16>, vector<1152x64xbf16>, vector<64x64xf32> -> vector<64x64xf32>
    %c0_4 = arith.constant 0 : index
    %c0_5 = arith.constant 0 : index
    %4 = vector.load %arg4[%c0_4, %c0_5] : memref<1x64xf32, #tpu.memory_space<vmem>>, vector<1x64xf32>
    %5 = vector.broadcast %4 : vector<1x64xf32> to vector<64x64xf32>
    %6 = arith.addf %3, %5 : vector<64x64xf32>
    %7 = arith.truncf %6 : vector<64x64xf32> to vector<64x64xbf16>
    %c0_6 = arith.constant 0 : index
    %c0_7 = arith.constant 0 : index
    %c0_8 = arith.constant 0 : index
    %8 = vector.load %arg5[%c0_6, %c0_7, %c0_8] : memref<1x64x64xbf16, #tpu.memory_space<vmem>>, vector<1x64x64xbf16>
    %9 = vector.shape_cast %8 : vector<1x64x64xbf16> to vector<64x64xbf16>
    %10 = vector.shape_cast %7 : vector<64x64xbf16> to vector<1x64x64xbf16>
    tpu.vector_store %arg5[%c0_6, %c0_7, %c0_8], %10 {strides = array<i32>} : memref<1x64x64xbf16, #tpu.memory_space<vmem>>, vector<1x64x64xbf16>,
    %c0_i32 = arith.constant 0 : i32
    %11 = arith.cmpi eq, %arg1, %c0_i32 : i32
    %12 = arith.extui %11 : i1 to i32
    %c0_i32_9 = arith.constant 0 : i32
    %13 = arith.cmpi ne, %12, %c0_i32_9 : i32
    scf.if %13 {
      %cst_24 = arith.constant 0.000000e+00 : f32
      %27 = vector.broadcast %cst_24 : f32 to vector<1x1x64xf32>
      %c0_25 = arith.constant 0 : index
      %c0_26 = arith.constant 0 : index
      %c0_27 = arith.constant 0 : index
      %28 = vector.load %arg6[%c0_25, %c0_26, %c0_27] : memref<1x1x64xf32, #tpu.memory_space<vmem>>, vector<1x1x64xf32>
      tpu.vector_store %arg6[%c0_25, %c0_26, %c0_27], %27 {strides = array<i32>} : memref<1x1x64xf32, #tpu.memory_space<vmem>>, vector<1x1x64xf32>,
      %cst_28 = arith.constant 0.000000e+00 : f32
      %29 = vector.broadcast %cst_28 : f32 to vector<1x1x64xf32>
      %c0_29 = arith.constant 0 : index
      %c0_30 = arith.constant 0 : index
      %c0_31 = arith.constant 0 : index
      %30 = vector.load %arg7[%c0_29, %c0_30, %c0_31] : memref<1x1x64xf32, #tpu.memory_space<vmem>>, vector<1x1x64xf32>
      tpu.vector_store %arg7[%c0_29, %c0_30, %c0_31], %29 {strides = array<i32>} : memref<1x1x64xf32, #tpu.memory_space<vmem>>, vector<1x1x64xf32>,
    } else {
    }
    %c0_10 = arith.constant 0 : index
    %c0_11 = arith.constant 0 : index
    %c0_12 = arith.constant 0 : index
    %14 = vector.load %arg6[%c0_10, %c0_11, %c0_12] : memref<1x1x64xf32, #tpu.memory_space<vmem>>, vector<1x1x64xf32>
    %cst_13 = arith.constant dense<0.000000e+00> : vector<64xf32>
    %15 = vector.multi_reduction <add>, %6, %cst_13 [0] : vector<64x64xf32> to vector<64xf32>
    %16 = vector.shape_cast %15 : vector<64xf32> to vector<1x64xf32>
    %17 = vector.shape_cast %16 : vector<1x64xf32> to vector<1x1x64xf32>
    %18 = arith.addf %14, %17 : vector<1x1x64xf32>
    %c0_14 = arith.constant 0 : index
    %c0_15 = arith.constant 0 : index
    %c0_16 = arith.constant 0 : index
    %19 = vector.load %arg6[%c0_14, %c0_15, %c0_16] : memref<1x1x64xf32, #tpu.memory_space<vmem>>, vector<1x1x64xf32>
    tpu.vector_store %arg6[%c0_14, %c0_15, %c0_16], %18 {strides = array<i32>} : memref<1x1x64xf32, #tpu.memory_space<vmem>>, vector<1x1x64xf32>,
    %c0_17 = arith.constant 0 : index
    %c0_18 = arith.constant 0 : index
    %c0_19 = arith.constant 0 : index
    %20 = vector.load %arg7[%c0_17, %c0_18, %c0_19] : memref<1x1x64xf32, #tpu.memory_space<vmem>>, vector<1x1x64xf32>
    %21 = arith.mulf %6, %6 : vector<64x64xf32>
    %cst_20 = arith.constant dense<0.000000e+00> : vector<64xf32>
    %22 = vector.multi_reduction <add>, %21, %cst_20 [0] : vector<64x64xf32> to vector<64xf32>
    %23 = vector.shape_cast %22 : vector<64xf32> to vector<1x64xf32>
    %24 = vector.shape_cast %23 : vector<1x64xf32> to vector<1x1x64xf32>
    %25 = arith.addf %20, %24 : vector<1x1x64xf32>
    %c0_21 = arith.constant 0 : index
    %c0_22 = arith.constant 0 : index
    %c0_23 = arith.constant 0 : index
    %26 = vector.load %arg7[%c0_21, %c0_22, %c0_23] : memref<1x1x64xf32, #tpu.memory_space<vmem>>, vector<1x1x64xf32>
    tpu.vector_store %arg7[%c0_21, %c0_22, %c0_23], %25 {strides = array<i32>} : memref<1x1x64xf32, #tpu.memory_space<vmem>>, vector<1x1x64xf32>,
    return
  }
  func.func @transform_0(%arg0: i32, %arg1: i32) -> (i32, i32, i32) {
    %c0_i32 = arith.constant 0 : i32
    %c0_i32_0 = arith.constant 0 : i32
    return %arg0, %arg1, %c0_i32 : i32, i32, i32
  }
  func.func @transform_1(%arg0: i32, %arg1: i32) -> (i32, i32) {
    %c0_i32 = arith.constant 0 : i32
    %c0_i32_0 = arith.constant 0 : i32
    %c0_i32_1 = arith.constant 0 : i32
    return %c0_i32, %c0_i32_0 : i32, i32
  }
  func.func @transform_2(%arg0: i32, %arg1: i32) -> (i32, i32) {
    %c0_i32 = arith.constant 0 : i32
    %c0_i32_0 = arith.constant 0 : i32
    %c0_i32_1 = arith.constant 0 : i32
    return %c0_i32, %c0_i32_0 : i32, i32
  }
  func.func @transform_3(%arg0: i32, %arg1: i32) -> (i32, i32, i32) {
    %c0_i32 = arith.constant 0 : i32
    %c0_i32_0 = arith.constant 0 : i32
    return %arg0, %arg1, %c0_i32 : i32, i32, i32
  }
  func.func @transform_4(%arg0: i32, %arg1: i32) -> (i32, i32, i32) {
    %c0_i32 = arith.constant 0 : i32
    %c0_i32_0 = arith.constant 0 : i32
    %c0_i32_1 = arith.constant 0 : i32
    return %arg0, %c0_i32, %c0_i32_0 : i32, i32, i32
  }
  func.func @transform_5(%arg0: i32, %arg1: i32) -> (i32, i32, i32) {
    %c0_i32 = arith.constant 0 : i32
    %c0_i32_0 = arith.constant 0 : i32
    %c0_i32_1 = arith.constant 0 : i32
    return %arg0, %c0_i32, %c0_i32_0 : i32, i32, i32
  }
}

module attributes {stable_mosaic.version = 11 : i64} {
  func.func @kernel(%arg0: i32, %arg1: i32, %arg2: memref<1x256x576xbf16, #tpu.memory_space<vmem>>, %arg3: memref<576x32xbf16, #tpu.memory_space<vmem>>, %arg4: memref<1x32xf32, #tpu.memory_space<vmem>>, %arg5: memref<1x256x32xbf16, #tpu.memory_space<vmem>>, %arg6: memref<1x1x32xf32, #tpu.memory_space<vmem>>, %arg7: memref<1x1x32xf32, #tpu.memory_space<vmem>>) attributes {dimension_semantics = [#tpu.dimension_semantics<parallel>, #tpu.dimension_semantics<arbitrary>], iteration_bounds = array<i64: 2, 1>, scalar_prefetch = 0 : i64, scratch_operands = 0 : i64, tpu.core_type = #tpu.core_type<tc>, window_params = [{transform_indices = @transform_0, window_bounds = array<i64: 1, 256, 576>}, {pipeline_mode = #tpu.pipeline_mode<synchronous>, transform_indices = @transform_1, window_bounds = array<i64: 576, 32>}, {pipeline_mode = #tpu.pipeline_mode<synchronous>, transform_indices = @transform_2, window_bounds = array<i64: 1, 32>}, {transform_indices = @transform_3, window_bounds = array<i64: 1, 256, 32>}, {transform_indices = @transform_4, window_bounds = array<i64: 1, 1, 32>}, {transform_indices = @transform_5, window_bounds = array<i64: 1, 1, 32>}]} {
    %c0 = arith.constant 0 : index
    %c0_0 = arith.constant 0 : index
    %c0_1 = arith.constant 0 : index
    %0 = vector.load %arg2[%c0, %c0_0, %c0_1] : memref<1x256x576xbf16, #tpu.memory_space<vmem>>, vector<1x256x576xbf16>
    %1 = vector.shape_cast %0 : vector<1x256x576xbf16> to vector<256x576xbf16>
    %c0_2 = arith.constant 0 : index
    %c0_3 = arith.constant 0 : index
    %2 = vector.load %arg3[%c0_2, %c0_3] : memref<576x32xbf16, #tpu.memory_space<vmem>>, vector<576x32xbf16>
    %cst = arith.constant dense<0.000000e+00> : vector<256x32xf32>
    %3 = tpu.matmul %1, %2, %cst {dimension_numbers = #tpu.dot_dimension_numbers<[1], [0], [0], [1], [0, 0, 1, 1], [], []>} : vector<256x576xbf16>, vector<576x32xbf16>, vector<256x32xf32> -> vector<256x32xf32>
    %c0_4 = arith.constant 0 : index
    %c0_5 = arith.constant 0 : index
    %4 = vector.load %arg4[%c0_4, %c0_5] : memref<1x32xf32, #tpu.memory_space<vmem>>, vector<1x32xf32>
    %5 = vector.broadcast %4 : vector<1x32xf32> to vector<256x32xf32>
    %6 = arith.addf %3, %5 : vector<256x32xf32>
    %7 = arith.truncf %6 : vector<256x32xf32> to vector<256x32xbf16>
    %c0_6 = arith.constant 0 : index
    %c0_7 = arith.constant 0 : index
    %c0_8 = arith.constant 0 : index
    %8 = vector.load %arg5[%c0_6, %c0_7, %c0_8] : memref<1x256x32xbf16, #tpu.memory_space<vmem>>, vector<1x256x32xbf16>
    %9 = vector.shape_cast %8 : vector<1x256x32xbf16> to vector<256x32xbf16>
    %10 = vector.shape_cast %7 : vector<256x32xbf16> to vector<1x256x32xbf16>
    tpu.vector_store %arg5[%c0_6, %c0_7, %c0_8], %10 {strides = array<i32>} : memref<1x256x32xbf16, #tpu.memory_space<vmem>>, vector<1x256x32xbf16>,
    %c0_i32 = arith.constant 0 : i32
    %11 = arith.cmpi eq, %arg1, %c0_i32 : i32
    %12 = arith.extui %11 : i1 to i32
    %c0_i32_9 = arith.constant 0 : i32
    %13 = arith.cmpi ne, %12, %c0_i32_9 : i32
    scf.if %13 {
      %cst_24 = arith.constant 0.000000e+00 : f32
      %27 = vector.broadcast %cst_24 : f32 to vector<1x1x32xf32>
      %c0_25 = arith.constant 0 : index
      %c0_26 = arith.constant 0 : index
      %c0_27 = arith.constant 0 : index
      %28 = vector.load %arg6[%c0_25, %c0_26, %c0_27] : memref<1x1x32xf32, #tpu.memory_space<vmem>>, vector<1x1x32xf32>
      tpu.vector_store %arg6[%c0_25, %c0_26, %c0_27], %27 {strides = array<i32>} : memref<1x1x32xf32, #tpu.memory_space<vmem>>, vector<1x1x32xf32>,
      %cst_28 = arith.constant 0.000000e+00 : f32
      %29 = vector.broadcast %cst_28 : f32 to vector<1x1x32xf32>
      %c0_29 = arith.constant 0 : index
      %c0_30 = arith.constant 0 : index
      %c0_31 = arith.constant 0 : index
      %30 = vector.load %arg7[%c0_29, %c0_30, %c0_31] : memref<1x1x32xf32, #tpu.memory_space<vmem>>, vector<1x1x32xf32>
      tpu.vector_store %arg7[%c0_29, %c0_30, %c0_31], %29 {strides = array<i32>} : memref<1x1x32xf32, #tpu.memory_space<vmem>>, vector<1x1x32xf32>,
    } else {
    }
    %c0_10 = arith.constant 0 : index
    %c0_11 = arith.constant 0 : index
    %c0_12 = arith.constant 0 : index
    %14 = vector.load %arg6[%c0_10, %c0_11, %c0_12] : memref<1x1x32xf32, #tpu.memory_space<vmem>>, vector<1x1x32xf32>
    %cst_13 = arith.constant dense<0.000000e+00> : vector<32xf32>
    %15 = vector.multi_reduction <add>, %6, %cst_13 [0] : vector<256x32xf32> to vector<32xf32>
    %16 = vector.shape_cast %15 : vector<32xf32> to vector<1x32xf32>
    %17 = vector.shape_cast %16 : vector<1x32xf32> to vector<1x1x32xf32>
    %18 = arith.addf %14, %17 : vector<1x1x32xf32>
    %c0_14 = arith.constant 0 : index
    %c0_15 = arith.constant 0 : index
    %c0_16 = arith.constant 0 : index
    %19 = vector.load %arg6[%c0_14, %c0_15, %c0_16] : memref<1x1x32xf32, #tpu.memory_space<vmem>>, vector<1x1x32xf32>
    tpu.vector_store %arg6[%c0_14, %c0_15, %c0_16], %18 {strides = array<i32>} : memref<1x1x32xf32, #tpu.memory_space<vmem>>, vector<1x1x32xf32>,
    %c0_17 = arith.constant 0 : index
    %c0_18 = arith.constant 0 : index
    %c0_19 = arith.constant 0 : index
    %20 = vector.load %arg7[%c0_17, %c0_18, %c0_19] : memref<1x1x32xf32, #tpu.memory_space<vmem>>, vector<1x1x32xf32>
    %21 = arith.mulf %6, %6 : vector<256x32xf32>
    %cst_20 = arith.constant dense<0.000000e+00> : vector<32xf32>
    %22 = vector.multi_reduction <add>, %21, %cst_20 [0] : vector<256x32xf32> to vector<32xf32>
    %23 = vector.shape_cast %22 : vector<32xf32> to vector<1x32xf32>
    %24 = vector.shape_cast %23 : vector<1x32xf32> to vector<1x1x32xf32>
    %25 = arith.addf %20, %24 : vector<1x1x32xf32>
    %c0_21 = arith.constant 0 : index
    %c0_22 = arith.constant 0 : index
    %c0_23 = arith.constant 0 : index
    %26 = vector.load %arg7[%c0_21, %c0_22, %c0_23] : memref<1x1x32xf32, #tpu.memory_space<vmem>>, vector<1x1x32xf32>
    tpu.vector_store %arg7[%c0_21, %c0_22, %c0_23], %25 {strides = array<i32>} : memref<1x1x32xf32, #tpu.memory_space<vmem>>, vector<1x1x32xf32>,
    return
  }
  func.func @transform_0(%arg0: i32, %arg1: i32) -> (i32, i32, i32) {
    %c0_i32 = arith.constant 0 : i32
    %c0_i32_0 = arith.constant 0 : i32
    return %arg0, %arg1, %c0_i32 : i32, i32, i32
  }
  func.func @transform_1(%arg0: i32, %arg1: i32) -> (i32, i32) {
    %c0_i32 = arith.constant 0 : i32
    %c0_i32_0 = arith.constant 0 : i32
    %c0_i32_1 = arith.constant 0 : i32
    return %c0_i32, %c0_i32_0 : i32, i32
  }
  func.func @transform_2(%arg0: i32, %arg1: i32) -> (i32, i32) {
    %c0_i32 = arith.constant 0 : i32
    %c0_i32_0 = arith.constant 0 : i32
    %c0_i32_1 = arith.constant 0 : i32
    return %c0_i32, %c0_i32_0 : i32, i32
  }
  func.func @transform_3(%arg0: i32, %arg1: i32) -> (i32, i32, i32) {
    %c0_i32 = arith.constant 0 : i32
    %c0_i32_0 = arith.constant 0 : i32
    return %arg0, %arg1, %c0_i32 : i32, i32, i32
  }
  func.func @transform_4(%arg0: i32, %arg1: i32) -> (i32, i32, i32) {
    %c0_i32 = arith.constant 0 : i32
    %c0_i32_0 = arith.constant 0 : i32
    %c0_i32_1 = arith.constant 0 : i32
    return %arg0, %c0_i32, %c0_i32_0 : i32, i32, i32
  }
  func.func @transform_5(%arg0: i32, %arg1: i32) -> (i32, i32, i32) {
    %c0_i32 = arith.constant 0 : i32
    %c0_i32_0 = arith.constant 0 : i32
    %c0_i32_1 = arith.constant 0 : i32
    return %arg0, %c0_i32, %c0_i32_0 : i32, i32, i32
  }
}

module attributes {stable_mosaic.version = 11 : i64} {
  func.func @_conv_kernel(%arg0: i32, %arg1: i32, %arg2: memref<1x256x2592xbf16, #tpu.memory_space<vmem>>, %arg3: memref<2592x3xbf16, #tpu.memory_space<vmem>>, %arg4: memref<1x3xf32, #tpu.memory_space<vmem>>, %arg5: memref<1x256x3xf32, #tpu.memory_space<vmem>>) attributes {dimension_semantics = [#tpu.dimension_semantics<parallel>, #tpu.dimension_semantics<parallel>], iteration_bounds = array<i64: 2, 1>, scalar_prefetch = 0 : i64, scratch_operands = 0 : i64, tpu.core_type = #tpu.core_type<tc>, window_params = [{transform_indices = @transform_0, window_bounds = array<i64: 1, 256, 2592>}, {pipeline_mode = #tpu.pipeline_mode<synchronous>, transform_indices = @transform_1, window_bounds = array<i64: 2592, 3>}, {pipeline_mode = #tpu.pipeline_mode<synchronous>, transform_indices = @transform_2, window_bounds = array<i64: 1, 3>}, {transform_indices = @transform_3, window_bounds = array<i64: 1, 256, 3>}]} {
    %c0 = arith.constant 0 : index
    %c0_0 = arith.constant 0 : index
    %c0_1 = arith.constant 0 : index
    %0 = vector.load %arg2[%c0, %c0_0, %c0_1] : memref<1x256x2592xbf16, #tpu.memory_space<vmem>>, vector<1x256x2592xbf16>
    %1 = vector.shape_cast %0 : vector<1x256x2592xbf16> to vector<256x2592xbf16>
    %c0_2 = arith.constant 0 : index
    %c0_3 = arith.constant 0 : index
    %2 = vector.load %arg3[%c0_2, %c0_3] : memref<2592x3xbf16, #tpu.memory_space<vmem>>, vector<2592x3xbf16>
    %cst = arith.constant dense<0.000000e+00> : vector<256x3xf32>
    %3 = tpu.matmul %1, %2, %cst {dimension_numbers = #tpu.dot_dimension_numbers<[1], [0], [0], [1], [0, 0, 1, 1], [], []>} : vector<256x2592xbf16>, vector<2592x3xbf16>, vector<256x3xf32> -> vector<256x3xf32>
    %c0_4 = arith.constant 0 : index
    %c0_5 = arith.constant 0 : index
    %4 = vector.load %arg4[%c0_4, %c0_5] : memref<1x3xf32, #tpu.memory_space<vmem>>, vector<1x3xf32>
    %5 = vector.broadcast %4 : vector<1x3xf32> to vector<256x3xf32>
    %6 = arith.addf %3, %5 : vector<256x3xf32>
    %c0_6 = arith.constant 0 : index
    %c0_7 = arith.constant 0 : index
    %c0_8 = arith.constant 0 : index
    %7 = vector.load %arg5[%c0_6, %c0_7, %c0_8] : memref<1x256x3xf32, #tpu.memory_space<vmem>>, vector<1x256x3xf32>
    %8 = vector.shape_cast %7 : vector<1x256x3xf32> to vector<256x3xf32>
    %9 = vector.shape_cast %6 : vector<256x3xf32> to vector<1x256x3xf32>
    tpu.vector_store %arg5[%c0_6, %c0_7, %c0_8], %9 {strides = array<i32>} : memref<1x256x3xf32, #tpu.memory_space<vmem>>, vector<1x256x3xf32>,
    return
  }
  func.func @transform_0(%arg0: i32, %arg1: i32) -> (i32, i32, i32) {
    %c0_i32 = arith.constant 0 : i32
    %c0_i32_0 = arith.constant 0 : i32
    return %arg0, %arg1, %c0_i32 : i32, i32, i32
  }
  func.func @transform_1(%arg0: i32, %arg1: i32) -> (i32, i32) {
    %c0_i32 = arith.constant 0 : i32
    %c0_i32_0 = arith.constant 0 : i32
    %c0_i32_1 = arith.constant 0 : i32
    return %c0_i32, %c0_i32_0 : i32, i32
  }
  func.func @transform_2(%arg0: i32, %arg1: i32) -> (i32, i32) {
    %c0_i32 = arith.constant 0 : i32
    %c0_i32_0 = arith.constant 0 : i32
    %c0_i32_1 = arith.constant 0 : i32
    return %c0_i32, %c0_i32_0 : i32, i32
  }
  func.func @transform_3(%arg0: i32, %arg1: i32) -> (i32, i32, i32) {
    %c0_i32 = arith.constant 0 : i32
    %c0_i32_0 = arith.constant 0 : i32
    return %arg0, %arg1, %c0_i32 : i32, i32, i32
  }
}

</mosaic_0001>

<bundles_post_ra>
// kernel: transformer_net_forward.32
= control target key start
LH: loop header
LB: loop body
LE: loop exit
PB: predicated region body
PF: predicated region fallthrough
CT: control target
= control target key end

     0   :  { %s578_s12 = smov 0   ;;  %s580_s13 = smov 0   ;;  %s626_s0 = inlined_call_operand.vmem [shape: bf16[2,64,128], index: 0, kind: input, shape index: {}]   ;;  %s627_s1 = inlined_call_operand.vmem [shape: f32[2,1,128], index: 1, kind: input, shape index: {}]   ;;  %s628_s2 = inlined_call_operand.vmem [shape: f32[2,1,128], index: 2, kind: input, shape index: {}]   ;;  %s629_s3 = inlined_call_operand.vmem [shape: bf16[2,64,128], index: 3, kind: output, shape index: {}]  }
   0x1   :  { %s582_s14 = smov 0  }
   0x2 LB: > { %s25_s15 = sadd.s32 1, %s552_s13  ;;  %p441_p0 = scmp.ge.s32.totalorder %s556_s14, 1  ;;  %s556_s14 = sphi %s582_s14, %s13_s14   ;;  %s552_s13 = sphi %s580_s13, %s631_s13   ;;  %s548_s12 = sphi %s578_s12, %s630_s12  }
   0x3   : > { %p27_p1 = scmp.ge.s32.totalorder %s25_s15, 2  ;;  %p174_p2 = scmp.lt.s32.totalorder %s556_s14, 3 }
   0x5   : > { %s633_s15 = smov (%p27_p1, %s25_s15), 0  ;;  %p175_p3 = pnand %p441_p0, %p174_p2 }
   0x6   : > { %p213_p4 = scmp.lt.s32.totalorder (!%p175_p3), %s548_s12, 1 }
   0x7   : > { %178 = sbr.rel (%p175_p3) target bundleno = 30 (0x1e), region = 32 }
   0xe   : > { %s635_s12 = smov (!%p213_p4, %s548_s12), 1 }
   0xf   : > { %s458_s16 = sshll.u32 %s635_s12, 5  ;;  %s224_s19 = scalar_lea.vmem %s627_s1, %s635_s12 }
  0x10   : > { %s220_s22 = scalar_lea.vmem %s626_s0, %s458_s16  ;;  %s227_s25 = scalar_lea.vmem %s628_s2, %s635_s12  ;;  %v446_v1 = vld [vmem:[%s224_s19] ss:$0 sm:$0xff] }
  0x11   : > { %v469_v0 = vld [vmem:[%s220_s22] sm:$0xff]   ;;  %v504_v2 = vld [vmem:[%s220_s22 + $0x8] sm:$0xff]   ;;  %v505_v7 = vld [vmem:[%s220_s22 + $0x10] sm:$0xff]   ;;  %s236_s28 = scalar_lea.vmem %s629_s3, %s458_s16 }
  0x12   : > { %v470_v3 = vunpack.c.l.bf16 %v469_v0  ;;  %v471_v4 = vunpack.c.h.bf16 %v469_v0  ;;  %v474_v5 = vunpack.c.l.bf16 %v504_v2  ;;  %v475_v6 = vunpack.c.h.bf16 %v504_v2  ;;  %v506_v8 = vld [vmem:[%s220_s22 + $0x18] sm:$0xff]   ;;  %v447_v9 = vld [vmem:[%s227_s25] ss:$0 sm:$0xff] }
  0x13   : > { %v478_v10 = vunpack.c.l.bf16 %v505_v7  ;;  %v479_v11 = vunpack.c.h.bf16 %v505_v7  ;;  %v482_v12 = vunpack.c.l.bf16 %v506_v8  ;;  %v483_v13 = vunpack.c.h.bf16 %v506_v8 }
  0x14   : > { %v261_v14 = vmul.f32 %v470_v3, %v446_v1  ;;  %v262_v15 = vmul.f32 %v471_v4, %v446_v1  ;;  %v263_v16 = vmul.f32 %v474_v5, %v446_v1  ;;  %v264_v17 = vmul.f32 %v475_v6, %v446_v1 }
  0x15   : > { %v265_v18 = vmul.f32 %v478_v10, %v446_v1  ;;  %v266_v19 = vmul.f32 %v479_v11, %v446_v1  ;;  %v267_v20 = vmul.f32 %v482_v12, %v446_v1  ;;  %v268_v21 = vmul.f32 %v483_v13, %v446_v1 }
  0x16   : > { %v276_v22 = vadd.f32 %v447_v9, %v261_v14  ;;  %v277_v23 = vadd.f32 %v447_v9, %v262_v15  ;;  %v278_v24 = vadd.f32 %v447_v9, %v263_v16  ;;  %v279_v25 = vadd.f32 %v447_v9, %v264_v17 }
  0x17   : > { %v280_v26 = vadd.f32 %v447_v9, %v265_v18  ;;  %v281_v27 = vadd.f32 %v447_v9, %v266_v19  ;;  %v282_v28 = vadd.f32 %v447_v9, %v267_v20  ;;  %v283_v29 = vadd.f32 %v447_v9, %v268_v21 }
  0x18   : > { %v284_v30 = vmax.f32 %v276_v22, 0.0  ;;  %v285_v31 = vmax.f32 %v277_v23, 0.0  ;;  %v286_v32 = vmax.f32 %v278_v24, 0.0  ;;  %v287_v33 = vmax.f32 %v279_v25, 0.0 }
  0x19   : > { %v288_v34 = vmax.f32 %v280_v26, 0.0  ;;  %v289_v35 = vmax.f32 %v281_v27, 0.0  ;;  %v290_v36 = vmax.f32 %v282_v28, 0.0  ;;  %v291_v37 = vmax.f32 %v283_v29, 0.0 }
  0x1a   : > { %v487_v38 = vpack.c.bf16 %v285_v31, %v284_v30  ;;  %v492_v39 = vpack.c.bf16 %v287_v33, %v286_v32 }
  0x1b   : > { %v497_v40 = vpack.c.bf16 %v289_v35, %v288_v34  ;;  %v502_v41 = vpack.c.bf16 %v291_v37, %v290_v36 }
  0x1c   : > { %488 = vst [vmem:[%s236_s28] sm:$0xff] %v487_v38   ;;  %507 = vst [vmem:[%s236_s28 + $0x8] sm:$0xff] %v492_v39  }
  0x1d   : > { %508 = vst [vmem:[%s236_s28 + $0x10] sm:$0xff] %v497_v40   ;;  %509 = vst [vmem:[%s236_s28 + $0x18] sm:$0xff] %v502_v41  }
  0x1e PF: > { %s13_s14 = sadd.s32 1, %s556_s14   ;;  %s630_s12 = smov %s552_s13 }
  0x1f   : > { %p10_p5 = scmp.ge.s32.totalorder %s13_s14, 4   ;;  %s631_s13 = smov %s633_s15 }
  0x21   :  { %12 = sbr.rel (!%p10_p5) target bundleno = 2 (0x2), region = 68 }

// kernel: transformer_net_forward.31
= control target key start
LH: loop header
LB: loop body
LE: loop exit
PB: predicated region body
PF: predicated region fallthrough
CT: control target
= control target key end

     0   :  { %s1711_s18 = smov 0   ;;  %s1713_s19 = smov 0   ;;  %s2147_s0 = inlined_call_operand.vmem [shape: bf16[2,256,243], index: 0, kind: input, shape index: {}]   ;;  %s2148_s1 = inlined_call_operand.vmem [shape: bf16[243,32], index: 1, kind: input, shape index: {}]   ;;  %s2149_s2 = inlined_call_operand.vmem [shape: f32[1,32], index: 2, kind: input, shape index: {}]   ;;  %s2150_s3 = inlined_call_operand.vmem [shape: bf16[2,256,32], index: 3, kind: output, shape index: {0}]   ;;  %s2151_s4 = inlined_call_operand.vmem [shape: f32[2,1,32], index: 4, kind: output, shape index: {1}]   ;;  %s2152_s5 = inlined_call_operand.vmem [shape: f32[2,1,32], index: 5, kind: output, shape index: {2}]  }
   0x1   :  { %s1715_s20 = smov 0  }
   0x2 LB: > { %s28_s21 = sadd.s32 1, %s1673_s19  ;;  %p1299_p0 = scmp.ge.s32.totalorder %s1677_s20, 1  ;;  %s1677_s20 = sphi %s1715_s20, %s16_s20   ;;  %s1673_s19 = sphi %s1713_s19, %s2154_s19   ;;  %s1669_s18 = sphi %s1711_s18, %s2153_s18  }
   0x3   : > { %p30_p1 = scmp.ge.s32.totalorder %s28_s21, 2  ;;  %p214_p2 = scmp.lt.s32.totalorder %s1677_s20, 3 }
   0x5   : > { %s2156_s21 = smov (%p30_p1, %s28_s21), 0  ;;  %p215_p3 = pnand %p1299_p0, %p214_p2 }
   0x6   : > { %v1591_v0 = vld [vmem:[%s2148_s1 + $0x40] sm:$0xff] (!%p215_p3)   ;;  %v1593_v2 = vld [vmem:[%s2148_s1 + $0x48] sm:$0xff] (!%p215_p3)   ;;  %v1595_v4 = vld [vmem:[%s2148_s1 + $0x50] sm:$0xff] (!%p215_p3)   ;;  %p258_p4 = scmp.lt.s32.totalorder (!%p215_p3), %s1669_s18, 1  ;;  %vm641_vm0 = vcmask (!%p215_p3), 1040384   ;;  %vm592_vm1 = vcmask (!%p215_p3), 941056  }
   0x7   : > { %218 = sbr.rel (%p215_p3) target bundleno = 366 (0x16e), region = 32  ;;  %v1592_v1 = vld [vmem:[%s2148_s1] sm:$0xff] (!%p215_p3)   ;;  %1437 = vmatprep.subr.bf16.mxu0 (!%p215_p3), %v1591_v0  ;;  %1549 = vmatprep.subr.bf16.mxu1 (!%p215_p3), %v1591_v0  ;;  %v1594_v3 = vld [vmem:[%s2148_s1 + $0x8] sm:$0xff] (!%p215_p3)   ;;  %v1596_v5 = vld [vmem:[%s2148_s1 + $0x10] sm:$0xff] (!%p215_p3)   ;;  %vm642_vm2 = vcmask (!%p215_p3), 1041408   ;;  %v1679_v12 = vmov (!%p215_p3), 65535  }
   0x8   : > { %1438 = vmatpush3.bf16.msra.mxu0 (!%p215_p3), %v1592_v1  ;;  %1557 = vmatpush3.bf16.msra.mxu1 (!%p215_p3), %v1592_v1  ;;  %v1597_v6 = vld [vmem:[%s2148_s1 + $0x58] sm:$0xff] (!%p215_p3)   ;;  %v1599_v8 = vld [vmem:[%s2148_s1 + $0x60] sm:$0xff] (!%p215_p3)   ;;  %v1601_v10 = vld [vmem:[%s2148_s1 + $0x68] sm:$0xff] (!%p215_p3)   ;;  %v643_v13 = vsel (!%p215_p3), %vm641_vm0, 4294967295, %v1679_v12  ;;  %vm974_vm3 = vcmask (!%p215_p3), 253952   ;;  %v1680_v52 = vmov (!%p215_p3), 0.0  }
   0x9   : > { %1439 = vmatprep.subr.bf16.mxu0 (!%p215_p3), %v1593_v2  ;;  %1550 = vmatprep.subr.bf16.mxu1 (!%p215_p3), %v1593_v2  ;;  %v1598_v7 = vld [vmem:[%s2148_s1 + $0x18] sm:$0xff] (!%p215_p3)   ;;  %v1600_v9 = vld [vmem:[%s2148_s1 + $0x20] sm:$0xff] (!%p215_p3)   ;;  %v1602_v14 = vld [vmem:[%s2148_s1 + $0x28] sm:$0xff] (!%p215_p3)   ;;  %v644_v17 = vsel (!%p215_p3), %vm642_vm2, %v643_v13, 0  ;;  %vm937_vm4 = vcmask (!%p215_p3), 257024   ;;  %vm978_vm5 = vcmask (!%p215_p3), 261120  }
   0xa   : > { %v1603_v15 = vld [vmem:[%s2148_s1 + $0x70] sm:$0xff] (!%p215_p3)   ;;  %v1605_v16 = vld [vmem:[%s2148_s1 + $0x78] ss:$0 sps:$4 sm:$0x33] (!%p215_p3)   ;;  %v1852_v55 = vld [vmem:[%s2149_s2] ss:$0 sm:$0xff] (!%p215_p3) }
   0xb   : > { %v1604_v19 = vld [vmem:[%s2148_s1 + $0x30] sm:$0xff] (!%p215_p3)   ;;  %v646_v20 = vand.u32 (!%p215_p3), %v1605_v16, %v644_v17  ;;  %v1606_v21 = vld [vmem:[%s2148_s1 + $0x38] sm:$0xff] (!%p215_p3)  }
   0xc   : > { %1440 = vmatpush3.bf16.msra.mxu0 (!%p215_p3), %v1594_v3  ;;  %1558 = vmatpush3.bf16.msra.mxu1 (!%p215_p3), %v1594_v3 }
   0xd   : > { %1441 = vmatprep.subr.bf16.mxu0 (!%p215_p3), %v1595_v4  ;;  %1551 = vmatprep.subr.bf16.mxu1 (!%p215_p3), %v1595_v4 }
   0xe   : > { %s2158_s18 = smov (!%p258_p4, %s1669_s18), 1 }
   0xf   : > { %s1403_s11 = sshll.u32 %s2158_s18, 8  ;;  %s1837_s14 = scalar_lea.vmem %s2151_s4, %s2158_s18 }
  0x10   : > { %1442 = vmatpush3.bf16.msra.mxu0 %v1596_v5  ;;  %1559 = vmatpush3.bf16.msra.mxu1 %v1596_v5  ;;  %s1762_s22 = scalar_lea.vmem %s2147_s0, %s1403_s11  ;;  %s1843_s17 = scalar_lea.vmem %s2152_s5, %s2158_s18  ;;  %975 = vst.msk [vmem:[%s1837_s14] sm:$0x1] %vm974_vm3, %v1680_v52 }
  0x11   : > { %1443 = vmatprep.subr.bf16.mxu0 %v1597_v6  ;;  %1552 = vmatprep.subr.bf16.mxu1 %v1597_v6  ;;  %v1609_v11 = vld [vmem:[%s1762_s22 + $0x4] ss:$8 sps:$4 sm:$0xff]   ;;  %v1607_v22 = vld [vmem:[%s1762_s22] ss:$8 sps:$4 sm:$0xff]   ;;  %v1610_v24 = vld [vmem:[%s1762_s22 + $0x14] ss:$8 sps:$4 sm:$0xff]  }
  0x12   : > { %1353 = vmatprep.mubr.msk.bf16.mxu0 %vm592_vm1, %v1609_v11  ;;  %v1621_v18 = vld [vmem:[%s1762_s22 + $0x84] ss:$8 sps:$4 sm:$0xff]   ;;  %v1619_v23 = vld [vmem:[%s1762_s22 + $0x80] ss:$8 sps:$4 sm:$0xff]   ;;  %v1625_v25 = vld [vmem:[%s1762_s22 + $0x94] ss:$8 sps:$4 sm:$0xff]  }
  0x13   : > { %1361 = vmatprep.mubr.msk.bf16.mxu1 %vm592_vm1, %v1621_v18  ;;  %v1612_v26 = vld [vmem:[%s1762_s22 + $0x10] ss:$8 sps:$4 sm:$0xff]   ;;  %v1613_v28 = vld [vmem:[%s1762_s22 + $0x24] ss:$8 sps:$4 sm:$0xff]   ;;  %v1615_v30 = vld [vmem:[%s1762_s22 + $0x20] ss:$8 sps:$4 sm:$0xff]  }
  0x14   : > { %1444 = vmatpush3.bf16.msra.mxu0 %v1598_v7  ;;  %1560 = vmatpush3.bf16.msra.mxu1 %v1598_v7  ;;  %v1627_v27 = vld [vmem:[%s1762_s22 + $0x90] ss:$8 sps:$4 sm:$0xff]   ;;  %v1631_v29 = vld [vmem:[%s1762_s22 + $0xa4] ss:$8 sps:$4 sm:$0xff]   ;;  %v1633_v31 = vld [vmem:[%s1762_s22 + $0xa0] ss:$8 sps:$4 sm:$0xff]  }
  0x15   : > { %1445 = vmatprep.subr.bf16.mxu0 %v1599_v8  ;;  %1553 = vmatprep.subr.bf16.mxu1 %v1599_v8  ;;  %v1616_v32 = vld [vmem:[%s1762_s22 + $0x34] ss:$8 sps:$4 sm:$0xff]   ;;  %v1618_v34 = vld [vmem:[%s1762_s22 + $0x30] ss:$8 sps:$4 sm:$0xff]   ;;  %v1622_v36 = vld [vmem:[%s1762_s22 + $0x44] ss:$8 sps:$4 sm:$0xff]  }
  0x16   : > { %v1637_v33 = vld [vmem:[%s1762_s22 + $0xb4] ss:$8 sps:$4 sm:$0xff]   ;;  %v1639_v35 = vld [vmem:[%s1762_s22 + $0xb0] ss:$8 sps:$4 sm:$0xff]   ;;  %v1643_v37 = vld [vmem:[%s1762_s22 + $0xc4] ss:$8 sps:$4 sm:$0xff]  }
  0x17   : > { %v1624_v38 = vld [vmem:[%s1762_s22 + $0x40] ss:$8 sps:$4 sm:$0xff]   ;;  %v1628_v40 = vld [vmem:[%s1762_s22 + $0x54] ss:$8 sps:$4 sm:$0xff]   ;;  %v1630_v42 = vld [vmem:[%s1762_s22 + $0x50] ss:$8 sps:$4 sm:$0xff]  }
  0x18   : > { %1446 = vmatpush3.bf16.msra.mxu0 %v1600_v9  ;;  %1561 = vmatpush3.bf16.msra.mxu1 %v1600_v9  ;;  %v1645_v39 = vld [vmem:[%s1762_s22 + $0xc0] ss:$8 sps:$4 sm:$0xff]   ;;  %v1646_v41 = vld [vmem:[%s1762_s22 + $0xd4] ss:$8 sps:$4 sm:$0xff]   ;;  %v1648_v43 = vld [vmem:[%s1762_s22 + $0xd0] ss:$8 sps:$4 sm:$0xff]  }
  0x19   : > { %1447 = vmatprep.subr.bf16.mxu0 %v1601_v10  ;;  %1554 = vmatprep.subr.bf16.mxu1 %v1601_v10  ;;  %v1634_v44 = vld [vmem:[%s1762_s22 + $0x64] ss:$8 sps:$4 sm:$0xff]   ;;  %v1636_v46 = vld [vmem:[%s1762_s22 + $0x60] ss:$8 sps:$4 sm:$0xff]   ;;  %v1640_v48 = vld [vmem:[%s1762_s22 + $0x74] ss:$8 sps:$4 sm:$0xff]  }
  0x1a   : > { %v1649_v45 = vld [vmem:[%s1762_s22 + $0xe4] ss:$8 sps:$4 sm:$0xff]   ;;  %v1651_v47 = vld [vmem:[%s1762_s22 + $0xe0] ss:$8 sps:$4 sm:$0xff]   ;;  %v1652_v49 = vld [vmem:[%s1762_s22 + $0xf4] ss:$8 sps:$4 sm:$0xff]  }
  0x1b   : > { %v1642_v50 = vld [vmem:[%s1762_s22 + $0x70] ss:$8 sps:$4 sm:$0xff]   ;;  %976 = vst.msk [vmem:[%s1843_s17] sm:$0x1] %vm974_vm3, %v1680_v52  ;;  %s1404_s24 = sshll.u32 %s2158_s18, 7 }
  0x1c   : > { %1448 = vmatpush3.bf16.msra.mxu0 %v1602_v14  ;;  %1562 = vmatpush3.bf16.msra.mxu1 %v1602_v14  ;;  %v1654_v51 = vld [vmem:[%s1762_s22 + $0xf0] ss:$8 sps:$4 sm:$0xff]   ;;  %s1862_s27 = scalar_lea.vmem %s2150_s3, %s1404_s24 }
  0x1d   : > { %1449 = vmatprep.subr.bf16.mxu0 %v1603_v15  ;;  %1555 = vmatprep.subr.bf16.mxu1 %v1603_v15 }
  0x20   : > { %1450 = vmatpush3.bf16.msra.mxu0 %v1604_v19  ;;  %1563 = vmatpush3.bf16.msra.mxu1 %v1604_v19 }
  0x21   : > { %1451 = vmatprep.subr.bf16.mxu0 %v646_v20  ;;  %1556 = vmatprep.subr.bf16.mxu1 %v646_v20 }
  0x24   : > { %1452 = vmatpush3.bf16.msra.mxu0 %v1606_v21  ;;  %1564 = vmatpush3.bf16.msra.mxu1 %v1606_v21 }
  0x27   : > { %681 = vmatmul.mubr.bf16.vlgmr.msra.gmra.mrb[0].mxu0 %v1607_v22  ;;  %745 = vmatmul.mubr.bf16.vlgmr.msra.gmra.mrb[0].mxu1 %v1619_v23 }
  0x28   : > { %1354 = vmatprep.mubr.msk.bf16.mxu0 %vm592_vm1, %v1610_v24  ;;  %1362 = vmatprep.mubr.msk.bf16.mxu1 %vm592_vm1, %v1625_v25 }
  0x2f   : > { %689 = vmatmul.mubr.bf16.gmra.mrb[4].mxu0 %v1612_v26  ;;  %753 = vmatmul.mubr.bf16.gmra.mrb[4].mxu1 %v1627_v27 }
  0x30   : > { %1355 = vmatprep.mubr.msk.bf16.mxu0 %vm592_vm1, %v1613_v28  ;;  %1363 = vmatprep.mubr.msk.bf16.mxu1 %vm592_vm1, %v1631_v29 }
  0x37   : > { %697 = vmatmul.mubr.bf16.gmra.mrb[8].mxu0 %v1615_v30  ;;  %761 = vmatmul.mubr.bf16.gmra.mrb[8].mxu1 %v1633_v31 }
  0x38   : > { %1356 = vmatprep.mubr.msk.bf16.mxu0 %vm592_vm1, %v1616_v32  ;;  %1364 = vmatprep.mubr.msk.bf16.mxu1 %vm592_vm1, %v1637_v33 }
  0x3f   : > { %705 = vmatmul.mubr.bf16.gmra.mrb[12].mxu0 %v1618_v34  ;;  %769 = vmatmul.mubr.bf16.gmra.mrb[12].mxu1 %v1639_v35 }
  0x40   : > { %1357 = vmatprep.mubr.msk.bf16.mxu0 %vm592_vm1, %v1622_v36  ;;  %1365 = vmatprep.mubr.msk.bf16.mxu1 %vm592_vm1, %v1643_v37 }
  0x47   : > { %713 = vmatmul.mubr.bf16.gmra.mrb[16].mxu0 %v1624_v38  ;;  %777 = vmatmul.mubr.bf16.gmra.mrb[16].mxu1 %v1645_v39 }
  0x48   : > { %1358 = vmatprep.mubr.msk.bf16.mxu0 %vm592_vm1, %v1628_v40  ;;  %1366 = vmatprep.mubr.msk.bf16.mxu1 %vm592_vm1, %v1646_v41 }
  0x4f   : > { %721 = vmatmul.mubr.bf16.gmra.mrb[20].mxu0 %v1630_v42  ;;  %785 = vmatmul.mubr.bf16.gmra.mrb[20].mxu1 %v1648_v43 }
  0x50   : > { %1359 = vmatprep.mubr.msk.bf16.mxu0 %vm592_vm1, %v1634_v44  ;;  %1367 = vmatprep.mubr.msk.bf16.mxu1 %vm592_vm1, %v1649_v45 }
  0x57   : > { %729 = vmatmul.mubr.bf16.gmra.mrb[24].mxu0 %v1636_v46  ;;  %793 = vmatmul.mubr.bf16.gmra.mrb[24].mxu1 %v1651_v47 }
  0x58   : > { %1360 = vmatprep.mubr.msk.bf16.mxu0 %vm592_vm1, %v1640_v48  ;;  %1368 = vmatprep.mubr.msk.bf16.mxu1 %vm592_vm1, %v1652_v49 }
  0x5f   : > { %737 = vmatmul.mubr.bf16.gmra.mrb[28].mxu0 %v1642_v50  ;;  %801 = vmatmul.mubr.bf16.gmra.mrb[28].mxu1 %v1654_v51 }
  0xfa   : > { %v1453_v53 = vpop.f32.mrb[0].mxu0  ;;  %v1501_v54 = vpop.f32.mrb[0].mxu1 }
  0xfb   : > { %v1454_v56 = vpop.f32.mrb[1].mxu0  ;;  %v1502_v57 = vpop.f32.mrb[1].mxu1 }
  0xfc   : > { %v1455_v58 = vadd.f32 %v1454_v56, %v1453_v53  ;;  %v1456_v59 = vpop.f32.mrb[2].mxu0  ;;  %v1503_v60 = vadd.f32 %v1502_v57, %v1501_v54  ;;  %v1504_v61 = vpop.f32.mrb[2].mxu1 }
  0xfd   : > { %v1457_v62 = vpop.f32.mrb[3].mxu0  ;;  %v1505_v63 = vpop.f32.mrb[3].mxu1 }
  0xfe   : > { %v683_v0 = vadd.f32 %v1455_v58, %v1852_v55  ;;  %v1458_v1 = vadd.f32 %v1457_v62, %v1456_v59  ;;  %v1857_v2 = vadd.f32 %v1503_v60, %v1852_v55  ;;  %v1506_v3 = vadd.f32 %v1505_v63, %v1504_v61 }
 0x100   : > { %v1405_v4 = vpack.c.bf16 %v683_v0, %v683_v0  ;;  %v1052_v5 = vmul.f32 %v683_v0, %v683_v0  ;;  %v686_v6 = vadd.f32 %v1458_v1, %v1852_v55  ;;  %v1421_v7 = vpack.c.bf16 %v1857_v2, %v1857_v2 }
 0x101   : > { %v1868_v8 = vadd.f32 %v1506_v3, %v1852_v55  ;;  %v979_v9 = vsel %vm978_vm5, %v683_v0, 0.0 }
 0x102   : > { %938 = vst.msk [vmem:[%s1862_s27] sm:$0xf] %vm937_vm4, %v1405_v4  ;;  %v1406_v10 = vpack.c.bf16 %v686_v6, %v686_v6  ;;  %v980_v11 = vsel %vm978_vm5, %v686_v6, 0.0  ;;  %v1053_v12 = vmul.f32 %v686_v6, %v686_v6  ;;  %v1459_v13 = vpop.f32.mrb[4].mxu0  ;;  %v1507_v14 = vpop.f32.mrb[4].mxu1  ;;  %v1084_v19 = vsel %vm978_vm5, %v1052_v5, 0.0 }
 0x103   : > { %v981_v15 = vadd.f32 %v980_v11, %v979_v9  ;;  %v1460_v16 = vpop.f32.mrb[5].mxu0  ;;  %954 = vst.msk [vmem:[%s1862_s27 + $0x40] sm:$0xf] %vm937_vm4, %v1421_v7  ;;  %v1422_v17 = vpack.c.bf16 %v1868_v8, %v1868_v8  ;;  %v1508_v18 = vpop.f32.mrb[5].mxu1 }
 0x104   : > { %939 = vst.msk [vmem:[%s1862_s27 + $0x4] sm:$0xf] %vm937_vm4, %v1406_v10  ;;  %v1085_v20 = vsel %vm978_vm5, %v1053_v12, 0.0  ;;  %v1461_v21 = vadd.f32 %v1460_v16, %v1459_v13  ;;  %v1462_v22 = vpop.f32.mrb[6].mxu0  ;;  %v1509_v23 = vadd.f32 %v1508_v18, %v1507_v14  ;;  %v1510_v24 = vpop.f32.mrb[6].mxu1 }
 0x105   : > { %v1086_v25 = vadd.f32 %v1085_v20, %v1084_v19  ;;  %v1463_v26 = vpop.f32.mrb[7].mxu0  ;;  %955 = vst.msk [vmem:[%s1862_s27 + $0x44] sm:$0xf] %vm937_vm4, %v1422_v17  ;;  %v1511_v27 = vpop.f32.mrb[7].mxu1 }
 0x106   : > { %v691_v28 = vadd.f32 %v1461_v21, %v1852_v55  ;;  %v1464_v29 = vadd.f32 %v1463_v26, %v1462_v22  ;;  %v1886_v30 = vadd.f32 %v1509_v23, %v1852_v55  ;;  %v1512_v31 = vadd.f32 %v1511_v27, %v1510_v24 }
 0x108   : > { %v1407_v32 = vpack.c.bf16 %v691_v28, %v691_v28  ;;  %v982_v33 = vsel %vm978_vm5, %v691_v28, 0.0  ;;  %v1054_v34 = vmul.f32 %v691_v28, %v691_v28  ;;  %v694_v35 = vadd.f32 %v1464_v29, %v1852_v55 }
 0x109   : > { %v983_v36 = vadd.f32 %v982_v33, %v981_v15  ;;  %v1423_v37 = vpack.c.bf16 %v1886_v30, %v1886_v30  ;;  %v1899_v47 = vadd.f32 %v1512_v31, %v1852_v55 }
 0x10a   : > { %940 = vst.msk [vmem:[%s1862_s27 + $0x8] sm:$0xf] %vm937_vm4, %v1407_v32  ;;  %v1087_v38 = vsel %vm978_vm5, %v1054_v34, 0.0  ;;  %v1408_v39 = vpack.c.bf16 %v694_v35, %v694_v35  ;;  %v984_v40 = vsel %vm978_vm5, %v694_v35, 0.0  ;;  %v1055_v41 = vmul.f32 %v694_v35, %v694_v35  ;;  %v1465_v42 = vpop.f32.mrb[8].mxu0  ;;  %v1513_v43 = vpop.f32.mrb[8].mxu1 }
 0x10b   : > { %v1088_v44 = vadd.f32 %v1087_v38, %v1086_v25  ;;  %v985_v45 = vadd.f32 %v984_v40, %v983_v36  ;;  %v1466_v46 = vpop.f32.mrb[9].mxu0  ;;  %956 = vst.msk [vmem:[%s1862_s27 + $0x48] sm:$0xf] %vm937_vm4, %v1423_v37  ;;  %v1514_v48 = vpop.f32.mrb[9].mxu1  ;;  %v1424_v57 = vpack.c.bf16 %v1899_v47, %v1899_v47 }
 0x10c   : > { %941 = vst.msk [vmem:[%s1862_s27 + $0xc] sm:$0xf] %vm937_vm4, %v1408_v39  ;;  %v1089_v49 = vsel %vm978_vm5, %v1055_v41, 0.0  ;;  %v1467_v50 = vadd.f32 %v1466_v46, %v1465_v42  ;;  %v1468_v51 = vpop.f32.mrb[10].mxu0  ;;  %v1515_v52 = vadd.f32 %v1514_v48, %v1513_v43  ;;  %v1516_v53 = vpop.f32.mrb[10].mxu1 }
 0x10d   : > { %v1090_v54 = vadd.f32 %v1089_v49, %v1088_v44  ;;  %v1469_v56 = vpop.f32.mrb[11].mxu0  ;;  %v1517_v58 = vpop.f32.mrb[11].mxu1  ;;  %957 = vst.msk [vmem:[%s1862_s27 + $0x4c] sm:$0xf] %vm937_vm4, %v1424_v57 }
 0x10e   : > { %v699_v59 = vadd.f32 %v1467_v50, %v1852_v55  ;;  %v1470_v60 = vadd.f32 %v1469_v56, %v1468_v51  ;;  %v1908_v61 = vadd.f32 %v1515_v52, %v1852_v55  ;;  %v1518_v62 = vadd.f32 %v1517_v58, %v1516_v53 }
 0x110   : > { %v1409_v63 = vpack.c.bf16 %v699_v59, %v699_v59  ;;  %v986_v0 = vsel %vm978_vm5, %v699_v59, 0.0  ;;  %v1056_v1 = vmul.f32 %v699_v59, %v699_v59  ;;  %v702_v3 = vadd.f32 %v1470_v60, %v1852_v55 }
 0x111   : > { %v987_v4 = vadd.f32 %v986_v0, %v985_v45  ;;  %v1425_v5 = vpack.c.bf16 %v1908_v61, %v1908_v61  ;;  %v1923_v16 = vadd.f32 %v1518_v62, %v1852_v55 }
 0x112   : > { %942 = vst.msk [vmem:[%s1862_s27 + $0x10] sm:$0xf] %vm937_vm4, %v1409_v63  ;;  %v1091_v6 = vsel %vm978_vm5, %v1056_v1, 0.0  ;;  %v1410_v7 = vpack.c.bf16 %v702_v3, %v702_v3  ;;  %v988_v9 = vsel %vm978_vm5, %v702_v3, 0.0  ;;  %v1057_v10 = vmul.f32 %v702_v3, %v702_v3  ;;  %v1471_v11 = vpop.f32.mrb[12].mxu0  ;;  %v1519_v12 = vpop.f32.mrb[12].mxu1 }
 0x113   : > { %v1092_v13 = vadd.f32 %v1091_v6, %v1090_v54  ;;  %v989_v14 = vadd.f32 %v988_v9, %v987_v4  ;;  %v1472_v15 = vpop.f32.mrb[13].mxu0  ;;  %958 = vst.msk [vmem:[%s1862_s27 + $0x50] sm:$0xf] %vm937_vm4, %v1425_v5  ;;  %v1520_v17 = vpop.f32.mrb[13].mxu1  ;;  %v1426_v25 = vpack.c.bf16 %v1923_v16, %v1923_v16 }
 0x114   : > { %943 = vst.msk [vmem:[%s1862_s27 + $0x14] sm:$0xf] %vm937_vm4, %v1410_v7  ;;  %v1093_v18 = vsel %vm978_vm5, %v1057_v10, 0.0  ;;  %v1473_v19 = vadd.f32 %v1472_v15, %v1471_v11  ;;  %v1474_v20 = vpop.f32.mrb[14].mxu0  ;;  %v1521_v21 = vadd.f32 %v1520_v17, %v1519_v12  ;;  %v1522_v22 = vpop.f32.mrb[14].mxu1 }
 0x115   : > { %v1094_v23 = vadd.f32 %v1093_v18, %v1092_v13  ;;  %v1475_v24 = vpop.f32.mrb[15].mxu0  ;;  %v1523_v26 = vpop.f32.mrb[15].mxu1  ;;  %959 = vst.msk [vmem:[%s1862_s27 + $0x54] sm:$0xf] %vm937_vm4, %v1426_v25 }
 0x116   : > { %v707_v27 = vadd.f32 %v1473_v19, %v1852_v55  ;;  %v1476_v28 = vadd.f32 %v1475_v24, %v1474_v20  ;;  %v1932_v29 = vadd.f32 %v1521_v21, %v1852_v55  ;;  %v1524_v31 = vadd.f32 %v1523_v26, %v1522_v22 }
 0x118   : > { %v1411_v32 = vpack.c.bf16 %v707_v27, %v707_v27  ;;  %v990_v33 = vsel %vm978_vm5, %v707_v27, 0.0  ;;  %v1058_v34 = vmul.f32 %v707_v27, %v707_v27  ;;  %v710_v35 = vadd.f32 %v1476_v28, %v1852_v55 }
 0x119   : > { %v991_v36 = vadd.f32 %v990_v33, %v989_v14  ;;  %v1427_v37 = vpack.c.bf16 %v1932_v29, %v1932_v29  ;;  %v1947_v48 = vadd.f32 %v1524_v31, %v1852_v55 }
 0x11a   : > { %944 = vst.msk [vmem:[%s1862_s27 + $0x18] sm:$0xf] %vm937_vm4, %v1411_v32  ;;  %v1095_v38 = vsel %vm978_vm5, %v1058_v34, 0.0  ;;  %v1412_v39 = vpack.c.bf16 %v710_v35, %v710_v35  ;;  %v992_v40 = vsel %vm978_vm5, %v710_v35, 0.0  ;;  %v1059_v41 = vmul.f32 %v710_v35, %v710_v35  ;;  %v1477_v42 = vpop.f32.mrb[16].mxu0  ;;  %v1525_v43 = vpop.f32.mrb[16].mxu1 }
 0x11b   : > { %v1096_v44 = vadd.f32 %v1095_v38, %v1094_v23  ;;  %v993_v45 = vadd.f32 %v992_v40, %v991_v36  ;;  %v1478_v46 = vpop.f32.mrb[17].mxu0  ;;  %960 = vst.msk [vmem:[%s1862_s27 + $0x58] sm:$0xf] %vm937_vm4, %v1427_v37  ;;  %v1526_v49 = vpop.f32.mrb[17].mxu1  ;;  %v1428_v58 = vpack.c.bf16 %v1947_v48, %v1947_v48 }
 0x11c   : > { %945 = vst.msk [vmem:[%s1862_s27 + $0x1c] sm:$0xf] %vm937_vm4, %v1412_v39  ;;  %v1097_v50 = vsel %vm978_vm5, %v1059_v41, 0.0  ;;  %v1479_v51 = vadd.f32 %v1478_v46, %v1477_v42  ;;  %v1480_v52 = vpop.f32.mrb[18].mxu0  ;;  %v1527_v53 = vadd.f32 %v1526_v49, %v1525_v43  ;;  %v1528_v54 = vpop.f32.mrb[18].mxu1 }
 0x11d   : > { %v1098_v56 = vadd.f32 %v1097_v50, %v1096_v44  ;;  %v1481_v57 = vpop.f32.mrb[19].mxu0  ;;  %v1529_v59 = vpop.f32.mrb[19].mxu1  ;;  %961 = vst.msk [vmem:[%s1862_s27 + $0x5c] sm:$0xf] %vm937_vm4, %v1428_v58 }
 0x11e   : > { %v715_v60 = vadd.f32 %v1479_v51, %v1852_v55  ;;  %v1482_v62 = vadd.f32 %v1481_v57, %v1480_v52  ;;  %v1956_v63 = vadd.f32 %v1527_v53, %v1852_v55  ;;  %v1530_v0 = vadd.f32 %v1529_v59, %v1528_v54 }
 0x120   : > { %v1413_v1 = vpack.c.bf16 %v715_v60, %v715_v60  ;;  %v994_v3 = vsel %vm978_vm5, %v715_v60, 0.0  ;;  %v1060_v4 = vmul.f32 %v715_v60, %v715_v60  ;;  %v718_v5 = vadd.f32 %v1482_v62, %v1852_v55 }
 0x121   : > { %v995_v6 = vadd.f32 %v994_v3, %v993_v45  ;;  %v1429_v7 = vpack.c.bf16 %v1956_v63, %v1956_v63  ;;  %v1971_v19 = vadd.f32 %v1530_v0, %v1852_v55 }
 0x122   : > { %946 = vst.msk [vmem:[%s1862_s27 + $0x20] sm:$0xf] %vm937_vm4, %v1413_v1  ;;  %v1099_v9 = vsel %vm978_vm5, %v1060_v4, 0.0  ;;  %v1414_v10 = vpack.c.bf16 %v718_v5, %v718_v5  ;;  %v996_v11 = vsel %vm978_vm5, %v718_v5, 0.0  ;;  %v1061_v12 = vmul.f32 %v718_v5, %v718_v5  ;;  %v1483_v13 = vpop.f32.mrb[20].mxu0  ;;  %v1531_v14 = vpop.f32.mrb[20].mxu1 }
 0x123   : > { %v1100_v15 = vadd.f32 %v1099_v9, %v1098_v56  ;;  %v997_v17 = vadd.f32 %v996_v11, %v995_v6  ;;  %v1484_v18 = vpop.f32.mrb[21].mxu0  ;;  %962 = vst.msk [vmem:[%s1862_s27 + $0x60] sm:$0xf] %vm937_vm4, %v1429_v7  ;;  %v1532_v20 = vpop.f32.mrb[21].mxu1  ;;  %v1430_v28 = vpack.c.bf16 %v1971_v19, %v1971_v19 }
 0x124   : > { %947 = vst.msk [vmem:[%s1862_s27 + $0x24] sm:$0xf] %vm937_vm4, %v1414_v10  ;;  %v1101_v21 = vsel %vm978_vm5, %v1061_v12, 0.0  ;;  %v1485_v22 = vadd.f32 %v1484_v18, %v1483_v13  ;;  %v1486_v23 = vpop.f32.mrb[22].mxu0  ;;  %v1533_v24 = vadd.f32 %v1532_v20, %v1531_v14  ;;  %v1534_v25 = vpop.f32.mrb[22].mxu1 }
 0x125   : > { %v1102_v26 = vadd.f32 %v1101_v21, %v1100_v15  ;;  %v1487_v27 = vpop.f32.mrb[23].mxu0  ;;  %v1535_v31 = vpop.f32.mrb[23].mxu1  ;;  %963 = vst.msk [vmem:[%s1862_s27 + $0x64] sm:$0xf] %vm937_vm4, %v1430_v28 }
 0x126   : > { %v723_v32 = vadd.f32 %v1485_v22, %v1852_v55  ;;  %v1488_v33 = vadd.f32 %v1487_v27, %v1486_v23  ;;  %v1980_v34 = vadd.f32 %v1533_v24, %v1852_v55  ;;  %v1536_v35 = vadd.f32 %v1535_v31, %v1534_v25 }
 0x128   : > { %v1415_v36 = vpack.c.bf16 %v723_v32, %v723_v32  ;;  %v998_v37 = vsel %vm978_vm5, %v723_v32, 0.0  ;;  %v1062_v38 = vmul.f32 %v723_v32, %v723_v32  ;;  %v726_v39 = vadd.f32 %v1488_v33, %v1852_v55 }
 0x129   : > { %v999_v40 = vadd.f32 %v998_v37, %v997_v17  ;;  %v1431_v41 = vpack.c.bf16 %v1980_v34, %v1980_v34  ;;  %v1995_v53 = vadd.f32 %v1536_v35, %v1852_v55 }
 0x12a   : > { %948 = vst.msk [vmem:[%s1862_s27 + $0x28] sm:$0xf] %vm937_vm4, %v1415_v36  ;;  %v1103_v42 = vsel %vm978_vm5, %v1062_v38, 0.0  ;;  %v1416_v43 = vpack.c.bf16 %v726_v39, %v726_v39  ;;  %v1000_v44 = vsel %vm978_vm5, %v726_v39, 0.0  ;;  %v1063_v45 = vmul.f32 %v726_v39, %v726_v39  ;;  %v1489_v46 = vpop.f32.mrb[24].mxu0  ;;  %v1537_v49 = vpop.f32.mrb[24].mxu1 }
 0x12b   : > { %v1104_v50 = vadd.f32 %v1103_v42, %v1102_v26  ;;  %v1001_v51 = vadd.f32 %v1000_v44, %v999_v40  ;;  %v1490_v52 = vpop.f32.mrb[25].mxu0  ;;  %964 = vst.msk [vmem:[%s1862_s27 + $0x68] sm:$0xf] %vm937_vm4, %v1431_v41  ;;  %v1538_v54 = vpop.f32.mrb[25].mxu1  ;;  %v1432_v1 = vpack.c.bf16 %v1995_v53, %v1995_v53 }
 0x12c   : > { %949 = vst.msk [vmem:[%s1862_s27 + $0x2c] sm:$0xf] %vm937_vm4, %v1416_v43  ;;  %v1105_v56 = vsel %vm978_vm5, %v1063_v45, 0.0  ;;  %v1491_v57 = vadd.f32 %v1490_v52, %v1489_v46  ;;  %v1492_v58 = vpop.f32.mrb[26].mxu0  ;;  %v1539_v59 = vadd.f32 %v1538_v54, %v1537_v49  ;;  %v1540_v60 = vpop.f32.mrb[26].mxu1 }
 0x12d   : > { %v1106_v62 = vadd.f32 %v1105_v56, %v1104_v50  ;;  %v1493_v0 = vpop.f32.mrb[27].mxu0  ;;  %v1541_v3 = vpop.f32.mrb[27].mxu1  ;;  %965 = vst.msk [vmem:[%s1862_s27 + $0x6c] sm:$0xf] %vm937_vm4, %v1432_v1  ;;  %v1068_v50 = vmul.f32 %v1857_v2, %v1857_v2  ;;  %v1069_v1 = vmul.f32 %v1868_v8, %v1868_v8 }
 0x12e   : > { %v731_v4 = vadd.f32 %v1491_v57, %v1852_v55  ;;  %v1494_v5 = vadd.f32 %v1493_v0, %v1492_v58  ;;  %v2004_v6 = vadd.f32 %v1539_v59, %v1852_v55  ;;  %v1542_v7 = vadd.f32 %v1541_v3, %v1540_v60 }
 0x12f   : > { %v1010_v0 = vsel %vm978_vm5, %v1857_v2, 0.0  ;;  %v1070_v2 = vmul.f32 %v1886_v30, %v1886_v30 }
 0x130   : > { %v1417_v9 = vpack.c.bf16 %v731_v4, %v731_v4  ;;  %v1002_v10 = vsel %vm978_vm5, %v731_v4, 0.0  ;;  %v1064_v11 = vmul.f32 %v731_v4, %v731_v4  ;;  %v734_v12 = vadd.f32 %v1494_v5, %v1852_v55 }
 0x131   : > { %v1003_v13 = vadd.f32 %v1002_v10, %v1001_v51  ;;  %v1433_v14 = vpack.c.bf16 %v2004_v6, %v2004_v6  ;;  %v2019_v26 = vadd.f32 %v1542_v7, %v1852_v55 }
 0x132   : > { %950 = vst.msk [vmem:[%s1862_s27 + $0x30] sm:$0xf] %vm937_vm4, %v1417_v9  ;;  %v1107_v15 = vsel %vm978_vm5, %v1064_v11, 0.0  ;;  %v1418_v17 = vpack.c.bf16 %v734_v12, %v734_v12  ;;  %v1004_v18 = vsel %vm978_vm5, %v734_v12, 0.0  ;;  %v1065_v20 = vmul.f32 %v734_v12, %v734_v12  ;;  %v1495_v21 = vpop.f32.mrb[28].mxu0  ;;  %v1543_v22 = vpop.f32.mrb[28].mxu1 }
 0x133   : > { %v1108_v23 = vadd.f32 %v1107_v15, %v1106_v62  ;;  %v1005_v24 = vadd.f32 %v1004_v18, %v1003_v13  ;;  %v1496_v25 = vpop.f32.mrb[29].mxu0  ;;  %966 = vst.msk [vmem:[%s1862_s27 + $0x70] sm:$0xf] %vm937_vm4, %v1433_v14  ;;  %v1544_v27 = vpop.f32.mrb[29].mxu1  ;;  %v1434_v38 = vpack.c.bf16 %v2019_v26, %v2019_v26  ;;  %v1115_v9 = vsel %vm978_vm5, %v1068_v50, 0.0 }
 0x134   : > { %951 = vst.msk [vmem:[%s1862_s27 + $0x34] sm:$0xf] %vm937_vm4, %v1418_v17  ;;  %v1109_v28 = vsel %vm978_vm5, %v1065_v20, 0.0  ;;  %v1497_v31 = vadd.f32 %v1496_v25, %v1495_v21  ;;  %v1498_v32 = vpop.f32.mrb[30].mxu0  ;;  %v1545_v33 = vadd.f32 %v1544_v27, %v1543_v22  ;;  %v1546_v35 = vpop.f32.mrb[30].mxu1  ;;  %v1117_v12 = vsel %vm978_vm5, %v1069_v1, 0.0 }
 0x135   : > { %v1110_v36 = vadd.f32 %v1109_v28, %v1108_v23  ;;  %v1499_v37 = vpop.f32.mrb[31].mxu0  ;;  %v1547_v39 = vpop.f32.mrb[31].mxu1  ;;  %967 = vst.msk [vmem:[%s1862_s27 + $0x74] sm:$0xf] %vm937_vm4, %v1434_v38  ;;  %v1014_v13 = vsel %vm978_vm5, %v1886_v30, 0.0  ;;  %v1071_v14 = vmul.f32 %v1899_v47, %v1899_v47  ;;  %v1119_v18 = vsel %vm978_vm5, %v1070_v2, 0.0 }
 0x136   : > { %v739_v40 = vadd.f32 %v1497_v31, %v1852_v55  ;;  %v1500_v41 = vadd.f32 %v1499_v37, %v1498_v32  ;;  %v2028_v42 = vadd.f32 %v1545_v33, %v1852_v55  ;;  %v1548_v43 = vadd.f32 %v1547_v39, %v1546_v35 }
 0x137   : > { %v1072_v20 = vmul.f32 %v1908_v61, %v1908_v61  ;;  %v1121_v23 = vsel %vm978_vm5, %v1071_v14, 0.0  ;;  %v1018_v30 = vsel %vm978_vm5, %v1908_v61, 0.0  ;;  %v1074_v31 = vmul.f32 %v1932_v29, %v1932_v29 }
 0x138   : > { %v1419_v44 = vpack.c.bf16 %v739_v40, %v739_v40  ;;  %v1006_v45 = vsel %vm978_vm5, %v739_v40, 0.0  ;;  %v1066_v46 = vmul.f32 %v739_v40, %v739_v40  ;;  %v742_v49 = vadd.f32 %v1500_v41, %v1852_v55 }
 0x139   : > { %v1007_v51 = vadd.f32 %v1006_v45, %v1005_v24  ;;  %v1435_v52 = vpack.c.bf16 %v2028_v42, %v2028_v42  ;;  %v2045_v62 = vadd.f32 %v1548_v43, %v1852_v55  ;;  %v1012_v55 = vsel %vm978_vm5, %v1868_v8, 0.0 }
 0x13a   : > { %952 = vst.msk [vmem:[%s1862_s27 + $0x38] sm:$0xf] %vm937_vm4, %v1419_v44  ;;  %v1111_v54 = vsel %vm978_vm5, %v1066_v46, 0.0  ;;  %v1420_v56 = vpack.c.bf16 %v742_v49, %v742_v49  ;;  %v1008_v57 = vsel %vm978_vm5, %v742_v49, 0.0  ;;  %v1067_v58 = vmul.f32 %v742_v49, %v742_v49 }
 0x13b   : > { %v1112_v59 = vadd.f32 %v1111_v54, %v1110_v36  ;;  %v1009_v60 = vadd.f32 %v1008_v57, %v1007_v51  ;;  %968 = vst.msk [vmem:[%s1862_s27 + $0x78] sm:$0xf] %vm937_vm4, %v1435_v52  ;;  %v1436_v7 = vpack.c.bf16 %v2045_v62, %v2045_v62  ;;  %v1016_v8 = vsel %vm978_vm5, %v1899_v47, 0.0 }
 0x13c   : > { %953 = vst.msk [vmem:[%s1862_s27 + $0x3c] sm:$0xf] %vm937_vm4, %v1420_v56  ;;  %v1113_v3 = vsel %vm978_vm5, %v1067_v58, 0.0  ;;  %v1073_v24 = vmul.f32 %v1923_v16, %v1923_v16  ;;  %v1123_v28 = vsel %vm978_vm5, %v1072_v20, 0.0  ;;  %v1020_v47 = vsel %vm978_vm5, %v1923_v16, 0.0 }
 0x13d   : > { %v1011_v4 = vadd.f32 %v1010_v0, %v1009_v60  ;;  %v1114_v5 = vadd.f32 %v1113_v3, %v1112_v59  ;;  %969 = vst.msk [vmem:[%s1862_s27 + $0x7c] sm:$0xf] %vm937_vm4, %v1436_v7  ;;  %v1022_v61 = vsel %vm978_vm5, %v1932_v29, 0.0  ;;  %v1075_v36 = vmul.f32 %v1947_v48, %v1947_v48 }
 0x13e   : > { %v1125_v35 = vsel %vm978_vm5, %v1073_v24, 0.0  ;;  %v1127_v39 = vsel %vm978_vm5, %v1074_v31, 0.0  ;;  %v1024_v16 = vsel %vm978_vm5, %v1947_v48, 0.0  ;;  %v1076_v40 = vmul.f32 %v1956_v63, %v1956_v63  ;;  %v977_v31 = vld [vmem:[%s1837_s14] sm:$0x1] }
 0x13f   : > { %v1013_v10 = vadd.f32 %v1012_v55, %v1011_v4  ;;  %v1116_v11 = vadd.f32 %v1115_v9, %v1114_v5  ;;  %v1129_v44 = vsel %vm978_vm5, %v1075_v36, 0.0  ;;  %v1026_v29 = vsel %vm978_vm5, %v1956_v63, 0.0 }
 0x140   : > { %v1077_v45 = vmul.f32 %v1971_v19, %v1971_v19  ;;  %v1131_v50 = vsel %vm978_vm5, %v1076_v40, 0.0  ;;  %v1028_v48 = vsel %vm978_vm5, %v1971_v19, 0.0  ;;  %v1078_v51 = vmul.f32 %v1980_v34, %v1980_v34 }
 0x141   : > { %v1015_v15 = vadd.f32 %v1014_v13, %v1013_v10  ;;  %v1118_v17 = vadd.f32 %v1117_v12, %v1116_v11  ;;  %v1030_v63 = vsel %vm978_vm5, %v1980_v34, 0.0  ;;  %v1079_v57 = vmul.f32 %v1995_v53, %v1995_v53 }
 0x142   : > { %v1133_v56 = vsel %vm978_vm5, %v1077_v45, 0.0  ;;  %v1135_v60 = vsel %vm978_vm5, %v1078_v51, 0.0  ;;  %v1032_v19 = vsel %vm978_vm5, %v1995_v53, 0.0  ;;  %v1080_v0 = vmul.f32 %v2004_v6, %v2004_v6 }
 0x143   : > { %v1017_v21 = vadd.f32 %v1016_v8, %v1015_v15  ;;  %v1120_v22 = vadd.f32 %v1119_v18, %v1118_v17  ;;  %v1137_v4 = vsel %vm978_vm5, %v1079_v57, 0.0  ;;  %v1034_v34 = vsel %vm978_vm5, %v2004_v6, 0.0 }
 0x144   : > { %v1081_v5 = vmul.f32 %v2019_v26, %v2019_v26  ;;  %v1082_v7 = vmul.f32 %v2028_v42, %v2028_v42  ;;  %v1139_v53 = vsel %vm978_vm5, %v1080_v0, 0.0  ;;  %v1036_v2 = vsel %vm978_vm5, %v2019_v26, 0.0 }
 0x145   : > { %v1122_v25 = vadd.f32 %v1121_v23, %v1120_v22  ;;  %v1019_v27 = vadd.f32 %v1018_v30, %v1017_v21  ;;  %v1038_v10 = vsel %vm978_vm5, %v2028_v42, 0.0  ;;  %v1083_v14 = vmul.f32 %v2045_v62, %v2045_v62 }
 0x146   : > { %v1141_v6 = vsel %vm978_vm5, %v1081_v5, 0.0  ;;  %v1143_v13 = vsel %vm978_vm5, %v1082_v7, 0.0  ;;  %v1040_v18 = vsel %vm978_vm5, %v2045_v62, 0.0 }
 0x147   : > { %v1021_v32 = vadd.f32 %v1020_v47, %v1019_v27  ;;  %v1124_v33 = vadd.f32 %v1123_v28, %v1122_v25  ;;  %v1145_v42 = vsel %vm978_vm5, %v1083_v14, 0.0 }
 0x149   : > { %v1023_v37 = vadd.f32 %v1022_v61, %v1021_v32  ;;  %v1126_v38 = vadd.f32 %v1125_v35, %v1124_v33  ;;  %v1051_v33 = vld [vmem:[%s1843_s17] sm:$0x1] }
 0x14b   : > { %v1025_v41 = vadd.f32 %v1024_v16, %v1023_v37  ;;  %v1128_v43 = vadd.f32 %v1127_v39, %v1126_v38 }
 0x14d   : > { %v1027_v46 = vadd.f32 %v1026_v29, %v1025_v41  ;;  %v1130_v49 = vadd.f32 %v1129_v44, %v1128_v43 }
 0x14f   : > { %v1132_v52 = vadd.f32 %v1131_v50, %v1130_v49  ;;  %v1029_v54 = vadd.f32 %v1028_v48, %v1027_v46 }
 0x151   : > { %v1134_v58 = vadd.f32 %v1133_v56, %v1132_v52  ;;  %v1031_v59 = vadd.f32 %v1030_v63, %v1029_v54 }
 0x153   : > { %v1136_v1 = vadd.f32 %v1135_v60, %v1134_v58  ;;  %v1033_v3 = vadd.f32 %v1032_v19, %v1031_v59 }
 0x155   : > { %v1138_v9 = vadd.f32 %v1137_v4, %v1136_v1  ;;  %v1035_v55 = vadd.f32 %v1034_v34, %v1033_v3 }
 0x157   : > { %v1140_v11 = vadd.f32 %v1139_v53, %v1138_v9  ;;  %v1037_v12 = vadd.f32 %v1036_v2, %v1035_v55 }
 0x159   : > { %v1142_v15 = vadd.f32 %v1141_v6, %v1140_v11  ;;  %v1039_v17 = vadd.f32 %v1038_v10, %v1037_v12 }
 0x15b   : > { %v1144_v8 = vadd.f32 %v1143_v13, %v1142_v15  ;;  %v1041_v26 = vadd.f32 %v1040_v18, %v1039_v17 }
 0x15d   : > { %v1042_v20 = vrot.slane %v1041_v26, 4  ;;  %v1146_v21 = vadd.f32 %v1145_v42, %v1144_v8 }
 0x15f   : > { %v1043_v22 = vadd.f32 %v1042_v20, %v1041_v26  ;;  %v1147_v23 = vrot.slane %v1146_v21, 4 }
 0x161   : > { %v1044_v30 = vrot.slane %v1043_v22, 2  ;;  %v1148_v24 = vadd.f32 %v1147_v23, %v1146_v21 }
 0x163   : > { %v1045_v25 = vadd.f32 %v1044_v30, %v1043_v22  ;;  %v1149_v27 = vrot.slane %v1148_v24, 2 }
 0x165   : > { %v1046_v28 = vrot.slane %v1045_v25, 1  ;;  %v1150_v47 = vadd.f32 %v1149_v27, %v1148_v24 }
 0x167   : > { %v1047_v32 = vadd.f32 %v1046_v28, %v1045_v25  ;;  %v1151_v62 = vrot.slane %v1150_v47, 1 }
 0x169   : > { %v1048_v35 = vadd.f32 %v1047_v32, %v977_v31  ;;  %v1152_v61 = vadd.f32 %v1151_v62, %v1150_v47 }
 0x16b   : > { %1050 = vst.msk [vmem:[%s1837_s14] sm:$0x1] %vm974_vm3, %v1048_v35  ;;  %v1153_v36 = vadd.f32 %v1152_v61, %v1051_v33 }
 0x16d   : > { %1154 = vst.msk [vmem:[%s1843_s17] sm:$0x1] %vm974_vm3, %v1153_v36 }
 0x16e PF: > { %s16_s20 = sadd.s32 1, %s1677_s20   ;;  %s2153_s18 = smov %s1673_s19 }
 0x16f   : > { %p13_p5 = scmp.ge.s32.totalorder %s16_s20, 4   ;;  %s2154_s19 = smov %s2156_s21 }
 0x171   :  { %15 = sbr.rel (!%p13_p5) target bundleno = 2 (0x2), region = 90 }

// kernel: transformer_net_forward.33
= control target key start
LH: loop header
LB: loop body
LE: loop exit
PB: predicated region body
PF: predicated region fallthrough
CT: control target
= control target key end

     0   :  { %s1152_s18 = smov 0   ;;  %s1154_s19 = smov 0   ;;  %s1330_s0 = inlined_call_operand.vmem [shape: bf16[2,64,288], index: 0, kind: input, shape index: {}]   ;;  %s1331_s1 = inlined_call_operand.vmem [shape: bf16[288,64], index: 1, kind: input, shape index: {}]   ;;  %s1332_s2 = inlined_call_operand.vmem [shape: f32[1,64], index: 2, kind: input, shape index: {}]   ;;  %s1333_s3 = inlined_call_operand.vmem [shape: bf16[2,64,64], index: 3, kind: output, shape index: {0}]   ;;  %s1334_s4 = inlined_call_operand.vmem [shape: f32[2,1,64], index: 4, kind: output, shape index: {1}]   ;;  %s1335_s5 = inlined_call_operand.vmem [shape: f32[2,1,64], index: 5, kind: output, shape index: {2}]  }
   0x1   :  { %s1156_s20 = smov 0  }
   0x2 LB: > { %s28_s21 = sadd.s32 1, %s1115_s19  ;;  %p905_p0 = scmp.ge.s32.totalorder %s1119_s20, 1  ;;  %s1119_s20 = sphi %s1156_s20, %s16_s20   ;;  %s1115_s19 = sphi %s1154_s19, %s1337_s19   ;;  %s1111_s18 = sphi %s1152_s18, %s1336_s18  }
   0x3   : > { %p30_p1 = scmp.ge.s32.totalorder %s28_s21, 2  ;;  %p214_p2 = scmp.lt.s32.totalorder %s1119_s20, 3 }
   0x5   : > { %s1339_s21 = smov (%p30_p1, %s28_s21), 0  ;;  %p215_p3 = pnand %p905_p0, %p214_p2 }
   0x6   : > { %v1063_v0 = vld [vmem:[%s1331_s1 + $0x40] sm:$0xff] (!%p215_p3)   ;;  %v1065_v2 = vld [vmem:[%s1331_s1 + $0x48] sm:$0xff] (!%p215_p3)   ;;  %p258_p4 = scmp.lt.s32.totalorder (!%p215_p3), %s1111_s18, 1  ;;  %v1067_v4 = vld [vmem:[%s1331_s1 + $0x50] sm:$0xff] (!%p215_p3)   ;;  %vm512_vm0 = vcmask (!%p215_p3), 261120   ;;  %vm700_vm1 = vcmask (!%p215_p3), 516096  }
   0x7   : > { %218 = sbr.rel (%p215_p3) target bundleno = 301 (0x12d), region = 32  ;;  %v1064_v1 = vld [vmem:[%s1331_s1] sm:$0xff] (!%p215_p3)   ;;  %963 = vmatprep.subr.bf16.mxu0 (!%p215_p3), %v1063_v0  ;;  %1021 = vmatprep.subr.bf16.mxu1 (!%p215_p3), %v1063_v0  ;;  %v1066_v3 = vld [vmem:[%s1331_s1 + $0x8] sm:$0xff] (!%p215_p3)   ;;  %v1068_v5 = vld [vmem:[%s1331_s1 + $0x10] sm:$0xff] (!%p215_p3)   ;;  %v1121_v30 = vmov (!%p215_p3), 0.0   ;;  %vm687_vm2 = vcmask (!%p215_p3), 519168  }
   0x8   : > { %964 = vmatpush3.bf16.msra.mxu0 (!%p215_p3), %v1064_v1  ;;  %1029 = vmatpush3.bf16.msra.mxu1 (!%p215_p3), %v1064_v1  ;;  %v1069_v6 = vld [vmem:[%s1331_s1 + $0x58] sm:$0xff] (!%p215_p3)   ;;  %v1071_v8 = vld [vmem:[%s1331_s1 + $0x60] sm:$0xff] (!%p215_p3)   ;;  %v1073_v10 = vld [vmem:[%s1331_s1 + $0x68] sm:$0xff] (!%p215_p3)   ;;  %vm704_vm3 = vcmask (!%p215_p3), 523264  }
   0x9   : > { %965 = vmatprep.subr.bf16.mxu0 (!%p215_p3), %v1065_v2  ;;  %1022 = vmatprep.subr.bf16.mxu1 (!%p215_p3), %v1065_v2  ;;  %v1070_v7 = vld [vmem:[%s1331_s1 + $0x18] sm:$0xff] (!%p215_p3)   ;;  %v1072_v9 = vld [vmem:[%s1331_s1 + $0x20] sm:$0xff] (!%p215_p3)   ;;  %v1074_v13 = vld [vmem:[%s1331_s1 + $0x28] sm:$0xff] (!%p215_p3)  }
   0xa   : > { %v1075_v14 = vld [vmem:[%s1331_s1 + $0x70] sm:$0xff] (!%p215_p3)   ;;  %v1077_v16 = vld [vmem:[%s1331_s1 + $0x78] sm:$0xff] (!%p215_p3)   ;;  %v1085_v18 = vld [vmem:[%s1331_s1 + $0x80] sm:$0xff] (!%p215_p3)  }
   0xb   : > { %v1076_v15 = vld [vmem:[%s1331_s1 + $0x30] sm:$0xff] (!%p215_p3)   ;;  %v1078_v17 = vld [vmem:[%s1331_s1 + $0x38] sm:$0xff] (!%p215_p3)   ;;  %v1086_v22 = vld [vmem:[%s1331_s1 + $0x88] sm:$0xff] (!%p215_p3)  }
   0xc   : > { %966 = vmatpush3.bf16.msra.mxu0 (!%p215_p3), %v1066_v3  ;;  %1030 = vmatpush3.bf16.msra.mxu1 (!%p215_p3), %v1066_v3  ;;  %v1267_v43 = vld [vmem:[%s1332_s2] ss:$0 sm:$0xff] (!%p215_p3) }
   0xd   : > { %967 = vmatprep.subr.bf16.mxu0 (!%p215_p3), %v1067_v4  ;;  %1023 = vmatprep.subr.bf16.mxu1 (!%p215_p3), %v1067_v4 }
   0xe   : > { %s1341_s18 = smov (!%p258_p4, %s1111_s18), 1 }
   0xf   : > { %s1037_s11 = smul.u32 96, %s1341_s18  ;;  %s1252_s23 = scalar_lea.vmem %s1334_s4, %s1341_s18 }
  0x10   : > { %968 = vmatpush3.bf16.msra.mxu0 %v1068_v5  ;;  %1031 = vmatpush3.bf16.msra.mxu1 %v1068_v5  ;;  %s1258_s26 = scalar_lea.vmem %s1335_s5, %s1341_s18  ;;  %701 = vst.msk [vmem:[%s1252_s23] sm:$0x1] %vm700_vm1, %v1121_v30  ;;  %s954_s28 = sshll.u32 %s1341_s18, 5 }
  0x11   : > { %969 = vmatprep.subr.bf16.mxu0 %v1069_v6  ;;  %1024 = vmatprep.subr.bf16.mxu1 %v1069_v6  ;;  %s1203_s22 = scalar_lea.vmem %s1330_s0, %s1037_s11  ;;  %702 = vst.msk [vmem:[%s1258_s26] sm:$0x1] %vm700_vm1, %v1121_v30  ;;  %s1274_s6 = scalar_lea.vmem %s1333_s3, %s954_s28 }
  0x12   : > { %v1081_v11 = vld [vmem:[%s1203_s22 + $0x4] ss:$12 sps:$4 sm:$0xff]   ;;  %v1084_v12 = vld [vmem:[%s1203_s22 + $0x4c] ss:$12 sps:$4 sm:$0xff]   ;;  %v1082_v20 = vld [vmem:[%s1203_s22 + $0x48] ss:$12 sps:$4 sm:$0xff]  }
  0x13   : > { %557 = vmatprep.mubr.bf16.mxu0 %v1081_v11  ;;  %581 = vmatprep.mubr.bf16.mxu1 %v1084_v12  ;;  %v1079_v19 = vld [vmem:[%s1203_s22] ss:$12 sps:$4 sm:$0xff]   ;;  %v1087_v21 = vld [vmem:[%s1203_s22 + $0x1c] ss:$12 sps:$4 sm:$0xff]   ;;  %v1090_v24 = vld [vmem:[%s1203_s22 + $0x18] ss:$12 sps:$4 sm:$0xff]  }
  0x14   : > { %970 = vmatpush3.bf16.msra.mxu0 %v1070_v7  ;;  %1032 = vmatpush3.bf16.msra.mxu1 %v1070_v7  ;;  %v1089_v23 = vld [vmem:[%s1203_s22 + $0x8] ss:$12 sps:$4 sm:$0xff]   ;;  %v1091_v25 = vld [vmem:[%s1203_s22 + $0x20] ss:$12 sps:$4 sm:$0xff]   ;;  %v1094_v27 = vld [vmem:[%s1203_s22 + $0x38] ss:$12 sps:$4 sm:$0xff]  }
  0x15   : > { %971 = vmatprep.subr.bf16.mxu0 %v1071_v8  ;;  %1025 = vmatprep.subr.bf16.mxu1 %v1071_v8  ;;  %v1092_v26 = vld [vmem:[%s1203_s22 + $0x34] ss:$12 sps:$4 sm:$0xff]   ;;  %v1095_v28 = vld [vmem:[%s1203_s22 + $0x30] ss:$12 sps:$4 sm:$0xff]  }
  0x16   : > { %v1096_v29 = vld [vmem:[%s1203_s22 + $0x50] ss:$12 sps:$4 sm:$0xff]  }
  0x18   : > { %972 = vmatpush3.bf16.msra.mxu0 %v1072_v9  ;;  %1033 = vmatpush3.bf16.msra.mxu1 %v1072_v9 }
  0x19   : > { %973 = vmatprep.subr.bf16.mxu0 %v1073_v10  ;;  %1026 = vmatprep.subr.bf16.mxu1 %v1073_v10 }
  0x1c   : > { %974 = vmatpush3.bf16.msra.mxu0 %v1074_v13  ;;  %1034 = vmatpush3.bf16.msra.mxu1 %v1074_v13 }
  0x1d   : > { %975 = vmatprep.subr.bf16.mxu0 %v1075_v14  ;;  %1027 = vmatprep.subr.bf16.mxu1 %v1075_v14 }
  0x20   : > { %976 = vmatpush3.bf16.msra.mxu0 %v1076_v15  ;;  %1035 = vmatpush3.bf16.msra.mxu1 %v1076_v15 }
  0x21   : > { %977 = vmatprep.subr.bf16.mxu0 %v1077_v16  ;;  %1028 = vmatprep.subr.bf16.mxu1 %v1077_v16 }
  0x24   : > { %978 = vmatpush3.bf16.msra.mxu0 %v1078_v17  ;;  %1036 = vmatpush3.bf16.msra.mxu1 %v1078_v17 }
  0x25   : > { %1009 = vmatprep.subr.bf16.mxu1 %v1085_v18 }
  0x27   : > { %558 = vmatmul.mubr.bf16.vlgmr.msra.gmra.mrb[0].mxu0 %v1079_v19  ;;  %582 = vmatmul.mubr.bf16.vlgmr.msra.gmra.mrb[0].mxu1 %v1082_v20 }
  0x28   : > { %1010 = vmatpush3.bf16.msra.mxu1 %v1085_v18  ;;  %565 = vmatprep.mubr.bf16.mxu0 %v1087_v21 }
  0x29   : > { %1011 = vmatprep.subr.bf16.mxu1 %v1086_v22  ;;  %1013 = vmatprep.mubr.msk.bf16.mxu1 %vm512_vm0, %v1089_v23 }
  0x2c   : > { %1012 = vmatpush3.bf16.msra.mxu1 %v1086_v22 }
  0x2f   : > { %566 = vmatmul.mubr.bf16.gmra.mrb[4].mxu0 %v1090_v24  ;;  %1014 = vmatmul.mubr.msk.bf16.vlgmr.msra.gmra.mrb[4].mxu1 %vm512_vm0, %v1091_v25 }
  0x30   : > { %573 = vmatprep.mubr.bf16.mxu0 %v1092_v26  ;;  %1017 = vmatprep.mubr.msk.bf16.mxu1 %vm512_vm0, %v1094_v27 }
  0x37   : > { %574 = vmatmul.mubr.bf16.gmra.mrb[8].mxu0 %v1095_v28  ;;  %1018 = vmatmul.mubr.msk.bf16.gmra.mrb[8].mxu1 %vm512_vm0, %v1096_v29 }
  0xfa   : > { %v979_v31 = vpop.f32.mrb[0].mxu0  ;;  %v997_v32 = vpop.f32.mrb[0].mxu1 }
  0xfb   : > { %v980_v33 = vpop.f32.mrb[1].mxu0  ;;  %v998_v34 = vpop.f32.mrb[1].mxu1 }
  0xfc   : > { %v981_v35 = vadd.f32 %v980_v33, %v979_v31  ;;  %v982_v36 = vpop.f32.mrb[2].mxu0  ;;  %v999_v37 = vadd.f32 %v998_v34, %v997_v32  ;;  %v1000_v38 = vpop.f32.mrb[2].mxu1 }
  0xfd   : > { %v983_v39 = vpop.f32.mrb[3].mxu0  ;;  %v1001_v40 = vpop.f32.mrb[3].mxu1 }
  0xfe   : > { %v984_v41 = vadd.f32 %v983_v39, %v982_v36  ;;  %v1002_v42 = vadd.f32 %v1001_v40, %v1000_v38  ;;  %v560_v46 = vadd.f32 %v981_v35, %v1267_v43  ;;  %v584_v63 = vadd.f32 %v999_v37, %v1267_v43 }
 0x100   : > { %v563_v54 = vadd.f32 %v984_v41, %v1267_v43  ;;  %v587_v25 = vadd.f32 %v1002_v42, %v1267_v43 }
 0x102   : > { %v985_v44 = vpop.f32.mrb[4].mxu0  ;;  %v1015_v45 = vpop.f32.mrb[4].mxu1 }
 0x103   : > { %v986_v47 = vpop.f32.mrb[5].mxu0  ;;  %v624_v48 = vpop.f32.mrb[5].mxu1 }
 0x104   : > { %v987_v49 = vadd.f32 %v986_v47, %v985_v44  ;;  %v625_v50 = vadd.f32 %v624_v48, %v560_v46  ;;  %v988_v51 = vpop.f32.mrb[6].mxu0  ;;  %v1016_v52 = vpop.f32.mrb[6].mxu1 }
 0x105   : > { %v989_v53 = vpop.f32.mrb[7].mxu0  ;;  %v627_v55 = vpop.f32.mrb[7].mxu1 }
 0x106   : > { %v568_v56 = vadd.f32 %v987_v49, %v1267_v43  ;;  %v955_v57 = vpack.c.bf16 %v625_v50, %v625_v50  ;;  %v730_v58 = vmul.f32 %v625_v50, %v625_v50  ;;  %v990_v59 = vadd.f32 %v989_v53, %v988_v51 }
 0x107   : > { %v628_v60 = vadd.f32 %v627_v55, %v563_v54  ;;  %v705_v62 = vsel %vm704_vm3, %v625_v50, 0.0 }
 0x108   : > { %v633_v61 = vadd.f32 %v1015_v45, %v568_v56  ;;  %688 = vst.msk [vmem:[%s1274_s6] sm:$0xf] %vm687_vm2, %v955_v57  ;;  %v571_v0 = vadd.f32 %v990_v59, %v1267_v43  ;;  %v738_v10 = vsel %vm704_vm3, %v730_v58, 0.0 }
 0x109   : > { %v956_v1 = vpack.c.bf16 %v628_v60, %v628_v60  ;;  %v706_v2 = vsel %vm704_vm3, %v628_v60, 0.0  ;;  %v731_v3 = vmul.f32 %v628_v60, %v628_v60 }
 0x10a   : > { %v957_v4 = vpack.c.bf16 %v633_v61, %v633_v61  ;;  %v732_v5 = vmul.f32 %v633_v61, %v633_v61  ;;  %v707_v6 = vadd.f32 %v706_v2, %v705_v62  ;;  %v708_v7 = vsel %vm704_vm3, %v633_v61, 0.0  ;;  %v991_v8 = vpop.f32.mrb[8].mxu0  ;;  %v1019_v9 = vpop.f32.mrb[8].mxu1 }
 0x10b   : > { %v636_v11 = vadd.f32 %v1016_v52, %v571_v0  ;;  %689 = vst.msk [vmem:[%s1274_s6 + $0x4] sm:$0xf] %vm687_vm2, %v956_v1  ;;  %v739_v12 = vsel %vm704_vm3, %v731_v3, 0.0  ;;  %v649_v13 = vadd.f32 %v1019_v9, %v584_v63  ;;  %v992_v14 = vpop.f32.mrb[9].mxu0  ;;  %v640_v15 = vpop.f32.mrb[9].mxu1 }
 0x10c   : > { %690 = vst.msk [vmem:[%s1274_s6 + $0x8] sm:$0xf] %vm687_vm2, %v957_v4  ;;  %v709_v16 = vadd.f32 %v708_v7, %v707_v6  ;;  %v740_v17 = vadd.f32 %v739_v12, %v738_v10  ;;  %v741_v18 = vsel %vm704_vm3, %v732_v5, 0.0  ;;  %v993_v19 = vadd.f32 %v992_v14, %v991_v8  ;;  %v994_v20 = vpop.f32.mrb[10].mxu0  ;;  %v1020_v21 = vpop.f32.mrb[10].mxu1 }
 0x10d   : > { %v958_v22 = vpack.c.bf16 %v636_v11, %v636_v11  ;;  %v733_v23 = vmul.f32 %v636_v11, %v636_v11  ;;  %v961_v24 = vpack.c.bf16 %v649_v13, %v649_v13  ;;  %v995_v26 = vpop.f32.mrb[11].mxu0  ;;  %v643_v27 = vpop.f32.mrb[11].mxu1  ;;  %v710_v30 = vsel %vm704_vm3, %v636_v11, 0.0  ;;  %v703_v7 = vld [vmem:[%s1252_s23] sm:$0x1] }
 0x10e   : > { %v742_v28 = vadd.f32 %v741_v18, %v740_v17  ;;  %v576_v29 = vadd.f32 %v993_v19, %v1267_v43  ;;  %v711_v31 = vadd.f32 %v710_v30, %v709_v16  ;;  %v652_v33 = vadd.f32 %v1020_v21, %v587_v25  ;;  %v729_v10 = vld [vmem:[%s1258_s26] sm:$0x1] }
 0x10f   : > { %691 = vst.msk [vmem:[%s1274_s6 + $0xc] sm:$0xf] %vm687_vm2, %v958_v22  ;;  %694 = vst.msk [vmem:[%s1274_s6 + $0x18] sm:$0xf] %vm687_vm2, %v961_v24  ;;  %v743_v32 = vsel %vm704_vm3, %v733_v23, 0.0  ;;  %v996_v34 = vadd.f32 %v995_v26, %v994_v20  ;;  %v736_v45 = vmul.f32 %v649_v13, %v649_v13  ;;  %v716_v51 = vsel %vm704_vm3, %v649_v13, 0.0 }
 0x110   : > { %v641_v35 = vadd.f32 %v640_v15, %v576_v29  ;;  %v744_v36 = vadd.f32 %v743_v32, %v742_v28  ;;  %v962_v37 = vpack.c.bf16 %v652_v33, %v652_v33  ;;  %v737_v52 = vmul.f32 %v652_v33, %v652_v33 }
 0x111   : > { %v579_v38 = vadd.f32 %v996_v34, %v1267_v43  ;;  %v749_v56 = vsel %vm704_vm3, %v736_v45, 0.0  ;;  %v718_v57 = vsel %vm704_vm3, %v652_v33, 0.0 }
 0x112   : > { %v959_v39 = vpack.c.bf16 %v641_v35, %v641_v35  ;;  %v712_v40 = vsel %vm704_vm3, %v641_v35, 0.0  ;;  %v734_v41 = vmul.f32 %v641_v35, %v641_v35  ;;  %695 = vst.msk [vmem:[%s1274_s6 + $0x1c] sm:$0xf] %vm687_vm2, %v962_v37  ;;  %v751_v60 = vsel %vm704_vm3, %v737_v52, 0.0 }
 0x113   : > { %v713_v42 = vadd.f32 %v712_v40, %v711_v31  ;;  %v644_v44 = vadd.f32 %v643_v27, %v579_v38 }
 0x114   : > { %692 = vst.msk [vmem:[%s1274_s6 + $0x10] sm:$0xf] %vm687_vm2, %v959_v39  ;;  %v745_v46 = vsel %vm704_vm3, %v734_v41, 0.0 }
 0x115   : > { %v746_v47 = vadd.f32 %v745_v46, %v744_v36  ;;  %v960_v48 = vpack.c.bf16 %v644_v44, %v644_v44  ;;  %v714_v49 = vsel %vm704_vm3, %v644_v44, 0.0  ;;  %v735_v50 = vmul.f32 %v644_v44, %v644_v44 }
 0x116   : > { %v715_v43 = vadd.f32 %v714_v49, %v713_v42 }
 0x117   : > { %693 = vst.msk [vmem:[%s1274_s6 + $0x14] sm:$0xf] %vm687_vm2, %v960_v48  ;;  %v747_v53 = vsel %vm704_vm3, %v735_v50, 0.0 }
 0x118   : > { %v717_v54 = vadd.f32 %v716_v51, %v715_v43  ;;  %v748_v55 = vadd.f32 %v747_v53, %v746_v47 }
 0x11a   : > { %v719_v58 = vadd.f32 %v718_v57, %v717_v54  ;;  %v750_v59 = vadd.f32 %v749_v56, %v748_v55 }
 0x11c   : > { %v720_v61 = vrot.slane %v719_v58, 4  ;;  %v752_v62 = vadd.f32 %v751_v60, %v750_v59 }
 0x11e   : > { %v721_v63 = vadd.f32 %v720_v61, %v719_v58  ;;  %v753_v0 = vrot.slane %v752_v62, 4 }
 0x120   : > { %v722_v1 = vrot.slane %v721_v63, 2  ;;  %v754_v2 = vadd.f32 %v753_v0, %v752_v62 }
 0x122   : > { %v723_v3 = vadd.f32 %v722_v1, %v721_v63  ;;  %v755_v4 = vrot.slane %v754_v2, 2 }
 0x124   : > { %v724_v5 = vrot.slane %v723_v3, 1  ;;  %v756_v6 = vadd.f32 %v755_v4, %v754_v2 }
 0x126   : > { %v725_v8 = vadd.f32 %v724_v5, %v723_v3  ;;  %v757_v9 = vrot.slane %v756_v6, 1 }
 0x128   : > { %v726_v11 = vadd.f32 %v725_v8, %v703_v7  ;;  %v758_v12 = vadd.f32 %v757_v9, %v756_v6 }
 0x12a   : > { %728 = vst.msk [vmem:[%s1252_s23] sm:$0x1] %vm700_vm1, %v726_v11  ;;  %v759_v13 = vadd.f32 %v758_v12, %v729_v10 }
 0x12c   : > { %760 = vst.msk [vmem:[%s1258_s26] sm:$0x1] %vm700_vm1, %v759_v13 }
 0x12d PF: > { %s16_s20 = sadd.s32 1, %s1119_s20   ;;  %s1336_s18 = smov %s1115_s19 }
 0x12e   : > { %p13_p5 = scmp.ge.s32.totalorder %s16_s20, 4   ;;  %s1337_s19 = smov %s1339_s21 }
 0x130   :  { %15 = sbr.rel (!%p13_p5) target bundleno = 2 (0x2), region = 90 }

// kernel: transformer_net_forward.34
= control target key start
LH: loop header
LB: loop body
LE: loop exit
PB: predicated region body
PF: predicated region fallthrough
CT: control target
= control target key end

     0   :  { %s508_s12 = smov 0   ;;  %s510_s13 = smov 0   ;;  %s547_s0 = inlined_call_operand.vmem [shape: bf16[2,32,128], index: 0, kind: input, shape index: {}]   ;;  %s548_s1 = inlined_call_operand.vmem [shape: f32[2,1,128], index: 1, kind: input, shape index: {}]   ;;  %s549_s2 = inlined_call_operand.vmem [shape: f32[2,1,128], index: 2, kind: input, shape index: {}]   ;;  %s550_s3 = inlined_call_operand.vmem [shape: bf16[2,32,128], index: 3, kind: output, shape index: {}]  }
   0x1   :  { %s512_s14 = smov 0  }
   0x2 LB: > { %s25_s15 = sadd.s32 1, %s482_s13  ;;  %p401_p0 = scmp.ge.s32.totalorder %s486_s14, 1  ;;  %s486_s14 = sphi %s512_s14, %s13_s14   ;;  %s482_s13 = sphi %s510_s13, %s552_s13   ;;  %s478_s12 = sphi %s508_s12, %s551_s12  }
   0x3   : > { %p27_p1 = scmp.ge.s32.totalorder %s25_s15, 2  ;;  %p174_p2 = scmp.lt.s32.totalorder %s486_s14, 3 }
   0x5   : > { %s554_s15 = smov (%p27_p1, %s25_s15), 0  ;;  %p175_p3 = pnand %p401_p0, %p174_p2 }
   0x6   : > { %p213_p4 = scmp.lt.s32.totalorder (!%p175_p3), %s478_s12, 1 }
   0x7   : > { %178 = sbr.rel (%p175_p3) target bundleno = 29 (0x1d), region = 32 }
   0xe   : > { %s556_s12 = smov (!%p213_p4, %s478_s12), 1 }
   0xf   : > { %s414_s16 = sshll.u32 %s556_s12, 4  ;;  %s224_s19 = scalar_lea.vmem %s548_s1, %s556_s12 }
  0x10   : > { %s220_s22 = scalar_lea.vmem %s547_s0, %s414_s16  ;;  %s227_s25 = scalar_lea.vmem %s549_s2, %s556_s12  ;;  %v406_v2 = vld [vmem:[%s224_s19] ss:$0 sm:$0xff] }
  0x11   : > { %v421_v0 = vld [vmem:[%s220_s22] sm:$0xff]   ;;  %v438_v1 = vld [vmem:[%s220_s22 + $0x8] sm:$0xff]   ;;  %s236_s28 = scalar_lea.vmem %s550_s3, %s414_s16 }
  0x12   : > { %v422_v3 = vunpack.c.l.bf16 %v421_v0  ;;  %v423_v4 = vunpack.c.h.bf16 %v421_v0  ;;  %v426_v5 = vunpack.c.l.bf16 %v438_v1  ;;  %v427_v6 = vunpack.c.h.bf16 %v438_v1  ;;  %v407_v7 = vld [vmem:[%s227_s25] ss:$0 sm:$0xff] }
  0x14   : > { %v253_v8 = vmul.f32 %v422_v3, %v406_v2  ;;  %v254_v9 = vmul.f32 %v423_v4, %v406_v2  ;;  %v255_v10 = vmul.f32 %v426_v5, %v406_v2  ;;  %v256_v11 = vmul.f32 %v427_v6, %v406_v2 }
  0x16   : > { %v264_v12 = vadd.f32 %v407_v7, %v253_v8  ;;  %v265_v13 = vadd.f32 %v407_v7, %v254_v9  ;;  %v266_v14 = vadd.f32 %v407_v7, %v255_v10  ;;  %v267_v15 = vadd.f32 %v407_v7, %v256_v11 }
  0x18   : > { %v268_v16 = vmax.f32 %v264_v12, 0.0  ;;  %v269_v17 = vmax.f32 %v265_v13, 0.0  ;;  %v270_v18 = vmax.f32 %v266_v14, 0.0  ;;  %v271_v19 = vmax.f32 %v267_v15, 0.0 }
  0x1a   : > { %v431_v20 = vpack.c.bf16 %v269_v17, %v268_v16  ;;  %v436_v21 = vpack.c.bf16 %v271_v19, %v270_v18 }
  0x1c   : > { %432 = vst [vmem:[%s236_s28] sm:$0xff] %v431_v20   ;;  %439 = vst [vmem:[%s236_s28 + $0x8] sm:$0xff] %v436_v21  }
  0x1d PF: > { %s13_s14 = sadd.s32 1, %s486_s14   ;;  %s551_s12 = smov %s482_s13 }
  0x1e   : > { %p10_p5 = scmp.ge.s32.totalorder %s13_s14, 4   ;;  %s552_s13 = smov %s554_s15 }
  0x20   :  { %12 = sbr.rel (!%p10_p5) target bundleno = 2 (0x2), region = 68 }

// kernel: transformer_net_forward.35
= control target key start
LH: loop header
LB: loop body
LE: loop exit
PB: predicated region body
PF: predicated region fallthrough
CT: control target
= control target key end

     0   :  { %s1166_s18 = smov 0   ;;  %s1168_s19 = smov 0   ;;  %s1343_s0 = inlined_call_operand.vmem [shape: bf16[2,16,576], index: 0, kind: input, shape index: {}]   ;;  %s1344_s1 = inlined_call_operand.vmem [shape: bf16[576,128], index: 1, kind: input, shape index: {}]   ;;  %s1345_s2 = inlined_call_operand.vmem [shape: f32[1,128], index: 2, kind: input, shape index: {}]   ;;  %s1346_s3 = inlined_call_operand.vmem [shape: bf16[2,16,128], index: 3, kind: output, shape index: {0}]   ;;  %s1347_s4 = inlined_call_operand.vmem [shape: f32[2,1,128], index: 4, kind: output, shape index: {1}]   ;;  %s1348_s5 = inlined_call_operand.vmem [shape: f32[2,1,128], index: 5, kind: output, shape index: {2}]  }
   0x1   :  { %s1170_s20 = smov 0  }
   0x2 LB: > { %s28_s21 = sadd.s32 1, %s1128_s19  ;;  %p920_p0 = scmp.ge.s32.totalorder %s1132_s20, 1  ;;  %s1132_s20 = sphi %s1170_s20, %s16_s20   ;;  %s1128_s19 = sphi %s1168_s19, %s1350_s19   ;;  %s1124_s18 = sphi %s1166_s18, %s1349_s18  }
   0x3   : > { %p30_p1 = scmp.ge.s32.totalorder %s28_s21, 2  ;;  %p214_p2 = scmp.lt.s32.totalorder %s1132_s20, 3 }
   0x5   : > { %s1352_s21 = smov (%p30_p1, %s28_s21), 0  ;;  %p215_p3 = pnand %p920_p0, %p214_p2 }
   0x6   : > { %v1067_v0 = vld [vmem:[%s1344_s1 + $0x40] sm:$0xff] (!%p215_p3)   ;;  %v1071_v4 = vld [vmem:[%s1344_s1 + $0x48] sm:$0xff] (!%p215_p3)   ;;  %v1075_v8 = vld [vmem:[%s1344_s1 + $0x50] sm:$0xff] (!%p215_p3)   ;;  %p258_p4 = scmp.lt.s32.totalorder (!%p215_p3), %s1124_s18, 1  ;;  %v1134_v33 = vmov (!%p215_p3), 0.0   ;;  %vm1135_vm0 = vmmov (!%p215_p3), 0  }
   0x7   : > { %218 = sbr.rel (%p215_p3) target bundleno = 290 (0x122), region = 32  ;;  %v1068_v1 = vld [vmem:[%s1344_s1] sm:$0xff] (!%p215_p3)   ;;  %979 = vmatprep.subr.bf16.mxu0 (!%p215_p3), %v1067_v0  ;;  %v1072_v5 = vld [vmem:[%s1344_s1 + $0x8] sm:$0xff] (!%p215_p3)   ;;  %v1076_v9 = vld [vmem:[%s1344_s1 + $0x10] sm:$0xff] (!%p215_p3)   ;;  %vm611_vm1 = vcmask (!%p215_p3), 523264  }
   0x8   : > { %v1069_v2 = vld [vmem:[%s1344_s1 + $0xc0] sm:$0xff] (!%p215_p3)   ;;  %980 = vmatpush3.bf16.msra.mxu0 (!%p215_p3), %v1068_v1  ;;  %v1073_v6 = vld [vmem:[%s1344_s1 + $0xc8] sm:$0xff] (!%p215_p3)   ;;  %v1077_v10 = vld [vmem:[%s1344_s1 + $0xd0] sm:$0xff] (!%p215_p3)  }
   0x9   : > { %v1070_v3 = vld [vmem:[%s1344_s1 + $0x80] sm:$0xff] (!%p215_p3)   ;;  %1001 = vmatprep.subr.bf16.mxu1 (!%p215_p3), %v1069_v2  ;;  %981 = vmatprep.subr.bf16.mxu0 (!%p215_p3), %v1071_v4  ;;  %v1074_v7 = vld [vmem:[%s1344_s1 + $0x88] sm:$0xff] (!%p215_p3)   ;;  %v1078_v11 = vld [vmem:[%s1344_s1 + $0x90] sm:$0xff] (!%p215_p3)  }
   0xa   : > { %1002 = vmatpush3.bf16.msra.mxu1 (!%p215_p3), %v1070_v3  ;;  %v1079_v12 = vld [vmem:[%s1344_s1 + $0x58] sm:$0xff] (!%p215_p3)   ;;  %v1083_v16 = vld [vmem:[%s1344_s1 + $0x60] sm:$0xff] (!%p215_p3)   ;;  %v1087_v20 = vld [vmem:[%s1344_s1 + $0x68] sm:$0xff] (!%p215_p3)  }
   0xb   : > { %1003 = vmatprep.subr.bf16.mxu1 (!%p215_p3), %v1073_v6  ;;  %v1080_v13 = vld [vmem:[%s1344_s1 + $0x18] sm:$0xff] (!%p215_p3)   ;;  %v1084_v17 = vld [vmem:[%s1344_s1 + $0x20] sm:$0xff] (!%p215_p3)   ;;  %v1088_v21 = vld [vmem:[%s1344_s1 + $0x28] sm:$0xff] (!%p215_p3)  }
   0xc   : > { %982 = vmatpush3.bf16.msra.mxu0 (!%p215_p3), %v1072_v5  ;;  %v1081_v14 = vld [vmem:[%s1344_s1 + $0xd8] sm:$0xff] (!%p215_p3)   ;;  %v1085_v18 = vld [vmem:[%s1344_s1 + $0xe0] sm:$0xff] (!%p215_p3)   ;;  %v1089_v22 = vld [vmem:[%s1344_s1 + $0xe8] sm:$0xff] (!%p215_p3)  }
   0xd   : > { %983 = vmatprep.subr.bf16.mxu0 (!%p215_p3), %v1075_v8  ;;  %v1082_v15 = vld [vmem:[%s1344_s1 + $0x98] sm:$0xff] (!%p215_p3)   ;;  %v1086_v19 = vld [vmem:[%s1344_s1 + $0xa0] sm:$0xff] (!%p215_p3)   ;;  %v1090_v23 = vld [vmem:[%s1344_s1 + $0xa8] sm:$0xff] (!%p215_p3)  }
   0xe   : > { %1004 = vmatpush3.bf16.msra.mxu1 %v1074_v7  ;;  %s1354_s18 = smov (!%p258_p4, %s1124_s18), 1  ;;  %v1091_v24 = vld [vmem:[%s1344_s1 + $0x70] sm:$0xff]   ;;  %v1095_v28 = vld [vmem:[%s1344_s1 + $0x78] sm:$0xff]   ;;  %v1105_v37 = vld [vmem:[%s1344_s1 + $0x100] sm:$0xff]  }
   0xf   : > { %1005 = vmatprep.subr.bf16.mxu1 %v1077_v10  ;;  %s1040_s30 = smul.u32 40, %s1354_s18  ;;  %v1092_v25 = vld [vmem:[%s1344_s1 + $0x30] sm:$0xff]   ;;  %v1096_v29 = vld [vmem:[%s1344_s1 + $0x38] sm:$0xff]   ;;  %v1106_v38 = vld [vmem:[%s1344_s1 + $0x108] sm:$0xff]   ;;  %s1313_s12 = scalar_lea.vmem %s1347_s4, %s1354_s18 }
  0x10   : > { %984 = vmatpush3.bf16.msra.mxu0 %v1076_v9  ;;  %v1093_v26 = vld [vmem:[%s1344_s1 + $0xf0] sm:$0xff]   ;;  %v1097_v30 = vld [vmem:[%s1344_s1 + $0xf8] sm:$0xff]   ;;  %s1319_s15 = scalar_lea.vmem %s1348_s5, %s1354_s18  ;;  %752 = vst [vmem:[%s1313_s12] sm:$0x1] %v1134_v33  ;;  %v924_v43 = vld [vmem:[%s1345_s2] ss:$0 sm:$0xff]  ;;  %s971_s22 = sshll.u32 %s1354_s18, 3 }
  0x11   : > { %985 = vmatprep.subr.bf16.mxu0 %v1079_v12  ;;  %v1094_v27 = vld [vmem:[%s1344_s1 + $0xb0] sm:$0xff]   ;;  %s1281_s16 = scalar_lea.vmem %s1343_s0, %s1040_s30  ;;  %v1101_v34 = vld [vmem:[%s1344_s1 + $0xb8] sm:$0xff]   ;;  %753 = vst [vmem:[%s1319_s15] sm:$0x1] %v1134_v33  ;;  %s276_s25 = scalar_lea.vmem %s1346_s3, %s971_s22 }
  0x12   : > { %1006 = vmatpush3.bf16.msra.mxu1 %v1078_v11  ;;  %v1098_v31 = vld [vmem:[%s1281_s16] ss:$20 sps:$4 sm:$0xff]   ;;  %v1100_v32 = vld [vmem:[%s1281_s16 + $0x4] ss:$20 sps:$4 sm:$0xff]   ;;  %v1102_v35 = vld [vmem:[%s1281_s16 + $0x8] ss:$20 sps:$4 sm:$0xff]  }
  0x13   : > { %1007 = vmatprep.subr.bf16.mxu1 %v1081_v14  ;;  %647 = vmatprep.mubr.bf16.mxu0 %v1100_v32  ;;  %v1104_v36 = vld [vmem:[%s1281_s16 + $0xc] ss:$20 sps:$4 sm:$0xff]   ;;  %v1107_v39 = vld [vmem:[%s1344_s1 + $0x110] sm:$0xff]   ;;  %v1108_v40 = vld [vmem:[%s1344_s1 + $0x118] sm:$0xff]  }
  0x14   : > { %986 = vmatpush3.bf16.msra.mxu0 %v1080_v13  ;;  %688 = vmatprep.mubr.bf16.mxu1 %v1104_v36  ;;  %v1109_v41 = vld [vmem:[%s1281_s16 + $0x10] ss:$20 sps:$4 sm:$0xff]  }
  0x15   : > { %987 = vmatprep.subr.bf16.mxu0 %v1083_v16 }
  0x16   : > { %1008 = vmatpush3.bf16.msra.mxu1 %v1082_v15 }
  0x17   : > { %1009 = vmatprep.subr.bf16.mxu1 %v1085_v18  ;;  %v754_v15 = vld [vmem:[%s1313_s12] sm:$0x1] }
  0x18   : > { %988 = vmatpush3.bf16.msra.mxu0 %v1084_v17  ;;  %v764_v18 = vld [vmem:[%s1319_s15] sm:$0x1] }
  0x19   : > { %989 = vmatprep.subr.bf16.mxu0 %v1087_v20 }
  0x1a   : > { %1010 = vmatpush3.bf16.msra.mxu1 %v1086_v19 }
  0x1b   : > { %1011 = vmatprep.subr.bf16.mxu1 %v1089_v22 }
  0x1c   : > { %990 = vmatpush3.bf16.msra.mxu0 %v1088_v21 }
  0x1d   : > { %991 = vmatprep.subr.bf16.mxu0 %v1091_v24 }
  0x1e   : > { %1012 = vmatpush3.bf16.msra.mxu1 %v1090_v23 }
  0x1f   : > { %1013 = vmatprep.subr.bf16.mxu1 %v1093_v26 }
  0x20   : > { %992 = vmatpush3.bf16.msra.mxu0 %v1092_v25 }
  0x21   : > { %993 = vmatprep.subr.bf16.mxu0 %v1095_v28 }
  0x22   : > { %1014 = vmatpush3.bf16.msra.mxu1 %v1094_v27 }
  0x23   : > { %1015 = vmatprep.subr.bf16.mxu1 %v1097_v30 }
  0x24   : > { %994 = vmatpush3.bf16.msra.mxu0 %v1096_v29 }
  0x25   : > { %1028 = vmatprep.subr.bf16.mxu0 %v1134_v33 }
  0x26   : > { %1016 = vmatpush3.bf16.msra.mxu1 %v1101_v34 }
  0x27   : > { %648 = vmatmul.mubr.bf16.vlgmr.msra.gmra.mrb[0].mxu0 %v1098_v31 }
  0x28   : > { %1036 = vmatprep.mubr.msk.bf16.mxu0 %vm1135_vm0, %v1134_v33  ;;  %1029 = vmatpush3.bf16.msra.mxu0 %v1105_v37 }
  0x29   : > { %689 = vmatmul.mubr.bf16.vlgmr.msra.gmra.mrb[0].mxu1 %v1102_v35  ;;  %1030 = vmatprep.subr.bf16.mxu0 %v1134_v33 }
  0x2c   : > { %1031 = vmatpush3.bf16.msra.mxu0 %v1106_v38 }
  0x2d   : > { %1032 = vmatprep.subr.bf16.mxu0 %v1134_v33 }
  0x30   : > { %1033 = vmatpush3.bf16.msra.mxu0 %v1107_v39 }
  0x31   : > { %1034 = vmatprep.subr.bf16.mxu0 %v1134_v33 }
  0x34   : > { %1035 = vmatpush3.bf16.msra.mxu0 %v1108_v40 }
  0x37   : > { %1037 = vmatmul.mubr.msk.bf16.vlgmr.msra.gmra.mrb[4].mxu0 %vm611_vm1, %v1109_v41 }
  0xfa   : > { %v995_v42 = vpop.f32.mrb[0].mxu0 }
  0xfb   : > { %v996_v44 = vpop.f32.mrb[1].mxu0 }
  0xfc   : > { %v997_v45 = vadd.f32 %v996_v44, %v995_v42  ;;  %v998_v46 = vpop.f32.mrb[2].mxu0  ;;  %v1017_v47 = vpop.f32.mrb[0].mxu1 }
  0xfd   : > { %v999_v48 = vpop.f32.mrb[3].mxu0  ;;  %v1018_v51 = vpop.f32.mrb[1].mxu1 }
  0xfe   : > { %v650_v49 = vadd.f32 %v997_v45, %v924_v43  ;;  %v1000_v50 = vadd.f32 %v999_v48, %v998_v46  ;;  %v1019_v52 = vadd.f32 %v1018_v51, %v1017_v47  ;;  %v1020_v53 = vpop.f32.mrb[2].mxu1 }
  0xff   : > { %v1021_v55 = vpop.f32.mrb[3].mxu1 }
 0x100   : > { %v653_v54 = vadd.f32 %v1000_v50, %v924_v43  ;;  %v1022_v56 = vadd.f32 %v1021_v55, %v1020_v53  ;;  %v691_v57 = vadd.f32 %v1019_v52, %v650_v49 }
 0x102   : > { %v694_v58 = vadd.f32 %v1022_v56, %v653_v54 }
 0x10a   : > { %v731_v59 = vpop.f32.mrb[4].mxu0 }
 0x10b   : > { %v732_v60 = vadd.f32 %v731_v59, %v691_v57  ;;  %v1038_v61 = vpop.f32.mrb[5].mxu0 }
 0x10c   : > { %v734_v62 = vpop.f32.mrb[6].mxu0 }
 0x10d   : > { %v735_v63 = vadd.f32 %v734_v62, %v694_v58  ;;  %v1039_v0 = vpop.f32.mrb[7].mxu0  ;;  %v765_v1 = vmul.f32 %v732_v60, %v732_v60 }
 0x10f   : > { %v977_v2 = vpack.c.bf16 %v735_v63, %v732_v60  ;;  %v755_v3 = vadd.f32 %v735_v63, %v732_v60  ;;  %v766_v4 = vmul.f32 %v735_v63, %v735_v63 }
 0x111   : > { %978 = vst [vmem:[%s276_s25] sm:$0xff] %v977_v2   ;;  %v756_v5 = vrot.slane %v755_v3, 4  ;;  %v767_v6 = vadd.f32 %v766_v4, %v765_v1 }
 0x113   : > { %v757_v7 = vadd.f32 %v756_v5, %v755_v3  ;;  %v768_v8 = vrot.slane %v767_v6, 4 }
 0x115   : > { %v758_v9 = vrot.slane %v757_v7, 2  ;;  %v769_v10 = vadd.f32 %v768_v8, %v767_v6 }
 0x117   : > { %v759_v11 = vadd.f32 %v758_v9, %v757_v7  ;;  %v770_v12 = vrot.slane %v769_v10, 2 }
 0x119   : > { %v760_v13 = vrot.slane %v759_v11, 1  ;;  %v771_v14 = vadd.f32 %v770_v12, %v769_v10 }
 0x11b   : > { %v761_v16 = vadd.f32 %v760_v13, %v759_v11  ;;  %v772_v17 = vrot.slane %v771_v14, 1 }
 0x11d   : > { %v762_v19 = vadd.f32 %v761_v16, %v754_v15  ;;  %v773_v20 = vadd.f32 %v772_v17, %v771_v14 }
 0x11f   : > { %763 = vst [vmem:[%s1313_s12] sm:$0x1] %v762_v19  ;;  %v774_v21 = vadd.f32 %v773_v20, %v764_v18 }
 0x121   : > { %775 = vst [vmem:[%s1319_s15] sm:$0x1] %v774_v21 }
 0x122 PF: > { %s16_s20 = sadd.s32 1, %s1132_s20   ;;  %s1349_s18 = smov %s1128_s19 }
 0x123   : > { %p13_p5 = scmp.ge.s32.totalorder %s16_s20, 4   ;;  %s1350_s19 = smov %s1352_s21 }
 0x125   :  { %15 = sbr.rel (!%p13_p5) target bundleno = 2 (0x2), region = 90 }

// kernel: transformer_net_forward.36
= control target key start
LH: loop header
LB: loop body
LE: loop exit
PB: predicated region body
PF: predicated region fallthrough
CT: control target
= control target key end

     0   :  { %s473_s12 = smov 0   ;;  %s475_s13 = smov 0   ;;  %s509_s0 = inlined_call_operand.vmem [shape: bf16[2,16,128], index: 0, kind: input, shape index: {}]   ;;  %s510_s1 = inlined_call_operand.vmem [shape: f32[2,1,128], index: 1, kind: input, shape index: {}]   ;;  %s511_s2 = inlined_call_operand.vmem [shape: f32[2,1,128], index: 2, kind: input, shape index: {}]   ;;  %s512_s3 = inlined_call_operand.vmem [shape: bf16[2,16,128], index: 3, kind: output, shape index: {}]  }
   0x1   :  { %s477_s14 = smov 0  }
   0x2 LB: > { %s25_s15 = sadd.s32 1, %s447_s13  ;;  %p381_p0 = scmp.ge.s32.totalorder %s451_s14, 1  ;;  %s451_s14 = sphi %s477_s14, %s13_s14   ;;  %s447_s13 = sphi %s475_s13, %s514_s13   ;;  %s443_s12 = sphi %s473_s12, %s513_s12  }
   0x3   : > { %p27_p1 = scmp.ge.s32.totalorder %s25_s15, 2  ;;  %p174_p2 = scmp.lt.s32.totalorder %s451_s14, 3 }
   0x5   : > { %s516_s15 = smov (%p27_p1, %s25_s15), 0  ;;  %p175_p3 = pnand %p381_p0, %p174_p2 }
   0x6   : > { %p213_p4 = scmp.lt.s32.totalorder (!%p175_p3), %s443_s12, 1 }
   0x7   : > { %178 = sbr.rel (%p175_p3) target bundleno = 29 (0x1d), region = 32 }
   0xe   : > { %s518_s12 = smov (!%p213_p4, %s443_s12), 1 }
   0xf   : > { %s392_s16 = sshll.u32 %s518_s12, 3  ;;  %s224_s19 = scalar_lea.vmem %s510_s1, %s518_s12 }
  0x10   : > { %s220_s22 = scalar_lea.vmem %s509_s0, %s392_s16  ;;  %s227_s25 = scalar_lea.vmem %s511_s2, %s518_s12  ;;  %v386_v1 = vld [vmem:[%s224_s19] ss:$0 sm:$0xff] }
  0x11   : > { %v397_v0 = vld [vmem:[%s220_s22] sm:$0xff]   ;;  %s236_s28 = scalar_lea.vmem %s512_s3, %s392_s16 }
  0x12   : > { %v398_v2 = vunpack.c.l.bf16 %v397_v0  ;;  %v399_v3 = vunpack.c.h.bf16 %v397_v0  ;;  %v387_v4 = vld [vmem:[%s227_s25] ss:$0 sm:$0xff] }
  0x14   : > { %v249_v5 = vmul.f32 %v398_v2, %v386_v1  ;;  %v250_v6 = vmul.f32 %v399_v3, %v386_v1 }
  0x16   : > { %v258_v7 = vadd.f32 %v387_v4, %v249_v5  ;;  %v259_v8 = vadd.f32 %v387_v4, %v250_v6 }
  0x18   : > { %v260_v9 = vmax.f32 %v258_v7, 0.0  ;;  %v261_v10 = vmax.f32 %v259_v8, 0.0 }
  0x1a   : > { %v403_v11 = vpack.c.bf16 %v261_v10, %v260_v9 }
  0x1c   : > { %404 = vst [vmem:[%s236_s28] sm:$0xff] %v403_v11  }
  0x1d PF: > { %s13_s14 = sadd.s32 1, %s451_s14   ;;  %s513_s12 = smov %s447_s13 }
  0x1e   : > { %p10_p5 = scmp.ge.s32.totalorder %s13_s14, 4   ;;  %s514_s13 = smov %s516_s15 }
  0x20   :  { %12 = sbr.rel (!%p10_p5) target bundleno = 2 (0x2), region = 68 }

// kernel: transformer_net_forward.40
= control target key start
LH: loop header
LB: loop body
LE: loop exit
PB: predicated region body
PF: predicated region fallthrough
CT: control target
= control target key end

     0   :  { %s570_s15 = smov 0   ;;  %s572_s16 = smov 0   ;;  %s612_s0 = inlined_call_operand.vmem [shape: bf16[2,16,128], index: 0, kind: input, shape index: {}]   ;;  %s613_s1 = inlined_call_operand.vmem [shape: f32[2,1,128], index: 1, kind: input, shape index: {}]   ;;  %s614_s2 = inlined_call_operand.vmem [shape: f32[2,1,128], index: 2, kind: input, shape index: {}]   ;;  %s615_s3 = inlined_call_operand.vmem [shape: bf16[2,16,128], index: 3, kind: input, shape index: {}]   ;;  %s616_s4 = inlined_call_operand.vmem [shape: bf16[2,16,128], index: 4, kind: output, shape index: {}]  }
   0x1   :  { %s574_s17 = smov 0  }
   0x2 LB: > { %s26_s18 = sadd.s32 1, %s539_s16  ;;  %p466_p0 = scmp.ge.s32.totalorder %s543_s17, 1  ;;  %s543_s17 = sphi %s574_s17, %s14_s17   ;;  %s539_s16 = sphi %s572_s16, %s618_s16   ;;  %s535_s15 = sphi %s570_s15, %s617_s15  }
   0x3   : > { %p28_p1 = scmp.ge.s32.totalorder %s26_s18, 2  ;;  %p216_p2 = scmp.lt.s32.totalorder %s543_s17, 3 }
   0x5   : > { %s620_s18 = smov (%p28_p1, %s26_s18), 0  ;;  %p217_p3 = pnand %p466_p0, %p216_p2 }
   0x6   : > { %p266_p4 = scmp.lt.s32.totalorder (!%p217_p3), %s535_s15, 1 }
   0x7   : > { %220 = sbr.rel (%p217_p3) target bundleno = 29 (0x1d), region = 36 }
   0xe   : > { %s622_s15 = smov (!%p266_p4, %s535_s15), 1 }
   0xf   : > { %s479_s19 = sshll.u32 %s622_s15, 3  ;;  %s277_s22 = scalar_lea.vmem %s613_s1, %s622_s15 }
  0x10   : > { %s273_s25 = scalar_lea.vmem %s612_s0, %s479_s19  ;;  %s280_s28 = scalar_lea.vmem %s614_s2, %s622_s15  ;;  %v473_v1 = vld [vmem:[%s277_s22] ss:$0 sm:$0xff] }
  0x11   : > { %s289_s5 = scalar_lea.vmem %s615_s3, %s479_s19  ;;  %v485_v0 = vld [vmem:[%s273_s25] sm:$0xff]   ;;  %s299_s8 = scalar_lea.vmem %s616_s4, %s479_s19 }
  0x12   : > { %v486_v2 = vunpack.c.l.bf16 %v485_v0  ;;  %v487_v3 = vunpack.c.h.bf16 %v485_v0  ;;  %v489_v4 = vld [vmem:[%s289_s5] sm:$0xff]  }
  0x13   : > { %v474_v5 = vld [vmem:[%s280_s28] ss:$0 sm:$0xff]  ;;  %v490_v8 = vunpack.c.l.bf16 %v489_v4  ;;  %v491_v9 = vunpack.c.h.bf16 %v489_v4 }
  0x14   : > { %v312_v6 = vmul.f32 %v486_v2, %v473_v1  ;;  %v313_v7 = vmul.f32 %v487_v3, %v473_v1 }
  0x16   : > { %v321_v10 = vadd.f32 %v474_v5, %v312_v6  ;;  %v322_v11 = vadd.f32 %v474_v5, %v313_v7 }
  0x18   : > { %v327_v12 = vadd.f32 %v490_v8, %v321_v10  ;;  %v328_v13 = vadd.f32 %v491_v9, %v322_v11 }
  0x1a   : > { %v495_v14 = vpack.c.bf16 %v328_v13, %v327_v12 }
  0x1c   : > { %496 = vst [vmem:[%s299_s8] sm:$0xff] %v495_v14  }
  0x1d PF: > { %s14_s17 = sadd.s32 1, %s543_s17   ;;  %s617_s15 = smov %s539_s16 }
  0x1e   : > { %p11_p5 = scmp.ge.s32.totalorder %s14_s17, 4   ;;  %s618_s16 = smov %s620_s18 }
  0x20   :  { %13 = sbr.rel (!%p11_p5) target bundleno = 2 (0x2), region = 75 }

// kernel: transformer_net_forward.37
= control target key start
LH: loop header
LB: loop body
LE: loop exit
PB: predicated region body
PF: predicated region fallthrough
CT: control target
= control target key end

     0   :  { %s1694_s18 = smov 0   ;;  %s1696_s19 = smov 0   ;;  %s1983_s0 = inlined_call_operand.vmem [shape: bf16[2,16,1152], index: 0, kind: input, shape index: {}]   ;;  %s1984_s1 = inlined_call_operand.vmem [shape: bf16[1152,128], index: 1, kind: input, shape index: {}]   ;;  %s1985_s2 = inlined_call_operand.vmem [shape: f32[1,128], index: 2, kind: input, shape index: {}]   ;;  %s1986_s3 = inlined_call_operand.vmem [shape: bf16[2,16,128], index: 3, kind: output, shape index: {0}]   ;;  %s1987_s4 = inlined_call_operand.vmem [shape: f32[2,1,128], index: 4, kind: output, shape index: {1}]   ;;  %s1988_s5 = inlined_call_operand.vmem [shape: f32[2,1,128], index: 5, kind: output, shape index: {2}]  }
   0x1   :  { %s1698_s20 = smov 0  }
   0x2 LB: > { %s28_s21 = sadd.s32 1, %s1656_s19  ;;  %p1311_p0 = scmp.ge.s32.totalorder %s1660_s20, 1  ;;  %s1660_s20 = sphi %s1698_s20, %s16_s20   ;;  %s1656_s19 = sphi %s1696_s19, %s1990_s19   ;;  %s1652_s18 = sphi %s1694_s18, %s1989_s18  }
   0x3   : > { %p30_p1 = scmp.ge.s32.totalorder %s28_s21, 2  ;;  %p214_p2 = scmp.lt.s32.totalorder %s1660_s20, 3 }
   0x5   : > { %s1992_s21 = smov (%p30_p1, %s28_s21), 0  ;;  %p215_p3 = pnand %p1311_p0, %p214_p2 }
   0x6   : > { %v1553_v0 = vld [vmem:[%s1984_s1 + $0x40] sm:$0xff] (!%p215_p3)   ;;  %v1557_v4 = vld [vmem:[%s1984_s1 + $0x48] sm:$0xff] (!%p215_p3)   ;;  %v1561_v8 = vld [vmem:[%s1984_s1 + $0x50] sm:$0xff] (!%p215_p3)   ;;  %p258_p4 = scmp.lt.s32.totalorder (!%p215_p3), %s1652_s18, 1  ;;  %vm1663_vm0 = vmmov (!%p215_p3), 0  }
   0x7   : > { %218 = sbr.rel (%p215_p3) target bundleno = 338 (0x152), region = 32  ;;  %v1554_v1 = vld [vmem:[%s1984_s1] sm:$0xff] (!%p215_p3)   ;;  %1409 = vmatprep.subr.bf16.mxu0 (!%p215_p3), %v1553_v0  ;;  %v1558_v5 = vld [vmem:[%s1984_s1 + $0x8] sm:$0xff] (!%p215_p3)   ;;  %v1562_v9 = vld [vmem:[%s1984_s1 + $0x10] sm:$0xff] (!%p215_p3)  }
   0x8   : > { %v1555_v2 = vld [vmem:[%s1984_s1 + $0xc0] sm:$0xff] (!%p215_p3)   ;;  %1410 = vmatpush3.bf16.msra.mxu0 (!%p215_p3), %v1554_v1  ;;  %v1559_v6 = vld [vmem:[%s1984_s1 + $0xc8] sm:$0xff] (!%p215_p3)   ;;  %v1563_v10 = vld [vmem:[%s1984_s1 + $0xd0] sm:$0xff] (!%p215_p3)  }
   0x9   : > { %v1556_v3 = vld [vmem:[%s1984_s1 + $0x80] sm:$0xff] (!%p215_p3)   ;;  %1431 = vmatprep.subr.bf16.mxu1 (!%p215_p3), %v1555_v2  ;;  %1411 = vmatprep.subr.bf16.mxu0 (!%p215_p3), %v1557_v4  ;;  %v1560_v7 = vld [vmem:[%s1984_s1 + $0x88] sm:$0xff] (!%p215_p3)   ;;  %v1564_v11 = vld [vmem:[%s1984_s1 + $0x90] sm:$0xff] (!%p215_p3)  }
   0xa   : > { %1432 = vmatpush3.bf16.msra.mxu1 (!%p215_p3), %v1556_v3  ;;  %v1565_v12 = vld [vmem:[%s1984_s1 + $0x58] sm:$0xff] (!%p215_p3)   ;;  %v1569_v16 = vld [vmem:[%s1984_s1 + $0x60] sm:$0xff] (!%p215_p3)   ;;  %v1573_v20 = vld [vmem:[%s1984_s1 + $0x68] sm:$0xff] (!%p215_p3)  }
   0xb   : > { %1433 = vmatprep.subr.bf16.mxu1 (!%p215_p3), %v1559_v6  ;;  %v1566_v13 = vld [vmem:[%s1984_s1 + $0x18] sm:$0xff] (!%p215_p3)   ;;  %v1570_v17 = vld [vmem:[%s1984_s1 + $0x20] sm:$0xff] (!%p215_p3)   ;;  %v1574_v21 = vld [vmem:[%s1984_s1 + $0x28] sm:$0xff] (!%p215_p3)   ;;  %v1662_v6 = vmov (!%p215_p3), 0.0  }
   0xc   : > { %1412 = vmatpush3.bf16.msra.mxu0 (!%p215_p3), %v1558_v5  ;;  %v1567_v14 = vld [vmem:[%s1984_s1 + $0xd8] sm:$0xff] (!%p215_p3)   ;;  %v1571_v18 = vld [vmem:[%s1984_s1 + $0xe0] sm:$0xff] (!%p215_p3)   ;;  %v1575_v22 = vld [vmem:[%s1984_s1 + $0xe8] sm:$0xff] (!%p215_p3)  }
   0xd   : > { %1413 = vmatprep.subr.bf16.mxu0 (!%p215_p3), %v1561_v8  ;;  %v1568_v15 = vld [vmem:[%s1984_s1 + $0x98] sm:$0xff] (!%p215_p3)   ;;  %v1572_v19 = vld [vmem:[%s1984_s1 + $0xa0] sm:$0xff] (!%p215_p3)   ;;  %v1576_v23 = vld [vmem:[%s1984_s1 + $0xa8] sm:$0xff] (!%p215_p3)  }
   0xe   : > { %1434 = vmatpush3.bf16.msra.mxu1 %v1560_v7  ;;  %s1994_s18 = smov (!%p258_p4, %s1652_s18), 1  ;;  %v1577_v24 = vld [vmem:[%s1984_s1 + $0x70] sm:$0xff]   ;;  %v1581_v28 = vld [vmem:[%s1984_s1 + $0x78] sm:$0xff]   ;;  %v1588_v34 = vld [vmem:[%s1984_s1 + $0x140] sm:$0xff]  }
   0xf   : > { %1435 = vmatprep.subr.bf16.mxu1 %v1563_v10  ;;  %s1526_s30 = smul.u32 72, %s1994_s18  ;;  %v1578_v25 = vld [vmem:[%s1984_s1 + $0x30] sm:$0xff]   ;;  %v1582_v29 = vld [vmem:[%s1984_s1 + $0x38] sm:$0xff]   ;;  %v1592_v37 = vld [vmem:[%s1984_s1 + $0x100] sm:$0xff]   ;;  %s1953_s29 = scalar_lea.vmem %s1987_s4, %s1994_s18 }
  0x10   : > { %1414 = vmatpush3.bf16.msra.mxu0 %v1562_v9  ;;  %v1579_v26 = vld [vmem:[%s1984_s1 + $0xf0] sm:$0xff]   ;;  %v1583_v30 = vld [vmem:[%s1984_s1 + $0xf8] sm:$0xff]   ;;  %v1593_v38 = vld [vmem:[%s1984_s1 + $0x1c0] sm:$0xff]   ;;  %s1959_s7 = scalar_lea.vmem %s1988_s5, %s1994_s18  ;;  %1143 = vst [vmem:[%s1953_s29] sm:$0x1] %v1662_v6 }
  0x11   : > { %1415 = vmatprep.subr.bf16.mxu0 %v1565_v12  ;;  %v1580_v27 = vld [vmem:[%s1984_s1 + $0xb0] sm:$0xff]   ;;  %s1809_s16 = scalar_lea.vmem %s1983_s0, %s1526_s30  ;;  %v1587_v33 = vld [vmem:[%s1984_s1 + $0xb8] sm:$0xff]   ;;  %v1594_v39 = vld [vmem:[%s1984_s1 + $0x180] sm:$0xff]   ;;  %1144 = vst [vmem:[%s1959_s7] sm:$0x1] %v1662_v6 }
  0x12   : > { %1436 = vmatpush3.bf16.msra.mxu1 %v1564_v11  ;;  %v1584_v31 = vld [vmem:[%s1809_s16] ss:$36 sps:$4 sm:$0xff]   ;;  %v1589_v35 = vld [vmem:[%s1809_s16 + $0x8] ss:$36 sps:$4 sm:$0xff]   ;;  %v1599_v44 = vld [vmem:[%s1984_s1 + $0x150] sm:$0xff]  }
  0x13   : > { %1437 = vmatprep.subr.bf16.mxu1 %v1567_v14  ;;  %v1586_v32 = vld [vmem:[%s1809_s16 + $0x4] ss:$36 sps:$4 sm:$0xff]   ;;  %v1591_v36 = vld [vmem:[%s1809_s16 + $0xc] ss:$36 sps:$4 sm:$0xff]   ;;  %v1603_v48 = vld [vmem:[%s1984_s1 + $0x158] sm:$0xff]  }
  0x14   : > { %1416 = vmatpush3.bf16.msra.mxu0 %v1566_v13  ;;  %956 = vmatprep.mubr.bf16.mxu0 %v1586_v32  ;;  %v1595_v40 = vld [vmem:[%s1984_s1 + $0x148] sm:$0xff]   ;;  %v1600_v45 = vld [vmem:[%s1984_s1 + $0x110] sm:$0xff]   ;;  %v1604_v49 = vld [vmem:[%s1984_s1 + $0x118] sm:$0xff]  }
  0x15   : > { %1417 = vmatprep.subr.bf16.mxu0 %v1569_v16  ;;  %997 = vmatprep.mubr.bf16.mxu1 %v1591_v36  ;;  %v1596_v41 = vld [vmem:[%s1984_s1 + $0x108] sm:$0xff]   ;;  %v1601_v46 = vld [vmem:[%s1984_s1 + $0x1d0] sm:$0xff]   ;;  %v1605_v50 = vld [vmem:[%s1984_s1 + $0x1d8] sm:$0xff]  }
  0x16   : > { %1438 = vmatpush3.bf16.msra.mxu1 %v1568_v15  ;;  %v1597_v42 = vld [vmem:[%s1984_s1 + $0x1c8] sm:$0xff]   ;;  %v1602_v47 = vld [vmem:[%s1984_s1 + $0x190] sm:$0xff]   ;;  %v1606_v51 = vld [vmem:[%s1984_s1 + $0x198] sm:$0xff]  }
  0x17   : > { %1439 = vmatprep.subr.bf16.mxu1 %v1571_v18  ;;  %v1598_v43 = vld [vmem:[%s1984_s1 + $0x188] sm:$0xff]   ;;  %v1607_v52 = vld [vmem:[%s1984_s1 + $0x160] sm:$0xff]   ;;  %v1615_v60 = vld [vmem:[%s1984_s1 + $0x170] sm:$0xff]  }
  0x18   : > { %1418 = vmatpush3.bf16.msra.mxu0 %v1570_v17  ;;  %v1608_v53 = vld [vmem:[%s1984_s1 + $0x120] sm:$0xff]   ;;  %v1611_v56 = vld [vmem:[%s1984_s1 + $0x168] sm:$0xff]   ;;  %v1616_v61 = vld [vmem:[%s1984_s1 + $0x130] sm:$0xff]  }
  0x19   : > { %1419 = vmatprep.subr.bf16.mxu0 %v1573_v20  ;;  %v1609_v54 = vld [vmem:[%s1984_s1 + $0x1e0] sm:$0xff]   ;;  %v1612_v57 = vld [vmem:[%s1984_s1 + $0x128] sm:$0xff]   ;;  %v1617_v62 = vld [vmem:[%s1984_s1 + $0x1f0] sm:$0xff]  }
  0x1a   : > { %1440 = vmatpush3.bf16.msra.mxu1 %v1572_v19  ;;  %v1610_v55 = vld [vmem:[%s1984_s1 + $0x1a0] sm:$0xff]   ;;  %v1613_v58 = vld [vmem:[%s1984_s1 + $0x1e8] sm:$0xff]   ;;  %v1618_v63 = vld [vmem:[%s1984_s1 + $0x1b0] sm:$0xff]  }
  0x1b   : > { %1441 = vmatprep.subr.bf16.mxu1 %v1575_v22  ;;  %v1614_v59 = vld [vmem:[%s1984_s1 + $0x1a8] sm:$0xff]   ;;  %v1619_v0 = vld [vmem:[%s1984_s1 + $0x178] sm:$0xff]   ;;  %v1622_v3 = vld [vmem:[%s1809_s16 + $0x10] ss:$36 sps:$4 sm:$0xff]  }
  0x1c   : > { %1420 = vmatpush3.bf16.msra.mxu0 %v1574_v21  ;;  %v1620_v1 = vld [vmem:[%s1984_s1 + $0x138] sm:$0xff]   ;;  %v1629_v9 = vld [vmem:[%s1984_s1 + $0x200] sm:$0xff]   ;;  %v1630_v10 = vld [vmem:[%s1984_s1 + $0x208] sm:$0xff]  }
  0x1d   : > { %1421 = vmatprep.subr.bf16.mxu0 %v1577_v24  ;;  %v1621_v2 = vld [vmem:[%s1984_s1 + $0x1f8] sm:$0xff]   ;;  %v1631_v11 = vld [vmem:[%s1984_s1 + $0x210] sm:$0xff]   ;;  %v1633_v13 = vld [vmem:[%s1984_s1 + $0x220] sm:$0xff]  }
  0x1e   : > { %1442 = vmatpush3.bf16.msra.mxu1 %v1576_v23  ;;  %v1624_v4 = vld [vmem:[%s1809_s16 + $0x14] ss:$36 sps:$4 sm:$0xff]   ;;  %v1628_v8 = vld [vmem:[%s1809_s16 + $0x1c] ss:$36 sps:$4 sm:$0xff]   ;;  %v1634_v14 = vld [vmem:[%s1984_s1 + $0x228] sm:$0xff]  }
  0x1f   : > { %1443 = vmatprep.subr.bf16.mxu1 %v1579_v26  ;;  %v1625_v5 = vld [vmem:[%s1984_s1 + $0x1b8] sm:$0xff]   ;;  %v1635_v15 = vld [vmem:[%s1984_s1 + $0x230] sm:$0xff]   ;;  %v1637_v17 = vld [vmem:[%s1809_s16 + $0x20] ss:$36 sps:$4 sm:$0xff]  }
  0x20   : > { %1422 = vmatpush3.bf16.msra.mxu0 %v1578_v25  ;;  %v1626_v7 = vld [vmem:[%s1809_s16 + $0x18] ss:$36 sps:$4 sm:$0xff]   ;;  %v1315_v19 = vld [vmem:[%s1985_s2] ss:$0 sm:$0xff]  ;;  %s1401_s16 = sshll.u32 %s1994_s18, 3 }
  0x21   : > { %1423 = vmatprep.subr.bf16.mxu0 %v1581_v28  ;;  %v1632_v12 = vld [vmem:[%s1984_s1 + $0x218] sm:$0xff]   ;;  %s276_s12 = scalar_lea.vmem %s1986_s3, %s1401_s16 }
  0x22   : > { %1444 = vmatpush3.bf16.msra.mxu1 %v1580_v27  ;;  %v1636_v16 = vld [vmem:[%s1984_s1 + $0x238] sm:$0xff]  }
  0x23   : > { %1445 = vmatprep.subr.bf16.mxu1 %v1583_v30 }
  0x24   : > { %1424 = vmatpush3.bf16.msra.mxu0 %v1582_v29 }
  0x25   : > { %1453 = vmatprep.subr.bf16.mxu0 %v1588_v34 }
  0x26   : > { %1446 = vmatpush3.bf16.msra.mxu1 %v1587_v33 }
  0x27   : > { %957 = vmatmul.mubr.bf16.vlgmr.msra.gmra.mrb[0].mxu0 %v1584_v31  ;;  %1475 = vmatprep.subr.bf16.mxu1 %v1593_v38 }
  0x28   : > { %1454 = vmatpush3.bf16.msra.mxu0 %v1592_v37  ;;  %1038 = vmatprep.mubr.bf16.mxu0 %v1624_v4 }
  0x29   : > { %998 = vmatmul.mubr.bf16.vlgmr.msra.gmra.mrb[0].mxu1 %v1589_v35  ;;  %1455 = vmatprep.subr.bf16.mxu0 %v1595_v40 }
  0x2a   : > { %1476 = vmatpush3.bf16.msra.mxu1 %v1594_v39  ;;  %1079 = vmatprep.mubr.bf16.mxu1 %v1628_v8 }
  0x2b   : > { %1477 = vmatprep.subr.bf16.mxu1 %v1597_v42 }
  0x2c   : > { %1456 = vmatpush3.bf16.msra.mxu0 %v1596_v41 }
  0x2d   : > { %1457 = vmatprep.subr.bf16.mxu0 %v1599_v44 }
  0x2e   : > { %1478 = vmatpush3.bf16.msra.mxu1 %v1598_v43 }
  0x2f   : > { %1479 = vmatprep.subr.bf16.mxu1 %v1601_v46 }
  0x30   : > { %1458 = vmatpush3.bf16.msra.mxu0 %v1600_v45 }
  0x31   : > { %1459 = vmatprep.subr.bf16.mxu0 %v1603_v48 }
  0x32   : > { %1480 = vmatpush3.bf16.msra.mxu1 %v1602_v47 }
  0x33   : > { %1481 = vmatprep.subr.bf16.mxu1 %v1605_v50 }
  0x34   : > { %1460 = vmatpush3.bf16.msra.mxu0 %v1604_v49 }
  0x35   : > { %1461 = vmatprep.subr.bf16.mxu0 %v1607_v52 }
  0x36   : > { %1482 = vmatpush3.bf16.msra.mxu1 %v1606_v51 }
  0x37   : > { %1483 = vmatprep.subr.bf16.mxu1 %v1609_v54 }
  0x38   : > { %1462 = vmatpush3.bf16.msra.mxu0 %v1608_v53 }
  0x39   : > { %1463 = vmatprep.subr.bf16.mxu0 %v1611_v56 }
  0x3a   : > { %1484 = vmatpush3.bf16.msra.mxu1 %v1610_v55 }
  0x3b   : > { %1485 = vmatprep.subr.bf16.mxu1 %v1613_v58 }
  0x3c   : > { %1464 = vmatpush3.bf16.msra.mxu0 %v1612_v57 }
  0x3d   : > { %1465 = vmatprep.subr.bf16.mxu0 %v1615_v60 }
  0x3e   : > { %1486 = vmatpush3.bf16.msra.mxu1 %v1614_v59 }
  0x3f   : > { %1487 = vmatprep.subr.bf16.mxu1 %v1617_v62 }
  0x40   : > { %1466 = vmatpush3.bf16.msra.mxu0 %v1616_v61 }
  0x41   : > { %1467 = vmatprep.subr.bf16.mxu0 %v1619_v0 }
  0x42   : > { %1488 = vmatpush3.bf16.msra.mxu1 %v1618_v63 }
  0x43   : > { %1489 = vmatprep.subr.bf16.mxu1 %v1621_v2 }
  0x44   : > { %1468 = vmatpush3.bf16.msra.mxu0 %v1620_v1 }
  0x45   : > { %1506 = vmatprep.subr.bf16.mxu0 %v1662_v6 }
  0x46   : > { %1490 = vmatpush3.bf16.msra.mxu1 %v1625_v5 }
  0x47   : > { %1039 = vmatmul.mubr.bf16.vlgmr.msra.gmra.mrb[4].mxu0 %v1622_v3 }
  0x48   : > { %1522 = vmatprep.mubr.msk.bf16.mxu0 %vm1663_vm0, %v1662_v6  ;;  %1507 = vmatpush3.bf16.msra.mxu0 %v1629_v9 }
  0x49   : > { %1080 = vmatmul.mubr.bf16.vlgmr.msra.gmra.mrb[4].mxu1 %v1626_v7  ;;  %1508 = vmatprep.subr.bf16.mxu0 %v1662_v6  ;;  %v1145_v7 = vld [vmem:[%s1953_s29] sm:$0x1] }
  0x4c   : > { %1509 = vmatpush3.bf16.msra.mxu0 %v1630_v10  ;;  %v1155_v10 = vld [vmem:[%s1959_s7] sm:$0x1] }
  0x4d   : > { %1510 = vmatprep.subr.bf16.mxu0 %v1662_v6 }
  0x50   : > { %1511 = vmatpush3.bf16.msra.mxu0 %v1631_v11 }
  0x51   : > { %1512 = vmatprep.subr.bf16.mxu0 %v1662_v6 }
  0x54   : > { %1513 = vmatpush3.bf16.msra.mxu0 %v1632_v12 }
  0x55   : > { %1514 = vmatprep.subr.bf16.mxu0 %v1662_v6 }
  0x58   : > { %1515 = vmatpush3.bf16.msra.mxu0 %v1633_v13 }
  0x59   : > { %1516 = vmatprep.subr.bf16.mxu0 %v1662_v6 }
  0x5c   : > { %1517 = vmatpush3.bf16.msra.mxu0 %v1634_v14 }
  0x5d   : > { %1518 = vmatprep.subr.bf16.mxu0 %v1662_v6 }
  0x60   : > { %1519 = vmatpush3.bf16.msra.mxu0 %v1635_v15 }
  0x61   : > { %1520 = vmatprep.subr.bf16.mxu0 %v1662_v6 }
  0x64   : > { %1521 = vmatpush3.bf16.msra.mxu0 %v1636_v16 }
  0x67   : > { %1523 = vmatmul.mubr.bf16.vlgmr.msra.gmra.mrb[8].mxu0 %v1637_v17 }
  0xfa   : > { %v1425_v18 = vpop.f32.mrb[0].mxu0 }
  0xfb   : > { %v1426_v20 = vpop.f32.mrb[1].mxu0 }
  0xfc   : > { %v1427_v21 = vadd.f32 %v1426_v20, %v1425_v18  ;;  %v1428_v22 = vpop.f32.mrb[2].mxu0  ;;  %v1447_v23 = vpop.f32.mrb[0].mxu1 }
  0xfd   : > { %v1429_v24 = vpop.f32.mrb[3].mxu0  ;;  %v1448_v27 = vpop.f32.mrb[1].mxu1 }
  0xfe   : > { %v959_v25 = vadd.f32 %v1427_v21, %v1315_v19  ;;  %v1430_v26 = vadd.f32 %v1429_v24, %v1428_v22  ;;  %v1449_v28 = vadd.f32 %v1448_v27, %v1447_v23  ;;  %v1450_v29 = vpop.f32.mrb[2].mxu1 }
  0xff   : > { %v1451_v31 = vpop.f32.mrb[3].mxu1 }
 0x100   : > { %v962_v30 = vadd.f32 %v1430_v26, %v1315_v19  ;;  %v1000_v32 = vadd.f32 %v1449_v28, %v959_v25  ;;  %v1452_v33 = vadd.f32 %v1451_v31, %v1450_v29 }
 0x102   : > { %v1003_v34 = vadd.f32 %v1452_v33, %v962_v30 }
 0x11a   : > { %v1469_v35 = vpop.f32.mrb[4].mxu0 }
 0x11b   : > { %v1470_v36 = vpop.f32.mrb[5].mxu0 }
 0x11c   : > { %v1471_v37 = vadd.f32 %v1470_v36, %v1469_v35  ;;  %v1472_v38 = vpop.f32.mrb[6].mxu0  ;;  %v1491_v39 = vpop.f32.mrb[4].mxu1 }
 0x11d   : > { %v1473_v40 = vpop.f32.mrb[7].mxu0  ;;  %v1492_v43 = vpop.f32.mrb[5].mxu1 }
 0x11e   : > { %v1041_v41 = vadd.f32 %v1471_v37, %v1000_v32  ;;  %v1474_v42 = vadd.f32 %v1473_v40, %v1472_v38  ;;  %v1493_v44 = vadd.f32 %v1492_v43, %v1491_v39  ;;  %v1494_v45 = vpop.f32.mrb[6].mxu1 }
 0x11f   : > { %v1495_v47 = vpop.f32.mrb[7].mxu1 }
 0x120   : > { %v1044_v46 = vadd.f32 %v1474_v42, %v1003_v34  ;;  %v1496_v48 = vadd.f32 %v1495_v47, %v1494_v45  ;;  %v1082_v49 = vadd.f32 %v1493_v44, %v1041_v41 }
 0x122   : > { %v1085_v50 = vadd.f32 %v1496_v48, %v1044_v46 }
 0x13a   : > { %v1122_v51 = vpop.f32.mrb[8].mxu0 }
 0x13b   : > { %v1123_v52 = vadd.f32 %v1122_v51, %v1082_v49  ;;  %v1524_v53 = vpop.f32.mrb[9].mxu0 }
 0x13c   : > { %v1125_v54 = vpop.f32.mrb[10].mxu0 }
 0x13d   : > { %v1126_v55 = vadd.f32 %v1125_v54, %v1085_v50  ;;  %v1525_v56 = vpop.f32.mrb[11].mxu0  ;;  %v1156_v57 = vmul.f32 %v1123_v52, %v1123_v52 }
 0x13f   : > { %v1407_v58 = vpack.c.bf16 %v1126_v55, %v1123_v52  ;;  %v1146_v59 = vadd.f32 %v1126_v55, %v1123_v52  ;;  %v1157_v60 = vmul.f32 %v1126_v55, %v1126_v55 }
 0x141   : > { %1408 = vst [vmem:[%s276_s12] sm:$0xff] %v1407_v58   ;;  %v1147_v61 = vrot.slane %v1146_v59, 4  ;;  %v1158_v62 = vadd.f32 %v1157_v60, %v1156_v57 }
 0x143   : > { %v1148_v63 = vadd.f32 %v1147_v61, %v1146_v59  ;;  %v1159_v0 = vrot.slane %v1158_v62, 4 }
 0x145   : > { %v1149_v1 = vrot.slane %v1148_v63, 2  ;;  %v1160_v2 = vadd.f32 %v1159_v0, %v1158_v62 }
 0x147   : > { %v1150_v3 = vadd.f32 %v1149_v1, %v1148_v63  ;;  %v1161_v4 = vrot.slane %v1160_v2, 2 }
 0x149   : > { %v1151_v5 = vrot.slane %v1150_v3, 1  ;;  %v1162_v6 = vadd.f32 %v1161_v4, %v1160_v2 }
 0x14b   : > { %v1152_v8 = vadd.f32 %v1151_v5, %v1150_v3  ;;  %v1163_v9 = vrot.slane %v1162_v6, 1 }
 0x14d   : > { %v1153_v11 = vadd.f32 %v1152_v8, %v1145_v7  ;;  %v1164_v12 = vadd.f32 %v1163_v9, %v1162_v6 }
 0x14f   : > { %1154 = vst [vmem:[%s1953_s29] sm:$0x1] %v1153_v11  ;;  %v1165_v13 = vadd.f32 %v1164_v12, %v1155_v10 }
 0x151   : > { %1166 = vst [vmem:[%s1959_s7] sm:$0x1] %v1165_v13 }
 0x152 PF: > { %s16_s20 = sadd.s32 1, %s1660_s20   ;;  %s1989_s18 = smov %s1656_s19 }
 0x153   : > { %p13_p5 = scmp.ge.s32.totalorder %s16_s20, 4   ;;  %s1990_s19 = smov %s1992_s21 }
 0x155   :  { %15 = sbr.rel (!%p13_p5) target bundleno = 2 (0x2), region = 90 }

// kernel: transformer_net_forward.57
= control target key start
LH: loop header
LB: loop body
LE: loop exit
PB: predicated region body
PF: predicated region fallthrough
CT: control target
= control target key end

     0   :  { %s2216_s18 = smov 0   ;;  %s2218_s19 = smov 0   ;;  %s2573_s0 = inlined_call_operand.vmem [shape: bf16[2,64,1152], index: 0, kind: input, shape index: {}]   ;;  %s2574_s1 = inlined_call_operand.vmem [shape: bf16[1152,64], index: 1, kind: input, shape index: {}]   ;;  %s2575_s2 = inlined_call_operand.vmem [shape: f32[1,64], index: 2, kind: input, shape index: {}]   ;;  %s2576_s3 = inlined_call_operand.vmem [shape: bf16[2,64,64], index: 3, kind: output, shape index: {0}]   ;;  %s2577_s4 = inlined_call_operand.vmem [shape: f32[2,1,64], index: 4, kind: output, shape index: {1}]   ;;  %s2578_s5 = inlined_call_operand.vmem [shape: f32[2,1,64], index: 5, kind: output, shape index: {2}]  }
   0x1   :  { %s2220_s20 = smov 0  }
   0x2 LB: > { %s28_s21 = sadd.s32 1, %s2179_s19  ;;  %p1667_p0 = scmp.ge.s32.totalorder %s2183_s20, 1  ;;  %s2183_s20 = sphi %s2220_s20, %s16_s20   ;;  %s2179_s19 = sphi %s2218_s19, %s2580_s19   ;;  %s2175_s18 = sphi %s2216_s18, %s2579_s18  }
   0x3   : > { %p30_p1 = scmp.ge.s32.totalorder %s28_s21, 2  ;;  %p214_p2 = scmp.lt.s32.totalorder %s2183_s20, 3 }
   0x5   : > { %s2582_s21 = smov (%p30_p1, %s28_s21), 0  ;;  %p215_p3 = pnand %p1667_p0, %p214_p2 }
   0x6   : > { %v2037_v0 = vld [vmem:[%s2574_s1 + $0x40] sm:$0xff] (!%p215_p3)   ;;  %v2041_v4 = vld [vmem:[%s2574_s1 + $0x48] sm:$0xff] (!%p215_p3)   ;;  %v2045_v8 = vld [vmem:[%s2574_s1 + $0x50] sm:$0xff] (!%p215_p3)   ;;  %p258_p4 = scmp.lt.s32.totalorder (!%p215_p3), %s2175_s18, 1  ;;  %vm1462_vm0 = vcmask (!%p215_p3), 516096   ;;  %vm1449_vm1 = vcmask (!%p215_p3), 519168  }
   0x7   : > { %218 = sbr.rel (%p215_p3) target bundleno = 355 (0x163), region = 32  ;;  %v2038_v1 = vld [vmem:[%s2574_s1 + $0xc0] sm:$0xff] (!%p215_p3)   ;;  %1799 = vmatprep.subr.bf16.mxu0 (!%p215_p3), %v2037_v0  ;;  %v2042_v5 = vld [vmem:[%s2574_s1 + $0xc8] sm:$0xff] (!%p215_p3)   ;;  %v2046_v9 = vld [vmem:[%s2574_s1 + $0xd0] sm:$0xff] (!%p215_p3)   ;;  %vm1466_vm2 = vcmask (!%p215_p3), 523264  }
   0x8   : > { %v2039_v2 = vld [vmem:[%s2574_s1] sm:$0xff] (!%p215_p3)   ;;  %1839 = vmatprep.subr.bf16.mxu1 (!%p215_p3), %v2038_v1  ;;  %v2043_v6 = vld [vmem:[%s2574_s1 + $0x8] sm:$0xff] (!%p215_p3)   ;;  %v2047_v10 = vld [vmem:[%s2574_s1 + $0x10] sm:$0xff] (!%p215_p3)  }
   0x9   : > { %v2040_v3 = vld [vmem:[%s2574_s1 + $0x80] sm:$0xff] (!%p215_p3)   ;;  %1800 = vmatpush3.bf16.msra.mxu0 (!%p215_p3), %v2039_v2  ;;  %v2044_v7 = vld [vmem:[%s2574_s1 + $0x88] sm:$0xff] (!%p215_p3)   ;;  %v2048_v11 = vld [vmem:[%s2574_s1 + $0x90] sm:$0xff] (!%p215_p3)  }
   0xa   : > { %1840 = vmatpush3.bf16.msra.mxu1 (!%p215_p3), %v2040_v3  ;;  %1801 = vmatprep.subr.bf16.mxu0 (!%p215_p3), %v2041_v4  ;;  %v2049_v12 = vld [vmem:[%s2574_s1 + $0x58] sm:$0xff] (!%p215_p3)   ;;  %v2053_v16 = vld [vmem:[%s2574_s1 + $0x60] sm:$0xff] (!%p215_p3)   ;;  %v2057_v20 = vld [vmem:[%s2574_s1 + $0x68] sm:$0xff] (!%p215_p3)  }
   0xb   : > { %1841 = vmatprep.subr.bf16.mxu1 (!%p215_p3), %v2042_v5  ;;  %v2050_v13 = vld [vmem:[%s2574_s1 + $0xd8] sm:$0xff] (!%p215_p3)   ;;  %v2054_v17 = vld [vmem:[%s2574_s1 + $0xe0] sm:$0xff] (!%p215_p3)   ;;  %v2058_v21 = vld [vmem:[%s2574_s1 + $0xe8] sm:$0xff] (!%p215_p3)  }
   0xc   : > { %v2051_v14 = vld [vmem:[%s2574_s1 + $0x18] sm:$0xff] (!%p215_p3)   ;;  %v2055_v18 = vld [vmem:[%s2574_s1 + $0x20] sm:$0xff] (!%p215_p3)   ;;  %v2059_v22 = vld [vmem:[%s2574_s1 + $0x28] sm:$0xff] (!%p215_p3)  }
   0xd   : > { %1802 = vmatpush3.bf16.msra.mxu0 (!%p215_p3), %v2043_v6  ;;  %v2052_v15 = vld [vmem:[%s2574_s1 + $0x98] sm:$0xff] (!%p215_p3)   ;;  %v2056_v19 = vld [vmem:[%s2574_s1 + $0xa0] sm:$0xff] (!%p215_p3)   ;;  %v2060_v23 = vld [vmem:[%s2574_s1 + $0xa8] sm:$0xff] (!%p215_p3)  }
   0xe   : > { %1842 = vmatpush3.bf16.msra.mxu1 %v2044_v7  ;;  %1803 = vmatprep.subr.bf16.mxu0 %v2045_v8  ;;  %s2584_s18 = smov (!%p258_p4, %s2175_s18), 1  ;;  %v2061_v24 = vld [vmem:[%s2574_s1 + $0x70] sm:$0xff]   ;;  %v2065_v28 = vld [vmem:[%s2574_s1 + $0x78] sm:$0xff]   ;;  %v2075_v36 = vld [vmem:[%s2574_s1 + $0x140] sm:$0xff]  }
   0xf   : > { %1843 = vmatprep.subr.bf16.mxu1 %v2046_v9  ;;  %v2062_v25 = vld [vmem:[%s2574_s1 + $0xf0] sm:$0xff]   ;;  %s2011_s7 = smul.u32 288, %s2584_s18  ;;  %v2066_v29 = vld [vmem:[%s2574_s1 + $0xf8] sm:$0xff]   ;;  %v2076_v37 = vld [vmem:[%s2574_s1 + $0x1c0] sm:$0xff]   ;;  %s2502_s29 = scalar_lea.vmem %s2577_s4, %s2584_s18 }
  0x10   : > { %v2063_v26 = vld [vmem:[%s2574_s1 + $0x30] sm:$0xff]   ;;  %v2067_v30 = vld [vmem:[%s2574_s1 + $0x38] sm:$0xff]   ;;  %v2077_v38 = vld [vmem:[%s2574_s1 + $0x100] sm:$0xff]   ;;  %s1790_s9 = sshll.u32 %s2584_s18, 5 }
  0x11   : > { %1804 = vmatpush3.bf16.msra.mxu0 %v2047_v10  ;;  %v2064_v27 = vld [vmem:[%s2574_s1 + $0xb0] sm:$0xff]   ;;  %s2334_s22 = scalar_lea.vmem %s2573_s0, %s2011_s7  ;;  %v2068_v31 = vld [vmem:[%s2574_s1 + $0xb8] sm:$0xff]   ;;  %v2078_v39 = vld [vmem:[%s2574_s1 + $0x180] sm:$0xff]   ;;  %s2508_s7 = scalar_lea.vmem %s2578_s5, %s2584_s18 }
  0x12   : > { %1844 = vmatpush3.bf16.msra.mxu1 %v2048_v11  ;;  %1805 = vmatprep.subr.bf16.mxu0 %v2049_v12  ;;  %v2069_v32 = vld [vmem:[%s2334_s22] ss:$36 sps:$4 sm:$0xff]   ;;  %v2072_v34 = vld [vmem:[%s2334_s22 + $0x8] ss:$36 sps:$4 sm:$0xff]   ;;  %v2085_v45 = vld [vmem:[%s2334_s22 + $0x54] ss:$36 sps:$4 sm:$0xff]   ;;  %s2523_s12 = scalar_lea.vmem %s2576_s3, %s1790_s9 }
  0x13   : > { %1845 = vmatprep.subr.bf16.mxu1 %v2050_v13  ;;  %v2071_v33 = vld [vmem:[%s2334_s22 + $0x4] ss:$36 sps:$4 sm:$0xff]   ;;  %v2074_v35 = vld [vmem:[%s2334_s22 + $0xc] ss:$36 sps:$4 sm:$0xff]   ;;  %v2093_v52 = vld [vmem:[%s2574_s1 + $0x158] sm:$0xff]  }
  0x14   : > { %1124 = vmatprep.mubr.bf16.mxu0 %v2071_v33  ;;  %1189 = vmatprep.mubr.bf16.mxu1 %v2074_v35  ;;  %v2079_v40 = vld [vmem:[%s2574_s1 + $0x148] sm:$0xff]   ;;  %v2088_v47 = vld [vmem:[%s2334_s22 + $0x50] ss:$36 sps:$4 sm:$0xff]   ;;  %v2094_v53 = vld [vmem:[%s2574_s1 + $0x1d8] sm:$0xff]  }
  0x15   : > { %1806 = vmatpush3.bf16.msra.mxu0 %v2051_v14  ;;  %v2080_v41 = vld [vmem:[%s2574_s1 + $0x1c8] sm:$0xff]   ;;  %v2089_v48 = vld [vmem:[%s2574_s1 + $0x150] sm:$0xff]   ;;  %v2095_v54 = vld [vmem:[%s2574_s1 + $0x118] sm:$0xff]  }
  0x16   : > { %1846 = vmatpush3.bf16.msra.mxu1 %v2052_v15  ;;  %1807 = vmatprep.subr.bf16.mxu0 %v2053_v16  ;;  %v2081_v42 = vld [vmem:[%s2574_s1 + $0x108] sm:$0xff]   ;;  %v2090_v49 = vld [vmem:[%s2574_s1 + $0x1d0] sm:$0xff]   ;;  %v2096_v55 = vld [vmem:[%s2574_s1 + $0x198] sm:$0xff]  }
  0x17   : > { %1847 = vmatprep.subr.bf16.mxu1 %v2054_v17  ;;  %v2082_v43 = vld [vmem:[%s2574_s1 + $0x188] sm:$0xff]   ;;  %v2091_v50 = vld [vmem:[%s2574_s1 + $0x110] sm:$0xff]   ;;  %v2099_v57 = vld [vmem:[%s2334_s22 + $0x9c] ss:$36 sps:$4 sm:$0xff]  }
  0x18   : > { %v2083_v44 = vld [vmem:[%s2334_s22 + $0x4c] ss:$36 sps:$4 sm:$0xff]   ;;  %v2097_v56 = vld [vmem:[%s2334_s22 + $0x94] ss:$36 sps:$4 sm:$0xff]   ;;  %v2103_v60 = vld [vmem:[%s2574_s1 + $0x160] sm:$0xff]  }
  0x19   : > { %1808 = vmatpush3.bf16.msra.mxu0 %v2055_v18  ;;  %v2087_v46 = vld [vmem:[%s2334_s22 + $0x48] ss:$36 sps:$4 sm:$0xff]   ;;  %v2092_v51 = vld [vmem:[%s2574_s1 + $0x190] sm:$0xff]   ;;  %v2102_v59 = vld [vmem:[%s2334_s22 + $0x98] ss:$36 sps:$4 sm:$0xff]  }
  0x1a   : > { %1848 = vmatpush3.bf16.msra.mxu1 %v2056_v19  ;;  %1809 = vmatprep.subr.bf16.mxu0 %v2057_v20  ;;  %v2101_v58 = vld [vmem:[%s2334_s22 + $0x90] ss:$36 sps:$4 sm:$0xff]   ;;  %v2104_v61 = vld [vmem:[%s2574_s1 + $0x1e0] sm:$0xff]   ;;  %v2107_v0 = vld [vmem:[%s2574_s1 + $0x168] sm:$0xff]  }
  0x1b   : > { %1849 = vmatprep.subr.bf16.mxu1 %v2058_v21  ;;  %v2105_v62 = vld [vmem:[%s2574_s1 + $0x120] sm:$0xff]   ;;  %v2108_v1 = vld [vmem:[%s2574_s1 + $0x1e8] sm:$0xff]   ;;  %v2115_v6 = vld [vmem:[%s2334_s22 + $0xd8] ss:$36 sps:$4 sm:$0xff]  }
  0x1c   : > { %v2106_v63 = vld [vmem:[%s2574_s1 + $0x1a0] sm:$0xff]   ;;  %v2109_v2 = vld [vmem:[%s2574_s1 + $0x128] sm:$0xff]   ;;  %v2117_v8 = vld [vmem:[%s2574_s1 + $0x170] sm:$0xff]  }
  0x1d   : > { %1810 = vmatpush3.bf16.msra.mxu0 %v2059_v22  ;;  %v2110_v3 = vld [vmem:[%s2574_s1 + $0x1a8] sm:$0xff]   ;;  %v2111_v4 = vld [vmem:[%s2334_s22 + $0xdc] ss:$36 sps:$4 sm:$0xff]   ;;  %v2118_v9 = vld [vmem:[%s2574_s1 + $0x1f0] sm:$0xff]  }
  0x1e   : > { %1850 = vmatpush3.bf16.msra.mxu1 %v2060_v23  ;;  %1811 = vmatprep.subr.bf16.mxu0 %v2061_v24  ;;  %v2113_v5 = vld [vmem:[%s2334_s22 + $0xe4] ss:$36 sps:$4 sm:$0xff]   ;;  %v2119_v10 = vld [vmem:[%s2574_s1 + $0x130] sm:$0xff]   ;;  %v2121_v12 = vld [vmem:[%s2574_s1 + $0x178] sm:$0xff]  }
  0x1f   : > { %1851 = vmatprep.subr.bf16.mxu1 %v2062_v25  ;;  %v2116_v7 = vld [vmem:[%s2334_s22 + $0xe0] ss:$36 sps:$4 sm:$0xff]   ;;  %v2120_v11 = vld [vmem:[%s2574_s1 + $0x1b0] sm:$0xff]   ;;  %v2122_v13 = vld [vmem:[%s2574_s1 + $0x1f8] sm:$0xff]  }
  0x20   : > { %v2123_v14 = vld [vmem:[%s2574_s1 + $0x138] sm:$0xff]   ;;  %v2125_v16 = vld [vmem:[%s2334_s22 + $0x10] ss:$36 sps:$4 sm:$0xff]   ;;  %v2131_v20 = vld [vmem:[%s2574_s1 + $0x200] sm:$0xff]  }
  0x21   : > { %1812 = vmatpush3.bf16.msra.mxu0 %v2063_v26  ;;  %v2124_v15 = vld [vmem:[%s2574_s1 + $0x1b8] sm:$0xff]   ;;  %v2132_v21 = vld [vmem:[%s2574_s1 + $0x208] sm:$0xff]   ;;  %v2138_v25 = vld [vmem:[%s2334_s22 + $0x60] ss:$36 sps:$4 sm:$0xff]  }
  0x22   : > { %1852 = vmatpush3.bf16.msra.mxu1 %v2064_v27  ;;  %1813 = vmatprep.subr.bf16.mxu0 %v2065_v28  ;;  %v2127_v17 = vld [vmem:[%s2334_s22 + $0x14] ss:$36 sps:$4 sm:$0xff]   ;;  %v2130_v19 = vld [vmem:[%s2334_s22 + $0x1c] ss:$36 sps:$4 sm:$0xff]   ;;  %v2135_v23 = vld [vmem:[%s2334_s22 + $0x64] ss:$36 sps:$4 sm:$0xff]  }
  0x23   : > { %1853 = vmatprep.subr.bf16.mxu1 %v2066_v29  ;;  %v2128_v18 = vld [vmem:[%s2334_s22 + $0x18] ss:$36 sps:$4 sm:$0xff]   ;;  %v2139_v26 = vld [vmem:[%s2574_s1 + $0x210] sm:$0xff]   ;;  %v2141_v27 = vld [vmem:[%s2334_s22 + $0xa4] ss:$36 sps:$4 sm:$0xff]  }
  0x24   : > { %v2133_v22 = vld [vmem:[%s2334_s22 + $0x5c] ss:$36 sps:$4 sm:$0xff]   ;;  %v2143_v28 = vld [vmem:[%s2334_s22 + $0xac] ss:$36 sps:$4 sm:$0xff]  }
  0x25   : > { %1814 = vmatpush3.bf16.msra.mxu0 %v2067_v30  ;;  %v2137_v24 = vld [vmem:[%s2334_s22 + $0x58] ss:$36 sps:$4 sm:$0xff]   ;;  %v2145_v30 = vld [vmem:[%s2334_s22 + $0xa0] ss:$36 sps:$4 sm:$0xff]   ;;  %v2149_v33 = vld [vmem:[%s2334_s22 + $0xec] ss:$36 sps:$4 sm:$0xff]  }
  0x26   : > { %1854 = vmatpush3.bf16.msra.mxu1 %v2068_v31  ;;  %1879 = vmatprep.subr.bf16.mxu0 %v2075_v36  ;;  %v2140_v29 = vld [vmem:[%s2574_s1 + $0x218] sm:$0xff]   ;;  %v2146_v31 = vld [vmem:[%s2334_s22 + $0xa8] ss:$36 sps:$4 sm:$0xff]  }
  0x27   : > { %1919 = vmatprep.subr.bf16.mxu1 %v2076_v37  ;;  %v2148_v35 = vld [vmem:[%s2574_s1 + $0x228] sm:$0xff]   ;;  %v2155_v37 = vld [vmem:[%s2574_s1 + $0x230] sm:$0xff]  }
  0x28   : > { %1125 = vmatmul.mubr.bf16.vlgmr.msra.gmra.mrb[0].mxu0 %v2069_v32  ;;  %v2147_v32 = vld [vmem:[%s2574_s1 + $0x220] sm:$0xff]   ;;  %v2153_v36 = vld [vmem:[%s2334_s22 + $0xe8] ss:$36 sps:$4 sm:$0xff]  }
  0x29   : > { %1190 = vmatmul.mubr.bf16.vlgmr.msra.gmra.mrb[0].mxu1 %v2072_v34  ;;  %1880 = vmatpush3.bf16.msra.mxu0 %v2077_v38  ;;  %v2151_v34 = vld [vmem:[%s2334_s22 + $0xf4] ss:$36 sps:$4 sm:$0xff]  }
  0x2a   : > { %1920 = vmatpush3.bf16.msra.mxu1 %v2078_v39  ;;  %1881 = vmatprep.subr.bf16.mxu0 %v2079_v40  ;;  %v2154_v38 = vld [vmem:[%s2334_s22 + $0xf0] ss:$36 sps:$4 sm:$0xff]   ;;  %v2157_v39 = vld [vmem:[%s2334_s22 + $0x20] ss:$36 sps:$4 sm:$0xff]  }
  0x2b   : > { %1921 = vmatprep.subr.bf16.mxu1 %v2080_v41  ;;  %1132 = vmatprep.mubr.bf16.mxu0 %v2083_v44  ;;  %v2158_v40 = vld [vmem:[%s2334_s22 + $0xb0] ss:$36 sps:$4 sm:$0xff]   ;;  %v2156_v41 = vld [vmem:[%s2574_s1 + $0x238] sm:$0xff]   ;;  %v2185_v44 = vmov 0.0  }
  0x2c   : > { %1197 = vmatprep.mubr.bf16.mxu1 %v2085_v45  ;;  %1463 = vst.msk [vmem:[%s2502_s29] sm:$0x1] %vm1462_vm0, %v2185_v44  ;;  %1464 = vst.msk [vmem:[%s2508_s7] sm:$0x1] %vm1462_vm0, %v2185_v44 }
  0x2d   : > { %1882 = vmatpush3.bf16.msra.mxu0 %v2081_v42  ;;  %v2159_v42 = vld [vmem:[%s2334_s22 + $0x68] ss:$36 sps:$4 sm:$0xff]  }
  0x2e   : > { %1922 = vmatpush3.bf16.msra.mxu1 %v2082_v43  ;;  %1883 = vmatprep.subr.bf16.mxu0 %v2089_v48  ;;  %v2160_v43 = vld [vmem:[%s2334_s22 + $0xf8] ss:$36 sps:$4 sm:$0xff]  }
  0x2f   : > { %1923 = vmatprep.subr.bf16.mxu1 %v2090_v49 }
  0x30   : > { %1133 = vmatmul.mubr.bf16.gmra.mrb[4].mxu0 %v2087_v46  ;;  %v1671_v46 = vld [vmem:[%s2575_s2] ss:$0 sm:$0xff] }
  0x31   : > { %1198 = vmatmul.mubr.bf16.gmra.mrb[4].mxu1 %v2088_v47  ;;  %1884 = vmatpush3.bf16.msra.mxu0 %v2091_v50 }
  0x32   : > { %1924 = vmatpush3.bf16.msra.mxu1 %v2092_v51  ;;  %1885 = vmatprep.subr.bf16.mxu0 %v2093_v52 }
  0x33   : > { %1925 = vmatprep.subr.bf16.mxu1 %v2094_v53  ;;  %1140 = vmatprep.mubr.bf16.mxu0 %v2097_v56 }
  0x34   : > { %1205 = vmatprep.mubr.bf16.mxu1 %v2099_v57 }
  0x35   : > { %1886 = vmatpush3.bf16.msra.mxu0 %v2095_v54 }
  0x36   : > { %1926 = vmatpush3.bf16.msra.mxu1 %v2096_v55  ;;  %1887 = vmatprep.subr.bf16.mxu0 %v2103_v60 }
  0x37   : > { %1927 = vmatprep.subr.bf16.mxu1 %v2104_v61 }
  0x38   : > { %1141 = vmatmul.mubr.bf16.gmra.mrb[8].mxu0 %v2101_v58 }
  0x39   : > { %1206 = vmatmul.mubr.bf16.gmra.mrb[8].mxu1 %v2102_v59  ;;  %1888 = vmatpush3.bf16.msra.mxu0 %v2105_v62 }
  0x3a   : > { %1928 = vmatpush3.bf16.msra.mxu1 %v2106_v63  ;;  %1889 = vmatprep.subr.bf16.mxu0 %v2107_v0 }
  0x3b   : > { %1929 = vmatprep.subr.bf16.mxu1 %v2108_v1  ;;  %1148 = vmatprep.mubr.bf16.mxu0 %v2111_v4 }
  0x3c   : > { %1213 = vmatprep.mubr.bf16.mxu1 %v2113_v5 }
  0x3d   : > { %1890 = vmatpush3.bf16.msra.mxu0 %v2109_v2 }
  0x3e   : > { %1930 = vmatpush3.bf16.msra.mxu1 %v2110_v3  ;;  %1891 = vmatprep.subr.bf16.mxu0 %v2117_v8 }
  0x3f   : > { %1931 = vmatprep.subr.bf16.mxu1 %v2118_v9 }
  0x40   : > { %1149 = vmatmul.mubr.bf16.gmra.mrb[12].mxu0 %v2115_v6 }
  0x41   : > { %1214 = vmatmul.mubr.bf16.gmra.mrb[12].mxu1 %v2116_v7  ;;  %1892 = vmatpush3.bf16.msra.mxu0 %v2119_v10 }
  0x42   : > { %1932 = vmatpush3.bf16.msra.mxu1 %v2120_v11  ;;  %1893 = vmatprep.subr.bf16.mxu0 %v2121_v12 }
  0x43   : > { %1933 = vmatprep.subr.bf16.mxu1 %v2122_v13  ;;  %1254 = vmatprep.mubr.bf16.mxu0 %v2127_v17 }
  0x44   : > { %1319 = vmatprep.mubr.bf16.mxu1 %v2130_v19 }
  0x45   : > { %1894 = vmatpush3.bf16.msra.mxu0 %v2123_v14 }
  0x46   : > { %1934 = vmatpush3.bf16.msra.mxu1 %v2124_v15  ;;  %1971 = vmatprep.subr.bf16.mxu0 %v2131_v20 }
  0x47   : > { %1995 = vmatprep.subr.bf16.mxu1 %v2131_v20 }
  0x48   : > { %1255 = vmatmul.mubr.bf16.vlgmr.msra.gmra.mrb[16].mxu0 %v2125_v16 }
  0x49   : > { %1320 = vmatmul.mubr.bf16.vlgmr.msra.gmra.mrb[16].mxu1 %v2128_v18  ;;  %1972 = vmatpush3.bf16.msra.mxu0 %v2131_v20 }
  0x4a   : > { %2003 = vmatpush3.bf16.msra.mxu1 %v2131_v20  ;;  %1973 = vmatprep.subr.bf16.mxu0 %v2132_v21 }
  0x4b   : > { %1996 = vmatprep.subr.bf16.mxu1 %v2132_v21  ;;  %1262 = vmatprep.mubr.bf16.mxu0 %v2133_v22 }
  0x4c   : > { %1327 = vmatprep.mubr.bf16.mxu1 %v2135_v23 }
  0x4d   : > { %1974 = vmatpush3.bf16.msra.mxu0 %v2132_v21 }
  0x4e   : > { %2004 = vmatpush3.bf16.msra.mxu1 %v2132_v21  ;;  %1975 = vmatprep.subr.bf16.mxu0 %v2139_v26 }
  0x4f   : > { %1997 = vmatprep.subr.bf16.mxu1 %v2139_v26 }
  0x50   : > { %1263 = vmatmul.mubr.bf16.gmra.mrb[20].mxu0 %v2137_v24 }
  0x51   : > { %1328 = vmatmul.mubr.bf16.gmra.mrb[20].mxu1 %v2138_v25  ;;  %1270 = vmatprep.mubr.bf16.mxu0 %v2141_v27 }
  0x52   : > { %1976 = vmatpush3.bf16.msra.mxu0 %v2139_v26  ;;  %1335 = vmatprep.mubr.bf16.mxu1 %v2143_v28 }
  0x53   : > { %2005 = vmatpush3.bf16.msra.mxu1 %v2139_v26  ;;  %1977 = vmatprep.subr.bf16.mxu0 %v2140_v29 }
  0x54   : > { %1998 = vmatprep.subr.bf16.mxu1 %v2140_v29 }
  0x56   : > { %1978 = vmatpush3.bf16.msra.mxu0 %v2140_v29 }
  0x57   : > { %2006 = vmatpush3.bf16.msra.mxu1 %v2140_v29  ;;  %1979 = vmatprep.subr.bf16.mxu0 %v2147_v32 }
  0x58   : > { %1271 = vmatmul.mubr.bf16.gmra.mrb[24].mxu0 %v2145_v30  ;;  %1999 = vmatprep.subr.bf16.mxu1 %v2147_v32 }
  0x59   : > { %1336 = vmatmul.mubr.bf16.gmra.mrb[24].mxu1 %v2146_v31  ;;  %1278 = vmatprep.mubr.bf16.mxu0 %v2149_v33 }
  0x5a   : > { %1980 = vmatpush3.bf16.msra.mxu0 %v2147_v32  ;;  %1343 = vmatprep.mubr.bf16.mxu1 %v2151_v34 }
  0x5b   : > { %2007 = vmatpush3.bf16.msra.mxu1 %v2147_v32  ;;  %1981 = vmatprep.subr.bf16.mxu0 %v2148_v35 }
  0x5c   : > { %2000 = vmatprep.subr.bf16.mxu1 %v2148_v35 }
  0x5e   : > { %1982 = vmatpush3.bf16.msra.mxu0 %v2148_v35 }
  0x5f   : > { %2008 = vmatpush3.bf16.msra.mxu1 %v2148_v35  ;;  %1983 = vmatprep.subr.bf16.mxu0 %v2155_v37 }
  0x60   : > { %1279 = vmatmul.mubr.bf16.gmra.mrb[28].mxu0 %v2153_v36  ;;  %2001 = vmatprep.subr.bf16.mxu1 %v2155_v37 }
  0x61   : > { %1344 = vmatmul.mubr.bf16.gmra.mrb[28].mxu1 %v2154_v38  ;;  %1987 = vmatprep.mubr.bf16.mxu0 %v2157_v39 }
  0x62   : > { %1984 = vmatpush3.bf16.msra.mxu0 %v2155_v37  ;;  %1991 = vmatprep.mubr.bf16.mxu1 %v2158_v40 }
  0x63   : > { %2009 = vmatpush3.bf16.msra.mxu1 %v2155_v37  ;;  %1985 = vmatprep.subr.bf16.mxu0 %v2156_v41 }
  0x64   : > { %2002 = vmatprep.subr.bf16.mxu1 %v2156_v41 }
  0x66   : > { %1986 = vmatpush3.bf16.msra.mxu0 %v2156_v41 }
  0x67   : > { %2010 = vmatpush3.bf16.msra.mxu1 %v2156_v41 }
  0x69   : > { %1988 = vmatmul.mubr.bf16.vlgmr.msra.gmra.mrb[32].mxu0 %v2159_v42 }
  0x6a   : > { %1992 = vmatmul.mubr.bf16.vlgmr.msra.gmra.mrb[32].mxu1 %v2160_v43 }
  0xfb   : > { %v1815_v45 = vpop.f32.mrb[0].mxu0 }
  0xfc   : > { %v1816_v47 = vpop.f32.mrb[1].mxu0  ;;  %v1855_v48 = vpop.f32.mrb[0].mxu1 }
  0xfd   : > { %v1817_v49 = vadd.f32 %v1816_v47, %v1815_v45  ;;  %v1818_v50 = vpop.f32.mrb[2].mxu0  ;;  %v1856_v51 = vpop.f32.mrb[1].mxu1 }
  0xfe   : > { %v1819_v52 = vpop.f32.mrb[3].mxu0  ;;  %v1857_v53 = vadd.f32 %v1856_v51, %v1855_v48  ;;  %v1858_v54 = vpop.f32.mrb[2].mxu1 }
  0xff   : > { %v1127_v55 = vadd.f32 %v1817_v49, %v1671_v46  ;;  %v1820_v56 = vadd.f32 %v1819_v52, %v1818_v50  ;;  %v1859_v57 = vpop.f32.mrb[3].mxu1 }
 0x100   : > { %v1860_v58 = vadd.f32 %v1859_v57, %v1858_v54 }
 0x101   : > { %v1130_v59 = vadd.f32 %v1820_v56, %v1671_v46  ;;  %v1192_v60 = vadd.f32 %v1857_v53, %v1127_v55 }
 0x103   : > { %v1195_v61 = vadd.f32 %v1860_v58, %v1130_v59  ;;  %v1821_v62 = vpop.f32.mrb[4].mxu0 }
 0x104   : > { %v1822_v63 = vpop.f32.mrb[5].mxu0  ;;  %v1861_v0 = vpop.f32.mrb[4].mxu1 }
 0x105   : > { %v1823_v1 = vadd.f32 %v1822_v63, %v1821_v62  ;;  %v1824_v2 = vpop.f32.mrb[6].mxu0  ;;  %v1862_v3 = vpop.f32.mrb[5].mxu1 }
 0x106   : > { %v1825_v4 = vpop.f32.mrb[7].mxu0  ;;  %v1863_v5 = vadd.f32 %v1862_v3, %v1861_v0  ;;  %v1864_v6 = vpop.f32.mrb[6].mxu1 }
 0x107   : > { %v1135_v7 = vadd.f32 %v1823_v1, %v1671_v46  ;;  %v1826_v8 = vadd.f32 %v1825_v4, %v1824_v2  ;;  %v1865_v9 = vpop.f32.mrb[7].mxu1 }
 0x108   : > { %v1866_v10 = vadd.f32 %v1865_v9, %v1864_v6 }
 0x109   : > { %v1138_v11 = vadd.f32 %v1826_v8, %v1671_v46  ;;  %v1200_v12 = vadd.f32 %v1863_v5, %v1135_v7 }
 0x10b   : > { %v1203_v13 = vadd.f32 %v1866_v10, %v1138_v11  ;;  %v1827_v14 = vpop.f32.mrb[8].mxu0 }
 0x10c   : > { %v1828_v15 = vpop.f32.mrb[9].mxu0  ;;  %v1867_v16 = vpop.f32.mrb[8].mxu1 }
 0x10d   : > { %v1829_v17 = vadd.f32 %v1828_v15, %v1827_v14  ;;  %v1830_v18 = vpop.f32.mrb[10].mxu0  ;;  %v1868_v19 = vpop.f32.mrb[9].mxu1 }
 0x10e   : > { %v1831_v20 = vpop.f32.mrb[11].mxu0  ;;  %v1869_v21 = vadd.f32 %v1868_v19, %v1867_v16  ;;  %v1870_v22 = vpop.f32.mrb[10].mxu1 }
 0x10f   : > { %v1143_v23 = vadd.f32 %v1829_v17, %v1671_v46  ;;  %v1832_v24 = vadd.f32 %v1831_v20, %v1830_v18  ;;  %v1871_v25 = vpop.f32.mrb[11].mxu1 }
 0x110   : > { %v1872_v26 = vadd.f32 %v1871_v25, %v1870_v22 }
 0x111   : > { %v1146_v27 = vadd.f32 %v1832_v24, %v1671_v46  ;;  %v1208_v28 = vadd.f32 %v1869_v21, %v1143_v23 }
 0x113   : > { %v1211_v29 = vadd.f32 %v1872_v26, %v1146_v27  ;;  %v1833_v30 = vpop.f32.mrb[12].mxu0 }
 0x114   : > { %v1873_v31 = vpop.f32.mrb[12].mxu1  ;;  %v1834_v32 = vpop.f32.mrb[13].mxu0 }
 0x115   : > { %v1874_v33 = vpop.f32.mrb[13].mxu1  ;;  %v1835_v34 = vadd.f32 %v1834_v32, %v1833_v30  ;;  %v1836_v35 = vpop.f32.mrb[14].mxu0 }
 0x116   : > { %v1875_v36 = vadd.f32 %v1874_v33, %v1873_v31  ;;  %v1876_v37 = vpop.f32.mrb[14].mxu1  ;;  %v1837_v38 = vpop.f32.mrb[15].mxu0 }
 0x117   : > { %v1877_v39 = vpop.f32.mrb[15].mxu1  ;;  %v1151_v40 = vadd.f32 %v1835_v34, %v1671_v46  ;;  %v1838_v41 = vadd.f32 %v1837_v38, %v1836_v35 }
 0x118   : > { %v1878_v42 = vadd.f32 %v1877_v39, %v1876_v37 }
 0x119   : > { %v1154_v43 = vadd.f32 %v1838_v41, %v1671_v46  ;;  %v1216_v44 = vadd.f32 %v1875_v36, %v1151_v40 }
 0x11b   : > { %v1219_v45 = vadd.f32 %v1878_v42, %v1154_v43  ;;  %v1895_v47 = vpop.f32.mrb[16].mxu0 }
 0x11c   : > { %v1896_v48 = vpop.f32.mrb[17].mxu0  ;;  %v1935_v51 = vpop.f32.mrb[16].mxu1 }
 0x11d   : > { %v1897_v49 = vadd.f32 %v1896_v48, %v1895_v47  ;;  %v1898_v50 = vpop.f32.mrb[18].mxu0  ;;  %v1936_v53 = vpop.f32.mrb[17].mxu1 }
 0x11e   : > { %v1899_v52 = vpop.f32.mrb[19].mxu0  ;;  %v1937_v56 = vadd.f32 %v1936_v53, %v1935_v51  ;;  %v1938_v57 = vpop.f32.mrb[18].mxu1 }
 0x11f   : > { %v1257_v54 = vadd.f32 %v1897_v49, %v1192_v60  ;;  %v1900_v55 = vadd.f32 %v1899_v52, %v1898_v50  ;;  %v1939_v58 = vpop.f32.mrb[19].mxu1 }
 0x120   : > { %v1940_v62 = vadd.f32 %v1939_v58, %v1938_v57 }
 0x121   : > { %v1260_v59 = vadd.f32 %v1900_v55, %v1195_v61  ;;  %v1322_v63 = vadd.f32 %v1937_v56, %v1257_v54 }
 0x123   : > { %v1901_v0 = vpop.f32.mrb[20].mxu0  ;;  %v2517_v1 = vadd.f32 %v1940_v62, %v1260_v59 }
 0x124   : > { %v1902_v46 = vpop.f32.mrb[21].mxu0  ;;  %v1941_v4 = vpop.f32.mrb[20].mxu1 }
 0x125   : > { %v1903_v2 = vadd.f32 %v1902_v46, %v1901_v0  ;;  %v1904_v3 = vpop.f32.mrb[22].mxu0  ;;  %v1942_v6 = vpop.f32.mrb[21].mxu1 }
 0x126   : > { %v1905_v5 = vpop.f32.mrb[23].mxu0  ;;  %v1943_v9 = vadd.f32 %v1942_v6, %v1941_v4  ;;  %v1944_v60 = vpop.f32.mrb[22].mxu1 }
 0x127   : > { %v1265_v7 = vadd.f32 %v1903_v2, %v1200_v12  ;;  %v1906_v8 = vadd.f32 %v1905_v5, %v1904_v3  ;;  %v1945_v10 = vpop.f32.mrb[23].mxu1 }
 0x128   : > { %v1946_v14 = vadd.f32 %v1945_v10, %v1944_v60 }
 0x129   : > { %v1268_v11 = vadd.f32 %v1906_v8, %v1203_v13  ;;  %v1330_v15 = vadd.f32 %v1943_v9, %v1265_v7 }
 0x12b   : > { %v1907_v61 = vpop.f32.mrb[24].mxu0  ;;  %v1333_v16 = vadd.f32 %v1946_v14, %v1268_v11 }
 0x12c   : > { %v1908_v17 = vpop.f32.mrb[25].mxu0  ;;  %v1947_v20 = vpop.f32.mrb[24].mxu1 }
 0x12d   : > { %v1909_v18 = vadd.f32 %v1908_v17, %v1907_v61  ;;  %v1910_v19 = vpop.f32.mrb[26].mxu0  ;;  %v1948_v22 = vpop.f32.mrb[25].mxu1 }
 0x12e   : > { %v1911_v21 = vpop.f32.mrb[27].mxu0  ;;  %v1949_v25 = vadd.f32 %v1948_v22, %v1947_v20  ;;  %v1950_v26 = vpop.f32.mrb[26].mxu1 }
 0x12f   : > { %v1273_v23 = vadd.f32 %v1909_v18, %v1208_v28  ;;  %v1912_v24 = vadd.f32 %v1911_v21, %v1910_v19  ;;  %v1951_v12 = vpop.f32.mrb[27].mxu1 }
 0x130   : > { %v1952_v30 = vadd.f32 %v1951_v12, %v1950_v26 }
 0x131   : > { %v1276_v27 = vadd.f32 %v1912_v24, %v1211_v29  ;;  %v1338_v31 = vadd.f32 %v1949_v25, %v1273_v23 }
 0x133   : > { %v1913_v32 = vpop.f32.mrb[28].mxu0  ;;  %v1341_v13 = vadd.f32 %v1952_v30, %v1276_v27 }
 0x134   : > { %v1914_v33 = vpop.f32.mrb[29].mxu0  ;;  %v1953_v36 = vpop.f32.mrb[28].mxu1 }
 0x135   : > { %v1915_v34 = vadd.f32 %v1914_v33, %v1913_v32  ;;  %v1916_v35 = vpop.f32.mrb[30].mxu0  ;;  %v1954_v38 = vpop.f32.mrb[29].mxu1 }
 0x136   : > { %v1917_v37 = vpop.f32.mrb[31].mxu0  ;;  %v1955_v41 = vadd.f32 %v1954_v38, %v1953_v36  ;;  %v1956_v28 = vpop.f32.mrb[30].mxu1 }
 0x137   : > { %v1281_v39 = vadd.f32 %v1915_v34, %v1216_v44  ;;  %v1918_v40 = vadd.f32 %v1917_v37, %v1916_v35  ;;  %v1957_v42 = vpop.f32.mrb[31].mxu1 }
 0x138   : > { %v1958_v47 = vadd.f32 %v1957_v42, %v1956_v28 }
 0x139   : > { %v1284_v43 = vadd.f32 %v1918_v40, %v1219_v45  ;;  %v1346_v48 = vadd.f32 %v1955_v41, %v1281_v39 }
 0x13b   : > { %v1349_v29 = vadd.f32 %v1958_v47, %v1284_v43 }
 0x13c   : > { %v1989_v49 = vpop.f32.mrb[32].mxu0 }
 0x13d   : > { %v1395_v50 = vadd.f32 %v1989_v49, %v1330_v15  ;;  %v1993_v51 = vpop.f32.mrb[32].mxu1  ;;  %v1386_v52 = vpop.f32.mrb[33].mxu0 }
 0x13e   : > { %v1411_v44 = vadd.f32 %v1993_v51, %v1346_v48  ;;  %v1387_v53 = vadd.f32 %v1386_v52, %v1322_v63  ;;  %v1402_v45 = vpop.f32.mrb[33].mxu1  ;;  %v1990_v54 = vpop.f32.mrb[34].mxu0 }
 0x13f   : > { %v1793_v55 = vpack.c.bf16 %v1395_v50, %v1395_v50  ;;  %v1403_v56 = vadd.f32 %v1402_v45, %v1338_v31  ;;  %v1994_v57 = vpop.f32.mrb[34].mxu1  ;;  %v1389_v58 = vpop.f32.mrb[35].mxu0  ;;  %v1398_v2 = vadd.f32 %v1990_v54, %v1333_v16  ;;  %v1494_v7 = vmul.f32 %v1395_v50, %v1395_v50  ;;  %v1465_v54 = vld [vmem:[%s2502_s29] sm:$0x1] }
 0x140   : > { %v1797_v59 = vpack.c.bf16 %v1411_v44, %v1411_v44  ;;  %v1791_v62 = vpack.c.bf16 %v1387_v53, %v1387_v53  ;;  %v1405_v0 = vpop.f32.mrb[35].mxu1  ;;  %v1414_v63 = vadd.f32 %v1994_v57, %v1349_v29  ;;  %v1390_v3 = vadd.f32 %v1389_v58, %v2517_v1  ;;  %v1491_v57 = vld [vmem:[%s2508_s7] sm:$0x1] }
 0x141   : > { %1452 = vst.msk [vmem:[%s2523_s12 + $0x8] sm:$0xf] %vm1449_vm1, %v1793_v55  ;;  %v1795_v46 = vpack.c.bf16 %v1403_v56, %v1403_v56  ;;  %v1406_v4 = vadd.f32 %v1405_v0, %v1341_v13  ;;  %v1492_v5 = vmul.f32 %v1387_v53, %v1387_v53  ;;  %v1794_v6 = vpack.c.bf16 %v1398_v2, %v1398_v2 }
 0x142   : > { %1456 = vst.msk [vmem:[%s2523_s12 + $0x18] sm:$0xf] %vm1449_vm1, %v1797_v59  ;;  %1450 = vst.msk [vmem:[%s2523_s12] sm:$0xf] %vm1449_vm1, %v1791_v62  ;;  %v1798_v8 = vpack.c.bf16 %v1414_v63, %v1414_v63  ;;  %v1792_v9 = vpack.c.bf16 %v1390_v3, %v1390_v3  ;;  %v1467_v60 = vsel %vm1466_vm2, %v1387_v53, 0.0  ;;  %v1468_v10 = vsel %vm1466_vm2, %v1390_v3, 0.0 }
 0x143   : > { %1454 = vst.msk [vmem:[%s2523_s12 + $0x10] sm:$0xf] %vm1449_vm1, %v1795_v46  ;;  %1453 = vst.msk [vmem:[%s2523_s12 + $0xc] sm:$0xf] %vm1449_vm1, %v1794_v6  ;;  %v1493_v11 = vmul.f32 %v1390_v3, %v1390_v3  ;;  %v1796_v14 = vpack.c.bf16 %v1406_v4, %v1406_v4  ;;  %v1469_v1 = vadd.f32 %v1468_v10, %v1467_v60  ;;  %v1470_v15 = vsel %vm1466_vm2, %v1395_v50, 0.0 }
 0x144   : > { %1457 = vst.msk [vmem:[%s2523_s12 + $0x1c] sm:$0xf] %vm1449_vm1, %v1798_v8  ;;  %1451 = vst.msk [vmem:[%s2523_s12 + $0x4] sm:$0xf] %vm1449_vm1, %v1792_v9  ;;  %v1500_v61 = vsel %vm1466_vm2, %v1492_v5, 0.0  ;;  %v1495_v16 = vmul.f32 %v1398_v2, %v1398_v2  ;;  %v1503_v20 = vsel %vm1466_vm2, %v1494_v7, 0.0  ;;  %v1496_v21 = vmul.f32 %v1403_v56, %v1403_v56 }
 0x145   : > { %v1501_v17 = vsel %vm1466_vm2, %v1493_v11, 0.0  ;;  %1455 = vst.msk [vmem:[%s2523_s12 + $0x14] sm:$0xf] %vm1449_vm1, %v1796_v14  ;;  %v1471_v18 = vadd.f32 %v1470_v15, %v1469_v1  ;;  %v1472_v22 = vsel %vm1466_vm2, %v1398_v2, 0.0  ;;  %v1474_v25 = vsel %vm1466_vm2, %v1403_v56, 0.0 }
 0x146   : > { %v1502_v19 = vadd.f32 %v1501_v17, %v1500_v61  ;;  %v1505_v26 = vsel %vm1466_vm2, %v1495_v16, 0.0  ;;  %v1497_v12 = vmul.f32 %v1406_v4, %v1406_v4  ;;  %v1498_v31 = vmul.f32 %v1411_v44, %v1411_v44 }
 0x147   : > { %v1473_v24 = vadd.f32 %v1472_v22, %v1471_v18  ;;  %v1507_v32 = vsel %vm1466_vm2, %v1496_v21, 0.0  ;;  %v1476_v13 = vsel %vm1466_vm2, %v1406_v4, 0.0  ;;  %v1478_v35 = vsel %vm1466_vm2, %v1411_v44, 0.0 }
 0x148   : > { %v1504_v23 = vadd.f32 %v1503_v20, %v1502_v19  ;;  %v1499_v36 = vmul.f32 %v1414_v63, %v1414_v63  ;;  %v1509_v37 = vsel %vm1466_vm2, %v1497_v12, 0.0  ;;  %v1511_v40 = vsel %vm1466_vm2, %v1498_v31, 0.0 }
 0x149   : > { %v1475_v27 = vadd.f32 %v1474_v25, %v1473_v24  ;;  %v1480_v41 = vsel %vm1466_vm2, %v1414_v63, 0.0 }
 0x14a   : > { %v1506_v30 = vadd.f32 %v1505_v26, %v1504_v23  ;;  %v1513_v43 = vsel %vm1466_vm2, %v1499_v36, 0.0 }
 0x14b   : > { %v1477_v33 = vadd.f32 %v1476_v13, %v1475_v27 }
 0x14c   : > { %v1508_v34 = vadd.f32 %v1507_v32, %v1506_v30 }
 0x14d   : > { %v1479_v38 = vadd.f32 %v1478_v35, %v1477_v33 }
 0x14e   : > { %v1510_v39 = vadd.f32 %v1509_v37, %v1508_v34 }
 0x14f   : > { %v1481_v28 = vadd.f32 %v1480_v41, %v1479_v38 }
 0x150   : > { %v1512_v42 = vadd.f32 %v1511_v40, %v1510_v39 }
 0x151   : > { %v1482_v47 = vrot.slane %v1481_v28, 4 }
 0x152   : > { %v1514_v48 = vadd.f32 %v1513_v43, %v1512_v42 }
 0x153   : > { %v1483_v29 = vadd.f32 %v1482_v47, %v1481_v28 }
 0x154   : > { %v1515_v49 = vrot.slane %v1514_v48, 4 }
 0x155   : > { %v1484_v50 = vrot.slane %v1483_v29, 2 }
 0x156   : > { %v1516_v51 = vadd.f32 %v1515_v49, %v1514_v48 }
 0x157   : > { %v1485_v52 = vadd.f32 %v1484_v50, %v1483_v29 }
 0x158   : > { %v1517_v44 = vrot.slane %v1516_v51, 2 }
 0x159   : > { %v1486_v53 = vrot.slane %v1485_v52, 1 }
 0x15a   : > { %v1518_v45 = vadd.f32 %v1517_v44, %v1516_v51 }
 0x15b   : > { %v1487_v55 = vadd.f32 %v1486_v53, %v1485_v52 }
 0x15c   : > { %v1519_v56 = vrot.slane %v1518_v45, 1 }
 0x15d   : > { %v1488_v58 = vadd.f32 %v1487_v55, %v1465_v54 }
 0x15e   : > { %v1520_v59 = vadd.f32 %v1519_v56, %v1518_v45 }
 0x15f   : > { %1490 = vst.msk [vmem:[%s2502_s29] sm:$0x1] %vm1462_vm0, %v1488_v58 }
 0x160   : > { %v1521_v62 = vadd.f32 %v1520_v59, %v1491_v57 }
 0x162   : > { %1522 = vst.msk [vmem:[%s2508_s7] sm:$0x1] %vm1462_vm0, %v1521_v62 }
 0x163 PF: > { %s16_s20 = sadd.s32 1, %s2183_s20   ;;  %s2579_s18 = smov %s2179_s19 }
 0x164   : > { %p13_p5 = scmp.ge.s32.totalorder %s16_s20, 4   ;;  %s2580_s19 = smov %s2582_s21 }
 0x166   :  { %15 = sbr.rel (!%p13_p5) target bundleno = 2 (0x2), region = 90 }

// kernel: transformer_net_forward.59
= control target key start
LH: loop header
LB: loop body
LE: loop exit
PB: predicated region body
PF: predicated region fallthrough
CT: control target
= control target key end

     0   :  { %s2831_s18 = smov 0   ;;  %s2833_s19 = smov 0   ;;  %s3443_s0 = inlined_call_operand.vmem [shape: bf16[2,256,576], index: 0, kind: input, shape index: {}]   ;;  %s3444_s1 = inlined_call_operand.vmem [shape: bf16[576,32], index: 1, kind: input, shape index: {}]   ;;  %s3445_s2 = inlined_call_operand.vmem [shape: f32[1,32], index: 2, kind: input, shape index: {}]   ;;  %s3446_s3 = inlined_call_operand.vmem [shape: bf16[2,256,32], index: 3, kind: output, shape index: {0}]   ;;  %s3447_s4 = inlined_call_operand.vmem [shape: f32[2,1,32], index: 4, kind: output, shape index: {1}]   ;;  %s3448_s5 = inlined_call_operand.vmem [shape: f32[2,1,32], index: 5, kind: output, shape index: {2}]  }
   0x1   :  { %s2835_s20 = smov 0  }
   0x2 LB: > { %s28_s21 = sadd.s32 1, %s2794_s19  ;;  %p2098_p0 = scmp.ge.s32.totalorder %s2798_s20, 1  ;;  %s2798_s20 = sphi %s2835_s20, %s16_s20   ;;  %s2794_s19 = sphi %s2833_s19, %s3450_s19   ;;  %s2790_s18 = sphi %s2831_s18, %s3449_s18  }
   0x3   : > { %p30_p1 = scmp.ge.s32.totalorder %s28_s21, 2  ;;  %p214_p2 = scmp.lt.s32.totalorder %s2798_s20, 3 }
   0x5   : > { %s3452_s21 = smov (%p30_p1, %s28_s21), 0  ;;  %p215_p3 = pnand %p2098_p0, %p214_p2 }
   0x6   : > { %v2628_v0 = vld [vmem:[%s3444_s1 + $0x40] sm:$0xff] (!%p215_p3)   ;;  %v2630_v2 = vld [vmem:[%s3444_s1 + $0x48] sm:$0xff] (!%p215_p3)   ;;  %p258_p4 = scmp.lt.s32.totalorder (!%p215_p3), %s2790_s18, 1  ;;  %v2632_v4 = vld [vmem:[%s3444_s1 + $0x50] sm:$0xff] (!%p215_p3)   ;;  %vm1076_vm0 = vcmask (!%p215_p3), 523264   ;;  %vm1773_vm1 = vcmask (!%p215_p3), 253952  }
   0x7   : > { %218 = sbr.rel (%p215_p3) target bundleno = 436 (0x1b4), region = 32  ;;  %v2629_v1 = vld [vmem:[%s3444_s1] sm:$0xff] (!%p215_p3)   ;;  %2302 = vmatprep.subr.bf16.mxu0 (!%p215_p3), %v2628_v0  ;;  %2586 = vmatprep.subr.bf16.mxu1 (!%p215_p3), %v2628_v0  ;;  %v2631_v3 = vld [vmem:[%s3444_s1 + $0x8] sm:$0xff] (!%p215_p3)   ;;  %v2633_v5 = vld [vmem:[%s3444_s1 + $0x10] sm:$0xff] (!%p215_p3)   ;;  %vm1777_vm2 = vcmask (!%p215_p3), 261120   ;;  %vm1736_vm3 = vcmask (!%p215_p3), 257024  }
   0x8   : > { %2303 = vmatpush3.bf16.msra.mxu0 (!%p215_p3), %v2629_v1  ;;  %2594 = vmatpush3.bf16.msra.mxu1 (!%p215_p3), %v2629_v1  ;;  %v2634_v6 = vld [vmem:[%s3444_s1 + $0x58] sm:$0xff] (!%p215_p3)   ;;  %v2636_v8 = vld [vmem:[%s3444_s1 + $0x60] sm:$0xff] (!%p215_p3)   ;;  %v2638_v10 = vld [vmem:[%s3444_s1 + $0x68] sm:$0xff] (!%p215_p3)  }
   0x9   : > { %2304 = vmatprep.subr.bf16.mxu0 (!%p215_p3), %v2630_v2  ;;  %2587 = vmatprep.subr.bf16.mxu1 (!%p215_p3), %v2630_v2  ;;  %v2635_v7 = vld [vmem:[%s3444_s1 + $0x18] sm:$0xff] (!%p215_p3)   ;;  %v2637_v9 = vld [vmem:[%s3444_s1 + $0x20] sm:$0xff] (!%p215_p3)   ;;  %v2639_v13 = vld [vmem:[%s3444_s1 + $0x28] sm:$0xff] (!%p215_p3)  }
   0xa   : > { %v2640_v14 = vld [vmem:[%s3444_s1 + $0x70] sm:$0xff] (!%p215_p3)   ;;  %v2642_v16 = vld [vmem:[%s3444_s1 + $0x78] sm:$0xff] (!%p215_p3)   ;;  %v2650_v18 = vld [vmem:[%s3444_s1 + $0xc0] sm:$0xff] (!%p215_p3)  }
   0xb   : > { %v2641_v15 = vld [vmem:[%s3444_s1 + $0x30] sm:$0xff] (!%p215_p3)   ;;  %v2643_v17 = vld [vmem:[%s3444_s1 + $0x38] sm:$0xff] (!%p215_p3)   ;;  %v2651_v19 = vld [vmem:[%s3444_s1 + $0x100] sm:$0xff] (!%p215_p3)  }
   0xc   : > { %2305 = vmatpush3.bf16.msra.mxu0 (!%p215_p3), %v2631_v3  ;;  %2595 = vmatpush3.bf16.msra.mxu1 (!%p215_p3), %v2631_v3  ;;  %v2652_v22 = vld [vmem:[%s3444_s1 + $0x80] sm:$0xff] (!%p215_p3)   ;;  %v2653_v23 = vld [vmem:[%s3444_s1 + $0xc8] sm:$0xff] (!%p215_p3)   ;;  %v2661_v28 = vld [vmem:[%s3444_s1 + $0xd0] sm:$0xff] (!%p215_p3)  }
   0xd   : > { %2306 = vmatprep.subr.bf16.mxu0 (!%p215_p3), %v2632_v4  ;;  %2588 = vmatprep.subr.bf16.mxu1 (!%p215_p3), %v2632_v4  ;;  %v2654_v26 = vld [vmem:[%s3444_s1 + $0x88] sm:$0xff] (!%p215_p3)   ;;  %v2662_v30 = vld [vmem:[%s3444_s1 + $0x90] sm:$0xff] (!%p215_p3)   ;;  %v2663_v31 = vld [vmem:[%s3444_s1 + $0xd8] sm:$0xff] (!%p215_p3)  }
   0xe   : > { %s3454_s18 = smov (!%p258_p4, %s2790_s18), 1  ;;  %v2682_v34 = vld [vmem:[%s3444_s1 + $0x108] sm:$0xff]   ;;  %v2664_v35 = vld [vmem:[%s3444_s1 + $0x98] sm:$0xff]   ;;  %v2671_v37 = vld [vmem:[%s3444_s1 + $0xe0] sm:$0xff]  }
   0xf   : > { %s2602_s11 = smul.u32 640, %s3454_s18  ;;  %v2672_v39 = vld [vmem:[%s3444_s1 + $0xa0] sm:$0xff]   ;;  %v2673_v40 = vld [vmem:[%s3444_s1 + $0xe8] sm:$0xff]   ;;  %v2681_v46 = vld [vmem:[%s3444_s1 + $0xf0] sm:$0xff]   ;;  %s3103_s15 = scalar_lea.vmem %s3447_s4, %s3454_s18 }
  0x10   : > { %2307 = vmatpush3.bf16.msra.mxu0 %v2633_v5  ;;  %2596 = vmatpush3.bf16.msra.mxu1 %v2633_v5  ;;  %v2674_v43 = vld [vmem:[%s3444_s1 + $0xa8] sm:$0xff]   ;;  %v2704_v47 = vld [vmem:[%s3444_s1 + $0x110] sm:$0xff]   ;;  %v2684_v49 = vld [vmem:[%s3444_s1 + $0xf8] sm:$0xff]   ;;  %s3109_s23 = scalar_lea.vmem %s3448_s5, %s3454_s18  ;;  %s2269_s24 = sshll.u32 %s3454_s18, 7 }
  0x11   : > { %2308 = vmatprep.subr.bf16.mxu0 %v2634_v6  ;;  %2589 = vmatprep.subr.bf16.mxu1 %v2634_v6  ;;  %s2882_s22 = scalar_lea.vmem %s3443_s0, %s2602_s11  ;;  %v2683_v48 = vld [vmem:[%s3444_s1 + $0xb0] sm:$0xff]   ;;  %v2685_v52 = vld [vmem:[%s3444_s1 + $0xb8] sm:$0xff]   ;;  %s3212_s26 = scalar_lea.vmem %s3446_s3, %s2269_s24 }
  0x12   : > { %v2646_v11 = vld [vmem:[%s2882_s22 + $0x4] ss:$20 sps:$4 sm:$0xff]   ;;  %v2644_v20 = vld [vmem:[%s2882_s22] ss:$20 sps:$4 sm:$0xff]   ;;  %v2659_v27 = vld [vmem:[%s2882_s22 + $0x28] ss:$20 sps:$4 sm:$0xff]  }
  0x13   : > { %v2649_v12 = vld [vmem:[%s2882_s22 + $0x1e4] ss:$20 sps:$4 sm:$0xff]   ;;  %1157 = vmatprep.mubr.bf16.mxu0 %v2646_v11  ;;  %v2647_v21 = vld [vmem:[%s2882_s22 + $0x1e0] ss:$20 sps:$4 sm:$0xff]   ;;  %v2660_v29 = vld [vmem:[%s2882_s22 + $0x208] ss:$20 sps:$4 sm:$0xff]  }
  0x14   : > { %2309 = vmatpush3.bf16.msra.mxu0 %v2635_v7  ;;  %2597 = vmatpush3.bf16.msra.mxu1 %v2635_v7  ;;  %v2655_v24 = vld [vmem:[%s2882_s22 + $0x2c] ss:$20 sps:$4 sm:$0xff]   ;;  %v2665_v32 = vld [vmem:[%s2882_s22 + $0x54] ss:$20 sps:$4 sm:$0xff]   ;;  %v2669_v36 = vld [vmem:[%s2882_s22 + $0x50] ss:$20 sps:$4 sm:$0xff]  }
  0x15   : > { %2310 = vmatprep.subr.bf16.mxu0 %v2636_v8  ;;  %2590 = vmatprep.subr.bf16.mxu1 %v2636_v8  ;;  %v2657_v25 = vld [vmem:[%s2882_s22 + $0x20c] ss:$20 sps:$4 sm:$0xff]   ;;  %v2667_v33 = vld [vmem:[%s2882_s22 + $0x234] ss:$20 sps:$4 sm:$0xff]   ;;  %v2670_v38 = vld [vmem:[%s2882_s22 + $0x230] ss:$20 sps:$4 sm:$0xff]  }
  0x16   : > { %1253 = vmatprep.mubr.bf16.mxu1 %v2649_v12  ;;  %v2675_v41 = vld [vmem:[%s2882_s22 + $0x7c] ss:$20 sps:$4 sm:$0xff]   ;;  %v2679_v44 = vld [vmem:[%s2882_s22 + $0x78] ss:$20 sps:$4 sm:$0xff]   ;;  %v2691_v54 = vld [vmem:[%s2882_s22 + $0xa0] ss:$20 sps:$4 sm:$0xff]  }
  0x17   : > { %v2677_v42 = vld [vmem:[%s2882_s22 + $0x25c] ss:$20 sps:$4 sm:$0xff]   ;;  %v2680_v45 = vld [vmem:[%s2882_s22 + $0x258] ss:$20 sps:$4 sm:$0xff]   ;;  %v2694_v57 = vld [vmem:[%s2882_s22 + $0x34] ss:$20 sps:$4 sm:$0xff]  }
  0x18   : > { %2311 = vmatpush3.bf16.msra.mxu0 %v2637_v9  ;;  %2598 = vmatpush3.bf16.msra.mxu1 %v2637_v9  ;;  %v2686_v50 = vld [vmem:[%s2882_s22 + $0xa4] ss:$20 sps:$4 sm:$0xff]   ;;  %v2690_v51 = vld [vmem:[%s2882_s22 + $0xc] ss:$20 sps:$4 sm:$0xff]   ;;  %v2688_v53 = vld [vmem:[%s2882_s22 + $0x8] ss:$20 sps:$4 sm:$0xff]  }
  0x19   : > { %2312 = vmatprep.subr.bf16.mxu0 %v2638_v10  ;;  %2591 = vmatprep.subr.bf16.mxu1 %v2638_v10  ;;  %v2692_v55 = vld [vmem:[%s2882_s22 + $0xcc] ss:$20 sps:$4 sm:$0xff]   ;;  %v2723_v56 = vld [vmem:[%s3444_s1 + $0x118] sm:$0xff]   ;;  %v2697_v59 = vld [vmem:[%s2882_s22 + $0x30] ss:$20 sps:$4 sm:$0xff]  }
  0x1a   : > { %v2696_v58 = vld [vmem:[%s2882_s22 + $0xc8] ss:$20 sps:$4 sm:$0xff]   ;;  %v2702_v62 = vld [vmem:[%s2882_s22 + $0xf0] ss:$20 sps:$4 sm:$0xff]   ;;  %v2703_v63 = vld [vmem:[%s2882_s22 + $0x58] ss:$20 sps:$4 sm:$0xff]  }
  0x1b   : > { %v2698_v60 = vld [vmem:[%s2882_s22 + $0xf4] ss:$20 sps:$4 sm:$0xff]   ;;  %v2700_v61 = vld [vmem:[%s2882_s22 + $0x5c] ss:$20 sps:$4 sm:$0xff]   ;;  %v2707_v1 = vld [vmem:[%s2882_s22 + $0x84] ss:$20 sps:$4 sm:$0xff]  }
  0x1c   : > { %2313 = vmatpush3.bf16.msra.mxu0 %v2639_v13  ;;  %2599 = vmatpush3.bf16.msra.mxu1 %v2639_v13  ;;  %v2705_v0 = vld [vmem:[%s2882_s22 + $0x11c] ss:$20 sps:$4 sm:$0xff]   ;;  %v2709_v2 = vld [vmem:[%s2882_s22 + $0x118] ss:$20 sps:$4 sm:$0xff]   ;;  %v2710_v3 = vld [vmem:[%s2882_s22 + $0x80] ss:$20 sps:$4 sm:$0xff]  }
  0x1d   : > { %2314 = vmatprep.subr.bf16.mxu0 %v2640_v14  ;;  %2592 = vmatprep.subr.bf16.mxu1 %v2640_v14  ;;  %v2711_v4 = vld [vmem:[%s2882_s22 + $0x144] ss:$20 sps:$4 sm:$0xff]   ;;  %v2713_v5 = vld [vmem:[%s2882_s22 + $0xac] ss:$20 sps:$4 sm:$0xff]   ;;  %v2716_v7 = vld [vmem:[%s2882_s22 + $0xa8] ss:$20 sps:$4 sm:$0xff]  }
  0x1e   : > { %v2715_v6 = vld [vmem:[%s2882_s22 + $0x140] ss:$20 sps:$4 sm:$0xff]   ;;  %v2721_v10 = vld [vmem:[%s2882_s22 + $0x168] ss:$20 sps:$4 sm:$0xff]   ;;  %v2722_v11 = vld [vmem:[%s2882_s22 + $0xd0] ss:$20 sps:$4 sm:$0xff]  }
  0x1f   : > { %v2717_v8 = vld [vmem:[%s2882_s22 + $0x16c] ss:$20 sps:$4 sm:$0xff]   ;;  %v2719_v9 = vld [vmem:[%s2882_s22 + $0xd4] ss:$20 sps:$4 sm:$0xff]   ;;  %v2726_v13 = vld [vmem:[%s2882_s22 + $0xfc] ss:$20 sps:$4 sm:$0xff]  }
  0x20   : > { %2315 = vmatpush3.bf16.msra.mxu0 %v2641_v15  ;;  %2600 = vmatpush3.bf16.msra.mxu1 %v2641_v15  ;;  %v2724_v12 = vld [vmem:[%s2882_s22 + $0x194] ss:$20 sps:$4 sm:$0xff]   ;;  %v2728_v14 = vld [vmem:[%s2882_s22 + $0x190] ss:$20 sps:$4 sm:$0xff]   ;;  %v2729_v15 = vld [vmem:[%s2882_s22 + $0xf8] ss:$20 sps:$4 sm:$0xff]  }
  0x21   : > { %2316 = vmatprep.subr.bf16.mxu0 %v2642_v16  ;;  %2593 = vmatprep.subr.bf16.mxu1 %v2642_v16  ;;  %v2730_v16 = vld [vmem:[%s2882_s22 + $0x1bc] ss:$20 sps:$4 sm:$0xff]  }
  0x24   : > { %2317 = vmatpush3.bf16.msra.mxu0 %v2643_v17  ;;  %2601 = vmatpush3.bf16.msra.mxu1 %v2643_v17  ;;  %v2732_v17 = vld [vmem:[%s2882_s22 + $0x124] ss:$20 sps:$4 sm:$0xff]  }
  0x25   : > { %2414 = vmatprep.subr.bf16.mxu1 %v2650_v18  ;;  %2546 = vmatprep.subr.bf16.mxu0 %v2651_v19  ;;  %v2734_v18 = vld [vmem:[%s2882_s22 + $0x1b8] ss:$20 sps:$4 sm:$0xff]  }
  0x27   : > { %1158 = vmatmul.mubr.bf16.vlgmr.msra.gmra.mrb[0].mxu0 %v2644_v20  ;;  %1254 = vmatmul.mubr.bf16.vlgmr.msra.gmra.mrb[0].mxu1 %v2647_v21  ;;  %v2736_v20 = vld [vmem:[%s2882_s22 + $0x14c] ss:$20 sps:$4 sm:$0xff]   ;;  %v2738_v21 = vld [vmem:[%s2882_s22 + $0x10] ss:$20 sps:$4 sm:$0xff]  }
  0x28   : > { %2415 = vmatpush3.bf16.msra.mxu1 %v2652_v22  ;;  %2547 = vmatpush3.bf16.msra.mxu0 %v2651_v19  ;;  %v2735_v19 = vld [vmem:[%s2882_s22 + $0x120] ss:$20 sps:$4 sm:$0xff]   ;;  %v2739_v22 = vld [vmem:[%s2882_s22 + $0x148] ss:$20 sps:$4 sm:$0xff]  }
  0x29   : > { %2416 = vmatprep.subr.bf16.mxu1 %v2653_v23  ;;  %1165 = vmatprep.mubr.bf16.mxu0 %v2655_v24  ;;  %v2740_v23 = vld [vmem:[%s2882_s22 + $0x38] ss:$20 sps:$4 sm:$0xff]   ;;  %v2741_v24 = vld [vmem:[%s2882_s22 + $0x174] ss:$20 sps:$4 sm:$0xff]  }
  0x2a   : > { %1261 = vmatprep.mubr.bf16.mxu1 %v2657_v25  ;;  %2548 = vmatprep.subr.bf16.mxu0 %v2682_v34  ;;  %v2743_v25 = vld [vmem:[%s2882_s22 + $0x60] ss:$20 sps:$4 sm:$0xff]  }
  0x2c   : > { %2417 = vmatpush3.bf16.msra.mxu1 %v2654_v26  ;;  %2549 = vmatpush3.bf16.msra.mxu0 %v2682_v34  ;;  %v2744_v26 = vld [vmem:[%s2882_s22 + $0x170] ss:$20 sps:$4 sm:$0xff]   ;;  %v2754_v34 = vld [vmem:[%s2882_s22 + $0x1c0] ss:$20 sps:$4 sm:$0xff]  }
  0x2d   : > { %2418 = vmatprep.subr.bf16.mxu1 %v2661_v28  ;;  %2550 = vmatprep.subr.bf16.mxu0 %v2704_v47  ;;  %v2746_v28 = vld [vmem:[%s2882_s22 + $0x19c] ss:$20 sps:$4 sm:$0xff]  }
  0x2f   : > { %1166 = vmatmul.mubr.bf16.gmra.mrb[4].mxu0 %v2659_v27  ;;  %1262 = vmatmul.mubr.bf16.gmra.mrb[4].mxu1 %v2660_v29  ;;  %v2745_v27 = vld [vmem:[%s2882_s22 + $0x88] ss:$20 sps:$4 sm:$0xff]   ;;  %v2748_v29 = vld [vmem:[%s2882_s22 + $0xb0] ss:$20 sps:$4 sm:$0xff]  }
  0x30   : > { %2419 = vmatpush3.bf16.msra.mxu1 %v2662_v30  ;;  %1173 = vmatprep.mubr.bf16.mxu0 %v2665_v32  ;;  %v2749_v30 = vld [vmem:[%s2882_s22 + $0x198] ss:$20 sps:$4 sm:$0xff]  }
  0x31   : > { %2420 = vmatprep.subr.bf16.mxu1 %v2663_v31  ;;  %1269 = vmatprep.mubr.bf16.mxu1 %v2667_v33  ;;  %v2750_v31 = vld [vmem:[%s2882_s22 + $0xd8] ss:$20 sps:$4 sm:$0xff]   ;;  %v2753_v33 = vld [vmem:[%s2882_s22 + $0x100] ss:$20 sps:$4 sm:$0xff]  }
  0x32   : > { %2551 = vmatpush3.bf16.msra.mxu0 %v2704_v47  ;;  %v2751_v32 = vld [vmem:[%s2882_s22 + $0x1c4] ss:$20 sps:$4 sm:$0xff]  }
  0x33   : > { %2552 = vmatprep.subr.bf16.mxu0 %v2723_v56  ;;  %v2770_v47 = vld [vmem:[%s2882_s22 + $0x218] ss:$20 sps:$4 sm:$0xff]  }
  0x34   : > { %2421 = vmatpush3.bf16.msra.mxu1 %v2664_v35  ;;  %v2755_v35 = vld [vmem:[%s2882_s22 + $0x128] ss:$20 sps:$4 sm:$0xff]  }
  0x35   : > { %2422 = vmatprep.subr.bf16.mxu1 %v2671_v37  ;;  %v2758_v37 = vld [vmem:[%s2882_s22 + $0x150] ss:$20 sps:$4 sm:$0xff]  }
  0x36   : > { %2553 = vmatpush3.bf16.msra.mxu0 %v2723_v56 }
  0x37   : > { %1174 = vmatmul.mubr.bf16.gmra.mrb[8].mxu0 %v2669_v36  ;;  %1270 = vmatmul.mubr.bf16.gmra.mrb[8].mxu1 %v2670_v38  ;;  %v2756_v36 = vld [vmem:[%s2882_s22 + $0x1ec] ss:$20 sps:$4 sm:$0xff]   ;;  %v2759_v38 = vld [vmem:[%s2882_s22 + $0x1e8] ss:$20 sps:$4 sm:$0xff]  }
  0x38   : > { %2423 = vmatpush3.bf16.msra.mxu1 %v2672_v39  ;;  %1181 = vmatprep.mubr.bf16.mxu0 %v2675_v41  ;;  %v2760_v39 = vld [vmem:[%s2882_s22 + $0x178] ss:$20 sps:$4 sm:$0xff]   ;;  %v2763_v41 = vld [vmem:[%s2882_s22 + $0x1a0] ss:$20 sps:$4 sm:$0xff]  }
  0x39   : > { %2424 = vmatprep.subr.bf16.mxu1 %v2673_v40  ;;  %1277 = vmatprep.mubr.bf16.mxu1 %v2677_v42  ;;  %v2761_v40 = vld [vmem:[%s2882_s22 + $0x214] ss:$20 sps:$4 sm:$0xff]   ;;  %v2764_v42 = vld [vmem:[%s2882_s22 + $0x210] ss:$20 sps:$4 sm:$0xff]  }
  0x3c   : > { %2425 = vmatpush3.bf16.msra.mxu1 %v2674_v43  ;;  %v2765_v43 = vld [vmem:[%s2882_s22 + $0x1c8] ss:$20 sps:$4 sm:$0xff]  }
  0x3d   : > { %2426 = vmatprep.subr.bf16.mxu1 %v2681_v46  ;;  %v2769_v46 = vld [vmem:[%s2882_s22 + $0x238] ss:$20 sps:$4 sm:$0xff]  }
  0x3f   : > { %1182 = vmatmul.mubr.bf16.gmra.mrb[12].mxu0 %v2679_v44  ;;  %1278 = vmatmul.mubr.bf16.gmra.mrb[12].mxu1 %v2680_v45  ;;  %v2766_v44 = vld [vmem:[%s2882_s22 + $0x23c] ss:$20 sps:$4 sm:$0xff]  }
  0x40   : > { %2427 = vmatpush3.bf16.msra.mxu1 %v2683_v48  ;;  %1189 = vmatprep.mubr.bf16.mxu0 %v2686_v50  ;;  %v2768_v45 = vld [vmem:[%s2882_s22 + $0x1f0] ss:$20 sps:$4 sm:$0xff]   ;;  %v2774_v50 = vld [vmem:[%s2882_s22 + $0x260] ss:$20 sps:$4 sm:$0xff]  }
  0x41   : > { %2428 = vmatprep.subr.bf16.mxu1 %v2684_v49  ;;  %1318 = vmatprep.mubr.bf16.mxu1 %v2690_v51  ;;  %v2771_v48 = vld [vmem:[%s2882_s22 + $0x264] ss:$20 sps:$4 sm:$0xff]   ;;  %v2773_v49 = vld [vmem:[%s2882_s22 + $0x240] ss:$20 sps:$4 sm:$0xff]   ;;  %v2775_v51 = vld [vmem:[%s2882_s22 + $0x268] ss:$20 sps:$4 sm:$0xff]  }
  0x44   : > { %2429 = vmatpush3.bf16.msra.mxu1 %v2685_v52 }
  0x47   : > { %1190 = vmatmul.mubr.bf16.gmra.mrb[16].mxu0 %v2691_v54  ;;  %1319 = vmatmul.mubr.bf16.vlgmr.msra.gmra.mrb[16].mxu1 %v2688_v53 }
  0x48   : > { %1197 = vmatprep.mubr.bf16.mxu0 %v2692_v55  ;;  %1326 = vmatprep.mubr.bf16.mxu1 %v2694_v57 }
  0x4f   : > { %1198 = vmatmul.mubr.bf16.gmra.mrb[20].mxu0 %v2696_v58  ;;  %1327 = vmatmul.mubr.bf16.gmra.mrb[20].mxu1 %v2697_v59 }
  0x50   : > { %1205 = vmatprep.mubr.bf16.mxu0 %v2698_v60  ;;  %1334 = vmatprep.mubr.bf16.mxu1 %v2700_v61 }
  0x57   : > { %1206 = vmatmul.mubr.bf16.gmra.mrb[24].mxu0 %v2702_v62  ;;  %1335 = vmatmul.mubr.bf16.gmra.mrb[24].mxu1 %v2703_v63 }
  0x58   : > { %1213 = vmatprep.mubr.bf16.mxu0 %v2705_v0  ;;  %1342 = vmatprep.mubr.bf16.mxu1 %v2707_v1 }
  0x5f   : > { %1214 = vmatmul.mubr.bf16.gmra.mrb[28].mxu0 %v2709_v2  ;;  %1343 = vmatmul.mubr.bf16.gmra.mrb[28].mxu1 %v2710_v3 }
  0x60   : > { %1221 = vmatprep.mubr.bf16.mxu0 %v2711_v4  ;;  %1350 = vmatprep.mubr.bf16.mxu1 %v2713_v5 }
  0x67   : > { %1222 = vmatmul.mubr.bf16.gmra.mrb[32].mxu0 %v2715_v6  ;;  %1351 = vmatmul.mubr.bf16.gmra.mrb[32].mxu1 %v2716_v7 }
  0x68   : > { %1229 = vmatprep.mubr.bf16.mxu0 %v2717_v8  ;;  %1358 = vmatprep.mubr.bf16.mxu1 %v2719_v9 }
  0x6f   : > { %1230 = vmatmul.mubr.bf16.gmra.mrb[36].mxu0 %v2721_v10  ;;  %1359 = vmatmul.mubr.bf16.gmra.mrb[36].mxu1 %v2722_v11 }
  0x70   : > { %1237 = vmatprep.mubr.bf16.mxu0 %v2724_v12  ;;  %1366 = vmatprep.mubr.bf16.mxu1 %v2726_v13 }
  0x77   : > { %1238 = vmatmul.mubr.bf16.gmra.mrb[40].mxu0 %v2728_v14  ;;  %1367 = vmatmul.mubr.bf16.gmra.mrb[40].mxu1 %v2729_v15 }
  0x78   : > { %1245 = vmatprep.mubr.bf16.mxu0 %v2730_v16  ;;  %1374 = vmatprep.mubr.bf16.mxu1 %v2732_v17 }
  0x7f   : > { %1246 = vmatmul.mubr.bf16.gmra.mrb[44].mxu0 %v2734_v18  ;;  %1375 = vmatmul.mubr.bf16.gmra.mrb[44].mxu1 %v2735_v19 }
  0x80   : > { %1382 = vmatprep.mubr.bf16.mxu1 %v2736_v20  ;;  %2554 = vmatprep.mubr.msk.bf16.mxu0 %vm1076_vm0, %v2738_v21 }
  0x87   : > { %1383 = vmatmul.mubr.bf16.gmra.mrb[48].mxu1 %v2739_v22  ;;  %2555 = vmatmul.mubr.msk.bf16.vlgmr.msra.gmra.mrb[48].mxu0 %vm1076_vm0, %v2740_v23 }
  0x88   : > { %1390 = vmatprep.mubr.bf16.mxu1 %v2741_v24  ;;  %2558 = vmatprep.mubr.msk.bf16.mxu0 %vm1076_vm0, %v2743_v25 }
  0x8f   : > { %1391 = vmatmul.mubr.bf16.gmra.mrb[52].mxu1 %v2744_v26  ;;  %2559 = vmatmul.mubr.msk.bf16.gmra.mrb[52].mxu0 %vm1076_vm0, %v2745_v27 }
  0x90   : > { %1398 = vmatprep.mubr.bf16.mxu1 %v2746_v28  ;;  %2562 = vmatprep.mubr.msk.bf16.mxu0 %vm1076_vm0, %v2748_v29 }
  0x97   : > { %1399 = vmatmul.mubr.bf16.gmra.mrb[56].mxu1 %v2749_v30  ;;  %2563 = vmatmul.mubr.msk.bf16.gmra.mrb[56].mxu0 %vm1076_vm0, %v2750_v31 }
  0x98   : > { %1406 = vmatprep.mubr.bf16.mxu1 %v2751_v32  ;;  %2566 = vmatprep.mubr.msk.bf16.mxu0 %vm1076_vm0, %v2753_v33 }
  0x9f   : > { %1407 = vmatmul.mubr.bf16.gmra.mrb[60].mxu1 %v2754_v34  ;;  %2567 = vmatmul.mubr.msk.bf16.gmra.mrb[60].mxu0 %vm1076_vm0, %v2755_v35 }
  0xa0   : > { %1414 = vmatprep.mubr.bf16.mxu1 %v2756_v36  ;;  %2570 = vmatprep.mubr.msk.bf16.mxu0 %vm1076_vm0, %v2758_v37  ;;  %v3086_v36 = vld [vmem:[%s3445_s2] ss:$0 sm:$0xff] }
  0xa7   : > { %1415 = vmatmul.mubr.bf16.gmra.mrb[64].mxu1 %v2759_v38  ;;  %2571 = vmatmul.mubr.msk.bf16.gmra.mrb[64].mxu0 %vm1076_vm0, %v2760_v39 }
  0xa8   : > { %1422 = vmatprep.mubr.bf16.mxu1 %v2761_v40  ;;  %2574 = vmatprep.mubr.msk.bf16.mxu0 %vm1076_vm0, %v2763_v41 }
  0xaf   : > { %1423 = vmatmul.mubr.bf16.gmra.mrb[68].mxu1 %v2764_v42  ;;  %2575 = vmatmul.mubr.msk.bf16.gmra.mrb[68].mxu0 %vm1076_vm0, %v2765_v43 }
  0xb0   : > { %1430 = vmatprep.mubr.bf16.mxu1 %v2766_v44  ;;  %2578 = vmatprep.mubr.msk.bf16.mxu0 %vm1076_vm0, %v2768_v45 }
  0xb7   : > { %1431 = vmatmul.mubr.bf16.gmra.mrb[72].mxu1 %v2769_v46  ;;  %2579 = vmatmul.mubr.msk.bf16.gmra.mrb[72].mxu0 %vm1076_vm0, %v2770_v47 }
  0xb8   : > { %1438 = vmatprep.mubr.bf16.mxu1 %v2771_v48  ;;  %2582 = vmatprep.mubr.msk.bf16.mxu0 %vm1076_vm0, %v2773_v49 }
  0xbf   : > { %1439 = vmatmul.mubr.bf16.gmra.mrb[76].mxu1 %v2774_v50  ;;  %2583 = vmatmul.mubr.msk.bf16.gmra.mrb[76].mxu0 %vm1076_vm0, %v2775_v51 }
  0xfa   : > { %v2318_v52 = vpop.f32.mrb[0].mxu0  ;;  %v2390_v53 = vpop.f32.mrb[0].mxu1 }
  0xfb   : > { %v2319_v54 = vpop.f32.mrb[1].mxu0  ;;  %v2391_v55 = vpop.f32.mrb[1].mxu1 }
  0xfc   : > { %v2320_v56 = vadd.f32 %v2319_v54, %v2318_v52  ;;  %v3061_v57 = vadd.f32 %v2391_v55, %v2390_v53  ;;  %v2321_v58 = vpop.f32.mrb[2].mxu0  ;;  %v2393_v59 = vpop.f32.mrb[2].mxu1  ;;  %v2800_v54 = vmov 0.0  }
  0xfd   : > { %v2322_v60 = vpop.f32.mrb[3].mxu0  ;;  %v2394_v61 = vpop.f32.mrb[3].mxu1  ;;  %1774 = vst.msk [vmem:[%s3103_s15] sm:$0x1] %vm1773_vm1, %v2800_v54  ;;  %1775 = vst.msk [vmem:[%s3109_s23] sm:$0x1] %vm1773_vm1, %v2800_v54 }
  0xfe   : > { %v2323_v62 = vadd.f32 %v2322_v60, %v2321_v58  ;;  %v3063_v63 = vadd.f32 %v2394_v61, %v2393_v59  ;;  %v1160_v42 = vadd.f32 %v2320_v56, %v3086_v36 }
 0x100   : > { %v1163_v49 = vadd.f32 %v2323_v62, %v3086_v36 }
 0x102   : > { %v2324_v0 = vpop.f32.mrb[4].mxu0  ;;  %v2396_v1 = vpop.f32.mrb[4].mxu1 }
 0x103   : > { %v2325_v2 = vpop.f32.mrb[5].mxu0  ;;  %v2397_v3 = vpop.f32.mrb[5].mxu1 }
 0x104   : > { %v2326_v4 = vadd.f32 %v2325_v2, %v2324_v0  ;;  %v3065_v5 = vadd.f32 %v2397_v3, %v2396_v1  ;;  %v2327_v6 = vpop.f32.mrb[6].mxu0  ;;  %v2399_v7 = vpop.f32.mrb[6].mxu1 }
 0x105   : > { %v2328_v8 = vpop.f32.mrb[7].mxu0  ;;  %v2400_v9 = vpop.f32.mrb[7].mxu1 }
 0x106   : > { %v2329_v10 = vadd.f32 %v2328_v8, %v2327_v6  ;;  %v3067_v11 = vadd.f32 %v2400_v9, %v2399_v7  ;;  %v1168_v60 = vadd.f32 %v2326_v4, %v3086_v36 }
 0x108   : > { %v1171_v6 = vadd.f32 %v2329_v10, %v3086_v36 }
 0x10a   : > { %v2330_v12 = vpop.f32.mrb[8].mxu0  ;;  %v2402_v13 = vpop.f32.mrb[8].mxu1 }
 0x10b   : > { %v2331_v14 = vpop.f32.mrb[9].mxu0  ;;  %v2403_v15 = vpop.f32.mrb[9].mxu1 }
 0x10c   : > { %v3069_v16 = vadd.f32 %v2331_v14, %v2330_v12  ;;  %v3071_v17 = vadd.f32 %v2403_v15, %v2402_v13  ;;  %v2333_v18 = vpop.f32.mrb[10].mxu0  ;;  %v2405_v19 = vpop.f32.mrb[10].mxu1 }
 0x10d   : > { %v2334_v20 = vpop.f32.mrb[11].mxu0  ;;  %v2406_v21 = vpop.f32.mrb[11].mxu1 }
 0x10e   : > { %v3073_v22 = vadd.f32 %v2334_v20, %v2333_v18  ;;  %v3075_v23 = vadd.f32 %v2406_v21, %v2405_v19  ;;  %v1176_v18 = vadd.f32 %v3069_v16, %v3086_v36 }
 0x112   : > { %v2336_v24 = vpop.f32.mrb[12].mxu0  ;;  %v2408_v25 = vpop.f32.mrb[12].mxu1 }
 0x113   : > { %v2337_v26 = vpop.f32.mrb[13].mxu0  ;;  %v2409_v27 = vpop.f32.mrb[13].mxu1 }
 0x114   : > { %v3077_v28 = vadd.f32 %v2337_v26, %v2336_v24  ;;  %v3079_v29 = vadd.f32 %v2409_v27, %v2408_v25  ;;  %v2339_v30 = vpop.f32.mrb[14].mxu0  ;;  %v2411_v31 = vpop.f32.mrb[14].mxu1  ;;  %v1179_v26 = vadd.f32 %v3073_v22, %v3086_v36 }
 0x115   : > { %v2340_v32 = vpop.f32.mrb[15].mxu0  ;;  %v2412_v33 = vpop.f32.mrb[15].mxu1 }
 0x116   : > { %v3081_v34 = vadd.f32 %v2340_v32, %v2339_v30  ;;  %v2413_v35 = vadd.f32 %v2412_v33, %v2411_v31 }
 0x118   : > { %v3089_v37 = vadd.f32 %v2413_v35, %v3086_v36 }
 0x11a   : > { %v2342_v38 = vpop.f32.mrb[16].mxu0  ;;  %v2430_v39 = vpop.f32.mrb[16].mxu1 }
 0x11b   : > { %v2343_v40 = vpop.f32.mrb[17].mxu0  ;;  %v2431_v41 = vpop.f32.mrb[17].mxu1 }
 0x11c   : > { %v3092_v43 = vadd.f32 %v2343_v40, %v2342_v38  ;;  %v2432_v44 = vadd.f32 %v2431_v41, %v2430_v39  ;;  %v2345_v45 = vpop.f32.mrb[18].mxu0  ;;  %v2433_v46 = vpop.f32.mrb[18].mxu1  ;;  %v1184_v39 = vadd.f32 %v3077_v28, %v3086_v36 }
 0x11d   : > { %v2346_v47 = vpop.f32.mrb[19].mxu0  ;;  %v2434_v48 = vpop.f32.mrb[19].mxu1 }
 0x11e   : > { %v3095_v50 = vadd.f32 %v2346_v47, %v2345_v45  ;;  %v2435_v51 = vadd.f32 %v2434_v48, %v2433_v46  ;;  %v3097_v52 = vadd.f32 %v2432_v44, %v1160_v42  ;;  %v1187_v46 = vadd.f32 %v3081_v34, %v3086_v36 }
 0x120   : > { %v3111_v53 = vadd.f32 %v2435_v51, %v1163_v49 }
 0x122   : > { %v2348_v55 = vpop.f32.mrb[20].mxu0  ;;  %v2436_v56 = vpop.f32.mrb[20].mxu1 }
 0x123   : > { %v2349_v58 = vpop.f32.mrb[21].mxu0  ;;  %v2437_v59 = vpop.f32.mrb[21].mxu1 }
 0x124   : > { %v3118_v61 = vadd.f32 %v2349_v58, %v2348_v55  ;;  %v2438_v62 = vadd.f32 %v2437_v59, %v2436_v56  ;;  %v2351_v0 = vpop.f32.mrb[22].mxu0  ;;  %v2439_v1 = vpop.f32.mrb[22].mxu1  ;;  %v1192_v58 = vadd.f32 %v3092_v43, %v3086_v36 }
 0x125   : > { %v2352_v2 = vpop.f32.mrb[23].mxu0  ;;  %v2440_v3 = vpop.f32.mrb[23].mxu1 }
 0x126   : > { %v3121_v7 = vadd.f32 %v2352_v2, %v2351_v0  ;;  %v2441_v8 = vadd.f32 %v2440_v3, %v2439_v1  ;;  %v3123_v9 = vadd.f32 %v2438_v62, %v1168_v60  ;;  %v1195_v2 = vadd.f32 %v3095_v50, %v3086_v36 }
 0x128   : > { %v3125_v12 = vadd.f32 %v2441_v8, %v1171_v6 }
 0x12a   : > { %v2354_v13 = vpop.f32.mrb[24].mxu0  ;;  %v2442_v14 = vpop.f32.mrb[24].mxu1 }
 0x12b   : > { %v2355_v15 = vpop.f32.mrb[25].mxu0  ;;  %v2443_v4 = vpop.f32.mrb[25].mxu1 }
 0x12c   : > { %v3129_v19 = vadd.f32 %v2355_v15, %v2354_v13  ;;  %v2444_v20 = vadd.f32 %v2443_v4, %v2442_v14  ;;  %v2357_v21 = vpop.f32.mrb[26].mxu0  ;;  %v2445_v24 = vpop.f32.mrb[26].mxu1 }
 0x12d   : > { %v2358_v10 = vpop.f32.mrb[27].mxu0  ;;  %v2446_v25 = vpop.f32.mrb[27].mxu1 }
 0x12e   : > { %v3133_v27 = vadd.f32 %v2358_v10, %v2357_v21  ;;  %v2447_v30 = vadd.f32 %v2446_v25, %v2445_v24  ;;  %v3135_v31 = vadd.f32 %v2444_v20, %v1176_v18  ;;  %v1200_v18 = vadd.f32 %v3118_v61, %v3086_v36 }
 0x130   : > { %v3137_v32 = vadd.f32 %v2447_v30, %v1179_v26  ;;  %v1203_v26 = vadd.f32 %v3121_v7, %v3086_v36 }
 0x132   : > { %v2360_v33 = vpop.f32.mrb[28].mxu0  ;;  %v2448_v35 = vpop.f32.mrb[28].mxu1 }
 0x133   : > { %v2361_v16 = vpop.f32.mrb[29].mxu0  ;;  %v2449_v38 = vpop.f32.mrb[29].mxu1 }
 0x134   : > { %v3141_v40 = vadd.f32 %v2361_v16, %v2360_v33  ;;  %v2450_v41 = vadd.f32 %v2449_v38, %v2448_v35  ;;  %v2363_v42 = vpop.f32.mrb[30].mxu0  ;;  %v2451_v44 = vpop.f32.mrb[30].mxu1 }
 0x135   : > { %v2364_v22 = vpop.f32.mrb[31].mxu0  ;;  %v2452_v45 = vpop.f32.mrb[31].mxu1 }
 0x136   : > { %v3145_v47 = vadd.f32 %v2364_v22, %v2363_v42  ;;  %v2453_v48 = vadd.f32 %v2452_v45, %v2451_v44  ;;  %v3147_v49 = vadd.f32 %v2450_v41, %v1184_v39  ;;  %v1208_v42 = vadd.f32 %v3129_v19, %v3086_v36 }
 0x138   : > { %v3149_v51 = vadd.f32 %v2453_v48, %v1187_v46 }
 0x13a   : > { %v2366_v54 = vpop.f32.mrb[32].mxu0  ;;  %v2454_v55 = vpop.f32.mrb[32].mxu1 }
 0x13b   : > { %v2367_v28 = vpop.f32.mrb[33].mxu0  ;;  %v2455_v56 = vpop.f32.mrb[33].mxu1 }
 0x13c   : > { %v3153_v59 = vadd.f32 %v2367_v28, %v2366_v54  ;;  %v2456_v60 = vadd.f32 %v2455_v56, %v2454_v55  ;;  %v2369_v62 = vpop.f32.mrb[34].mxu0  ;;  %v2457_v0 = vpop.f32.mrb[34].mxu1  ;;  %v1211_v54 = vadd.f32 %v3133_v27, %v3086_v36 }
 0x13d   : > { %v2370_v34 = vpop.f32.mrb[35].mxu0  ;;  %v2458_v1 = vpop.f32.mrb[35].mxu1 }
 0x13e   : > { %v3157_v3 = vadd.f32 %v2370_v34, %v2369_v62  ;;  %v2459_v6 = vadd.f32 %v2458_v1, %v2457_v0  ;;  %v3159_v8 = vadd.f32 %v2456_v60, %v1192_v58  ;;  %v1216_v34 = vadd.f32 %v3141_v40, %v3086_v36 }
 0x13f   : > { %v3194_v40 = vadd.f32 %v3061_v57, %v3086_v36 }
 0x140   : > { %v3161_v13 = vadd.f32 %v2459_v6, %v1195_v2 }
 0x142   : > { %v2372_v14 = vpop.f32.mrb[36].mxu0  ;;  %v2460_v15 = vpop.f32.mrb[36].mxu1 }
 0x143   : > { %v2373_v43 = vpop.f32.mrb[37].mxu0  ;;  %v2461_v4 = vpop.f32.mrb[37].mxu1 }
 0x144   : > { %v3165_v20 = vadd.f32 %v2373_v43, %v2372_v14  ;;  %v2462_v21 = vadd.f32 %v2461_v4, %v2460_v15  ;;  %v2375_v24 = vpop.f32.mrb[38].mxu0  ;;  %v2463_v10 = vpop.f32.mrb[38].mxu1  ;;  %v1219_v43 = vadd.f32 %v3145_v47, %v3086_v36 }
 0x145   : > { %v2376_v50 = vpop.f32.mrb[39].mxu0  ;;  %v2464_v25 = vpop.f32.mrb[39].mxu1 }
 0x146   : > { %v3169_v30 = vadd.f32 %v2376_v50, %v2375_v24  ;;  %v2465_v33 = vadd.f32 %v2464_v25, %v2463_v10  ;;  %v3171_v35 = vadd.f32 %v2462_v21, %v1200_v18  ;;  %v3198_v25 = vadd.f32 %v3063_v63, %v3086_v36 }
 0x148   : > { %v3173_v16 = vadd.f32 %v2465_v33, %v1203_v26 }
 0x14a   : > { %v2378_v38 = vpop.f32.mrb[40].mxu0  ;;  %v2466_v39 = vpop.f32.mrb[40].mxu1 }
 0x14b   : > { %v2379_v61 = vpop.f32.mrb[41].mxu0  ;;  %v2467_v41 = vpop.f32.mrb[41].mxu1 }
 0x14c   : > { %v2380_v44 = vadd.f32 %v2379_v61, %v2378_v38  ;;  %v2468_v22 = vadd.f32 %v2467_v41, %v2466_v39  ;;  %v2381_v45 = vpop.f32.mrb[42].mxu0  ;;  %v2469_v46 = vpop.f32.mrb[42].mxu1  ;;  %v3203_v38 = vadd.f32 %v3065_v5, %v3086_v36  ;;  %v3207_v39 = vadd.f32 %v3067_v11, %v3086_v36 }
 0x14d   : > { %v2382_v48 = vpop.f32.mrb[43].mxu0  ;;  %v2470_v7 = vpop.f32.mrb[43].mxu1  ;;  %v3217_v5 = vadd.f32 %v3071_v17, %v3086_v36  ;;  %v3221_v11 = vadd.f32 %v3075_v23, %v3086_v36  ;;  %v1232_v17 = vadd.f32 %v3165_v20, %v3086_v36  ;;  %v3232_v23 = vadd.f32 %v3169_v30, %v3086_v36 }
 0x14e   : > { %v2383_v55 = vadd.f32 %v2382_v48, %v2381_v45  ;;  %v2471_v28 = vadd.f32 %v2470_v7, %v2469_v46  ;;  %v3179_v56 = vadd.f32 %v2468_v22, %v1208_v42  ;;  %v1227_v46 = vadd.f32 %v3157_v3, %v3086_v36 }
 0x150   : > { %v3181_v58 = vadd.f32 %v2471_v28, %v1211_v54  ;;  %v3247_v20 = vadd.f32 %v2383_v55, %v3086_v36 }
 0x152   : > { %v2384_v60 = vpop.f32.mrb[44].mxu0  ;;  %v2472_v62 = vpop.f32.mrb[44].mxu1 }
 0x153   : > { %v2385_v0 = vpop.f32.mrb[45].mxu0  ;;  %v2473_v19 = vpop.f32.mrb[45].mxu1 }
 0x154   : > { %v2386_v1 = vadd.f32 %v2385_v0, %v2384_v60  ;;  %v2474_v2 = vadd.f32 %v2473_v19, %v2472_v62  ;;  %v2387_v6 = vpop.f32.mrb[46].mxu0  ;;  %v2475_v14 = vpop.f32.mrb[46].mxu1 }
 0x155   : > { %v2388_v15 = vpop.f32.mrb[47].mxu0  ;;  %v2476_v27 = vpop.f32.mrb[47].mxu1 }
 0x156   : > { %v2389_v4 = vadd.f32 %v2388_v15, %v2387_v6  ;;  %v2477_v18 = vadd.f32 %v2476_v27, %v2475_v14  ;;  %v3187_v21 = vadd.f32 %v2474_v2, %v1216_v34  ;;  %v3250_v30 = vadd.f32 %v2386_v1, %v3086_v36 }
 0x158   : > { %v3189_v24 = vadd.f32 %v2477_v18, %v1219_v43 }
 0x15a   : > { %v2478_v10 = vpop.f32.mrb[48].mxu1  ;;  %v2556_v50 = vpop.f32.mrb[48].mxu0 }
 0x15b   : > { %v1490_v47 = vadd.f32 %v2556_v50, %v3123_v9  ;;  %v2479_v26 = vpop.f32.mrb[49].mxu1  ;;  %v1481_v33 = vpop.f32.mrb[49].mxu0 }
 0x15c   : > { %v2480_v57 = vadd.f32 %v2479_v26, %v2478_v10  ;;  %v1482_v63 = vadd.f32 %v1481_v33, %v3097_v52  ;;  %v2481_v9 = vpop.f32.mrb[50].mxu1  ;;  %v2557_v61 = vpop.f32.mrb[50].mxu0  ;;  %v1224_v52 = vadd.f32 %v3153_v59, %v3086_v36 }
 0x15d   : > { %v2272_v41 = vpack.c.bf16 %v1490_v47, %v1490_v47  ;;  %v1493_v42 = vadd.f32 %v2557_v61, %v3125_v12  ;;  %v2482_v22 = vpop.f32.mrb[51].mxu1  ;;  %v1484_v45 = vpop.f32.mrb[51].mxu0  ;;  %v3235_v12 = vadd.f32 %v2380_v44, %v3086_v36  ;;  %v3253_v44 = vadd.f32 %v2389_v4, %v3086_v36 }
 0x15e   : > { %v2270_v48 = vpack.c.bf16 %v1482_v63, %v1482_v63  ;;  %v2483_v7 = vadd.f32 %v2482_v22, %v2481_v9  ;;  %v1851_v59 = vmul.f32 %v1482_v63, %v1482_v63  ;;  %v1485_v3 = vadd.f32 %v1484_v45, %v3111_v53 }
 0x15f   : > { %1739 = vst.msk [vmem:[%s3212_s26 + $0x8] sm:$0xf] %vm1736_vm3, %v2272_v41  ;;  %v2273_v54 = vpack.c.bf16 %v1493_v42, %v1493_v42  ;;  %v3242_v28 = vadd.f32 %v2480_v57, %v1224_v52  ;;  %v1853_v62 = vmul.f32 %v1490_v47, %v1490_v47  ;;  %v1778_v0 = vsel %vm1777_vm2, %v1482_v63, 0.0 }
 0x160   : > { %1737 = vst.msk [vmem:[%s3212_s26] sm:$0xf] %vm1736_vm3, %v2270_v48  ;;  %v3244_v60 = vadd.f32 %v2483_v7, %v1227_v46  ;;  %v2271_v53 = vpack.c.bf16 %v1485_v3, %v1485_v3  ;;  %v1779_v19 = vsel %vm1777_vm2, %v1485_v3, 0.0  ;;  %v1852_v34 = vmul.f32 %v1485_v3, %v1485_v3 }
 0x161   : > { %1740 = vst.msk [vmem:[%s3212_s26 + $0xc] sm:$0xf] %vm1736_vm3, %v2273_v54  ;;  %v1781_v55 = vsel %vm1777_vm2, %v1490_v47, 0.0  ;;  %v1854_v14 = vmul.f32 %v1493_v42, %v1493_v42  ;;  %v1780_v1 = vadd.f32 %v1779_v19, %v1778_v0  ;;  %v1883_v4 = vsel %vm1777_vm2, %v1851_v59, 0.0 }
 0x162   : > { %v2484_v2 = vpop.f32.mrb[52].mxu1  ;;  %v2560_v6 = vpop.f32.mrb[52].mxu0  ;;  %1738 = vst.msk [vmem:[%s3212_s26 + $0x4] sm:$0xf] %vm1736_vm3, %v2271_v53  ;;  %v1884_v18 = vsel %vm1777_vm2, %v1852_v34, 0.0  ;;  %v1886_v47 = vsel %vm1777_vm2, %v1853_v62, 0.0 }
 0x163   : > { %v1506_v15 = vadd.f32 %v2560_v6, %v3147_v49  ;;  %v2485_v27 = vpop.f32.mrb[53].mxu1  ;;  %v1497_v43 = vpop.f32.mrb[53].mxu0  ;;  %v1782_v57 = vadd.f32 %v1781_v55, %v1780_v1  ;;  %v1885_v63 = vadd.f32 %v1884_v18, %v1883_v4  ;;  %v1783_v41 = vsel %vm1777_vm2, %v1493_v42, 0.0 }
 0x164   : > { %v2486_v10 = vadd.f32 %v2485_v27, %v2484_v2  ;;  %v1498_v50 = vadd.f32 %v1497_v43, %v3135_v31  ;;  %v2487_v26 = vpop.f32.mrb[54].mxu1  ;;  %v2561_v33 = vpop.f32.mrb[54].mxu0  ;;  %v1888_v54 = vsel %vm1777_vm2, %v1854_v14, 0.0 }
 0x165   : > { %v2276_v49 = vpack.c.bf16 %v1506_v15, %v1506_v15  ;;  %v2488_v9 = vpop.f32.mrb[55].mxu1  ;;  %v1500_v61 = vpop.f32.mrb[55].mxu0  ;;  %v1887_v46 = vadd.f32 %v1886_v47, %v1885_v63  ;;  %v1784_v31 = vadd.f32 %v1783_v41, %v1782_v57  ;;  %v1509_v48 = vadd.f32 %v2561_v33, %v3149_v51 }
 0x166   : > { %v2274_v22 = vpack.c.bf16 %v1498_v50, %v1498_v50  ;;  %v1785_v45 = vsel %vm1777_vm2, %v1498_v50, 0.0  ;;  %v1855_v52 = vmul.f32 %v1498_v50, %v1498_v50  ;;  %v2489_v7 = vadd.f32 %v2488_v9, %v2487_v26 }
 0x167   : > { %1743 = vst.msk [vmem:[%s3212_s26 + $0x18] sm:$0xf] %vm1736_vm3, %v2276_v49  ;;  %v1501_v42 = vadd.f32 %v1500_v61, %v3137_v32  ;;  %v3277_v3 = vadd.f32 %v2486_v10, %v1232_v17  ;;  %v1857_v62 = vmul.f32 %v1506_v15, %v1506_v15  ;;  %v1786_v0 = vadd.f32 %v1785_v45, %v1784_v31 }
 0x168   : > { %1741 = vst.msk [vmem:[%s3212_s26 + $0x10] sm:$0xf] %vm1736_vm3, %v2274_v22  ;;  %v1890_v59 = vsel %vm1777_vm2, %v1855_v52, 0.0  ;;  %v1889_v53 = vadd.f32 %v1888_v54, %v1887_v46  ;;  %v2277_v19 = vpack.c.bf16 %v1509_v48, %v1509_v48  ;;  %v1789_v34 = vsel %vm1777_vm2, %v1506_v15, 0.0 }
 0x169   : > { %v2275_v51 = vpack.c.bf16 %v1501_v42, %v1501_v42  ;;  %v1787_v2 = vsel %vm1777_vm2, %v1501_v42, 0.0  ;;  %v1856_v6 = vmul.f32 %v1501_v42, %v1501_v42  ;;  %v3285_v4 = vadd.f32 %v2489_v7, %v3232_v23 }
 0x16a   : > { %v2490_v55 = vpop.f32.mrb[56].mxu1  ;;  %v2564_v14 = vpop.f32.mrb[56].mxu0  ;;  %v1891_v1 = vadd.f32 %v1890_v59, %v1889_v53  ;;  %1744 = vst.msk [vmem:[%s3212_s26 + $0x1c] sm:$0xf] %vm1736_vm3, %v2277_v19  ;;  %v1788_v27 = vadd.f32 %v1787_v2, %v1786_v0  ;;  %v1858_v18 = vmul.f32 %v1509_v48, %v1509_v48  ;;  %v1894_v47 = vsel %vm1777_vm2, %v1857_v62, 0.0 }
 0x16b   : > { %v1522_v32 = vadd.f32 %v2564_v14, %v3171_v35  ;;  %v2491_v17 = vpop.f32.mrb[57].mxu1  ;;  %v1513_v43 = vpop.f32.mrb[57].mxu0  ;;  %1742 = vst.msk [vmem:[%s3212_s26 + $0x14] sm:$0xf] %vm1736_vm3, %v2275_v51  ;;  %v1892_v15 = vsel %vm1777_vm2, %v1856_v6, 0.0  ;;  %v1791_v9 = vsel %vm1777_vm2, %v1509_v48, 0.0 }
 0x16c   : > { %v2492_v10 = vadd.f32 %v2491_v17, %v2490_v55  ;;  %v1514_v50 = vadd.f32 %v1513_v43, %v3159_v8  ;;  %v2493_v26 = vpop.f32.mrb[58].mxu1  ;;  %v2565_v33 = vpop.f32.mrb[58].mxu0  ;;  %v1790_v35 = vadd.f32 %v1789_v34, %v1788_v27  ;;  %v1893_v57 = vadd.f32 %v1892_v15, %v1891_v1 }
 0x16d   : > { %v2280_v63 = vpack.c.bf16 %v1522_v32, %v1522_v32  ;;  %v2494_v49 = vpop.f32.mrb[59].mxu1  ;;  %v1516_v23 = vpop.f32.mrb[59].mxu0  ;;  %v1525_v52 = vadd.f32 %v2565_v33, %v3173_v16  ;;  %v1896_v31 = vsel %vm1777_vm2, %v1858_v18, 0.0  ;;  %v1861_v59 = vmul.f32 %v1522_v32, %v1522_v32 }
 0x16e   : > { %v2278_v61 = vpack.c.bf16 %v1514_v50, %v1514_v50  ;;  %v1793_v41 = vsel %vm1777_vm2, %v1514_v50, 0.0  ;;  %v1859_v22 = vmul.f32 %v1514_v50, %v1514_v50  ;;  %v1895_v45 = vadd.f32 %v1894_v47, %v1893_v57 }
 0x16f   : > { %1747 = vst.msk [vmem:[%s3212_s26 + $0x28] sm:$0xf] %vm1736_vm3, %v2280_v63  ;;  %v1792_v8 = vadd.f32 %v1791_v9, %v1790_v35  ;;  %v2495_v46 = vadd.f32 %v2494_v49, %v2493_v26  ;;  %v1517_v48 = vadd.f32 %v1516_v23, %v3161_v13  ;;  %v3303_v54 = vadd.f32 %v2492_v10, %v3235_v12 }
 0x170   : > { %1745 = vst.msk [vmem:[%s3212_s26 + $0x20] sm:$0xf] %vm1736_vm3, %v2278_v61  ;;  %v1898_v7 = vsel %vm1777_vm2, %v1859_v22, 0.0  ;;  %v1897_v62 = vadd.f32 %v1896_v31, %v1895_v45  ;;  %v2281_v0 = vpack.c.bf16 %v1525_v52, %v1525_v52  ;;  %v1797_v16 = vsel %vm1777_vm2, %v1522_v32, 0.0 }
 0x171   : > { %v1794_v42 = vadd.f32 %v1793_v41, %v1792_v8  ;;  %v2279_v53 = vpack.c.bf16 %v1517_v48, %v1517_v48  ;;  %v1795_v19 = vsel %vm1777_vm2, %v1517_v48, 0.0  ;;  %v1860_v34 = vmul.f32 %v1517_v48, %v1517_v48 }
 0x172   : > { %v2496_v51 = vpop.f32.mrb[60].mxu1  ;;  %v2568_v2 = vpop.f32.mrb[60].mxu0  ;;  %v1899_v6 = vadd.f32 %v1898_v7, %v1897_v62  ;;  %1748 = vst.msk [vmem:[%s3212_s26 + $0x2c] sm:$0xf] %vm1736_vm3, %v2281_v0  ;;  %v3311_v1 = vadd.f32 %v2495_v46, %v3247_v20  ;;  %v1862_v27 = vmul.f32 %v1525_v52, %v1525_v52  ;;  %v1902_v10 = vsel %vm1777_vm2, %v1861_v59, 0.0 }
 0x173   : > { %v1796_v13 = vadd.f32 %v1795_v19, %v1794_v42  ;;  %v1538_v12 = vadd.f32 %v2568_v2, %v3187_v21  ;;  %v2497_v55 = vpop.f32.mrb[61].mxu1  ;;  %v1529_v14 = vpop.f32.mrb[61].mxu0  ;;  %1746 = vst.msk [vmem:[%s3212_s26 + $0x24] sm:$0xf] %vm1736_vm3, %v2279_v53  ;;  %v1900_v32 = vsel %vm1777_vm2, %v1860_v34, 0.0  ;;  %v1799_v47 = vsel %vm1777_vm2, %v1525_v52, 0.0 }
 0x174   : > { %v2498_v17 = vadd.f32 %v2497_v55, %v2496_v51  ;;  %v1530_v43 = vadd.f32 %v1529_v14, %v3179_v56  ;;  %v2499_v18 = vpop.f32.mrb[62].mxu1  ;;  %v2569_v15 = vpop.f32.mrb[62].mxu0  ;;  %v1901_v50 = vadd.f32 %v1900_v32, %v1899_v6  ;;  %v1904_v61 = vsel %vm1777_vm2, %v1862_v27, 0.0 }
 0x175   : > { %v1798_v21 = vadd.f32 %v1797_v16, %v1796_v13  ;;  %v2284_v26 = vpack.c.bf16 %v1538_v12, %v1538_v12  ;;  %v2500_v33 = vpop.f32.mrb[63].mxu1  ;;  %v1532_v20 = vpop.f32.mrb[63].mxu0  ;;  %v1541_v23 = vadd.f32 %v2569_v15, %v3189_v24  ;;  %v1865_v8 = vmul.f32 %v1538_v12, %v1538_v12 }
 0x176   : > { %v2282_v35 = vpack.c.bf16 %v1530_v43, %v1530_v43  ;;  %v1801_v57 = vsel %vm1777_vm2, %v1530_v43, 0.0  ;;  %v1863_v63 = vmul.f32 %v1530_v43, %v1530_v43  ;;  %v1903_v49 = vadd.f32 %v1902_v10, %v1901_v50 }
 0x177   : > { %1751 = vst.msk [vmem:[%s3212_s26 + $0x38] sm:$0xf] %vm1736_vm3, %v2284_v26  ;;  %v1800_v56 = vadd.f32 %v1799_v47, %v1798_v21  ;;  %v2501_v9 = vadd.f32 %v2500_v33, %v2499_v18  ;;  %v1533_v22 = vadd.f32 %v1532_v20, %v3181_v58  ;;  %v1409_v45 = vadd.f32 %v2498_v17, %v3250_v30 }
 0x178   : > { %1749 = vst.msk [vmem:[%s3212_s26 + $0x30] sm:$0xf] %vm1736_vm3, %v2282_v35  ;;  %v1906_v41 = vsel %vm1777_vm2, %v1863_v63, 0.0  ;;  %v1905_v46 = vadd.f32 %v1904_v61, %v1903_v49  ;;  %v2285_v31 = vpack.c.bf16 %v1541_v23, %v1541_v23  ;;  %v1805_v7 = vsel %vm1777_vm2, %v1538_v12, 0.0 }
 0x179   : > { %v1802_v52 = vadd.f32 %v1801_v57, %v1800_v56  ;;  %v2283_v24 = vpack.c.bf16 %v1533_v22, %v1533_v22  ;;  %v1803_v48 = vsel %vm1777_vm2, %v1533_v22, 0.0  ;;  %v1864_v59 = vmul.f32 %v1533_v22, %v1533_v22 }
 0x17a   : > { %v2502_v42 = vpop.f32.mrb[64].mxu1  ;;  %v2572_v62 = vpop.f32.mrb[64].mxu0  ;;  %v1907_v0 = vadd.f32 %v1906_v41, %v1905_v46  ;;  %1752 = vst.msk [vmem:[%s3212_s26 + $0x3c] sm:$0xf] %vm1736_vm3, %v2285_v31  ;;  %v3335_v19 = vadd.f32 %v2501_v9, %v3253_v44  ;;  %v1866_v34 = vmul.f32 %v1541_v23, %v1541_v23  ;;  %v1910_v55 = vsel %vm1777_vm2, %v1865_v8, 0.0 }
 0x17b   : > { %v1804_v16 = vadd.f32 %v1803_v48, %v1802_v52  ;;  %v1554_v58 = vadd.f32 %v2572_v62, %v3277_v3  ;;  %v2503_v30 = vpop.f32.mrb[65].mxu1  ;;  %v1545_v53 = vpop.f32.mrb[65].mxu0  ;;  %1750 = vst.msk [vmem:[%s3212_s26 + $0x34] sm:$0xf] %vm1736_vm3, %v2283_v24  ;;  %v1908_v51 = vsel %vm1777_vm2, %v1864_v59, 0.0  ;;  %v1807_v17 = vsel %vm1777_vm2, %v1541_v23, 0.0 }
 0x17c   : > { %v2504_v2 = vadd.f32 %v2503_v30, %v2502_v42  ;;  %v1546_v6 = vadd.f32 %v1545_v53, %v3242_v28  ;;  %v2505_v13 = vpop.f32.mrb[66].mxu1  ;;  %v2573_v12 = vpop.f32.mrb[66].mxu0  ;;  %v1909_v14 = vadd.f32 %v1908_v51, %v1907_v0  ;;  %v1912_v26 = vsel %vm1777_vm2, %v1866_v34, 0.0 }
 0x17d   : > { %v1806_v3 = vadd.f32 %v1805_v7, %v1804_v16  ;;  %v2288_v27 = vpack.c.bf16 %v1554_v58, %v1554_v58  ;;  %v2506_v32 = vpop.f32.mrb[67].mxu1  ;;  %v1548_v44 = vpop.f32.mrb[67].mxu0  ;;  %v1557_v21 = vadd.f32 %v2573_v12, %v3285_v4  ;;  %v1869_v35 = vmul.f32 %v1554_v58, %v1554_v58 }
 0x17e   : > { %v2286_v43 = vpack.c.bf16 %v1546_v6, %v1546_v6  ;;  %v1809_v18 = vsel %vm1777_vm2, %v1546_v6, 0.0  ;;  %v1867_v15 = vmul.f32 %v1546_v6, %v1546_v6  ;;  %v1911_v10 = vadd.f32 %v1910_v55, %v1909_v14 }
 0x17f   : > { %1755 = vst.msk [vmem:[%s3212_s26 + $0x48] sm:$0xf] %vm1736_vm3, %v2288_v27  ;;  %v1808_v28 = vadd.f32 %v1807_v17, %v1806_v3  ;;  %v2507_v50 = vadd.f32 %v2506_v32, %v2505_v13  ;;  %v1549_v20 = vadd.f32 %v1548_v44, %v3244_v60  ;;  %v3353_v47 = vadd.f32 %v2504_v2, %v3194_v40 }
 0x180   : > { %1753 = vst.msk [vmem:[%s3212_s26 + $0x40] sm:$0xf] %vm1736_vm3, %v2286_v43  ;;  %v1914_v33 = vsel %vm1777_vm2, %v1867_v15, 0.0  ;;  %v1913_v63 = vadd.f32 %v1912_v26, %v1911_v10  ;;  %v2289_v49 = vpack.c.bf16 %v1557_v21, %v1557_v21  ;;  %v1813_v4 = vsel %vm1777_vm2, %v1554_v58, 0.0 }
 0x181   : > { %v1810_v57 = vadd.f32 %v1809_v18, %v1808_v28  ;;  %v2287_v56 = vpack.c.bf16 %v1549_v20, %v1549_v20  ;;  %v1811_v23 = vsel %vm1777_vm2, %v1549_v20, 0.0  ;;  %v1868_v9 = vmul.f32 %v1549_v20, %v1549_v20 }
 0x182   : > { %v2508_v61 = vpop.f32.mrb[68].mxu1  ;;  %v2576_v41 = vpop.f32.mrb[68].mxu0  ;;  %v1915_v22 = vadd.f32 %v1914_v33, %v1913_v63  ;;  %1756 = vst.msk [vmem:[%s3212_s26 + $0x4c] sm:$0xf] %vm1736_vm3, %v2289_v49  ;;  %v3360_v46 = vadd.f32 %v2507_v50, %v3198_v25  ;;  %v1870_v31 = vmul.f32 %v1557_v21, %v1557_v21  ;;  %v1918_v62 = vsel %vm1777_vm2, %v1869_v35, 0.0 }
 0x183   : > { %v1812_v60 = vadd.f32 %v1811_v23, %v1810_v57  ;;  %v1570_v8 = vadd.f32 %v2576_v41, %v1409_v45  ;;  %v2509_v40 = vpop.f32.mrb[69].mxu1  ;;  %v1561_v52 = vpop.f32.mrb[69].mxu0  ;;  %1754 = vst.msk [vmem:[%s3212_s26 + $0x44] sm:$0xf] %vm1736_vm3, %v2287_v56  ;;  %v1916_v7 = vsel %vm1777_vm2, %v1868_v9, 0.0  ;;  %v1815_v30 = vsel %vm1777_vm2, %v1557_v21, 0.0 }
 0x184   : > { %v2510_v24 = vadd.f32 %v2509_v40, %v2508_v61  ;;  %v1562_v48 = vadd.f32 %v1561_v52, %v3303_v54  ;;  %v2511_v59 = vpop.f32.mrb[70].mxu1  ;;  %v2577_v42 = vpop.f32.mrb[70].mxu0  ;;  %v1917_v0 = vadd.f32 %v1916_v7, %v1915_v22  ;;  %v1920_v12 = vsel %vm1777_vm2, %v1870_v31, 0.0 }
 0x185   : > { %v1814_v45 = vadd.f32 %v1813_v4, %v1812_v60  ;;  %v2292_v16 = vpack.c.bf16 %v1570_v8, %v1570_v8  ;;  %v2512_v58 = vpop.f32.mrb[71].mxu1  ;;  %v1564_v25 = vpop.f32.mrb[71].mxu0  ;;  %v1573_v6 = vadd.f32 %v2577_v42, %v3335_v19  ;;  %v1873_v27 = vmul.f32 %v1570_v8, %v1570_v8 }
 0x186   : > { %v2290_v53 = vpack.c.bf16 %v1562_v48, %v1562_v48  ;;  %v1817_v34 = vsel %vm1777_vm2, %v1562_v48, 0.0  ;;  %v1871_v51 = vmul.f32 %v1562_v48, %v1562_v48  ;;  %v1919_v2 = vadd.f32 %v1918_v62, %v1917_v0 }
 0x187   : > { %1759 = vst.msk [vmem:[%s3212_s26 + $0x58] sm:$0xf] %vm1736_vm3, %v2292_v16  ;;  %v1816_v54 = vadd.f32 %v1815_v30, %v1814_v45  ;;  %v2513_v13 = vadd.f32 %v2512_v58, %v2511_v59  ;;  %v1565_v3 = vadd.f32 %v1564_v25, %v3311_v1  ;;  %v1425_v14 = vadd.f32 %v2510_v24, %v3203_v38 }
 0x188   : > { %1757 = vst.msk [vmem:[%s3212_s26 + $0x50] sm:$0xf] %vm1736_vm3, %v2290_v53  ;;  %v1922_v55 = vsel %vm1777_vm2, %v1871_v51, 0.0  ;;  %v1921_v44 = vadd.f32 %v1920_v12, %v1919_v2  ;;  %v2293_v17 = vpack.c.bf16 %v1573_v6, %v1573_v6  ;;  %v1821_v43 = vsel %vm1777_vm2, %v1570_v8, 0.0 }
 0x189   : > { %v1818_v32 = vadd.f32 %v1817_v34, %v1816_v54  ;;  %v2291_v19 = vpack.c.bf16 %v1565_v3, %v1565_v3  ;;  %v1819_v18 = vsel %vm1777_vm2, %v1565_v3, 0.0  ;;  %v1872_v15 = vmul.f32 %v1565_v3, %v1565_v3 }
 0x18a   : > { %v2514_v10 = vpop.f32.mrb[72].mxu1  ;;  %v2580_v28 = vpop.f32.mrb[72].mxu0  ;;  %v1923_v21 = vadd.f32 %v1922_v55, %v1921_v44  ;;  %1760 = vst.msk [vmem:[%s3212_s26 + $0x5c] sm:$0xf] %vm1736_vm3, %v2293_v17  ;;  %v1428_v33 = vadd.f32 %v2513_v13, %v3207_v39  ;;  %v1874_v20 = vmul.f32 %v1573_v6, %v1573_v6  ;;  %v1926_v56 = vsel %vm1777_vm2, %v1873_v27, 0.0 }
 0x18b   : > { %v1820_v50 = vadd.f32 %v1819_v18, %v1818_v32  ;;  %v1586_v1 = vadd.f32 %v2580_v28, %v1425_v14  ;;  %v2515_v26 = vpop.f32.mrb[73].mxu1  ;;  %v1577_v38 = vpop.f32.mrb[73].mxu0  ;;  %1758 = vst.msk [vmem:[%s3212_s26 + $0x54] sm:$0xf] %vm1736_vm3, %v2291_v19  ;;  %v1924_v35 = vsel %vm1777_vm2, %v1872_v15, 0.0  ;;  %v1823_v39 = vsel %vm1777_vm2, %v1573_v6, 0.0 }
 0x18c   : > { %v2516_v57 = vadd.f32 %v2515_v26, %v2514_v10  ;;  %v1578_v63 = vadd.f32 %v1577_v38, %v3353_v47  ;;  %v2517_v49 = vpop.f32.mrb[74].mxu1  ;;  %v2581_v4 = vpop.f32.mrb[74].mxu0  ;;  %v1925_v9 = vadd.f32 %v1924_v35, %v1923_v21  ;;  %v1928_v24 = vsel %vm1777_vm2, %v1874_v20, 0.0 }
 0x18d   : > { %v1822_v23 = vadd.f32 %v1821_v43, %v1820_v50  ;;  %v2296_v61 = vpack.c.bf16 %v1586_v1, %v1586_v1  ;;  %v2518_v41 = vpop.f32.mrb[75].mxu1  ;;  %v1580_v22 = vpop.f32.mrb[75].mxu0  ;;  %v1589_v31 = vadd.f32 %v2581_v4, %v1428_v33  ;;  %v1877_v62 = vmul.f32 %v1586_v1, %v1586_v1 }
 0x18e   : > { %v2294_v60 = vpack.c.bf16 %v1578_v63, %v1578_v63  ;;  %v1825_v8 = vsel %vm1777_vm2, %v1578_v63, 0.0  ;;  %v1875_v40 = vmul.f32 %v1578_v63, %v1578_v63  ;;  %v1927_v52 = vadd.f32 %v1926_v56, %v1925_v9 }
 0x18f   : > { %1763 = vst.msk [vmem:[%s3212_s26 + $0x68] sm:$0xf] %vm1736_vm3, %v2296_v61  ;;  %v1824_v47 = vadd.f32 %v1823_v39, %v1822_v23  ;;  %v2519_v7 = vadd.f32 %v2518_v41, %v2517_v49  ;;  %v1581_v59 = vadd.f32 %v1580_v22, %v3360_v46  ;;  %v1433_v42 = vadd.f32 %v2516_v57, %v3217_v5 }
 0x190   : > { %1761 = vst.msk [vmem:[%s3212_s26 + $0x60] sm:$0xf] %vm1736_vm3, %v2294_v60  ;;  %v1930_v48 = vsel %vm1777_vm2, %v1875_v40, 0.0  ;;  %v1929_v0 = vadd.f32 %v1928_v24, %v1927_v52  ;;  %v2297_v16 = vpack.c.bf16 %v1589_v31, %v1589_v31  ;;  %v1280_v58 = vadd.f32 %v3079_v29, %v3086_v36 }
 0x191   : > { %v1826_v45 = vadd.f32 %v1825_v8, %v1824_v47  ;;  %v2295_v25 = vpack.c.bf16 %v1581_v59, %v1581_v59  ;;  %v1827_v30 = vsel %vm1777_vm2, %v1581_v59, 0.0  ;;  %v1876_v53 = vmul.f32 %v1581_v59, %v1581_v59 }
 0x192   : > { %v2520_v34 = vpop.f32.mrb[76].mxu1  ;;  %v2584_v51 = vpop.f32.mrb[76].mxu0  ;;  %v1829_v2 = vsel %vm1777_vm2, %v1586_v1, 0.0  ;;  %v1931_v54 = vadd.f32 %v1930_v48, %v1929_v0  ;;  %1764 = vst.msk [vmem:[%s3212_s26 + $0x6c] sm:$0xf] %vm1736_vm3, %v2297_v16  ;;  %v1436_v13 = vadd.f32 %v2519_v7, %v3221_v11  ;;  %v1878_v12 = vmul.f32 %v1589_v31, %v1589_v31 }
 0x193   : > { %v1828_v5 = vadd.f32 %v1827_v30, %v1826_v45  ;;  %v2521_v46 = vpop.f32.mrb[77].mxu1  ;;  %v1593_v6 = vpop.f32.mrb[77].mxu0  ;;  %1762 = vst.msk [vmem:[%s3212_s26 + $0x64] sm:$0xf] %vm1736_vm3, %v2295_v25  ;;  %v1932_v29 = vsel %vm1777_vm2, %v1876_v53, 0.0  ;;  %v1934_v27 = vsel %vm1777_vm2, %v1877_v62, 0.0 }
 0x194   : > { %v2522_v36 = vadd.f32 %v2521_v46, %v2520_v34  ;;  %v1594_v55 = vadd.f32 %v1593_v6, %v1433_v42  ;;  %v2523_v3 = vpop.f32.mrb[78].mxu1  ;;  %v2585_v14 = vpop.f32.mrb[78].mxu0  ;;  %v1831_v32 = vsel %vm1777_vm2, %v1589_v31, 0.0  ;;  %v1933_v17 = vadd.f32 %v1932_v29, %v1931_v54  ;;  %v1776_v30 = vld [vmem:[%s3103_s15] sm:$0x1] }
 0x195   : > { %v1830_v44 = vadd.f32 %v1829_v2, %v1828_v5  ;;  %v2524_v43 = vpop.f32.mrb[79].mxu1  ;;  %v1596_v19 = vpop.f32.mrb[79].mxu0  ;;  %v1936_v26 = vsel %vm1777_vm2, %v1878_v12, 0.0  ;;  %v1850_v54 = vld [vmem:[%s3109_s23] sm:$0x1] }
 0x196   : > { %v1441_v18 = vadd.f32 %v2522_v36, %v1280_v58  ;;  %v2298_v11 = vpack.c.bf16 %v1594_v55, %v1594_v55  ;;  %v1833_v15 = vsel %vm1777_vm2, %v1594_v55, 0.0  ;;  %v1879_v10 = vmul.f32 %v1594_v55, %v1594_v55 }
 0x197   : > { %v1935_v28 = vadd.f32 %v1934_v27, %v1933_v17  ;;  %v1832_v21 = vadd.f32 %v1831_v32, %v1830_v44  ;;  %v2525_v50 = vadd.f32 %v2524_v43, %v2523_v3  ;;  %v1597_v1 = vadd.f32 %v1596_v19, %v1436_v13 }
 0x198   : > { %v1602_v38 = vadd.f32 %v2584_v51, %v1441_v18  ;;  %1765 = vst.msk [vmem:[%s3212_s26 + $0x70] sm:$0xf] %vm1736_vm3, %v2298_v11  ;;  %v1938_v33 = vsel %vm1777_vm2, %v1879_v10, 0.0 }
 0x199   : > { %v1834_v20 = vadd.f32 %v1833_v15, %v1832_v21  ;;  %v1937_v35 = vadd.f32 %v1936_v26, %v1935_v28  ;;  %v1444_v57 = vadd.f32 %v2525_v50, %v3089_v37  ;;  %v2299_v63 = vpack.c.bf16 %v1597_v1, %v1597_v1 }
 0x19a   : > { %v2300_v49 = vpack.c.bf16 %v1602_v38, %v1602_v38  ;;  %v1881_v4 = vmul.f32 %v1602_v38, %v1602_v38  ;;  %v1835_v56 = vsel %vm1777_vm2, %v1597_v1, 0.0  ;;  %v1837_v23 = vsel %vm1777_vm2, %v1602_v38, 0.0 }
 0x19b   : > { %v1939_v9 = vadd.f32 %v1938_v33, %v1937_v35  ;;  %v1605_v61 = vadd.f32 %v2585_v14, %v1444_v57  ;;  %1766 = vst.msk [vmem:[%s3212_s26 + $0x74] sm:$0xf] %vm1736_vm3, %v2299_v63  ;;  %v1836_v41 = vadd.f32 %v1835_v56, %v1834_v20  ;;  %v1880_v22 = vmul.f32 %v1597_v1, %v1597_v1 }
 0x19c   : > { %1767 = vst.msk [vmem:[%s3212_s26 + $0x78] sm:$0xf] %vm1736_vm3, %v2300_v49  ;;  %v1942_v52 = vsel %vm1777_vm2, %v1881_v4, 0.0 }
 0x19d   : > { %v2301_v39 = vpack.c.bf16 %v1605_v61, %v1605_v61  ;;  %v1839_v60 = vsel %vm1777_vm2, %v1605_v61, 0.0  ;;  %v1882_v37 = vmul.f32 %v1605_v61, %v1605_v61  ;;  %v1838_v8 = vadd.f32 %v1837_v23, %v1836_v41 }
 0x19e   : > { %v1940_v40 = vsel %vm1777_vm2, %v1880_v22, 0.0 }
 0x19f   : > { %1768 = vst.msk [vmem:[%s3212_s26 + $0x7c] sm:$0xf] %vm1736_vm3, %v2301_v39  ;;  %v1944_v47 = vsel %vm1777_vm2, %v1882_v37, 0.0  ;;  %v1840_v31 = vadd.f32 %v1839_v60, %v1838_v8  ;;  %v1941_v7 = vadd.f32 %v1940_v40, %v1939_v9 }
 0x1a1   : > { %v1841_v24 = vrot.slane %v1840_v31, 4  ;;  %v1943_v48 = vadd.f32 %v1942_v52, %v1941_v7 }
 0x1a3   : > { %v1842_v59 = vadd.f32 %v1841_v24, %v1840_v31  ;;  %v1945_v42 = vadd.f32 %v1944_v47, %v1943_v48 }
 0x1a5   : > { %v1843_v62 = vrot.slane %v1842_v59, 2  ;;  %v1946_v45 = vrot.slane %v1945_v42, 4 }
 0x1a7   : > { %v1844_v0 = vadd.f32 %v1843_v62, %v1842_v59  ;;  %v1947_v16 = vadd.f32 %v1946_v45, %v1945_v42 }
 0x1a9   : > { %v1845_v58 = vrot.slane %v1844_v0, 1  ;;  %v1948_v25 = vrot.slane %v1947_v16, 2 }
 0x1ab   : > { %v1846_v53 = vadd.f32 %v1845_v58, %v1844_v0  ;;  %v1949_v34 = vadd.f32 %v1948_v25, %v1947_v16 }
 0x1ad   : > { %v1847_v51 = vadd.f32 %v1846_v53, %v1776_v30  ;;  %v1950_v2 = vrot.slane %v1949_v34, 1 }
 0x1af   : > { %1849 = vst.msk [vmem:[%s3103_s15] sm:$0x1] %vm1773_vm1, %v1847_v51  ;;  %v1951_v5 = vadd.f32 %v1950_v2, %v1949_v34 }
 0x1b1   : > { %v1952_v46 = vadd.f32 %v1951_v5, %v1850_v54 }
 0x1b3   : > { %1953 = vst.msk [vmem:[%s3109_s23] sm:$0x1] %vm1773_vm1, %v1952_v46 }
 0x1b4 PF: > { %s16_s20 = sadd.s32 1, %s2798_s20   ;;  %s3449_s18 = smov %s2794_s19 }
 0x1b5   : > { %p13_p5 = scmp.ge.s32.totalorder %s16_s20, 4   ;;  %s3450_s19 = smov %s3452_s21 }
 0x1b7   :  { %15 = sbr.rel (!%p13_p5) target bundleno = 2 (0x2), region = 90 }

// kernel: transformer_net_forward.61
= control target key start
LH: loop header
LB: loop body
LE: loop exit
PB: predicated region body
PF: predicated region fallthrough
CT: control target
= control target key end

     0   :  { %s7936_s12 = smov 0   ;;  %s7938_s13 = smov 0   ;;  %s9843_s0 = inlined_call_operand.vmem [shape: bf16[2,256,2592], index: 0, kind: input, shape index: {}]   ;;  %s9844_s1 = inlined_call_operand.vmem [shape: bf16[2592,3], index: 1, kind: input, shape index: {}]   ;;  %s9845_s2 = inlined_call_operand.vmem [shape: f32[1,3], index: 2, kind: input, shape index: {}]   ;;  %s9846_s3 = inlined_call_operand.vmem [shape: f32[2,256,3], index: 3, kind: output, shape index: {}]  }
   0x1   :  { %s7940_s14 = smov 0  }
   0x2 LB: > { %s25_s15 = sadd.s32 1, %s7910_s13  ;;  %p5496_p0 = scmp.ge.s32.totalorder %s7914_s14, 1  ;;  %s7914_s14 = sphi %s7940_s14, %s13_s14   ;;  %s7910_s13 = sphi %s7938_s13, %s9848_s13   ;;  %s7906_s12 = sphi %s7936_s12, %s9847_s12  }
   0x3   : > { %p27_p1 = scmp.ge.s32.totalorder %s25_s15, 2  ;;  %p159_p2 = scmp.lt.s32.totalorder %s7914_s14, 3 }
   0x5   : > { %s9850_s15 = smov (%p27_p1, %s25_s15), 0  ;;  %p160_p3 = pnand %p5496_p0, %p159_p2 }
   0x6   : > { %v7233_v0 = vld [vmem:[%s9844_s1 + $0x40] sm:$0xff] (!%p160_p3)   ;;  %v7235_v2 = vld [vmem:[%s9844_s1 + $0x48] sm:$0xff] (!%p160_p3)   ;;  %p193_p4 = scmp.lt.s32.totalorder (!%p160_p3), %s7906_s12, 1  ;;  %v7237_v4 = vld [vmem:[%s9844_s1 + $0x50] sm:$0xff] (!%p160_p3)   ;;  %vm3549_vm0 = vcmask (!%p160_p3), 261120   ;;  %vm5369_vm1 = vcmask (!%p160_p3), 23552  }
   0x7   : > { %163 = sbr.rel (%p160_p3) target bundleno = 925 (0x39d), region = 32  ;;  %v7234_v1 = vld [vmem:[%s9844_s1] sm:$0xff] (!%p160_p3)   ;;  %6018 = vmatprep.subr.bf16.mxu0 (!%p160_p3), %v7233_v0  ;;  %7192 = vmatprep.subr.bf16.mxu1 (!%p160_p3), %v7233_v0  ;;  %v7236_v3 = vld [vmem:[%s9844_s1 + $0x8] sm:$0xff] (!%p160_p3)   ;;  %v7238_v5 = vld [vmem:[%s9844_s1 + $0x10] sm:$0xff] (!%p160_p3)  }
   0x8   : > { %6019 = vmatpush3.bf16.msra.mxu0 (!%p160_p3), %v7234_v1  ;;  %7200 = vmatpush3.bf16.msra.mxu1 (!%p160_p3), %v7234_v1  ;;  %v7239_v6 = vld [vmem:[%s9844_s1 + $0x58] sm:$0xff] (!%p160_p3)   ;;  %v7241_v8 = vld [vmem:[%s9844_s1 + $0x60] sm:$0xff] (!%p160_p3)   ;;  %v7243_v10 = vld [vmem:[%s9844_s1 + $0x68] sm:$0xff] (!%p160_p3)  }
   0x9   : > { %6020 = vmatprep.subr.bf16.mxu0 (!%p160_p3), %v7235_v2  ;;  %7193 = vmatprep.subr.bf16.mxu1 (!%p160_p3), %v7235_v2  ;;  %v7240_v7 = vld [vmem:[%s9844_s1 + $0x18] sm:$0xff] (!%p160_p3)   ;;  %v7242_v9 = vld [vmem:[%s9844_s1 + $0x20] sm:$0xff] (!%p160_p3)   ;;  %v7244_v13 = vld [vmem:[%s9844_s1 + $0x28] sm:$0xff] (!%p160_p3)  }
   0xa   : > { %v7245_v14 = vld [vmem:[%s9844_s1 + $0x70] sm:$0xff] (!%p160_p3)   ;;  %v7247_v16 = vld [vmem:[%s9844_s1 + $0x78] sm:$0xff] (!%p160_p3)   ;;  %v7255_v18 = vld [vmem:[%s9844_s1 + $0xc0] sm:$0xff] (!%p160_p3)  }
   0xb   : > { %v7246_v15 = vld [vmem:[%s9844_s1 + $0x30] sm:$0xff] (!%p160_p3)   ;;  %v7248_v17 = vld [vmem:[%s9844_s1 + $0x38] sm:$0xff] (!%p160_p3)   ;;  %v7258_v21 = vld [vmem:[%s9844_s1 + $0x140] sm:$0xff] (!%p160_p3)  }
   0xc   : > { %6021 = vmatpush3.bf16.msra.mxu0 (!%p160_p3), %v7236_v3  ;;  %7201 = vmatpush3.bf16.msra.mxu1 (!%p160_p3), %v7236_v3  ;;  %v7256_v22 = vld [vmem:[%s9844_s1 + $0x80] sm:$0xff] (!%p160_p3)   ;;  %v7257_v23 = vld [vmem:[%s9844_s1 + $0xc8] sm:$0xff] (!%p160_p3)   ;;  %v7267_v31 = vld [vmem:[%s9844_s1 + $0xd0] sm:$0xff] (!%p160_p3)  }
   0xd   : > { %6022 = vmatprep.subr.bf16.mxu0 (!%p160_p3), %v7237_v4  ;;  %7194 = vmatprep.subr.bf16.mxu1 (!%p160_p3), %v7237_v4  ;;  %v7260_v24 = vld [vmem:[%s9844_s1 + $0x100] sm:$0xff] (!%p160_p3)   ;;  %v7259_v27 = vld [vmem:[%s9844_s1 + $0x88] sm:$0xff] (!%p160_p3)   ;;  %v7268_v32 = vld [vmem:[%s9844_s1 + $0x90] sm:$0xff] (!%p160_p3)  }
   0xe   : > { %s9852_s12 = smov (!%p193_p4, %s7906_s12), 1  ;;  %v7278_v28 = vld [vmem:[%s9844_s1 + $0x148] sm:$0xff]   ;;  %v7269_v34 = vld [vmem:[%s9844_s1 + $0xd8] sm:$0xff]   ;;  %v7277_v40 = vld [vmem:[%s9844_s1 + $0xe0] sm:$0xff]  }
   0xf   : > { %s7208_s30 = smul.u32 2688, %s9852_s12  ;;  %v7280_v33 = vld [vmem:[%s9844_s1 + $0x108] sm:$0xff]   ;;  %v7270_v37 = vld [vmem:[%s9844_s1 + $0x98] sm:$0xff]   ;;  %v7279_v41 = vld [vmem:[%s9844_s1 + $0xa0] sm:$0xff]  }
  0x10   : > { %6023 = vmatpush3.bf16.msra.mxu0 %v7238_v5  ;;  %7202 = vmatpush3.bf16.msra.mxu1 %v7238_v5  ;;  %v7281_v42 = vld [vmem:[%s9844_s1 + $0xe8] sm:$0xff]   ;;  %v7292_v43 = vld [vmem:[%s9844_s1 + $0x150] sm:$0xff]   ;;  %v7291_v52 = vld [vmem:[%s9844_s1 + $0xf8] sm:$0xff]  }
  0x11   : > { %6024 = vmatprep.subr.bf16.mxu0 %v7239_v6  ;;  %7195 = vmatprep.subr.bf16.mxu1 %v7239_v6  ;;  %s7987_s10 = scalar_lea.vmem %s9843_s0, %s7208_s30  ;;  %v7294_v46 = vld [vmem:[%s9844_s1 + $0x110] sm:$0xff]   ;;  %v7282_v47 = vld [vmem:[%s9844_s1 + $0xa8] sm:$0xff]   ;;  %v7309_v55 = vld [vmem:[%s9844_s1 + $0x158] sm:$0xff]  }
  0x12   : > { %v7251_v11 = vld [vmem:[%s7987_s10 + $0x4] ss:$84 sps:$4 sm:$0xff]   ;;  %v7249_v19 = vld [vmem:[%s7987_s10] ss:$84 sps:$4 sm:$0xff]   ;;  %v7265_v29 = vld [vmem:[%s7987_s10 + $0xa8] ss:$84 sps:$4 sm:$0xff]  }
  0x13   : > { %v7254_v12 = vld [vmem:[%s7987_s10 + $0x7e4] ss:$84 sps:$4 sm:$0xff]   ;;  %3630 = vmatprep.mubr.bf16.mxu0 %v7251_v11  ;;  %v7252_v20 = vld [vmem:[%s7987_s10 + $0x7e0] ss:$84 sps:$4 sm:$0xff]   ;;  %v7266_v30 = vld [vmem:[%s7987_s10 + $0x888] ss:$84 sps:$4 sm:$0xff]  }
  0x14   : > { %6025 = vmatpush3.bf16.msra.mxu0 %v7240_v7  ;;  %7203 = vmatpush3.bf16.msra.mxu1 %v7240_v7  ;;  %v7261_v25 = vld [vmem:[%s7987_s10 + $0xac] ss:$84 sps:$4 sm:$0xff]   ;;  %v7271_v35 = vld [vmem:[%s7987_s10 + $0x154] ss:$84 sps:$4 sm:$0xff]   ;;  %v7275_v38 = vld [vmem:[%s7987_s10 + $0x150] ss:$84 sps:$4 sm:$0xff]  }
  0x15   : > { %6026 = vmatprep.subr.bf16.mxu0 %v7241_v8  ;;  %7196 = vmatprep.subr.bf16.mxu1 %v7241_v8  ;;  %v7263_v26 = vld [vmem:[%s7987_s10 + $0x88c] ss:$84 sps:$4 sm:$0xff]   ;;  %v7273_v36 = vld [vmem:[%s7987_s10 + $0x934] ss:$84 sps:$4 sm:$0xff]   ;;  %v7276_v39 = vld [vmem:[%s7987_s10 + $0x930] ss:$84 sps:$4 sm:$0xff]  }
  0x16   : > { %3726 = vmatprep.mubr.bf16.mxu1 %v7254_v12  ;;  %v7283_v44 = vld [vmem:[%s7987_s10 + $0x1fc] ss:$84 sps:$4 sm:$0xff]   ;;  %v7287_v49 = vld [vmem:[%s7987_s10 + $0x1f8] ss:$84 sps:$4 sm:$0xff]   ;;  %v7300_v59 = vld [vmem:[%s7987_s10 + $0x2a0] ss:$84 sps:$4 sm:$0xff]  }
  0x17   : > { %v7285_v45 = vld [vmem:[%s7987_s10 + $0x9dc] ss:$84 sps:$4 sm:$0xff]   ;;  %v7288_v50 = vld [vmem:[%s7987_s10 + $0x9d8] ss:$84 sps:$4 sm:$0xff]   ;;  %v7301_v60 = vld [vmem:[%s9844_s1 + $0x1c0] sm:$0xff]  }
  0x18   : > { %6027 = vmatpush3.bf16.msra.mxu0 %v7242_v9  ;;  %7204 = vmatpush3.bf16.msra.mxu1 %v7242_v9  ;;  %v7289_v48 = vld [vmem:[%s9844_s1 + $0xf0] sm:$0xff]   ;;  %v7295_v53 = vld [vmem:[%s7987_s10 + $0x2a4] ss:$84 sps:$4 sm:$0xff]   ;;  %v7299_v54 = vld [vmem:[%s7987_s10 + $0xc] ss:$84 sps:$4 sm:$0xff]  }
  0x19   : > { %6028 = vmatprep.subr.bf16.mxu0 %v7243_v10  ;;  %7197 = vmatprep.subr.bf16.mxu1 %v7243_v10  ;;  %v7290_v51 = vld [vmem:[%s9844_s1 + $0xb0] sm:$0xff]   ;;  %v7310_v56 = vld [vmem:[%s9844_s1 + $0x118] sm:$0xff]   ;;  %v7302_v61 = vld [vmem:[%s9844_s1 + $0x180] sm:$0xff]  }
  0x1a   : > { %v7293_v57 = vld [vmem:[%s9844_s1 + $0xb8] sm:$0xff]   ;;  %v7303_v62 = vld [vmem:[%s7987_s10 + $0x34c] ss:$84 sps:$4 sm:$0xff]   ;;  %v7305_v63 = vld [vmem:[%s7987_s10 + $0xb4] ss:$84 sps:$4 sm:$0xff]  }
  0x1b   : > { %v7297_v58 = vld [vmem:[%s7987_s10 + $0x8] ss:$84 sps:$4 sm:$0xff]   ;;  %v7319_v0 = vld [vmem:[%s9844_s1 + $0x160] sm:$0xff]   ;;  %v7334_v9 = vld [vmem:[%s9844_s1 + $0x1d0] sm:$0xff]  }
  0x1c   : > { %6029 = vmatpush3.bf16.msra.mxu0 %v7244_v13  ;;  %7205 = vmatpush3.bf16.msra.mxu1 %v7244_v13  ;;  %v7317_v1 = vld [vmem:[%s9844_s1 + $0x1c8] sm:$0xff]   ;;  %v7320_v2 = vld [vmem:[%s9844_s1 + $0x120] sm:$0xff]   ;;  %v7313_v7 = vld [vmem:[%s7987_s10 + $0x15c] ss:$84 sps:$4 sm:$0xff]  }
  0x1d   : > { %6030 = vmatprep.subr.bf16.mxu0 %v7245_v14  ;;  %7198 = vmatprep.subr.bf16.mxu1 %v7245_v14  ;;  %v7318_v3 = vld [vmem:[%s9844_s1 + $0x188] sm:$0xff]   ;;  %v7308_v5 = vld [vmem:[%s7987_s10 + $0xb0] ss:$84 sps:$4 sm:$0xff]  }
  0x1e   : > { %v7307_v4 = vld [vmem:[%s7987_s10 + $0x348] ss:$84 sps:$4 sm:$0xff]   ;;  %v7336_v11 = vld [vmem:[%s9844_s1 + $0x190] sm:$0xff]   ;;  %v7316_v13 = vld [vmem:[%s7987_s10 + $0x158] ss:$84 sps:$4 sm:$0xff]  }
  0x1f   : > { %v7311_v6 = vld [vmem:[%s7987_s10 + $0x3f4] ss:$84 sps:$4 sm:$0xff]   ;;  %v7315_v12 = vld [vmem:[%s7987_s10 + $0x3f0] ss:$84 sps:$4 sm:$0xff]  }
  0x20   : > { %6031 = vmatpush3.bf16.msra.mxu0 %v7246_v15  ;;  %7206 = vmatpush3.bf16.msra.mxu1 %v7246_v15  ;;  %v7333_v8 = vld [vmem:[%s9844_s1 + $0x168] sm:$0xff]   ;;  %v7321_v14 = vld [vmem:[%s7987_s10 + $0x49c] ss:$84 sps:$4 sm:$0xff]  }
  0x21   : > { %6032 = vmatprep.subr.bf16.mxu0 %v7247_v16  ;;  %7199 = vmatprep.subr.bf16.mxu1 %v7247_v16  ;;  %v7335_v10 = vld [vmem:[%s9844_s1 + $0x128] sm:$0xff]   ;;  %v7343_v15 = vld [vmem:[%s9844_s1 + $0x170] sm:$0xff]  }
  0x22   : > { %v7344_v16 = vld [vmem:[%s9844_s1 + $0x130] sm:$0xff]  }
  0x24   : > { %6033 = vmatpush3.bf16.msra.mxu0 %v7248_v17  ;;  %7207 = vmatpush3.bf16.msra.mxu1 %v7248_v17  ;;  %v7323_v17 = vld [vmem:[%s7987_s10 + $0x204] ss:$84 sps:$4 sm:$0xff]  }
  0x25   : > { %6130 = vmatprep.subr.bf16.mxu1 %v7255_v18  ;;  %6242 = vmatprep.subr.bf16.mxu0 %v7258_v21  ;;  %v7351_v18 = vld [vmem:[%s9844_s1 + $0x1d8] sm:$0xff]   ;;  %v7326_v21 = vld [vmem:[%s7987_s10 + $0x200] ss:$84 sps:$4 sm:$0xff]  }
  0x27   : > { %3631 = vmatmul.mubr.bf16.vlgmr.msra.gmra.mrb[0].mxu0 %v7249_v19  ;;  %3727 = vmatmul.mubr.bf16.vlgmr.msra.gmra.mrb[0].mxu1 %v7252_v20  ;;  %v7352_v19 = vld [vmem:[%s9844_s1 + $0x198] sm:$0xff]  }
  0x28   : > { %6131 = vmatpush3.bf16.msra.mxu1 %v7256_v22  ;;  %6243 = vmatpush3.bf16.msra.mxu0 %v7260_v24  ;;  %v7325_v20 = vld [vmem:[%s7987_s10 + $0x498] ss:$84 sps:$4 sm:$0xff]  }
  0x29   : > { %6132 = vmatprep.subr.bf16.mxu1 %v7257_v23  ;;  %3638 = vmatprep.mubr.bf16.mxu0 %v7261_v25  ;;  %v7327_v22 = vld [vmem:[%s7987_s10 + $0x544] ss:$84 sps:$4 sm:$0xff]   ;;  %v7329_v23 = vld [vmem:[%s7987_s10 + $0x2ac] ss:$84 sps:$4 sm:$0xff]  }
  0x2a   : > { %3734 = vmatprep.mubr.bf16.mxu1 %v7263_v26  ;;  %6244 = vmatprep.subr.bf16.mxu0 %v7278_v28  ;;  %v7359_v24 = vld [vmem:[%s9844_s1 + $0x178] sm:$0xff]   ;;  %v7367_v26 = vld [vmem:[%s9844_s1 + $0x1e0] sm:$0xff]  }
  0x2b   : > { %v7360_v25 = vld [vmem:[%s9844_s1 + $0x138] sm:$0xff]  }
  0x2c   : > { %6133 = vmatpush3.bf16.msra.mxu1 %v7259_v27  ;;  %6245 = vmatpush3.bf16.msra.mxu0 %v7280_v33  ;;  %v7331_v27 = vld [vmem:[%s7987_s10 + $0x540] ss:$84 sps:$4 sm:$0xff]   ;;  %v7332_v28 = vld [vmem:[%s7987_s10 + $0x2a8] ss:$84 sps:$4 sm:$0xff]  }
  0x2d   : > { %6134 = vmatprep.subr.bf16.mxu1 %v7267_v31  ;;  %6246 = vmatprep.subr.bf16.mxu0 %v7292_v43  ;;  %v7337_v31 = vld [vmem:[%s7987_s10 + $0x5ec] ss:$84 sps:$4 sm:$0xff]   ;;  %v7341_v33 = vld [vmem:[%s7987_s10 + $0x5e8] ss:$84 sps:$4 sm:$0xff]   ;;  %v7399_v43 = vld [vmem:[%s9844_s1 + $0x1f0] sm:$0xff]  }
  0x2f   : > { %3639 = vmatmul.mubr.bf16.gmra.mrb[4].mxu0 %v7265_v29  ;;  %3735 = vmatmul.mubr.bf16.gmra.mrb[4].mxu1 %v7266_v30  ;;  %v7368_v29 = vld [vmem:[%s9844_s1 + $0x1a0] sm:$0xff]  }
  0x30   : > { %6135 = vmatpush3.bf16.msra.mxu1 %v7268_v32  ;;  %3646 = vmatprep.mubr.bf16.mxu0 %v7271_v35  ;;  %v7369_v30 = vld [vmem:[%s9844_s1 + $0x240] sm:$0xff]   ;;  %v7339_v32 = vld [vmem:[%s7987_s10 + $0x354] ss:$84 sps:$4 sm:$0xff]  }
  0x31   : > { %6136 = vmatprep.subr.bf16.mxu1 %v7269_v34  ;;  %3742 = vmatprep.mubr.bf16.mxu1 %v7273_v36  ;;  %v7342_v34 = vld [vmem:[%s7987_s10 + $0x350] ss:$84 sps:$4 sm:$0xff]   ;;  %v7383_v35 = vld [vmem:[%s9844_s1 + $0x1e8] sm:$0xff]  }
  0x32   : > { %6247 = vmatpush3.bf16.msra.mxu0 %v7294_v46  ;;  %v7384_v36 = vld [vmem:[%s9844_s1 + $0x1a8] sm:$0xff]   ;;  %v7358_v46 = vld [vmem:[%s7987_s10 + $0x4a0] ss:$84 sps:$4 sm:$0xff]  }
  0x33   : > { %6248 = vmatprep.subr.bf16.mxu0 %v7309_v55  ;;  %v7373_v55 = vld [vmem:[%s7987_s10 + $0xbc] ss:$84 sps:$4 sm:$0xff]  }
  0x34   : > { %6137 = vmatpush3.bf16.msra.mxu1 %v7270_v37  ;;  %v7345_v37 = vld [vmem:[%s7987_s10 + $0x694] ss:$84 sps:$4 sm:$0xff]  }
  0x35   : > { %6138 = vmatprep.subr.bf16.mxu1 %v7277_v40  ;;  %v7350_v40 = vld [vmem:[%s7987_s10 + $0x3f8] ss:$84 sps:$4 sm:$0xff]  }
  0x36   : > { %6249 = vmatpush3.bf16.msra.mxu0 %v7310_v56  ;;  %v7385_v56 = vld [vmem:[%s9844_s1 + $0x248] sm:$0xff]  }
  0x37   : > { %3647 = vmatmul.mubr.bf16.gmra.mrb[8].mxu0 %v7275_v38  ;;  %3743 = vmatmul.mubr.bf16.gmra.mrb[8].mxu1 %v7276_v39  ;;  %v7347_v38 = vld [vmem:[%s7987_s10 + $0x3fc] ss:$84 sps:$4 sm:$0xff]  }
  0x38   : > { %6139 = vmatpush3.bf16.msra.mxu1 %v7279_v41  ;;  %3654 = vmatprep.mubr.bf16.mxu0 %v7283_v44  ;;  %v7349_v39 = vld [vmem:[%s7987_s10 + $0x690] ss:$84 sps:$4 sm:$0xff]  }
  0x39   : > { %6140 = vmatprep.subr.bf16.mxu1 %v7281_v42  ;;  %3750 = vmatprep.mubr.bf16.mxu1 %v7285_v45  ;;  %v7353_v41 = vld [vmem:[%s7987_s10 + $0x73c] ss:$84 sps:$4 sm:$0xff]   ;;  %v7355_v42 = vld [vmem:[%s7987_s10 + $0x4a4] ss:$84 sps:$4 sm:$0xff]  }
  0x3a   : > { %6250 = vmatprep.subr.bf16.mxu0 %v7319_v0  ;;  %v7400_v44 = vld [vmem:[%s9844_s1 + $0x1b0] sm:$0xff]   ;;  %v7357_v45 = vld [vmem:[%s7987_s10 + $0x738] ss:$84 sps:$4 sm:$0xff]  }
  0x3b   : > { %6251 = vmatpush3.bf16.msra.mxu0 %v7320_v2  ;;  %v7402_v0 = vld [vmem:[%s9844_s1 + $0x210] sm:$0xff]   ;;  %v7381_v2 = vld [vmem:[%s7987_s10 + $0x698] ss:$84 sps:$4 sm:$0xff]  }
  0x3c   : > { %6141 = vmatpush3.bf16.msra.mxu1 %v7282_v47  ;;  %6252 = vmatprep.subr.bf16.mxu0 %v7333_v8  ;;  %v7361_v47 = vld [vmem:[%s7987_s10 + $0x54c] ss:$84 sps:$4 sm:$0xff]  }
  0x3d   : > { %6142 = vmatprep.subr.bf16.mxu1 %v7289_v48  ;;  %v7365_v48 = vld [vmem:[%s7987_s10 + $0x14] ss:$84 sps:$4 sm:$0xff]   ;;  %v7434_v8 = vld [vmem:[%s9844_s1 + $0x220] sm:$0xff]  }
  0x3f   : > { %3655 = vmatmul.mubr.bf16.gmra.mrb[12].mxu0 %v7287_v49  ;;  %3751 = vmatmul.mubr.bf16.gmra.mrb[12].mxu1 %v7288_v50  ;;  %v7415_v49 = vld [vmem:[%s9844_s1 + $0x1f8] sm:$0xff]  }
  0x40   : > { %6143 = vmatpush3.bf16.msra.mxu1 %v7290_v51  ;;  %3662 = vmatprep.mubr.bf16.mxu0 %v7295_v53  ;;  %v7416_v50 = vld [vmem:[%s9844_s1 + $0x1b8] sm:$0xff]   ;;  %v7363_v51 = vld [vmem:[%s7987_s10 + $0x10] ss:$84 sps:$4 sm:$0xff]  }
  0x41   : > { %6144 = vmatprep.subr.bf16.mxu1 %v7291_v52  ;;  %3791 = vmatprep.mubr.bf16.mxu1 %v7299_v54  ;;  %v7366_v52 = vld [vmem:[%s7987_s10 + $0x548] ss:$84 sps:$4 sm:$0xff]   ;;  %v7370_v53 = vld [vmem:[%s9844_s1 + $0x200] sm:$0xff]  }
  0x42   : > { %6253 = vmatpush3.bf16.msra.mxu0 %v7335_v10  ;;  %v7371_v54 = vld [vmem:[%s7987_s10 + $0x5f4] ss:$84 sps:$4 sm:$0xff]  }
  0x43   : > { %6254 = vmatprep.subr.bf16.mxu0 %v7343_v15  ;;  %v7391_v10 = vld [vmem:[%s7987_s10 + $0x740] ss:$84 sps:$4 sm:$0xff]  }
  0x44   : > { %6145 = vmatpush3.bf16.msra.mxu1 %v7293_v57  ;;  %v7431_v57 = vld [vmem:[%s9844_s1 + $0x2c0] sm:$0xff]   ;;  %v7395_v15 = vld [vmem:[%s7987_s10 + $0x2b4] ss:$84 sps:$4 sm:$0xff]  }
  0x45   : > { %6354 = vmatprep.subr.bf16.mxu1 %v7301_v60  ;;  %v7375_v60 = vld [vmem:[%s7987_s10 + $0x5f0] ss:$84 sps:$4 sm:$0xff]  }
  0x46   : > { %6255 = vmatpush3.bf16.msra.mxu0 %v7344_v16  ;;  %v7466_v16 = vld [vmem:[%s9844_s1 + $0x230] sm:$0xff]  }
  0x47   : > { %3663 = vmatmul.mubr.bf16.gmra.mrb[16].mxu0 %v7300_v59  ;;  %3792 = vmatmul.mubr.bf16.vlgmr.msra.gmra.mrb[16].mxu1 %v7297_v58  ;;  %v7386_v58 = vld [vmem:[%s9844_s1 + $0x208] sm:$0xff]   ;;  %v7401_v59 = vld [vmem:[%s9844_s1 + $0x250] sm:$0xff]  }
  0x48   : > { %6355 = vmatpush3.bf16.msra.mxu1 %v7302_v61  ;;  %3670 = vmatprep.mubr.bf16.mxu0 %v7303_v62  ;;  %v7376_v61 = vld [vmem:[%s7987_s10 + $0xb8] ss:$84 sps:$4 sm:$0xff]   ;;  %v7377_v62 = vld [vmem:[%s7987_s10 + $0x69c] ss:$84 sps:$4 sm:$0xff]  }
  0x49   : > { %3799 = vmatprep.mubr.bf16.mxu1 %v7305_v63  ;;  %6356 = vmatprep.subr.bf16.mxu1 %v7317_v1  ;;  %v7379_v63 = vld [vmem:[%s7987_s10 + $0x164] ss:$84 sps:$4 sm:$0xff]  }
  0x4a   : > { %6256 = vmatprep.subr.bf16.mxu0 %v7359_v24  ;;  %v7417_v1 = vld [vmem:[%s9844_s1 + $0x258] sm:$0xff]  }
  0x4b   : > { %6257 = vmatpush3.bf16.msra.mxu0 %v7360_v25  ;;  %v7408_v24 = vld [vmem:[%s7987_s10 + $0x358] ss:$84 sps:$4 sm:$0xff]   ;;  %v7409_v25 = vld [vmem:[%s7987_s10 + $0x93c] ss:$84 sps:$4 sm:$0xff]  }
  0x4c   : > { %6357 = vmatpush3.bf16.msra.mxu1 %v7318_v3  ;;  %6466 = vmatprep.subr.bf16.mxu0 %v7369_v30  ;;  %v7418_v3 = vld [vmem:[%s9844_s1 + $0x218] sm:$0xff]  }
  0x4d   : > { %6358 = vmatprep.subr.bf16.mxu1 %v7334_v9  ;;  %v7449_v9 = vld [vmem:[%s9844_s1 + $0x268] sm:$0xff]   ;;  %v7419_v30 = vld [vmem:[%s7987_s10 + $0x9e4] ss:$84 sps:$4 sm:$0xff]  }
  0x4f   : > { %3671 = vmatmul.mubr.bf16.gmra.mrb[20].mxu0 %v7307_v4  ;;  %3800 = vmatmul.mubr.bf16.gmra.mrb[20].mxu1 %v7308_v5  ;;  %v7433_v4 = vld [vmem:[%s9844_s1 + $0x260] sm:$0xff]  }
  0x50   : > { %3678 = vmatprep.mubr.bf16.mxu0 %v7311_v6  ;;  %3807 = vmatprep.mubr.bf16.mxu1 %v7313_v7  ;;  %v7382_v5 = vld [vmem:[%s7987_s10 + $0x160] ss:$84 sps:$4 sm:$0xff]   ;;  %v7387_v6 = vld [vmem:[%s7987_s10 + $0x744] ss:$84 sps:$4 sm:$0xff]  }
  0x51   : > { %6359 = vmatpush3.bf16.msra.mxu1 %v7336_v11  ;;  %v7389_v7 = vld [vmem:[%s7987_s10 + $0x20c] ss:$84 sps:$4 sm:$0xff]   ;;  %v7392_v11 = vld [vmem:[%s7987_s10 + $0x208] ss:$84 sps:$4 sm:$0xff]  }
  0x52   : > { %6360 = vmatprep.subr.bf16.mxu1 %v7351_v18  ;;  %v7398_v18 = vld [vmem:[%s7987_s10 + $0x2b0] ss:$84 sps:$4 sm:$0xff]  }
  0x55   : > { %6361 = vmatpush3.bf16.msra.mxu1 %v7352_v19  ;;  %v7403_v19 = vld [vmem:[%s7987_s10 + $0x894] ss:$84 sps:$4 sm:$0xff]  }
  0x56   : > { %6362 = vmatprep.subr.bf16.mxu1 %v7367_v26  ;;  %v7411_v26 = vld [vmem:[%s7987_s10 + $0x404] ss:$84 sps:$4 sm:$0xff]  }
  0x57   : > { %3679 = vmatmul.mubr.bf16.gmra.mrb[24].mxu0 %v7315_v12  ;;  %3808 = vmatmul.mubr.bf16.gmra.mrb[24].mxu1 %v7316_v13  ;;  %v7450_v12 = vld [vmem:[%s9844_s1 + $0x228] sm:$0xff]   ;;  %v7465_v13 = vld [vmem:[%s9844_s1 + $0x270] sm:$0xff]  }
  0x58   : > { %3686 = vmatprep.mubr.bf16.mxu0 %v7321_v14  ;;  %3815 = vmatprep.mubr.bf16.mxu1 %v7323_v17  ;;  %v7393_v14 = vld [vmem:[%s7987_s10 + $0x7ec] ss:$84 sps:$4 sm:$0xff]   ;;  %v7397_v17 = vld [vmem:[%s7987_s10 + $0x7e8] ss:$84 sps:$4 sm:$0xff]  }
  0x59   : > { %6363 = vmatpush3.bf16.msra.mxu1 %v7368_v29  ;;  %v7414_v29 = vld [vmem:[%s7987_s10 + $0x400] ss:$84 sps:$4 sm:$0xff]  }
  0x5a   : > { %6364 = vmatprep.subr.bf16.mxu1 %v7383_v35  ;;  %v7429_v35 = vld [vmem:[%s7987_s10 + $0x1c] ss:$84 sps:$4 sm:$0xff]  }
  0x5d   : > { %6365 = vmatpush3.bf16.msra.mxu1 %v7384_v36  ;;  %v7427_v36 = vld [vmem:[%s7987_s10 + $0x18] ss:$84 sps:$4 sm:$0xff]  }
  0x5e   : > { %6366 = vmatprep.subr.bf16.mxu1 %v7399_v43  ;;  %v7463_v43 = vld [vmem:[%s9844_s1 + $0x2d0] sm:$0xff]  }
  0x5f   : > { %3687 = vmatmul.mubr.bf16.gmra.mrb[28].mxu0 %v7325_v20  ;;  %3816 = vmatmul.mubr.bf16.gmra.mrb[28].mxu1 %v7326_v21  ;;  %v7405_v20 = vld [vmem:[%s7987_s10 + $0x35c] ss:$84 sps:$4 sm:$0xff]  }
  0x60   : > { %3694 = vmatprep.mubr.bf16.mxu0 %v7327_v22  ;;  %3823 = vmatprep.mubr.bf16.mxu1 %v7329_v23  ;;  %v7481_v21 = vld [vmem:[%s9844_s1 + $0x278] sm:$0xff]   ;;  %v7407_v23 = vld [vmem:[%s7987_s10 + $0x890] ss:$84 sps:$4 sm:$0xff]  }
  0x61   : > { %6367 = vmatpush3.bf16.msra.mxu1 %v7400_v44  ;;  %v7482_v22 = vld [vmem:[%s9844_s1 + $0x238] sm:$0xff]  }
  0x62   : > { %6368 = vmatprep.subr.bf16.mxu1 %v7415_v49  ;;  %v7439_v44 = vld [vmem:[%s7987_s10 + $0x5f8] ss:$84 sps:$4 sm:$0xff]  }
  0x63   : > { %v7479_v49 = vld [vmem:[%s9844_s1 + $0x2d8] sm:$0xff]  }
  0x65   : > { %6369 = vmatpush3.bf16.msra.mxu1 %v7416_v50  ;;  %v7445_v50 = vld [vmem:[%s7987_s10 + $0x6a0] ss:$84 sps:$4 sm:$0xff]  }
  0x66   : > { %6578 = vmatprep.subr.bf16.mxu1 %v7431_v57  ;;  %v7511_v57 = vld [vmem:[%s9844_s1 + $0x2e8] sm:$0xff]  }
  0x67   : > { %3695 = vmatmul.mubr.bf16.gmra.mrb[32].mxu0 %v7331_v27  ;;  %3824 = vmatmul.mubr.bf16.gmra.mrb[32].mxu1 %v7332_v28  ;;  %v7497_v27 = vld [vmem:[%s9844_s1 + $0x340] sm:$0xff]   ;;  %v7413_v28 = vld [vmem:[%s7987_s10 + $0x938] ss:$84 sps:$4 sm:$0xff]  }
  0x68   : > { %3702 = vmatprep.mubr.bf16.mxu0 %v7337_v31  ;;  %3831 = vmatprep.mubr.bf16.mxu1 %v7339_v32  ;;  %v7421_v31 = vld [vmem:[%s7987_s10 + $0x4ac] ss:$84 sps:$4 sm:$0xff]  }
  0x69   : > { %v7423_v32 = vld [vmem:[%s7987_s10 + $0x9e0] ss:$84 sps:$4 sm:$0xff]  }
  0x6f   : > { %3703 = vmatmul.mubr.bf16.gmra.mrb[36].mxu0 %v7341_v33  ;;  %3832 = vmatmul.mubr.bf16.gmra.mrb[36].mxu1 %v7342_v34  ;;  %v7424_v33 = vld [vmem:[%s7987_s10 + $0x4a8] ss:$84 sps:$4 sm:$0xff]  }
  0x70   : > { %3710 = vmatprep.mubr.bf16.mxu0 %v7345_v37  ;;  %3839 = vmatprep.mubr.bf16.mxu1 %v7347_v38  ;;  %v7425_v34 = vld [vmem:[%s7987_s10 + $0x554] ss:$84 sps:$4 sm:$0xff]   ;;  %v7430_v37 = vld [vmem:[%s7987_s10 + $0x550] ss:$84 sps:$4 sm:$0xff]  }
  0x71   : > { %v7432_v38 = vld [vmem:[%s9844_s1 + $0x280] sm:$0xff]  }
  0x77   : > { %3711 = vmatmul.mubr.bf16.gmra.mrb[40].mxu0 %v7349_v39  ;;  %3840 = vmatmul.mubr.bf16.gmra.mrb[40].mxu1 %v7350_v40  ;;  %v7435_v39 = vld [vmem:[%s7987_s10 + $0x5fc] ss:$84 sps:$4 sm:$0xff]   ;;  %v7437_v40 = vld [vmem:[%s7987_s10 + $0xc4] ss:$84 sps:$4 sm:$0xff]  }
  0x78   : > { %3718 = vmatprep.mubr.bf16.mxu0 %v7353_v41  ;;  %3847 = vmatprep.mubr.bf16.mxu1 %v7355_v42  ;;  %v7447_v41 = vld [vmem:[%s9844_s1 + $0x2c8] sm:$0xff]  }
  0x79   : > { %v7448_v42 = vld [vmem:[%s9844_s1 + $0x288] sm:$0xff]  }
  0x7f   : > { %3719 = vmatmul.mubr.bf16.gmra.mrb[44].mxu0 %v7357_v45  ;;  %3848 = vmatmul.mubr.bf16.gmra.mrb[44].mxu1 %v7358_v46  ;;  %v7440_v45 = vld [vmem:[%s7987_s10 + $0xc0] ss:$84 sps:$4 sm:$0xff]   ;;  %v7441_v46 = vld [vmem:[%s7987_s10 + $0x6a4] ss:$84 sps:$4 sm:$0xff]  }
  0x80   : > { %3855 = vmatprep.mubr.bf16.mxu1 %v7361_v47  ;;  %3952 = vmatprep.mubr.bf16.mxu0 %v7365_v48  ;;  %v7443_v47 = vld [vmem:[%s7987_s10 + $0x16c] ss:$84 sps:$4 sm:$0xff]   ;;  %v7464_v48 = vld [vmem:[%s9844_s1 + $0x290] sm:$0xff]  }
  0x87   : > { %3856 = vmatmul.mubr.bf16.gmra.mrb[48].mxu1 %v7366_v52  ;;  %3953 = vmatmul.mubr.bf16.vlgmr.msra.gmra.mrb[48].mxu0 %v7363_v51  ;;  %v7446_v51 = vld [vmem:[%s7987_s10 + $0x168] ss:$84 sps:$4 sm:$0xff]  }
  0x88   : > { %6467 = vmatpush3.bf16.msra.mxu0 %v7370_v53  ;;  %3863 = vmatprep.mubr.bf16.mxu1 %v7371_v54  ;;  %v7480_v52 = vld [vmem:[%s9844_s1 + $0x298] sm:$0xff]   ;;  %v7495_v53 = vld [vmem:[%s9844_s1 + $0x2e0] sm:$0xff]  }
  0x89   : > { %3960 = vmatprep.mubr.bf16.mxu0 %v7373_v55  ;;  %6468 = vmatprep.subr.bf16.mxu0 %v7385_v56  ;;  %v7451_v54 = vld [vmem:[%s7987_s10 + $0x74c] ss:$84 sps:$4 sm:$0xff]   ;;  %v7453_v55 = vld [vmem:[%s7987_s10 + $0x214] ss:$84 sps:$4 sm:$0xff]  }
  0x8a   : > { %v7496_v56 = vld [vmem:[%s9844_s1 + $0x2a0] sm:$0xff]  }
  0x8c   : > { %6469 = vmatpush3.bf16.msra.mxu0 %v7386_v58  ;;  %v7455_v58 = vld [vmem:[%s7987_s10 + $0x748] ss:$84 sps:$4 sm:$0xff]  }
  0x8d   : > { %6470 = vmatprep.subr.bf16.mxu0 %v7401_v59  ;;  %v7456_v59 = vld [vmem:[%s7987_s10 + $0x210] ss:$84 sps:$4 sm:$0xff]  }
  0x8f   : > { %3864 = vmatmul.mubr.bf16.gmra.mrb[52].mxu1 %v7375_v60  ;;  %3961 = vmatmul.mubr.bf16.gmra.mrb[52].mxu0 %v7376_v61  ;;  %v7512_v60 = vld [vmem:[%s9844_s1 + $0x2a8] sm:$0xff]   ;;  %v7527_v61 = vld [vmem:[%s9844_s1 + $0x2f0] sm:$0xff]  }
  0x90   : > { %3871 = vmatprep.mubr.bf16.mxu1 %v7377_v62  ;;  %3968 = vmatprep.mubr.bf16.mxu0 %v7379_v63  ;;  %v7457_v62 = vld [vmem:[%s7987_s10 + $0x7f4] ss:$84 sps:$4 sm:$0xff]   ;;  %v7459_v63 = vld [vmem:[%s7987_s10 + $0x2bc] ss:$84 sps:$4 sm:$0xff]  }
  0x91   : > { %6471 = vmatpush3.bf16.msra.mxu0 %v7402_v0  ;;  %v7528_v0 = vld [vmem:[%s9844_s1 + $0x2b0] sm:$0xff]  }
  0x92   : > { %6472 = vmatprep.subr.bf16.mxu0 %v7417_v1  ;;  %v7543_v1 = vld [vmem:[%s9844_s1 + $0x2f8] sm:$0xff]  }
  0x95   : > { %6473 = vmatpush3.bf16.msra.mxu0 %v7418_v3  ;;  %v7559_v3 = vld [vmem:[%s9844_s1 + $0x3c0] sm:$0xff]  }
  0x96   : > { %6474 = vmatprep.subr.bf16.mxu0 %v7433_v4  ;;  %v7461_v4 = vld [vmem:[%s7987_s10 + $0x7f0] ss:$84 sps:$4 sm:$0xff]  }
  0x97   : > { %3872 = vmatmul.mubr.bf16.gmra.mrb[56].mxu1 %v7381_v2  ;;  %3969 = vmatmul.mubr.bf16.gmra.mrb[56].mxu0 %v7382_v5  ;;  %v7544_v2 = vld [vmem:[%s9844_s1 + $0x2b8] sm:$0xff]  }
  0x98   : > { %3879 = vmatprep.mubr.bf16.mxu1 %v7387_v6  ;;  %3976 = vmatprep.mubr.bf16.mxu0 %v7389_v7  ;;  %v7462_v5 = vld [vmem:[%s7987_s10 + $0x2b8] ss:$84 sps:$4 sm:$0xff]   ;;  %v7467_v6 = vld [vmem:[%s7987_s10 + $0x89c] ss:$84 sps:$4 sm:$0xff]  }
  0x99   : > { %6475 = vmatpush3.bf16.msra.mxu0 %v7434_v8  ;;  %v7469_v7 = vld [vmem:[%s7987_s10 + $0x364] ss:$84 sps:$4 sm:$0xff]  }
  0x9a   : > { %6476 = vmatprep.subr.bf16.mxu0 %v7449_v9  ;;  %v7471_v8 = vld [vmem:[%s7987_s10 + $0x898] ss:$84 sps:$4 sm:$0xff]   ;;  %v7472_v9 = vld [vmem:[%s7987_s10 + $0x360] ss:$84 sps:$4 sm:$0xff]  }
  0x9d   : > { %6477 = vmatpush3.bf16.msra.mxu0 %v7450_v12  ;;  %v7477_v12 = vld [vmem:[%s7987_s10 + $0x940] ss:$84 sps:$4 sm:$0xff]  }
  0x9e   : > { %6478 = vmatprep.subr.bf16.mxu0 %v7465_v13  ;;  %v7478_v13 = vld [vmem:[%s7987_s10 + $0x408] ss:$84 sps:$4 sm:$0xff]  }
  0x9f   : > { %3880 = vmatmul.mubr.bf16.gmra.mrb[60].mxu1 %v7391_v10  ;;  %3977 = vmatmul.mubr.bf16.gmra.mrb[60].mxu0 %v7392_v11  ;;  %v7473_v10 = vld [vmem:[%s7987_s10 + $0x944] ss:$84 sps:$4 sm:$0xff]   ;;  %v7475_v11 = vld [vmem:[%s7987_s10 + $0x40c] ss:$84 sps:$4 sm:$0xff]  }
  0xa0   : > { %3887 = vmatprep.mubr.bf16.mxu1 %v7393_v14  ;;  %3984 = vmatprep.mubr.bf16.mxu0 %v7395_v15  ;;  %v7483_v14 = vld [vmem:[%s7987_s10 + $0x9ec] ss:$84 sps:$4 sm:$0xff]   ;;  %v7485_v15 = vld [vmem:[%s7987_s10 + $0x4b4] ss:$84 sps:$4 sm:$0xff]  }
  0xa1   : > { %6479 = vmatpush3.bf16.msra.mxu0 %v7466_v16  ;;  %v7487_v16 = vld [vmem:[%s7987_s10 + $0x9e8] ss:$84 sps:$4 sm:$0xff]  }
  0xa2   : > { %6480 = vmatprep.subr.bf16.mxu0 %v7481_v21 }
  0xa5   : > { %6481 = vmatpush3.bf16.msra.mxu0 %v7482_v22 }
  0xa6   : > { %6690 = vmatprep.subr.bf16.mxu0 %v7497_v27  ;;  %v7493_v27 = vld [vmem:[%s7987_s10 + $0x24] ss:$84 sps:$4 sm:$0xff]  }
  0xa7   : > { %3888 = vmatmul.mubr.bf16.gmra.mrb[64].mxu1 %v7397_v17  ;;  %3985 = vmatmul.mubr.bf16.gmra.mrb[64].mxu0 %v7398_v18  ;;  %v7488_v17 = vld [vmem:[%s7987_s10 + $0x4b0] ss:$84 sps:$4 sm:$0xff]  }
  0xa8   : > { %3895 = vmatprep.mubr.bf16.mxu1 %v7403_v19  ;;  %3992 = vmatprep.mubr.bf16.mxu0 %v7405_v20 }
  0xaf   : > { %3896 = vmatmul.mubr.bf16.gmra.mrb[68].mxu1 %v7407_v23  ;;  %3993 = vmatmul.mubr.bf16.gmra.mrb[68].mxu0 %v7408_v24 }
  0xb0   : > { %3903 = vmatprep.mubr.bf16.mxu1 %v7409_v25  ;;  %4000 = vmatprep.mubr.bf16.mxu0 %v7411_v26  ;;  %v7489_v26 = vld [vmem:[%s7987_s10 + $0x55c] ss:$84 sps:$4 sm:$0xff]  }
  0xb7   : > { %3904 = vmatmul.mubr.bf16.gmra.mrb[72].mxu1 %v7413_v28  ;;  %4001 = vmatmul.mubr.bf16.gmra.mrb[72].mxu0 %v7414_v29 }
  0xb8   : > { %3911 = vmatprep.mubr.bf16.mxu1 %v7419_v30  ;;  %4008 = vmatprep.mubr.bf16.mxu0 %v7421_v31 }
  0xbf   : > { %3912 = vmatmul.mubr.bf16.gmra.mrb[76].mxu1 %v7423_v32  ;;  %4009 = vmatmul.mubr.bf16.gmra.mrb[76].mxu0 %v7424_v33  ;;  %v7491_v32 = vld [vmem:[%s7987_s10 + $0x20] ss:$84 sps:$4 sm:$0xff]   ;;  %v7494_v33 = vld [vmem:[%s7987_s10 + $0x558] ss:$84 sps:$4 sm:$0xff]  }
  0xc0   : > { %4016 = vmatprep.mubr.bf16.mxu0 %v7425_v34  ;;  %4113 = vmatprep.mubr.bf16.mxu1 %v7429_v35 }
  0xc7   : > { %4017 = vmatmul.mubr.bf16.gmra.mrb[80].mxu0 %v7430_v37  ;;  %4114 = vmatmul.mubr.bf16.vlgmr.msra.gmra.mrb[80].mxu1 %v7427_v36 }
  0xc8   : > { %6579 = vmatpush3.bf16.msra.mxu1 %v7432_v38  ;;  %4024 = vmatprep.mubr.bf16.mxu0 %v7435_v39 }
  0xc9   : > { %4121 = vmatprep.mubr.bf16.mxu1 %v7437_v40  ;;  %6580 = vmatprep.subr.bf16.mxu1 %v7447_v41 }
  0xcc   : > { %6581 = vmatpush3.bf16.msra.mxu1 %v7448_v42  ;;  %v7498_v42 = vld [vmem:[%s9844_s1 + $0x300] sm:$0xff]  }
  0xcd   : > { %6582 = vmatprep.subr.bf16.mxu1 %v7463_v43  ;;  %v7499_v43 = vld [vmem:[%s7987_s10 + $0x604] ss:$84 sps:$4 sm:$0xff]  }
  0xcf   : > { %4025 = vmatmul.mubr.bf16.gmra.mrb[84].mxu0 %v7439_v44  ;;  %4122 = vmatmul.mubr.bf16.gmra.mrb[84].mxu1 %v7440_v45 }
  0xd0   : > { %4032 = vmatprep.mubr.bf16.mxu0 %v7441_v46  ;;  %4129 = vmatprep.mubr.bf16.mxu1 %v7443_v47  ;;  %v7501_v46 = vld [vmem:[%s7987_s10 + $0xcc] ss:$84 sps:$4 sm:$0xff]  }
  0xd1   : > { %6583 = vmatpush3.bf16.msra.mxu1 %v7464_v48  ;;  %v7513_v47 = vld [vmem:[%s9844_s1 + $0x348] sm:$0xff]  }
  0xd2   : > { %6584 = vmatprep.subr.bf16.mxu1 %v7479_v49 }
  0xd5   : > { %6585 = vmatpush3.bf16.msra.mxu1 %v7480_v52  ;;  %v7503_v52 = vld [vmem:[%s7987_s10 + $0x600] ss:$84 sps:$4 sm:$0xff]  }
  0xd6   : > { %6586 = vmatprep.subr.bf16.mxu1 %v7495_v53  ;;  %v7504_v53 = vld [vmem:[%s7987_s10 + $0xc8] ss:$84 sps:$4 sm:$0xff]  }
  0xd7   : > { %4033 = vmatmul.mubr.bf16.gmra.mrb[88].mxu0 %v7445_v50  ;;  %4130 = vmatmul.mubr.bf16.gmra.mrb[88].mxu1 %v7446_v51  ;;  %v7514_v50 = vld [vmem:[%s9844_s1 + $0x308] sm:$0xff]   ;;  %v7529_v51 = vld [vmem:[%s9844_s1 + $0x350] sm:$0xff]  }
  0xd8   : > { %4040 = vmatprep.mubr.bf16.mxu0 %v7451_v54  ;;  %4137 = vmatprep.mubr.bf16.mxu1 %v7453_v55 }
  0xd9   : > { %6587 = vmatpush3.bf16.msra.mxu1 %v7496_v56 }
  0xda   : > { %6588 = vmatprep.subr.bf16.mxu1 %v7511_v57 }
  0xdd   : > { %6589 = vmatpush3.bf16.msra.mxu1 %v7512_v60 }
  0xde   : > { %6590 = vmatprep.subr.bf16.mxu1 %v7527_v61 }
  0xdf   : > { %4041 = vmatmul.mubr.bf16.gmra.mrb[92].mxu0 %v7455_v58  ;;  %4138 = vmatmul.mubr.bf16.gmra.mrb[92].mxu1 %v7456_v59 }
  0xe0   : > { %4048 = vmatprep.mubr.bf16.mxu0 %v7457_v62  ;;  %4145 = vmatprep.mubr.bf16.mxu1 %v7459_v63  ;;  %v7505_v62 = vld [vmem:[%s7987_s10 + $0x6ac] ss:$84 sps:$4 sm:$0xff]   ;;  %v7507_v63 = vld [vmem:[%s7987_s10 + $0x174] ss:$84 sps:$4 sm:$0xff]  }
  0xe1   : > { %6591 = vmatpush3.bf16.msra.mxu1 %v7528_v0 }
  0xe2   : > { %6592 = vmatprep.subr.bf16.mxu1 %v7543_v1 }
  0xe5   : > { %6593 = vmatpush3.bf16.msra.mxu1 %v7544_v2  ;;  %v7530_v2 = vld [vmem:[%s9844_s1 + $0x310] sm:$0xff]  }
  0xe6   : > { %6802 = vmatprep.subr.bf16.mxu1 %v7559_v3 }
  0xe7   : > { %4049 = vmatmul.mubr.bf16.gmra.mrb[96].mxu0 %v7461_v4  ;;  %4146 = vmatmul.mubr.bf16.gmra.mrb[96].mxu1 %v7462_v5  ;;  %v7545_v5 = vld [vmem:[%s9844_s1 + $0x358] sm:$0xff]  }
  0xe8   : > { %4056 = vmatprep.mubr.bf16.mxu0 %v7467_v6  ;;  %4153 = vmatprep.mubr.bf16.mxu1 %v7469_v7  ;;  %v7546_v6 = vld [vmem:[%s9844_s1 + $0x318] sm:$0xff]   ;;  %v7561_v7 = vld [vmem:[%s9844_s1 + $0x360] sm:$0xff]  }
  0xef   : > { %4057 = vmatmul.mubr.bf16.gmra.mrb[100].mxu0 %v7471_v8  ;;  %4154 = vmatmul.mubr.bf16.gmra.mrb[100].mxu1 %v7472_v9  ;;  %v7509_v8 = vld [vmem:[%s7987_s10 + $0x6a8] ss:$84 sps:$4 sm:$0xff]   ;;  %v7510_v9 = vld [vmem:[%s7987_s10 + $0x170] ss:$84 sps:$4 sm:$0xff]  }
  0xf0   : > { %4064 = vmatprep.mubr.bf16.mxu0 %v7473_v10  ;;  %4161 = vmatprep.mubr.bf16.mxu1 %v7475_v11 }
  0xf7   : > { %4065 = vmatmul.mubr.bf16.gmra.mrb[104].mxu0 %v7477_v12  ;;  %4162 = vmatmul.mubr.bf16.gmra.mrb[104].mxu1 %v7478_v13 }
  0xf8   : > { %4072 = vmatprep.mubr.bf16.mxu0 %v7483_v14  ;;  %4169 = vmatprep.mubr.bf16.mxu1 %v7485_v15 }
  0xfa   : > { %v6106_v18 = vpop.f32.mrb[0].mxu1  ;;  %v6034_v19 = vpop.f32.mrb[0].mxu0 }
  0xfb   : > { %v6107_v20 = vpop.f32.mrb[1].mxu1  ;;  %v6035_v21 = vpop.f32.mrb[1].mxu0 }
  0xfc   : > { %v8368_v22 = vadd.f32 %v6107_v20, %v6106_v18  ;;  %v6109_v23 = vpop.f32.mrb[2].mxu1  ;;  %v8370_v24 = vadd.f32 %v6035_v21, %v6034_v19  ;;  %v6037_v25 = vpop.f32.mrb[2].mxu0  ;;  %v7515_v18 = vld [vmem:[%s7987_s10 + $0x754] ss:$84 sps:$4 sm:$0xff]   ;;  %v7517_v19 = vld [vmem:[%s7987_s10 + $0x21c] ss:$84 sps:$4 sm:$0xff]  }
  0xfd   : > { %v6110_v28 = vpop.f32.mrb[3].mxu1  ;;  %v6038_v29 = vpop.f32.mrb[3].mxu0 }
  0xfe   : > { %v8374_v30 = vadd.f32 %v6110_v28, %v6109_v23  ;;  %v8376_v31 = vadd.f32 %v6038_v29, %v6037_v25  ;;  %v7562_v23 = vld [vmem:[%s9844_s1 + $0x320] sm:$0xff]   ;;  %v7577_v25 = vld [vmem:[%s9844_s1 + $0x368] sm:$0xff]   ;;  %v7593_v29 = vld [vmem:[%s9844_s1 + $0x370] sm:$0xff]  }
  0xff   : > { %4073 = vmatmul.mubr.bf16.gmra.mrb[108].mxu0 %v7487_v16  ;;  %4170 = vmatmul.mubr.bf16.gmra.mrb[108].mxu1 %v7488_v17  ;;  %v7578_v28 = vld [vmem:[%s9844_s1 + $0x328] sm:$0xff]  }
 0x100   : > { %4177 = vmatprep.mubr.bf16.mxu1 %v7489_v26  ;;  %4274 = vmatprep.mubr.bf16.mxu0 %v7493_v27 }
 0x102   : > { %v6112_v34 = vpop.f32.mrb[4].mxu1  ;;  %v6040_v35 = vpop.f32.mrb[4].mxu0 }
 0x103   : > { %v6113_v36 = vpop.f32.mrb[5].mxu1  ;;  %v6041_v37 = vpop.f32.mrb[5].mxu0 }
 0x104   : > { %v8380_v38 = vadd.f32 %v6113_v36, %v6112_v34  ;;  %v6115_v39 = vpop.f32.mrb[6].mxu1  ;;  %v8382_v40 = vadd.f32 %v6041_v37, %v6040_v35  ;;  %v6043_v41 = vpop.f32.mrb[6].mxu0  ;;  %v7520_v34 = vld [vmem:[%s7987_s10 + $0x218] ss:$84 sps:$4 sm:$0xff]  }
 0x105   : > { %v6116_v44 = vpop.f32.mrb[7].mxu1  ;;  %v6044_v45 = vpop.f32.mrb[7].mxu0 }
 0x106   : > { %v8392_v48 = vadd.f32 %v6116_v44, %v6115_v39  ;;  %v8394_v49 = vadd.f32 %v6044_v45, %v6043_v41 }
 0x107   : > { %4178 = vmatmul.mubr.bf16.gmra.mrb[112].mxu1 %v7494_v33  ;;  %4275 = vmatmul.mubr.bf16.vlgmr.msra.gmra.mrb[112].mxu0 %v7491_v32  ;;  %v8453_v32 = vld [vmem:[%s9845_s2] ss:$0 sm:$0xff]  ;;  %v7519_v33 = vld [vmem:[%s7987_s10 + $0x750] ss:$84 sps:$4 sm:$0xff]  }
 0x108   : > { %6691 = vmatpush3.bf16.msra.mxu0 %v7498_v42  ;;  %4185 = vmatprep.mubr.bf16.mxu1 %v7499_v43  ;;  %v3633_v41 = vadd.f32 %v8370_v24, %v8453_v32 }
 0x109   : > { %4282 = vmatprep.mubr.bf16.mxu0 %v7501_v46  ;;  %6692 = vmatprep.subr.bf16.mxu0 %v7513_v47  ;;  %v7521_v46 = vld [vmem:[%s7987_s10 + $0x7fc] ss:$84 sps:$4 sm:$0xff]   ;;  %v7523_v47 = vld [vmem:[%s7987_s10 + $0x2c4] ss:$84 sps:$4 sm:$0xff]  }
 0x10a   : > { %v6118_v54 = vpop.f32.mrb[8].mxu1  ;;  %v6046_v55 = vpop.f32.mrb[8].mxu0 }
 0x10b   : > { %v6119_v56 = vpop.f32.mrb[9].mxu1  ;;  %v6047_v57 = vpop.f32.mrb[9].mxu0 }
 0x10c   : > { %v8404_v58 = vadd.f32 %v6119_v56, %v6118_v54  ;;  %v6121_v59 = vpop.f32.mrb[10].mxu1  ;;  %v8406_v60 = vadd.f32 %v6047_v57, %v6046_v55  ;;  %v6049_v61 = vpop.f32.mrb[10].mxu0  ;;  %6693 = vmatpush3.bf16.msra.mxu0 %v7514_v50  ;;  %v7609_v56 = vld [vmem:[%s9844_s1 + $0x378] sm:$0xff]  }
 0x10d   : > { %v6122_v0 = vpop.f32.mrb[11].mxu1  ;;  %v6050_v1 = vpop.f32.mrb[11].mxu0  ;;  %6694 = vmatprep.subr.bf16.mxu0 %v7529_v51  ;;  %v7610_v57 = vld [vmem:[%s9844_s1 + $0x338] sm:$0xff]  }
 0x10e   : > { %v8413_v3 = vadd.f32 %v6122_v0, %v6121_v59  ;;  %v8415_v4 = vadd.f32 %v6050_v1, %v6049_v61  ;;  %v7525_v61 = vld [vmem:[%s7987_s10 + $0x7f8] ss:$84 sps:$4 sm:$0xff]  }
 0x10f   : > { %4186 = vmatmul.mubr.bf16.gmra.mrb[116].mxu1 %v7503_v52  ;;  %4283 = vmatmul.mubr.bf16.gmra.mrb[116].mxu0 %v7504_v53  ;;  %v7594_v52 = vld [vmem:[%s9844_s1 + $0x330] sm:$0xff]   ;;  %v3636_v53 = vadd.f32 %v8376_v31, %v8453_v32  ;;  %v7625_v31 = vld [vmem:[%s9844_s1 + $0x440] sm:$0xff]  }
 0x110   : > { %4193 = vmatprep.mubr.bf16.mxu1 %v7505_v62  ;;  %4290 = vmatprep.mubr.bf16.mxu0 %v7507_v63  ;;  %v7526_v62 = vld [vmem:[%s7987_s10 + $0x2c0] ss:$84 sps:$4 sm:$0xff]  }
 0x111   : > { %6695 = vmatpush3.bf16.msra.mxu0 %v7530_v2 }
 0x112   : > { %v6124_v10 = vpop.f32.mrb[12].mxu1  ;;  %v6052_v11 = vpop.f32.mrb[12].mxu0  ;;  %6696 = vmatprep.subr.bf16.mxu0 %v7545_v5  ;;  %v3641_v5 = vadd.f32 %v8382_v40, %v8453_v32 }
 0x113   : > { %v6125_v12 = vpop.f32.mrb[13].mxu1  ;;  %v6053_v13 = vpop.f32.mrb[13].mxu0 }
 0x114   : > { %v8428_v14 = vadd.f32 %v6125_v12, %v6124_v10  ;;  %v6127_v15 = vpop.f32.mrb[14].mxu1  ;;  %v8430_v16 = vadd.f32 %v6053_v13, %v6052_v11  ;;  %v6055_v17 = vpop.f32.mrb[14].mxu0  ;;  %v7531_v10 = vld [vmem:[%s7987_s10 + $0x8a4] ss:$84 sps:$4 sm:$0xff]   ;;  %v7533_v11 = vld [vmem:[%s7987_s10 + $0x36c] ss:$84 sps:$4 sm:$0xff]  }
 0x115   : > { %v6128_v20 = vpop.f32.mrb[15].mxu1  ;;  %v6056_v21 = vpop.f32.mrb[15].mxu0  ;;  %6697 = vmatpush3.bf16.msra.mxu0 %v7546_v6 }
 0x116   : > { %v8440_v26 = vadd.f32 %v6128_v20, %v6127_v15  ;;  %v8442_v27 = vadd.f32 %v6056_v21, %v6055_v17  ;;  %6698 = vmatprep.subr.bf16.mxu0 %v7561_v7  ;;  %v3644_v15 = vadd.f32 %v8394_v49, %v8453_v32  ;;  %v7535_v20 = vld [vmem:[%s7987_s10 + $0x8a0] ss:$84 sps:$4 sm:$0xff]   ;;  %v7536_v21 = vld [vmem:[%s7987_s10 + $0x368] ss:$84 sps:$4 sm:$0xff]  }
 0x117   : > { %4194 = vmatmul.mubr.bf16.gmra.mrb[120].mxu1 %v7509_v8  ;;  %4291 = vmatmul.mubr.bf16.gmra.mrb[120].mxu0 %v7510_v9 }
 0x118   : > { %4201 = vmatprep.mubr.bf16.mxu1 %v7515_v18  ;;  %4298 = vmatprep.mubr.bf16.mxu0 %v7517_v19 }
 0x119   : > { %6699 = vmatpush3.bf16.msra.mxu0 %v7562_v23 }
 0x11a   : > { %v6146_v35 = vpop.f32.mrb[16].mxu1  ;;  %v6058_v36 = vpop.f32.mrb[16].mxu0  ;;  %6700 = vmatprep.subr.bf16.mxu0 %v7577_v25 }
 0x11b   : > { %v6147_v37 = vpop.f32.mrb[17].mxu1  ;;  %v6059_v39 = vpop.f32.mrb[17].mxu0 }
 0x11c   : > { %v6148_v42 = vadd.f32 %v6147_v37, %v6146_v35  ;;  %v6149_v43 = vpop.f32.mrb[18].mxu1  ;;  %v8459_v44 = vadd.f32 %v6059_v39, %v6058_v36  ;;  %v6061_v45 = vpop.f32.mrb[18].mxu0  ;;  %v7537_v37 = vld [vmem:[%s7987_s10 + $0x94c] ss:$84 sps:$4 sm:$0xff]   ;;  %v7539_v39 = vld [vmem:[%s7987_s10 + $0x414] ss:$84 sps:$4 sm:$0xff]  }
 0x11d   : > { %v6150_v50 = vpop.f32.mrb[19].mxu1  ;;  %v6062_v51 = vpop.f32.mrb[19].mxu0  ;;  %6701 = vmatpush3.bf16.msra.mxu0 %v7578_v28 }
 0x11e   : > { %v8468_v24 = vadd.f32 %v6148_v42, %v3633_v41  ;;  %v6151_v54 = vadd.f32 %v6150_v50, %v6149_v43  ;;  %v8470_v55 = vadd.f32 %v6062_v51, %v6061_v45  ;;  %6702 = vmatprep.subr.bf16.mxu0 %v7593_v29  ;;  %v3649_v29 = vadd.f32 %v8406_v60, %v8453_v32  ;;  %v7541_v50 = vld [vmem:[%s7987_s10 + $0x948] ss:$84 sps:$4 sm:$0xff]   ;;  %v7542_v51 = vld [vmem:[%s7987_s10 + $0x410] ss:$84 sps:$4 sm:$0xff]  }
 0x11f   : > { %4202 = vmatmul.mubr.bf16.gmra.mrb[124].mxu1 %v7519_v33  ;;  %4299 = vmatmul.mubr.bf16.gmra.mrb[124].mxu0 %v7520_v34  ;;  %v3652_v43 = vadd.f32 %v8415_v4, %v8453_v32  ;;  %v3657_v4 = vadd.f32 %v8430_v16, %v8453_v32 }
 0x120   : > { %v8478_v59 = vadd.f32 %v6151_v54, %v3636_v53  ;;  %4209 = vmatprep.mubr.bf16.mxu1 %v7521_v46  ;;  %4306 = vmatprep.mubr.bf16.mxu0 %v7523_v47 }
 0x121   : > { %6703 = vmatpush3.bf16.msra.mxu0 %v7594_v52 }
 0x122   : > { %v6152_v63 = vpop.f32.mrb[20].mxu1  ;;  %v6064_v0 = vpop.f32.mrb[20].mxu0  ;;  %6704 = vmatprep.subr.bf16.mxu0 %v7609_v56 }
 0x123   : > { %v6153_v1 = vpop.f32.mrb[21].mxu1  ;;  %v6065_v2 = vpop.f32.mrb[21].mxu0 }
 0x124   : > { %v6154_v6 = vadd.f32 %v6153_v1, %v6152_v63  ;;  %v6155_v7 = vpop.f32.mrb[22].mxu1  ;;  %v8487_v8 = vadd.f32 %v6065_v2, %v6064_v0  ;;  %v6067_v9 = vpop.f32.mrb[22].mxu0  ;;  %v7547_v63 = vld [vmem:[%s7987_s10 + $0x9f4] ss:$84 sps:$4 sm:$0xff]   ;;  %v7549_v0 = vld [vmem:[%s7987_s10 + $0x4bc] ss:$84 sps:$4 sm:$0xff]  }
 0x125   : > { %v6156_v12 = vpop.f32.mrb[23].mxu1  ;;  %v6068_v13 = vpop.f32.mrb[23].mxu0  ;;  %6705 = vmatpush3.bf16.msra.mxu0 %v7610_v57 }
 0x126   : > { %v8493_v17 = vadd.f32 %v6154_v6, %v3641_v5  ;;  %v6157_v18 = vadd.f32 %v6156_v12, %v6155_v7  ;;  %v8495_v19 = vadd.f32 %v6068_v13, %v6067_v9  ;;  %6914 = vmatprep.subr.bf16.mxu0 %v7625_v31  ;;  %v3660_v5 = vadd.f32 %v8442_v27, %v8453_v32 }
 0x127   : > { %4210 = vmatmul.mubr.bf16.gmra.mrb[128].mxu1 %v7525_v61  ;;  %4307 = vmatmul.mubr.bf16.gmra.mrb[128].mxu0 %v7526_v62  ;;  %v3665_v27 = vadd.f32 %v8459_v44, %v8453_v32 }
 0x128   : > { %v8497_v40 = vadd.f32 %v6157_v18, %v3644_v15  ;;  %4217 = vmatprep.mubr.bf16.mxu1 %v7531_v10  ;;  %4314 = vmatprep.mubr.bf16.mxu0 %v7533_v11  ;;  %v7551_v10 = vld [vmem:[%s7987_s10 + $0x9f0] ss:$84 sps:$4 sm:$0xff]   ;;  %v7552_v11 = vld [vmem:[%s7987_s10 + $0x4b8] ss:$84 sps:$4 sm:$0xff]  }
 0x12a   : > { %v6158_v23 = vpop.f32.mrb[24].mxu1  ;;  %v6070_v25 = vpop.f32.mrb[24].mxu0 }
 0x12b   : > { %v6159_v28 = vpop.f32.mrb[25].mxu1  ;;  %v6071_v49 = vpop.f32.mrb[25].mxu0 }
 0x12c   : > { %v6160_v33 = vadd.f32 %v6159_v28, %v6158_v23  ;;  %v6161_v34 = vpop.f32.mrb[26].mxu1  ;;  %v8503_v35 = vadd.f32 %v6071_v49, %v6070_v25  ;;  %v6073_v36 = vpop.f32.mrb[26].mxu0  ;;  %v7553_v28 = vld [vmem:[%s7987_s10 + $0x564] ss:$84 sps:$4 sm:$0xff]   ;;  %v7557_v49 = vld [vmem:[%s7987_s10 + $0x2c] ss:$84 sps:$4 sm:$0xff]  }
 0x12d   : > { %v6162_v41 = vpop.f32.mrb[27].mxu1  ;;  %v6074_v42 = vpop.f32.mrb[27].mxu0 }
 0x12e   : > { %v8509_v45 = vadd.f32 %v6160_v33, %v3649_v29  ;;  %v6163_v46 = vadd.f32 %v6162_v41, %v6161_v34  ;;  %v8511_v47 = vadd.f32 %v6074_v42, %v6073_v36  ;;  %v3668_v34 = vadd.f32 %v8470_v55, %v8453_v32  ;;  %v7555_v41 = vld [vmem:[%s7987_s10 + $0x28] ss:$84 sps:$4 sm:$0xff]   ;;  %v7558_v42 = vld [vmem:[%s7987_s10 + $0x560] ss:$84 sps:$4 sm:$0xff]  }
 0x12f   : > { %4218 = vmatmul.mubr.bf16.gmra.mrb[132].mxu1 %v7535_v20  ;;  %4315 = vmatmul.mubr.bf16.gmra.mrb[132].mxu0 %v7536_v21  ;;  %v3673_v55 = vadd.f32 %v8487_v8, %v8453_v32  ;;  %v3676_v8 = vadd.f32 %v8495_v19, %v8453_v32  ;;  %v7591_v19 = vld [vmem:[%s9844_s1 + $0x3d0] sm:$0xff]  }
 0x130   : > { %v8513_v60 = vadd.f32 %v6163_v46, %v3652_v43  ;;  %4225 = vmatprep.mubr.bf16.mxu1 %v7537_v37  ;;  %4322 = vmatprep.mubr.bf16.mxu0 %v7539_v39 }
 0x132   : > { %v6164_v52 = vpop.f32.mrb[28].mxu1  ;;  %v6076_v53 = vpop.f32.mrb[28].mxu0 }
 0x133   : > { %v6165_v54 = vpop.f32.mrb[29].mxu1  ;;  %v6077_v56 = vpop.f32.mrb[29].mxu0 }
 0x134   : > { %v6166_v57 = vadd.f32 %v6165_v54, %v6164_v52  ;;  %v6167_v31 = vpop.f32.mrb[30].mxu1  ;;  %v8519_v61 = vadd.f32 %v6077_v56, %v6076_v53  ;;  %v6079_v62 = vpop.f32.mrb[30].mxu0 }
 0x135   : > { %v6168_v1 = vpop.f32.mrb[31].mxu1  ;;  %v6080_v2 = vpop.f32.mrb[31].mxu0 }
 0x136   : > { %v8525_v6 = vadd.f32 %v6166_v57, %v3657_v4  ;;  %v6169_v7 = vadd.f32 %v6168_v1, %v6167_v31  ;;  %v8527_v9 = vadd.f32 %v6080_v2, %v6079_v62  ;;  %v7560_v4 = vld [vmem:[%s9844_s1 + $0x380] sm:$0xff]  }
 0x137   : > { %4226 = vmatmul.mubr.bf16.gmra.mrb[136].mxu1 %v7541_v50  ;;  %4323 = vmatmul.mubr.bf16.gmra.mrb[136].mxu0 %v7542_v51  ;;  %v7563_v57 = vld [vmem:[%s7987_s10 + $0x60c] ss:$84 sps:$4 sm:$0xff]  }
 0x138   : > { %v8529_v16 = vadd.f32 %v6169_v7, %v3660_v5  ;;  %4233 = vmatprep.mubr.bf16.mxu1 %v7547_v63  ;;  %4330 = vmatprep.mubr.bf16.mxu0 %v7549_v0  ;;  %v7565_v63 = vld [vmem:[%s7987_s10 + $0xd4] ss:$84 sps:$4 sm:$0xff]  }
 0x139   : > { %v7575_v0 = vld [vmem:[%s9844_s1 + $0x3c8] sm:$0xff]  }
 0x13a   : > { %v6170_v12 = vpop.f32.mrb[32].mxu1  ;;  %v6082_v13 = vpop.f32.mrb[32].mxu0 }
 0x13b   : > { %v6171_v15 = vpop.f32.mrb[33].mxu1  ;;  %v6083_v18 = vpop.f32.mrb[33].mxu0 }
 0x13c   : > { %v6172_v20 = vadd.f32 %v6171_v15, %v6170_v12  ;;  %v6173_v21 = vpop.f32.mrb[34].mxu1  ;;  %v8535_v23 = vadd.f32 %v6083_v18, %v6082_v13  ;;  %v6085_v25 = vpop.f32.mrb[34].mxu0  ;;  %v7568_v12 = vld [vmem:[%s7987_s10 + $0xd0] ss:$84 sps:$4 sm:$0xff]  }
 0x13d   : > { %v6174_v29 = vpop.f32.mrb[35].mxu1  ;;  %v6086_v33 = vpop.f32.mrb[35].mxu0 }
 0x13e   : > { %v8541_v36 = vadd.f32 %v6172_v20, %v3665_v27  ;;  %v6175_v37 = vadd.f32 %v6174_v29, %v6173_v21  ;;  %v8543_v39 = vadd.f32 %v6086_v33, %v6085_v25  ;;  %v3681_v20 = vadd.f32 %v8503_v35, %v8453_v32  ;;  %v7569_v29 = vld [vmem:[%s7987_s10 + $0x6b4] ss:$84 sps:$4 sm:$0xff]   ;;  %v7571_v33 = vld [vmem:[%s7987_s10 + $0x17c] ss:$84 sps:$4 sm:$0xff]  }
 0x13f   : > { %4234 = vmatmul.mubr.bf16.gmra.mrb[140].mxu1 %v7551_v10  ;;  %4331 = vmatmul.mubr.bf16.gmra.mrb[140].mxu0 %v7552_v11  ;;  %v7576_v10 = vld [vmem:[%s9844_s1 + $0x388] sm:$0xff]   ;;  %v3684_v35 = vadd.f32 %v8511_v47, %v8453_v32  ;;  %v7623_v47 = vld [vmem:[%s9844_s1 + $0x3e0] sm:$0xff]  }
 0x140   : > { %v8545_v44 = vadd.f32 %v6175_v37, %v3668_v34  ;;  %4338 = vmatprep.mubr.bf16.mxu0 %v7553_v28  ;;  %4435 = vmatprep.mubr.bf16.mxu1 %v7557_v49  ;;  %v7567_v11 = vld [vmem:[%s7987_s10 + $0x608] ss:$84 sps:$4 sm:$0xff]  }
 0x142   : > { %v6176_v43 = vpop.f32.mrb[36].mxu1  ;;  %v6088_v46 = vpop.f32.mrb[36].mxu0 }
 0x143   : > { %v6177_v50 = vpop.f32.mrb[37].mxu1  ;;  %v6089_v51 = vpop.f32.mrb[37].mxu0 }
 0x144   : > { %v6178_v52 = vadd.f32 %v6177_v50, %v6176_v43  ;;  %v6179_v53 = vpop.f32.mrb[38].mxu1  ;;  %v8551_v54 = vadd.f32 %v6089_v51, %v6088_v46  ;;  %v6091_v56 = vpop.f32.mrb[38].mxu0  ;;  %v7607_v50 = vld [vmem:[%s9844_s1 + $0x3d8] sm:$0xff]  }
 0x145   : > { %v6180_v31 = vpop.f32.mrb[39].mxu1  ;;  %v6092_v62 = vpop.f32.mrb[39].mxu0  ;;  %v7608_v51 = vld [vmem:[%s9844_s1 + $0x398] sm:$0xff]  }
 0x146   : > { %v8563_v1 = vadd.f32 %v6178_v52, %v3673_v55  ;;  %v6181_v2 = vadd.f32 %v6180_v31, %v6179_v53  ;;  %v8565_v5 = vadd.f32 %v6092_v62, %v6091_v56  ;;  %v7573_v52 = vld [vmem:[%s7987_s10 + $0x6b0] ss:$84 sps:$4 sm:$0xff]   ;;  %v7574_v53 = vld [vmem:[%s7987_s10 + $0x178] ss:$84 sps:$4 sm:$0xff]   ;;  %v3689_v62 = vadd.f32 %v8519_v61, %v8453_v32 }
 0x147   : > { %4339 = vmatmul.mubr.bf16.gmra.mrb[144].mxu0 %v7558_v42  ;;  %4436 = vmatmul.mubr.bf16.vlgmr.msra.gmra.mrb[144].mxu1 %v7555_v41  ;;  %v7592_v41 = vld [vmem:[%s9844_s1 + $0x390] sm:$0xff]   ;;  %v7639_v61 = vld [vmem:[%s9844_s1 + $0x3e8] sm:$0xff]  }
 0x148   : > { %v8567_v7 = vadd.f32 %v6181_v2, %v3676_v8  ;;  %6803 = vmatpush3.bf16.msra.mxu1 %v7560_v4  ;;  %4346 = vmatprep.mubr.bf16.mxu0 %v7563_v57 }
 0x149   : > { %4443 = vmatprep.mubr.bf16.mxu1 %v7565_v63  ;;  %6804 = vmatprep.subr.bf16.mxu1 %v7575_v0 }
 0x14a   : > { %v6182_v13 = vpop.f32.mrb[40].mxu1  ;;  %v6094_v15 = vpop.f32.mrb[40].mxu0 }
 0x14b   : > { %v6183_v18 = vpop.f32.mrb[41].mxu1  ;;  %v6095_v27 = vpop.f32.mrb[41].mxu0 }
 0x14c   : > { %v6184_v21 = vadd.f32 %v6183_v18, %v6182_v13  ;;  %v6185_v25 = vpop.f32.mrb[42].mxu1  ;;  %v8579_v28 = vadd.f32 %v6095_v27, %v6094_v15  ;;  %v6097_v49 = vpop.f32.mrb[42].mxu0  ;;  %6805 = vmatpush3.bf16.msra.mxu1 %v7576_v10  ;;  %v7579_v10 = vld [vmem:[%s7987_s10 + $0x75c] ss:$84 sps:$4 sm:$0xff]   ;;  %v7624_v13 = vld [vmem:[%s9844_s1 + $0x3a0] sm:$0xff]   ;;  %v3692_v15 = vadd.f32 %v8527_v9, %v8453_v32 }
 0x14d   : > { %v6186_v34 = vpop.f32.mrb[43].mxu1  ;;  %v6098_v37 = vpop.f32.mrb[43].mxu0  ;;  %6806 = vmatprep.subr.bf16.mxu1 %v7591_v19  ;;  %v7581_v19 = vld [vmem:[%s7987_s10 + $0x224] ss:$84 sps:$4 sm:$0xff]   ;;  %v7655_v9 = vld [vmem:[%s9844_s1 + $0x3f0] sm:$0xff]  }
 0x14e   : > { %v8588_v42 = vadd.f32 %v6184_v21, %v3681_v20  ;;  %v6187_v43 = vadd.f32 %v6186_v34, %v6185_v25  ;;  %v8590_v46 = vadd.f32 %v6098_v37, %v6097_v49  ;;  %v7640_v25 = vld [vmem:[%s9844_s1 + $0x3a8] sm:$0xff]  }
 0x14f   : > { %4347 = vmatmul.mubr.bf16.gmra.mrb[148].mxu0 %v7567_v11  ;;  %4444 = vmatmul.mubr.bf16.gmra.mrb[148].mxu1 %v7568_v12  ;;  %v7583_v49 = vld [vmem:[%s7987_s10 + $0x758] ss:$84 sps:$4 sm:$0xff]  }
 0x150   : > { %v8598_v55 = vadd.f32 %v6187_v43, %v3684_v35  ;;  %4354 = vmatprep.mubr.bf16.mxu0 %v7569_v29  ;;  %4451 = vmatprep.mubr.bf16.mxu1 %v7571_v33  ;;  %v7584_v29 = vld [vmem:[%s7987_s10 + $0x220] ss:$84 sps:$4 sm:$0xff]   ;;  %v3697_v35 = vadd.f32 %v8535_v23, %v8453_v32 }
 0x151   : > { %6807 = vmatpush3.bf16.msra.mxu1 %v7592_v41 }
 0x152   : > { %v6188_v56 = vpop.f32.mrb[44].mxu1  ;;  %v6100_v4 = vpop.f32.mrb[44].mxu0  ;;  %6808 = vmatprep.subr.bf16.mxu1 %v7607_v50 }
 0x153   : > { %v6189_v57 = vpop.f32.mrb[45].mxu1  ;;  %v6101_v31 = vpop.f32.mrb[45].mxu0 }
 0x154   : > { %v6190_v63 = vadd.f32 %v6189_v57, %v6188_v56  ;;  %v6191_v0 = vpop.f32.mrb[46].mxu1  ;;  %v8607_v8 = vadd.f32 %v6101_v31, %v6100_v4  ;;  %v6103_v2 = vpop.f32.mrb[46].mxu0  ;;  %v3700_v56 = vadd.f32 %v8543_v39, %v8453_v32  ;;  %v7656_v31 = vld [vmem:[%s9844_s1 + $0x3b0] sm:$0xff]   ;;  %v7671_v39 = vld [vmem:[%s9844_s1 + $0x3f8] sm:$0xff]  }
 0x155   : > { %v6192_v11 = vpop.f32.mrb[47].mxu1  ;;  %v6104_v12 = vpop.f32.mrb[47].mxu0  ;;  %6809 = vmatpush3.bf16.msra.mxu1 %v7608_v51 }
 0x156   : > { %v8619_v18 = vadd.f32 %v6190_v63, %v3689_v62  ;;  %v6193_v27 = vadd.f32 %v6192_v11, %v6191_v0  ;;  %v8621_v20 = vadd.f32 %v6104_v12, %v6103_v2  ;;  %6810 = vmatprep.subr.bf16.mxu1 %v7623_v47  ;;  %v7672_v2 = vld [vmem:[%s9844_s1 + $0x3b8] sm:$0xff]   ;;  %v7589_v11 = vld [vmem:[%s7987_s10 + $0x800] ss:$84 sps:$4 sm:$0xff]  }
 0x157   : > { %4355 = vmatmul.mubr.bf16.gmra.mrb[152].mxu0 %v7573_v52  ;;  %4452 = vmatmul.mubr.bf16.gmra.mrb[152].mxu1 %v7574_v53  ;;  %v7585_v52 = vld [vmem:[%s7987_s10 + $0x804] ss:$84 sps:$4 sm:$0xff]   ;;  %v7587_v53 = vld [vmem:[%s7987_s10 + $0x2cc] ss:$84 sps:$4 sm:$0xff]   ;;  %v7590_v12 = vld [vmem:[%s7987_s10 + $0x2c8] ss:$84 sps:$4 sm:$0xff]  }
 0x158   : > { %v8623_v21 = vadd.f32 %v6193_v27, %v3692_v15  ;;  %4362 = vmatprep.mubr.bf16.mxu0 %v7579_v10  ;;  %4459 = vmatprep.mubr.bf16.mxu1 %v7581_v19 }
 0x159   : > { %6811 = vmatpush3.bf16.msra.mxu1 %v7624_v13 }
 0x15a   : > { %v6194_v33 = vpop.f32.mrb[48].mxu1  ;;  %v6258_v34 = vpop.f32.mrb[48].mxu0  ;;  %6812 = vmatprep.subr.bf16.mxu1 %v7639_v61 }
 0x15b   : > { %v6195_v37 = vpop.f32.mrb[49].mxu1  ;;  %v6259_v41 = vpop.f32.mrb[49].mxu0 }
 0x15c   : > { %v6196_v43 = vadd.f32 %v6195_v37, %v6194_v33  ;;  %v6260_v50 = vadd.f32 %v6259_v41, %v6258_v34  ;;  %v6197_v51 = vpop.f32.mrb[50].mxu1  ;;  %v6261_v47 = vpop.f32.mrb[50].mxu0  ;;  %v7595_v33 = vld [vmem:[%s7987_s10 + $0x8ac] ss:$84 sps:$4 sm:$0xff]   ;;  %v7597_v34 = vld [vmem:[%s7987_s10 + $0x374] ss:$84 sps:$4 sm:$0xff]   ;;  %v3708_v37 = vadd.f32 %v8565_v5, %v8453_v32 }
 0x15d   : > { %v6198_v4 = vpop.f32.mrb[51].mxu1  ;;  %v6262_v57 = vpop.f32.mrb[51].mxu0  ;;  %6813 = vmatpush3.bf16.msra.mxu1 %v7640_v25  ;;  %v3705_v25 = vadd.f32 %v8551_v54, %v8453_v32 }
 0x15e   : > { %v6199_v62 = vadd.f32 %v6198_v4, %v6197_v51  ;;  %v6263_v23 = vadd.f32 %v6262_v57, %v6261_v47  ;;  %v8642_v63 = vadd.f32 %v6196_v43, %v3697_v35  ;;  %v8645_v0 = vadd.f32 %v6260_v50, %v8468_v24  ;;  %6814 = vmatprep.subr.bf16.mxu1 %v7655_v9  ;;  %v7687_v24 = vld [vmem:[%s9844_s1 + $0x4c0] sm:$0xff]  }
 0x15f   : > { %4363 = vmatmul.mubr.bf16.gmra.mrb[156].mxu0 %v7583_v49  ;;  %4460 = vmatmul.mubr.bf16.gmra.mrb[156].mxu1 %v7584_v29 }
 0x160   : > { %4370 = vmatprep.mubr.bf16.mxu0 %v7585_v52  ;;  %4467 = vmatprep.mubr.bf16.mxu1 %v7587_v53  ;;  %v8653_v10 = vadd.f32 %v6199_v62, %v3700_v56  ;;  %v8656_v19 = vadd.f32 %v6263_v23, %v8478_v59  ;;  %v7599_v52 = vld [vmem:[%s7987_s10 + $0x8a8] ss:$84 sps:$4 sm:$0xff]   ;;  %v7600_v53 = vld [vmem:[%s7987_s10 + $0x370] ss:$84 sps:$4 sm:$0xff]  }
 0x161   : > { %6815 = vmatpush3.bf16.msra.mxu1 %v7656_v31 }
 0x162   : > { %v6200_v13 = vpop.f32.mrb[52].mxu1  ;;  %v6264_v61 = vpop.f32.mrb[52].mxu0  ;;  %6816 = vmatprep.subr.bf16.mxu1 %v7671_v39 }
 0x163   : > { %v6201_v15 = vpop.f32.mrb[53].mxu1  ;;  %v6265_v27 = vpop.f32.mrb[53].mxu0 }
 0x164   : > { %v6202_v9 = vadd.f32 %v6201_v15, %v6200_v13  ;;  %v6266_v49 = vadd.f32 %v6265_v27, %v6264_v61  ;;  %v6203_v59 = vpop.f32.mrb[54].mxu1  ;;  %v6267_v29 = vpop.f32.mrb[54].mxu0 }
 0x165   : > { %v6204_v41 = vpop.f32.mrb[55].mxu1  ;;  %v6268_v35 = vpop.f32.mrb[55].mxu0  ;;  %6817 = vmatpush3.bf16.msra.mxu1 %v7672_v2 }
 0x166   : > { %v6205_v43 = vadd.f32 %v6204_v41, %v6203_v59  ;;  %v6269_v50 = vadd.f32 %v6268_v35, %v6267_v29  ;;  %v8669_v51 = vadd.f32 %v6202_v9, %v3705_v25  ;;  %v8672_v54 = vadd.f32 %v6266_v49, %v8493_v17  ;;  %7026 = vmatprep.subr.bf16.mxu1 %v7687_v24  ;;  %v7601_v24 = vld [vmem:[%s7987_s10 + $0x954] ss:$84 sps:$4 sm:$0xff]  }
 0x167   : > { %4371 = vmatmul.mubr.bf16.gmra.mrb[160].mxu0 %v7589_v11  ;;  %4468 = vmatmul.mubr.bf16.gmra.mrb[160].mxu1 %v7590_v12  ;;  %v3713_v17 = vadd.f32 %v8579_v28, %v8453_v32  ;;  %v7603_v11 = vld [vmem:[%s7987_s10 + $0x41c] ss:$84 sps:$4 sm:$0xff]   ;;  %v3716_v12 = vadd.f32 %v8590_v46, %v8453_v32 }
 0x168   : > { %4378 = vmatprep.mubr.bf16.mxu0 %v7595_v33  ;;  %4475 = vmatprep.mubr.bf16.mxu1 %v7597_v34  ;;  %v8674_v47 = vadd.f32 %v6205_v43, %v3708_v37  ;;  %v8677_v5 = vadd.f32 %v6269_v50, %v8497_v40  ;;  %v7605_v33 = vld [vmem:[%s7987_s10 + $0x950] ss:$84 sps:$4 sm:$0xff]   ;;  %v7606_v34 = vld [vmem:[%s7987_s10 + $0x418] ss:$84 sps:$4 sm:$0xff]  }
 0x169   : > { %v7611_v50 = vld [vmem:[%s7987_s10 + $0x9fc] ss:$84 sps:$4 sm:$0xff]  }
 0x16a   : > { %v6206_v56 = vpop.f32.mrb[56].mxu1  ;;  %v6270_v4 = vpop.f32.mrb[56].mxu0 }
 0x16b   : > { %v6207_v57 = vpop.f32.mrb[57].mxu1  ;;  %v6271_v31 = vpop.f32.mrb[57].mxu0 }
 0x16c   : > { %v6208_v62 = vadd.f32 %v6207_v57, %v6206_v56  ;;  %v6272_v23 = vadd.f32 %v6271_v31, %v6270_v4  ;;  %v6209_v39 = vpop.f32.mrb[58].mxu1  ;;  %v6273_v2 = vpop.f32.mrb[58].mxu0 }
 0x16d   : > { %v6210_v40 = vpop.f32.mrb[59].mxu1  ;;  %v6274_v13 = vpop.f32.mrb[59].mxu0 }
 0x16e   : > { %v6211_v61 = vadd.f32 %v6210_v40, %v6209_v39  ;;  %v6275_v15 = vadd.f32 %v6274_v13, %v6273_v2  ;;  %v8687_v27 = vadd.f32 %v6208_v62, %v3713_v17  ;;  %v8690_v25 = vadd.f32 %v6272_v23, %v8509_v45  ;;  %v7615_v2 = vld [vmem:[%s7987_s10 + $0x9f8] ss:$84 sps:$4 sm:$0xff]  }
 0x16f   : > { %4379 = vmatmul.mubr.bf16.gmra.mrb[164].mxu0 %v7599_v52  ;;  %4476 = vmatmul.mubr.bf16.gmra.mrb[164].mxu1 %v7600_v53  ;;  %v3721_v45 = vadd.f32 %v8607_v8, %v8453_v32  ;;  %v7613_v52 = vld [vmem:[%s7987_s10 + $0x4c4] ss:$84 sps:$4 sm:$0xff]   ;;  %v3724_v53 = vadd.f32 %v8621_v20, %v8453_v32 }
 0x170   : > { %4386 = vmatprep.mubr.bf16.mxu0 %v7601_v24  ;;  %4483 = vmatprep.mubr.bf16.mxu1 %v7603_v11  ;;  %v8692_v28 = vadd.f32 %v6211_v61, %v3716_v12  ;;  %v8695_v46 = vadd.f32 %v6275_v15, %v8513_v60  ;;  %v7616_v24 = vld [vmem:[%s7987_s10 + $0x4c0] ss:$84 sps:$4 sm:$0xff]  }
 0x171   : > { %v7621_v15 = vld [vmem:[%s7987_s10 + $0x34] ss:$84 sps:$4 sm:$0xff]  }
 0x172   : > { %v6212_v9 = vpop.f32.mrb[60].mxu1  ;;  %v6276_v49 = vpop.f32.mrb[60].mxu0 }
 0x173   : > { %v6213_v59 = vpop.f32.mrb[61].mxu1  ;;  %v6277_v29 = vpop.f32.mrb[61].mxu0 }
 0x174   : > { %v6214_v37 = vadd.f32 %v6213_v59, %v6212_v9  ;;  %v6278_v41 = vadd.f32 %v6277_v29, %v6276_v49  ;;  %v6215_v35 = vpop.f32.mrb[62].mxu1  ;;  %v6279_v43 = vpop.f32.mrb[62].mxu0 }
 0x175   : > { %v6216_v60 = vpop.f32.mrb[63].mxu1  ;;  %v6280_v56 = vpop.f32.mrb[63].mxu0 }
 0x176   : > { %v6217_v4 = vadd.f32 %v6216_v60, %v6215_v35  ;;  %v6281_v57 = vadd.f32 %v6280_v56, %v6279_v43  ;;  %v8705_v31 = vadd.f32 %v6214_v37, %v3721_v45  ;;  %v8708_v17 = vadd.f32 %v6278_v41, %v8525_v6  ;;  %v8720_v6 = vld [vmem:[%s9845_s2] ss:$0 sm:$0xff] }
 0x177   : > { %4387 = vmatmul.mubr.bf16.gmra.mrb[168].mxu0 %v7605_v33  ;;  %4484 = vmatmul.mubr.bf16.gmra.mrb[168].mxu1 %v7606_v34  ;;  %v3729_v11 = vadd.f32 %v8720_v6, %v8368_v22  ;;  %v3732_v9 = vadd.f32 %v8720_v6, %v8374_v30 }
 0x178   : > { %4394 = vmatprep.mubr.bf16.mxu0 %v7611_v50  ;;  %4491 = vmatprep.mubr.bf16.mxu1 %v7613_v52  ;;  %v8710_v8 = vadd.f32 %v6217_v4, %v3724_v53  ;;  %v8713_v32 = vadd.f32 %v6281_v57, %v8529_v16  ;;  %v7617_v16 = vld [vmem:[%s7987_s10 + $0x56c] ss:$84 sps:$4 sm:$0xff]   ;;  %v7619_v50 = vld [vmem:[%s7987_s10 + $0x30] ss:$84 sps:$4 sm:$0xff]   ;;  %v7622_v52 = vld [vmem:[%s7987_s10 + $0x568] ss:$84 sps:$4 sm:$0xff]  }
 0x179   : > { %v7626_v57 = vld [vmem:[%s9844_s1 + $0x400] sm:$0xff]  }
 0x17a   : > { %v6218_v20 = vpop.f32.mrb[64].mxu1  ;;  %v6282_v62 = vpop.f32.mrb[64].mxu0 }
 0x17b   : > { %v6219_v23 = vpop.f32.mrb[65].mxu1  ;;  %v6283_v39 = vpop.f32.mrb[65].mxu0 }
 0x17c   : > { %v6220_v12 = vadd.f32 %v6219_v23, %v6218_v20  ;;  %v6284_v40 = vadd.f32 %v6283_v39, %v6282_v62  ;;  %v6221_v13 = vpop.f32.mrb[66].mxu1  ;;  %v6285_v61 = vpop.f32.mrb[66].mxu0  ;;  %v3740_v20 = vadd.f32 %v8720_v6, %v8392_v48  ;;  %v7629_v39 = vld [vmem:[%s7987_s10 + $0xdc] ss:$84 sps:$4 sm:$0xff]   ;;  %v7642_v48 = vld [vmem:[%s9844_s1 + $0x408] sm:$0xff]  }
 0x17d   : > { %v6222_v49 = vpop.f32.mrb[67].mxu1  ;;  %v6286_v59 = vpop.f32.mrb[67].mxu0 }
 0x17e   : > { %v6223_v29 = vadd.f32 %v6222_v49, %v6221_v13  ;;  %v6287_v33 = vadd.f32 %v6286_v59, %v6285_v61  ;;  %v8728_v34 = vadd.f32 %v6220_v12, %v3729_v11  ;;  %v8731_v45 = vadd.f32 %v6284_v40, %v8541_v36  ;;  %v7631_v49 = vld [vmem:[%s7987_s10 + $0x610] ss:$84 sps:$4 sm:$0xff]   ;;  %v7632_v59 = vld [vmem:[%s7987_s10 + $0xd8] ss:$84 sps:$4 sm:$0xff]  }
 0x17f   : > { %4395 = vmatmul.mubr.bf16.gmra.mrb[172].mxu0 %v7615_v2  ;;  %4492 = vmatmul.mubr.bf16.gmra.mrb[172].mxu1 %v7616_v24  ;;  %v3737_v36 = vadd.f32 %v8720_v6, %v8380_v38  ;;  %v7641_v2 = vld [vmem:[%s9844_s1 + $0x448] sm:$0xff]  }
 0x180   : > { %4499 = vmatprep.mubr.bf16.mxu1 %v7617_v16  ;;  %4596 = vmatprep.mubr.bf16.mxu0 %v7621_v15  ;;  %v8733_v22 = vadd.f32 %v6223_v29, %v3732_v9  ;;  %v8736_v30 = vadd.f32 %v6287_v33, %v8545_v44  ;;  %v7627_v44 = vld [vmem:[%s7987_s10 + $0x614] ss:$84 sps:$4 sm:$0xff]   ;;  %v3745_v29 = vadd.f32 %v8720_v6, %v8404_v58  ;;  %v7673_v58 = vld [vmem:[%s9844_s1 + $0x458] sm:$0xff]  }
 0x182   : > { %v6224_v37 = vpop.f32.mrb[68].mxu1  ;;  %v6288_v41 = vpop.f32.mrb[68].mxu0 }
 0x183   : > { %v6225_v35 = vpop.f32.mrb[69].mxu1  ;;  %v6289_v43 = vpop.f32.mrb[69].mxu0 }
 0x184   : > { %v6226_v53 = vadd.f32 %v6225_v35, %v6224_v37  ;;  %v6290_v60 = vadd.f32 %v6289_v43, %v6288_v41  ;;  %v6227_v56 = vpop.f32.mrb[70].mxu1  ;;  %v6291_v4 = vpop.f32.mrb[70].mxu0  ;;  %v7633_v35 = vld [vmem:[%s7987_s10 + $0x6bc] ss:$84 sps:$4 sm:$0xff]   ;;  %v7635_v43 = vld [vmem:[%s7987_s10 + $0x184] ss:$84 sps:$4 sm:$0xff]  }
 0x185   : > { %v6228_v62 = vpop.f32.mrb[71].mxu1  ;;  %v6292_v23 = vpop.f32.mrb[71].mxu0 }
 0x186   : > { %v6229_v38 = vadd.f32 %v6228_v62, %v6227_v56  ;;  %v6293_v24 = vadd.f32 %v6292_v23, %v6291_v4  ;;  %v8752_v11 = vadd.f32 %v6226_v53, %v3737_v36  ;;  %v8755_v12 = vadd.f32 %v6290_v60, %v8563_v1  ;;  %v7657_v1 = vld [vmem:[%s9844_s1 + $0x450] sm:$0xff]   ;;  %v7689_v23 = vld [vmem:[%s9844_s1 + $0x460] sm:$0xff]  }
 0x187   : > { %4500 = vmatmul.mubr.bf16.gmra.mrb[176].mxu1 %v7622_v52  ;;  %4597 = vmatmul.mubr.bf16.vlgmr.msra.gmra.mrb[176].mxu0 %v7619_v50  ;;  %v3748_v50 = vadd.f32 %v8720_v6, %v8413_v3  ;;  %v7658_v53 = vld [vmem:[%s9844_s1 + $0x410] sm:$0xff]  }
 0x188   : > { %6915 = vmatpush3.bf16.msra.mxu0 %v7626_v57  ;;  %4507 = vmatprep.mubr.bf16.mxu1 %v7627_v44  ;;  %v8760_v40 = vadd.f32 %v6229_v38, %v3740_v20  ;;  %v8763_v13 = vadd.f32 %v6293_v24, %v8567_v7  ;;  %v7674_v20 = vld [vmem:[%s9844_s1 + $0x418] sm:$0xff]   ;;  %v7638_v24 = vld [vmem:[%s7987_s10 + $0x180] ss:$84 sps:$4 sm:$0xff]  }
 0x189   : > { %4604 = vmatprep.mubr.bf16.mxu0 %v7629_v39  ;;  %6916 = vmatprep.subr.bf16.mxu0 %v7641_v2  ;;  %v7637_v38 = vld [vmem:[%s7987_s10 + $0x6b8] ss:$84 sps:$4 sm:$0xff]  }
 0x18a   : > { %v6230_v61 = vpop.f32.mrb[72].mxu1  ;;  %v6294_v16 = vpop.f32.mrb[72].mxu0 }
 0x18b   : > { %v6231_v15 = vpop.f32.mrb[73].mxu1  ;;  %v6295_v9 = vpop.f32.mrb[73].mxu0 }
 0x18c   : > { %v6232_v33 = vadd.f32 %v6231_v15, %v6230_v61  ;;  %v6296_v37 = vadd.f32 %v6295_v9, %v6294_v16  ;;  %v6233_v7 = vpop.f32.mrb[74].mxu1  ;;  %v6297_v41 = vpop.f32.mrb[74].mxu0  ;;  %6917 = vmatpush3.bf16.msra.mxu0 %v7642_v48  ;;  %v7643_v15 = vld [vmem:[%s7987_s10 + $0x764] ss:$84 sps:$4 sm:$0xff]   ;;  %v7645_v9 = vld [vmem:[%s7987_s10 + $0x22c] ss:$84 sps:$4 sm:$0xff]  }
 0x18d   : > { %v6234_v52 = vpop.f32.mrb[75].mxu1  ;;  %v6298_v36 = vpop.f32.mrb[75].mxu0  ;;  %6918 = vmatprep.subr.bf16.mxu0 %v7657_v1 }
 0x18e   : > { %v6235_v60 = vadd.f32 %v6234_v52, %v6233_v7  ;;  %v6299_v56 = vadd.f32 %v6298_v36, %v6297_v41  ;;  %v8782_v4 = vadd.f32 %v6232_v33, %v3745_v29  ;;  %v8785_v57 = vadd.f32 %v6296_v37, %v8588_v42  ;;  %v7690_v33 = vld [vmem:[%s9844_s1 + $0x420] sm:$0xff]   ;;  %v7721_v52 = vld [vmem:[%s9844_s1 + $0x470] sm:$0xff]  }
 0x18f   : > { %4508 = vmatmul.mubr.bf16.gmra.mrb[180].mxu1 %v7631_v49  ;;  %4605 = vmatmul.mubr.bf16.gmra.mrb[180].mxu0 %v7632_v59  ;;  %v3756_v49 = vadd.f32 %v8720_v6, %v8440_v26  ;;  %v7705_v26 = vld [vmem:[%s9844_s1 + $0x468] sm:$0xff]  }
 0x190   : > { %4515 = vmatprep.mubr.bf16.mxu1 %v7633_v35  ;;  %4612 = vmatprep.mubr.bf16.mxu0 %v7635_v43  ;;  %v8787_v3 = vadd.f32 %v6235_v60, %v3748_v50  ;;  %v8790_v44 = vadd.f32 %v6299_v56, %v8598_v55  ;;  %v3753_v55 = vadd.f32 %v8720_v6, %v8428_v14  ;;  %v7647_v60 = vld [vmem:[%s7987_s10 + $0x760] ss:$84 sps:$4 sm:$0xff]   ;;  %v7648_v56 = vld [vmem:[%s7987_s10 + $0x228] ss:$84 sps:$4 sm:$0xff]  }
 0x191   : > { %6919 = vmatpush3.bf16.msra.mxu0 %v7658_v53 }
 0x192   : > { %v6236_v62 = vpop.f32.mrb[76].mxu1  ;;  %v6300_v42 = vpop.f32.mrb[76].mxu0  ;;  %6920 = vmatprep.subr.bf16.mxu0 %v7673_v58 }
 0x193   : > { %v6237_v39 = vpop.f32.mrb[77].mxu1  ;;  %v6301_v2 = vpop.f32.mrb[77].mxu0 }
 0x194   : > { %v6238_v48 = vadd.f32 %v6237_v39, %v6236_v62  ;;  %v6302_v1 = vadd.f32 %v6301_v2, %v6300_v42  ;;  %v6239_v61 = vpop.f32.mrb[78].mxu1  ;;  %v6303_v16 = vpop.f32.mrb[78].mxu0  ;;  %v7649_v42 = vld [vmem:[%s7987_s10 + $0x80c] ss:$84 sps:$4 sm:$0xff]  }
 0x195   : > { %v6240_v59 = vpop.f32.mrb[79].mxu1  ;;  %v6304_v29 = vpop.f32.mrb[79].mxu0  ;;  %6921 = vmatpush3.bf16.msra.mxu0 %v7674_v20 }
 0x196   : > { %v6241_v37 = vadd.f32 %v6240_v59, %v6239_v61  ;;  %v6305_v7 = vadd.f32 %v6304_v29, %v6303_v16  ;;  %6922 = vmatprep.subr.bf16.mxu0 %v7689_v23  ;;  %v8809_v14 = vadd.f32 %v6238_v48, %v3753_v55  ;;  %v8812_v41 = vadd.f32 %v6302_v1, %v8619_v18  ;;  %v7706_v18 = vld [vmem:[%s9844_s1 + $0x428] sm:$0xff]   ;;  %v7737_v61 = vld [vmem:[%s9844_s1 + $0x478] sm:$0xff]   ;;  %v7654_v29 = vld [vmem:[%s7987_s10 + $0x2d0] ss:$84 sps:$4 sm:$0xff]  }
 0x197   : > { %4516 = vmatmul.mubr.bf16.gmra.mrb[184].mxu1 %v7637_v38  ;;  %4613 = vmatmul.mubr.bf16.gmra.mrb[184].mxu0 %v7638_v24  ;;  %v7651_v23 = vld [vmem:[%s7987_s10 + $0x2d4] ss:$84 sps:$4 sm:$0xff]  }
 0x198   : > { %4523 = vmatprep.mubr.bf16.mxu1 %v7643_v15  ;;  %4620 = vmatprep.mubr.bf16.mxu0 %v7645_v9  ;;  %v8817_v6 = vadd.f32 %v6241_v37, %v3756_v49  ;;  %v8820_v35 = vadd.f32 %v6305_v7, %v8623_v21  ;;  %v7722_v38 = vld [vmem:[%s9844_s1 + $0x430] sm:$0xff]   ;;  %v7653_v59 = vld [vmem:[%s7987_s10 + $0x808] ss:$84 sps:$4 sm:$0xff]  }
 0x199   : > { %6923 = vmatpush3.bf16.msra.mxu0 %v7690_v33 }
 0x19a   : > { %v6306_v43 = vpop.f32.mrb[80].mxu0  ;;  %v6370_v50 = vpop.f32.mrb[80].mxu1  ;;  %6924 = vmatprep.subr.bf16.mxu0 %v7705_v26 }
 0x19b   : > { %v6307_v36 = vpop.f32.mrb[81].mxu0  ;;  %v6371_v53 = vpop.f32.mrb[81].mxu1 }
 0x19c   : > { %v6308_v58 = vadd.f32 %v6307_v36, %v6306_v43  ;;  %v6372_v21 = vadd.f32 %v6371_v53, %v6370_v50  ;;  %v6309_v20 = vpop.f32.mrb[82].mxu0  ;;  %v6373_v62 = vpop.f32.mrb[82].mxu1  ;;  %v7661_v43 = vld [vmem:[%s7987_s10 + $0x37c] ss:$84 sps:$4 sm:$0xff]  }
 0x19d   : > { %v6310_v39 = vpop.f32.mrb[83].mxu0  ;;  %v6374_v2 = vpop.f32.mrb[83].mxu1  ;;  %6925 = vmatpush3.bf16.msra.mxu0 %v7706_v18  ;;  %v7659_v18 = vld [vmem:[%s7987_s10 + $0x8b4] ss:$84 sps:$4 sm:$0xff]  }
 0x19e   : > { %v8836_v24 = vadd.f32 %v6308_v58, %v8642_v63  ;;  %v8839_v55 = vadd.f32 %v6372_v21, %v8645_v0  ;;  %v6311_v48 = vadd.f32 %v6310_v39, %v6309_v20  ;;  %v6375_v1 = vadd.f32 %v6374_v2, %v6373_v62  ;;  %6926 = vmatprep.subr.bf16.mxu0 %v7721_v52  ;;  %v7738_v0 = vld [vmem:[%s9844_s1 + $0x438] sm:$0xff]  }
 0x19f   : > { %4524 = vmatmul.mubr.bf16.gmra.mrb[188].mxu1 %v7647_v60  ;;  %4621 = vmatmul.mubr.bf16.gmra.mrb[188].mxu0 %v7648_v56 }
 0x1a0   : > { %v8845_v16 = vadd.f32 %v6311_v48, %v8653_v10  ;;  %v8848_v63 = vadd.f32 %v6375_v1, %v8656_v19  ;;  %4531 = vmatprep.mubr.bf16.mxu1 %v7649_v42  ;;  %4628 = vmatprep.mubr.bf16.mxu0 %v7651_v23  ;;  %v8856_v10 = vld [vmem:[%s9844_s1 + $0x500] sm:$0xff]   ;;  %v7664_v23 = vld [vmem:[%s7987_s10 + $0x378] ss:$84 sps:$4 sm:$0xff]   ;;  %v7665_v1 = vld [vmem:[%s7987_s10 + $0x95c] ss:$84 sps:$4 sm:$0xff]  }
 0x1a1   : > { %6927 = vmatpush3.bf16.msra.mxu0 %v7722_v38  ;;  %v7663_v42 = vld [vmem:[%s7987_s10 + $0x8b0] ss:$84 sps:$4 sm:$0xff]  }
 0x1a2   : > { %v6312_v15 = vpop.f32.mrb[84].mxu0  ;;  %v6376_v9 = vpop.f32.mrb[84].mxu1  ;;  %6928 = vmatprep.subr.bf16.mxu0 %v7737_v61  ;;  %v7667_v61 = vld [vmem:[%s7987_s10 + $0x424] ss:$84 sps:$4 sm:$0xff]  }
 0x1a3   : > { %v6313_v49 = vpop.f32.mrb[85].mxu0  ;;  %v6377_v19 = vpop.f32.mrb[85].mxu1 }
 0x1a4   : > { %v6314_v33 = vadd.f32 %v6313_v49, %v6312_v15  ;;  %v6378_v37 = vadd.f32 %v6377_v19, %v6376_v9  ;;  %v6315_v7 = vpop.f32.mrb[86].mxu0  ;;  %v6379_v26 = vpop.f32.mrb[86].mxu1 }
 0x1a5   : > { %v6316_v50 = vpop.f32.mrb[87].mxu0  ;;  %v6380_v52 = vpop.f32.mrb[87].mxu1  ;;  %6929 = vmatpush3.bf16.msra.mxu0 %v7738_v0 }
 0x1a6   : > { %v8863_v36 = vadd.f32 %v6314_v33, %v8669_v51  ;;  %v8866_v53 = vadd.f32 %v6378_v37, %v8672_v54  ;;  %v6317_v60 = vadd.f32 %v6316_v50, %v6315_v7  ;;  %v6381_v56 = vadd.f32 %v6380_v52, %v6379_v26  ;;  %7156 = vmatprep.subr.bf16.mxu0 %v8856_v10  ;;  %v7670_v7 = vld [vmem:[%s7987_s10 + $0x420] ss:$84 sps:$4 sm:$0xff]   ;;  %v7675_v52 = vld [vmem:[%s7987_s10 + $0xa04] ss:$84 sps:$4 sm:$0xff]  }
 0x1a7   : > { %4532 = vmatmul.mubr.bf16.gmra.mrb[192].mxu1 %v7653_v59  ;;  %4629 = vmatmul.mubr.bf16.gmra.mrb[192].mxu0 %v7654_v29 }
 0x1a8   : > { %v8870_v58 = vadd.f32 %v6317_v60, %v8674_v47  ;;  %v8873_v21 = vadd.f32 %v6381_v56, %v8677_v5  ;;  %4539 = vmatprep.mubr.bf16.mxu1 %v7659_v18  ;;  %4636 = vmatprep.mubr.bf16.mxu0 %v7661_v43  ;;  %v7677_v60 = vld [vmem:[%s7987_s10 + $0x4cc] ss:$84 sps:$4 sm:$0xff]  }
 0x1aa   : > { %v6318_v51 = vpop.f32.mrb[88].mxu0  ;;  %v6382_v20 = vpop.f32.mrb[88].mxu1 }
 0x1ab   : > { %v6319_v54 = vpop.f32.mrb[89].mxu0  ;;  %v6383_v62 = vpop.f32.mrb[89].mxu1 }
 0x1ac   : > { %v6320_v39 = vadd.f32 %v6319_v54, %v6318_v51  ;;  %v6384_v2 = vadd.f32 %v6383_v62, %v6382_v20  ;;  %v6321_v38 = vpop.f32.mrb[90].mxu0  ;;  %v6385_v48 = vpop.f32.mrb[90].mxu1 }
 0x1ad   : > { %v6322_v0 = vpop.f32.mrb[91].mxu0  ;;  %v6386_v47 = vpop.f32.mrb[91].mxu1 }
 0x1ae   : > { %v8880_v5 = vadd.f32 %v6320_v39, %v8687_v27  ;;  %v8883_v15 = vadd.f32 %v6384_v2, %v8690_v25  ;;  %v6323_v9 = vadd.f32 %v6322_v0, %v6321_v38  ;;  %v6387_v49 = vadd.f32 %v6386_v47, %v6385_v48  ;;  %v7669_v25 = vld [vmem:[%s7987_s10 + $0x958] ss:$84 sps:$4 sm:$0xff]   ;;  %v7680_v38 = vld [vmem:[%s7987_s10 + $0x4c8] ss:$84 sps:$4 sm:$0xff]  }
 0x1af   : > { %4540 = vmatmul.mubr.bf16.gmra.mrb[196].mxu1 %v7663_v42  ;;  %4637 = vmatmul.mubr.bf16.gmra.mrb[196].mxu0 %v7664_v23  ;;  %v7681_v47 = vld [vmem:[%s7987_s10 + $0x574] ss:$84 sps:$4 sm:$0xff]  }
 0x1b0   : > { %v8886_v19 = vadd.f32 %v6323_v9, %v8692_v28  ;;  %v8889_v59 = vadd.f32 %v6387_v49, %v8695_v46  ;;  %4547 = vmatprep.mubr.bf16.mxu1 %v7665_v1  ;;  %4644 = vmatprep.mubr.bf16.mxu0 %v7667_v61  ;;  %v7685_v9 = vld [vmem:[%s7987_s10 + $0x3c] ss:$84 sps:$4 sm:$0xff]  }
 0x1b2   : > { %v6324_v29 = vpop.f32.mrb[92].mxu0  ;;  %v6388_v27 = vpop.f32.mrb[92].mxu1 }
 0x1b3   : > { %v6325_v33 = vpop.f32.mrb[93].mxu0  ;;  %v6389_v37 = vpop.f32.mrb[93].mxu1 }
 0x1b4   : > { %v6326_v26 = vadd.f32 %v6325_v33, %v6324_v29  ;;  %v6390_v18 = vadd.f32 %v6389_v37, %v6388_v27  ;;  %v6327_v43 = vpop.f32.mrb[94].mxu0  ;;  %v6391_v50 = vpop.f32.mrb[94].mxu1 }
 0x1b5   : > { %v6328_v56 = vpop.f32.mrb[95].mxu0  ;;  %v6392_v28 = vpop.f32.mrb[95].mxu1 }
 0x1b6   : > { %v8896_v46 = vadd.f32 %v6326_v26, %v8705_v31  ;;  %v8899_v51 = vadd.f32 %v6390_v18, %v8708_v17  ;;  %v6329_v20 = vadd.f32 %v6328_v56, %v6327_v43  ;;  %v6393_v54 = vadd.f32 %v6392_v28, %v6391_v50  ;;  %v7679_v17 = vld [vmem:[%s7987_s10 + $0xa00] ss:$84 sps:$4 sm:$0xff]   ;;  %v7686_v43 = vld [vmem:[%s7987_s10 + $0x570] ss:$84 sps:$4 sm:$0xff]  }
 0x1b7   : > { %4548 = vmatmul.mubr.bf16.gmra.mrb[200].mxu1 %v7669_v25  ;;  %4645 = vmatmul.mubr.bf16.gmra.mrb[200].mxu0 %v7670_v7  ;;  %v7691_v28 = vld [vmem:[%s7987_s10 + $0x61c] ss:$84 sps:$4 sm:$0xff]  }
 0x1b8   : > { %v8902_v62 = vadd.f32 %v6329_v20, %v8710_v8  ;;  %v8905_v42 = vadd.f32 %v6393_v54, %v8713_v32  ;;  %4555 = vmatprep.mubr.bf16.mxu1 %v7675_v52  ;;  %4652 = vmatprep.mubr.bf16.mxu0 %v7677_v60  ;;  %v7693_v54 = vld [vmem:[%s7987_s10 + $0xe4] ss:$84 sps:$4 sm:$0xff]  }
 0x1ba   : > { %v6330_v23 = vpop.f32.mrb[96].mxu0  ;;  %v6394_v31 = vpop.f32.mrb[96].mxu1 }
 0x1bb   : > { %v6331_v39 = vpop.f32.mrb[97].mxu0  ;;  %v6395_v2 = vpop.f32.mrb[97].mxu1 }
 0x1bc   : > { %v6332_v48 = vadd.f32 %v6331_v39, %v6330_v23  ;;  %v6396_v1 = vadd.f32 %v6395_v2, %v6394_v31  ;;  %v6333_v61 = vpop.f32.mrb[98].mxu0  ;;  %v6397_v0 = vpop.f32.mrb[98].mxu1  ;;  %v7703_v23 = vld [vmem:[%s9844_s1 + $0x4c8] sm:$0xff]  }
 0x1bd   : > { %v6334_v49 = vpop.f32.mrb[99].mxu0  ;;  %v6398_v8 = vpop.f32.mrb[99].mxu1 }
 0x1be   : > { %v8912_v32 = vadd.f32 %v6332_v48, %v8728_v34  ;;  %v8915_v29 = vadd.f32 %v6396_v1, %v8731_v45  ;;  %v6335_v27 = vadd.f32 %v6334_v49, %v6333_v61  ;;  %v6399_v33 = vadd.f32 %v6398_v8, %v6397_v0  ;;  %v7683_v45 = vld [vmem:[%s7987_s10 + $0x38] ss:$84 sps:$4 sm:$0xff]  }
 0x1bf   : > { %4556 = vmatmul.mubr.bf16.gmra.mrb[204].mxu1 %v7679_v17  ;;  %4653 = vmatmul.mubr.bf16.gmra.mrb[204].mxu0 %v7680_v38 }
 0x1c0   : > { %v8918_v37 = vadd.f32 %v6335_v27, %v8733_v22  ;;  %v8921_v25 = vadd.f32 %v6399_v33, %v8736_v30  ;;  %4660 = vmatprep.mubr.bf16.mxu0 %v7681_v47  ;;  %4757 = vmatprep.mubr.bf16.mxu1 %v7685_v9  ;;  %v7688_v22 = vld [vmem:[%s9844_s1 + $0x480] sm:$0xff]  }
 0x1c1   : > { %v7696_v47 = vld [vmem:[%s7987_s10 + $0xe0] ss:$84 sps:$4 sm:$0xff]   ;;  %v7697_v33 = vld [vmem:[%s7987_s10 + $0x6c4] ss:$84 sps:$4 sm:$0xff]  }
 0x1c2   : > { %v6336_v7 = vpop.f32.mrb[100].mxu0  ;;  %v6400_v34 = vpop.f32.mrb[100].mxu1 }
 0x1c3   : > { %v6337_v26 = vpop.f32.mrb[101].mxu0  ;;  %v6401_v18 = vpop.f32.mrb[101].mxu1 }
 0x1c4   : > { %v6338_v50 = vadd.f32 %v6337_v26, %v6336_v7  ;;  %v6402_v52 = vadd.f32 %v6401_v18, %v6400_v34  ;;  %v6339_v60 = vpop.f32.mrb[102].mxu0  ;;  %v6403_v56 = vpop.f32.mrb[102].mxu1  ;;  %v7699_v7 = vld [vmem:[%s7987_s10 + $0x18c] ss:$84 sps:$4 sm:$0xff]   ;;  %v7720_v18 = vld [vmem:[%s9844_s1 + $0x490] sm:$0xff]  }
 0x1c5   : > { %v6340_v30 = vpop.f32.mrb[103].mxu0  ;;  %v6404_v20 = vpop.f32.mrb[103].mxu1 }
 0x1c6   : > { %v8934_v31 = vadd.f32 %v6338_v50, %v8752_v11  ;;  %v8937_v39 = vadd.f32 %v6402_v52, %v8755_v12  ;;  %v6341_v2 = vadd.f32 %v6340_v30, %v6339_v60  ;;  %v6405_v17 = vadd.f32 %v6404_v20, %v6403_v56  ;;  %v7704_v11 = vld [vmem:[%s9844_s1 + $0x488] sm:$0xff]   ;;  %v7719_v12 = vld [vmem:[%s9844_s1 + $0x4d0] sm:$0xff]   ;;  %v7735_v60 = vld [vmem:[%s9844_s1 + $0x4d8] sm:$0xff]  }
 0x1c7   : > { %4661 = vmatmul.mubr.bf16.gmra.mrb[208].mxu0 %v7686_v43  ;;  %4758 = vmatmul.mubr.bf16.vlgmr.msra.gmra.mrb[208].mxu1 %v7683_v45 }
 0x1c8   : > { %v8940_v38 = vadd.f32 %v6341_v2, %v8760_v40  ;;  %v8943_v48 = vadd.f32 %v6405_v17, %v8763_v13  ;;  %7027 = vmatpush3.bf16.msra.mxu1 %v7688_v22  ;;  %4668 = vmatprep.mubr.bf16.mxu0 %v7691_v28  ;;  %v7695_v13 = vld [vmem:[%s7987_s10 + $0x618] ss:$84 sps:$4 sm:$0xff]  }
 0x1c9   : > { %4765 = vmatprep.mubr.bf16.mxu1 %v7693_v54  ;;  %7028 = vmatprep.subr.bf16.mxu1 %v7703_v23  ;;  %v7702_v54 = vld [vmem:[%s7987_s10 + $0x188] ss:$84 sps:$4 sm:$0xff]  }
 0x1ca   : > { %v6342_v1 = vpop.f32.mrb[104].mxu0  ;;  %v6406_v40 = vpop.f32.mrb[104].mxu1 }
 0x1cb   : > { %v6343_v61 = vpop.f32.mrb[105].mxu0  ;;  %v6407_v0 = vpop.f32.mrb[105].mxu1 }
 0x1cc   : > { %v6344_v9 = vadd.f32 %v6343_v61, %v6342_v1  ;;  %v6408_v49 = vadd.f32 %v6407_v0, %v6406_v40  ;;  %v6345_v8 = vpop.f32.mrb[106].mxu0  ;;  %v6409_v27 = vpop.f32.mrb[106].mxu1  ;;  %7029 = vmatpush3.bf16.msra.mxu1 %v7704_v11  ;;  %v7709_v1 = vld [vmem:[%s7987_s10 + $0x234] ss:$84 sps:$4 sm:$0xff]   ;;  %v7752_v0 = vld [vmem:[%s9844_s1 + $0x4a0] sm:$0xff]  }
 0x1cd   : > { %v6346_v34 = vpop.f32.mrb[107].mxu0  ;;  %v6410_v26 = vpop.f32.mrb[107].mxu1  ;;  %7030 = vmatprep.subr.bf16.mxu1 %v7719_v12  ;;  %v7707_v12 = vld [vmem:[%s7987_s10 + $0x76c] ss:$84 sps:$4 sm:$0xff]  }
 0x1ce   : > { %v8959_v45 = vadd.f32 %v6344_v9, %v8782_v4  ;;  %v8962_v43 = vadd.f32 %v6408_v49, %v8785_v57  ;;  %v6347_v50 = vadd.f32 %v6346_v34, %v6345_v8  ;;  %v6411_v52 = vadd.f32 %v6410_v26, %v6409_v27  ;;  %v7736_v4 = vld [vmem:[%s9844_s1 + $0x498] sm:$0xff]   ;;  %v7766_v8 = vld [vmem:[%s9844_s1 + $0x4e8] sm:$0xff]  }
 0x1cf   : > { %4669 = vmatmul.mubr.bf16.gmra.mrb[212].mxu0 %v7695_v13  ;;  %4766 = vmatmul.mubr.bf16.gmra.mrb[212].mxu1 %v7696_v47 }
 0x1d0   : > { %v8968_v56 = vadd.f32 %v6347_v50, %v8787_v3  ;;  %v8971_v22 = vadd.f32 %v6411_v52, %v8790_v44  ;;  %4676 = vmatprep.mubr.bf16.mxu0 %v7697_v33  ;;  %4773 = vmatprep.mubr.bf16.mxu1 %v7699_v7  ;;  %v7751_v3 = vld [vmem:[%s9844_s1 + $0x4e0] sm:$0xff]  }
 0x1d1   : > { %7031 = vmatpush3.bf16.msra.mxu1 %v7720_v18  ;;  %v7701_v44 = vld [vmem:[%s7987_s10 + $0x6c0] ss:$84 sps:$4 sm:$0xff]   ;;  %v7712_v18 = vld [vmem:[%s7987_s10 + $0x230] ss:$84 sps:$4 sm:$0xff]  }
 0x1d2   : > { %v6348_v57 = vpop.f32.mrb[108].mxu0  ;;  %v6412_v28 = vpop.f32.mrb[108].mxu1  ;;  %7032 = vmatprep.subr.bf16.mxu1 %v7735_v60 }
 0x1d3   : > { %v6349_v30 = vpop.f32.mrb[109].mxu0  ;;  %v6413_v20 = vpop.f32.mrb[109].mxu1 }
 0x1d4   : > { %v6350_v23 = vadd.f32 %v6349_v30, %v6348_v57  ;;  %v6414_v2 = vadd.f32 %v6413_v20, %v6412_v28  ;;  %v6351_v17 = vpop.f32.mrb[110].mxu0  ;;  %v6415_v11 = vpop.f32.mrb[110].mxu1  ;;  %v7713_v57 = vld [vmem:[%s7987_s10 + $0x814] ss:$84 sps:$4 sm:$0xff]   ;;  %v7715_v28 = vld [vmem:[%s7987_s10 + $0x2dc] ss:$84 sps:$4 sm:$0xff]  }
 0x1d5   : > { %v6352_v40 = vpop.f32.mrb[111].mxu0  ;;  %v6416_v61 = vpop.f32.mrb[111].mxu1  ;;  %7033 = vmatpush3.bf16.msra.mxu1 %v7736_v4  ;;  %v7781_v20 = vld [vmem:[%s9844_s1 + $0x4b0] sm:$0xff]  }
 0x1d6   : > { %v8987_v13 = vadd.f32 %v6350_v23, %v8809_v14  ;;  %v8990_v47 = vadd.f32 %v6414_v2, %v8812_v41  ;;  %v6353_v9 = vadd.f32 %v6352_v40, %v6351_v17  ;;  %v6417_v49 = vadd.f32 %v6416_v61, %v6415_v11  ;;  %7034 = vmatprep.subr.bf16.mxu1 %v7751_v3  ;;  %v7767_v41 = vld [vmem:[%s9844_s1 + $0x4a8] sm:$0xff]   ;;  %v7794_v17 = vld [vmem:[%s9844_s1 + $0x4f8] sm:$0xff]  }
 0x1d7   : > { %4677 = vmatmul.mubr.bf16.gmra.mrb[216].mxu0 %v7701_v44  ;;  %4774 = vmatmul.mubr.bf16.gmra.mrb[216].mxu1 %v7702_v54 }
 0x1d8   : > { %v8996_v27 = vadd.f32 %v6353_v9, %v8817_v6  ;;  %v8999_v14 = vadd.f32 %v6417_v49, %v8820_v35  ;;  %4684 = vmatprep.mubr.bf16.mxu0 %v7707_v12  ;;  %4781 = vmatprep.mubr.bf16.mxu1 %v7709_v1  ;;  %v7780_v6 = vld [vmem:[%s9844_s1 + $0x4f0] sm:$0xff]   ;;  %v7711_v35 = vld [vmem:[%s7987_s10 + $0x768] ss:$84 sps:$4 sm:$0xff]  }
 0x1d9   : > { %7035 = vmatpush3.bf16.msra.mxu1 %v7752_v0  ;;  %v7717_v0 = vld [vmem:[%s7987_s10 + $0x810] ss:$84 sps:$4 sm:$0xff]  }
 0x1da   : > { %v6418_v33 = vpop.f32.mrb[112].mxu1  ;;  %v6482_v7 = vpop.f32.mrb[112].mxu0  ;;  %7036 = vmatprep.subr.bf16.mxu1 %v7766_v8 }
 0x1db   : > { %v6419_v34 = vpop.f32.mrb[113].mxu1  ;;  %v6483_v26 = vpop.f32.mrb[113].mxu0 }
 0x1dc   : > { %v6420_v50 = vadd.f32 %v6419_v34, %v6418_v33  ;;  %v6484_v52 = vadd.f32 %v6483_v26, %v6482_v7  ;;  %v6421_v60 = vpop.f32.mrb[114].mxu1  ;;  %v6485_v4 = vpop.f32.mrb[114].mxu0  ;;  %v7725_v33 = vld [vmem:[%s7987_s10 + $0x384] ss:$84 sps:$4 sm:$0xff]  }
 0x1dd   : > { %v6422_v3 = vpop.f32.mrb[115].mxu1  ;;  %v6486_v30 = vpop.f32.mrb[115].mxu0  ;;  %7037 = vmatpush3.bf16.msra.mxu1 %v7767_v41  ;;  %v7723_v41 = vld [vmem:[%s7987_s10 + $0x8bc] ss:$84 sps:$4 sm:$0xff]  }
 0x1de   : > { %v9015_v44 = vadd.f32 %v6420_v50, %v8836_v24  ;;  %v9018_v54 = vadd.f32 %v6484_v52, %v8839_v55  ;;  %v6423_v23 = vadd.f32 %v6422_v3, %v6421_v60  ;;  %v6487_v2 = vadd.f32 %v6486_v30, %v6485_v4  ;;  %7038 = vmatprep.subr.bf16.mxu1 %v7780_v6  ;;  %v7795_v55 = vld [vmem:[%s9844_s1 + $0x4b8] sm:$0xff]  }
 0x1df   : > { %4685 = vmatmul.mubr.bf16.gmra.mrb[220].mxu0 %v7711_v35  ;;  %4782 = vmatmul.mubr.bf16.gmra.mrb[220].mxu1 %v7712_v18 }
 0x1e0   : > { %v9024_v11 = vadd.f32 %v6423_v23, %v8845_v16  ;;  %v9027_v24 = vadd.f32 %v6487_v2, %v8848_v63  ;;  %4692 = vmatprep.mubr.bf16.mxu0 %v7713_v57  ;;  %4789 = vmatprep.mubr.bf16.mxu1 %v7715_v28  ;;  %v7718_v16 = vld [vmem:[%s7987_s10 + $0x2d8] ss:$84 sps:$4 sm:$0xff]   ;;  %v7728_v28 = vld [vmem:[%s7987_s10 + $0x380] ss:$84 sps:$4 sm:$0xff]  }
 0x1e1   : > { %7039 = vmatpush3.bf16.msra.mxu1 %v7781_v20  ;;  %v7729_v2 = vld [vmem:[%s7987_s10 + $0x964] ss:$84 sps:$4 sm:$0xff]  }
 0x1e2   : > { %v6424_v12 = vpop.f32.mrb[116].mxu1  ;;  %v6488_v1 = vpop.f32.mrb[116].mxu0  ;;  %7040 = vmatprep.subr.bf16.mxu1 %v7794_v17  ;;  %v7731_v17 = vld [vmem:[%s7987_s10 + $0x42c] ss:$84 sps:$4 sm:$0xff]  }
 0x1e3   : > { %v6425_v40 = vpop.f32.mrb[117].mxu1  ;;  %v6489_v61 = vpop.f32.mrb[117].mxu0 }
 0x1e4   : > { %v6426_v9 = vadd.f32 %v6425_v40, %v6424_v12  ;;  %v6490_v49 = vadd.f32 %v6489_v61, %v6488_v1  ;;  %v6427_v63 = vpop.f32.mrb[118].mxu1  ;;  %v6491_v8 = vpop.f32.mrb[118].mxu0 }
 0x1e5   : > { %v6428_v7 = vpop.f32.mrb[119].mxu1  ;;  %v6492_v6 = vpop.f32.mrb[119].mxu0  ;;  %7041 = vmatpush3.bf16.msra.mxu1 %v7795_v55 }
 0x1e6   : > { %v9037_v34 = vadd.f32 %v6426_v9, %v8863_v36  ;;  %v9040_v26 = vadd.f32 %v6490_v49, %v8866_v53  ;;  %v6429_v35 = vadd.f32 %v6428_v7, %v6427_v63  ;;  %v6493_v18 = vadd.f32 %v6492_v6, %v6491_v8  ;;  %v7727_v53 = vld [vmem:[%s7987_s10 + $0x8b8] ss:$84 sps:$4 sm:$0xff]   ;;  %v7734_v63 = vld [vmem:[%s7987_s10 + $0x428] ss:$84 sps:$4 sm:$0xff]  }
 0x1e7   : > { %4693 = vmatmul.mubr.bf16.gmra.mrb[224].mxu0 %v7717_v0  ;;  %4790 = vmatmul.mubr.bf16.gmra.mrb[224].mxu1 %v7718_v16  ;;  %v7739_v6 = vld [vmem:[%s7987_s10 + $0xa0c] ss:$84 sps:$4 sm:$0xff]  }
 0x1e8   : > { %v9043_v50 = vadd.f32 %v6429_v35, %v8870_v58  ;;  %v9046_v52 = vadd.f32 %v6493_v18, %v8873_v21  ;;  %4700 = vmatprep.mubr.bf16.mxu0 %v7723_v41  ;;  %4797 = vmatprep.mubr.bf16.mxu1 %v7725_v33  ;;  %v7741_v35 = vld [vmem:[%s7987_s10 + $0x4d4] ss:$84 sps:$4 sm:$0xff]  }
 0x1ea   : > { %v6430_v60 = vpop.f32.mrb[120].mxu1  ;;  %v6494_v36 = vpop.f32.mrb[120].mxu0 }
 0x1eb   : > { %v6431_v4 = vpop.f32.mrb[121].mxu1  ;;  %v6495_v57 = vpop.f32.mrb[121].mxu0 }
 0x1ec   : > { %v6432_v3 = vadd.f32 %v6431_v4, %v6430_v60  ;;  %v6496_v30 = vadd.f32 %v6495_v57, %v6494_v36  ;;  %v6433_v20 = vpop.f32.mrb[122].mxu1  ;;  %v6497_v23 = vpop.f32.mrb[122].mxu0 }
 0x1ed   : > { %v6434_v55 = vpop.f32.mrb[123].mxu1  ;;  %v6498_v58 = vpop.f32.mrb[123].mxu0 }
 0x1ee   : > { %v9053_v21 = vadd.f32 %v6432_v3, %v8880_v5  ;;  %v9056_v12 = vadd.f32 %v6496_v30, %v8883_v15  ;;  %v6435_v1 = vadd.f32 %v6434_v55, %v6433_v20  ;;  %v6499_v40 = vadd.f32 %v6498_v58, %v6497_v23  ;;  %v7733_v15 = vld [vmem:[%s7987_s10 + $0x960] ss:$84 sps:$4 sm:$0xff]   ;;  %v7744_v20 = vld [vmem:[%s7987_s10 + $0x4d0] ss:$84 sps:$4 sm:$0xff]  }
 0x1ef   : > { %4701 = vmatmul.mubr.bf16.gmra.mrb[228].mxu0 %v7727_v53  ;;  %4798 = vmatmul.mubr.bf16.gmra.mrb[228].mxu1 %v7728_v28  ;;  %v7745_v58 = vld [vmem:[%s7987_s10 + $0x57c] ss:$84 sps:$4 sm:$0xff]  }
 0x1f0   : > { %v9059_v61 = vadd.f32 %v6435_v1, %v8886_v19  ;;  %v9062_v0 = vadd.f32 %v6499_v40, %v8889_v59  ;;  %4708 = vmatprep.mubr.bf16.mxu0 %v7729_v2  ;;  %4805 = vmatprep.mubr.bf16.mxu1 %v7731_v17  ;;  %v7749_v1 = vld [vmem:[%s7987_s10 + $0x44] ss:$84 sps:$4 sm:$0xff]  }
 0x1f2   : > { %v6436_v16 = vpop.f32.mrb[124].mxu1  ;;  %v6500_v5 = vpop.f32.mrb[124].mxu0 }
 0x1f3   : > { %v6437_v9 = vpop.f32.mrb[125].mxu1  ;;  %v6501_v49 = vpop.f32.mrb[125].mxu0 }
 0x1f4   : > { %v6438_v8 = vadd.f32 %v6437_v9, %v6436_v16  ;;  %v6502_v41 = vadd.f32 %v6501_v49, %v6500_v5  ;;  %v6439_v33 = vpop.f32.mrb[126].mxu1  ;;  %v6503_v7 = vpop.f32.mrb[126].mxu0 }
 0x1f5   : > { %v6440_v18 = vpop.f32.mrb[127].mxu1  ;;  %v6504_v19 = vpop.f32.mrb[127].mxu0 }
 0x1f6   : > { %v9069_v59 = vadd.f32 %v6438_v8, %v8896_v46  ;;  %v9072_v60 = vadd.f32 %v6502_v41, %v8899_v51  ;;  %v6441_v36 = vadd.f32 %v6440_v18, %v6439_v33  ;;  %v6505_v4 = vadd.f32 %v6504_v19, %v6503_v7  ;;  %v7743_v51 = vld [vmem:[%s7987_s10 + $0xa08] ss:$84 sps:$4 sm:$0xff]   ;;  %v7750_v33 = vld [vmem:[%s7987_s10 + $0x578] ss:$84 sps:$4 sm:$0xff]  }
 0x1f7   : > { %4709 = vmatmul.mubr.bf16.gmra.mrb[232].mxu0 %v7733_v15  ;;  %4806 = vmatmul.mubr.bf16.gmra.mrb[232].mxu1 %v7734_v63  ;;  %v7754_v19 = vld [vmem:[%s7987_s10 + $0x624] ss:$84 sps:$4 sm:$0xff]  }
 0x1f8   : > { %v9075_v57 = vadd.f32 %v6441_v36, %v8902_v62  ;;  %v9078_v53 = vadd.f32 %v6505_v4, %v8905_v42  ;;  %4716 = vmatprep.mubr.bf16.mxu0 %v7739_v6  ;;  %4813 = vmatprep.mubr.bf16.mxu1 %v7741_v35  ;;  %v7756_v4 = vld [vmem:[%s7987_s10 + $0xec] ss:$84 sps:$4 sm:$0xff]  }
 0x1fa   : > { %v6442_v28 = vpop.f32.mrb[128].mxu1  ;;  %v6506_v46 = vpop.f32.mrb[128].mxu0 }
 0x1fb   : > { %v6443_v3 = vpop.f32.mrb[129].mxu1  ;;  %v6507_v30 = vpop.f32.mrb[129].mxu0 }
 0x1fc   : > { %v6444_v23 = vadd.f32 %v6443_v3, %v6442_v28  ;;  %v6508_v2 = vadd.f32 %v6507_v30, %v6506_v46  ;;  %v6445_v17 = vpop.f32.mrb[130].mxu1  ;;  %v6509_v55 = vpop.f32.mrb[130].mxu0 }
 0x1fd   : > { %v6446_v40 = vpop.f32.mrb[131].mxu1  ;;  %v6510_v62 = vpop.f32.mrb[131].mxu0 }
 0x1fe   : > { %v9085_v42 = vadd.f32 %v6444_v23, %v8912_v32  ;;  %v9088_v16 = vadd.f32 %v6508_v2, %v8915_v29  ;;  %v6447_v5 = vadd.f32 %v6446_v40, %v6445_v17  ;;  %v6511_v9 = vadd.f32 %v6510_v62, %v6509_v55  ;;  %v7747_v29 = vld [vmem:[%s7987_s10 + $0x40] ss:$84 sps:$4 sm:$0xff]   ;;  %v7759_v55 = vld [vmem:[%s7987_s10 + $0xe8] ss:$84 sps:$4 sm:$0xff]  }
 0x1ff   : > { %4717 = vmatmul.mubr.bf16.gmra.mrb[236].mxu0 %v7743_v51  ;;  %4814 = vmatmul.mubr.bf16.gmra.mrb[236].mxu1 %v7744_v20  ;;  %v7758_v17 = vld [vmem:[%s7987_s10 + $0x620] ss:$84 sps:$4 sm:$0xff]  }
 0x200   : > { %v9091_v49 = vadd.f32 %v6447_v5, %v8918_v37  ;;  %v9094_v15 = vadd.f32 %v6511_v9, %v8921_v25  ;;  %4821 = vmatprep.mubr.bf16.mxu1 %v7745_v58  ;;  %4918 = vmatprep.mubr.bf16.mxu0 %v7749_v1  ;;  %v7808_v25 = vld [vmem:[%s9844_s1 + $0x508] sm:$0xff]  }
 0x201   : > { %v7760_v62 = vld [vmem:[%s7987_s10 + $0x6cc] ss:$84 sps:$4 sm:$0xff]   ;;  %v7762_v5 = vld [vmem:[%s7987_s10 + $0x194] ss:$84 sps:$4 sm:$0xff]  }
 0x202   : > { %v6448_v63 = vpop.f32.mrb[132].mxu1  ;;  %v6512_v32 = vpop.f32.mrb[132].mxu0 }
 0x203   : > { %v6449_v8 = vpop.f32.mrb[133].mxu1  ;;  %v6513_v41 = vpop.f32.mrb[133].mxu0 }
 0x204   : > { %v6450_v7 = vadd.f32 %v6449_v8, %v6448_v63  ;;  %v6514_v6 = vadd.f32 %v6513_v41, %v6512_v32  ;;  %v6451_v35 = vpop.f32.mrb[134].mxu1  ;;  %v6515_v18 = vpop.f32.mrb[134].mxu0 }
 0x205   : > { %v6452_v36 = vpop.f32.mrb[135].mxu1  ;;  %v6516_v37 = vpop.f32.mrb[135].mxu0 }
 0x206   : > { %v9104_v28 = vadd.f32 %v6450_v7, %v8934_v31  ;;  %v9107_v46 = vadd.f32 %v6514_v6, %v8937_v39  ;;  %v6453_v3 = vadd.f32 %v6452_v36, %v6451_v35  ;;  %v6517_v30 = vadd.f32 %v6516_v37, %v6515_v18  ;;  %v7765_v35 = vld [vmem:[%s7987_s10 + $0x190] ss:$84 sps:$4 sm:$0xff]  }
 0x207   : > { %4822 = vmatmul.mubr.bf16.gmra.mrb[240].mxu1 %v7750_v33  ;;  %4919 = vmatmul.mubr.bf16.vlgmr.msra.gmra.mrb[240].mxu0 %v7747_v29 }
 0x208   : > { %v9110_v51 = vadd.f32 %v6453_v3, %v8940_v38  ;;  %v9113_v20 = vadd.f32 %v6517_v30, %v8943_v48  ;;  %7157 = vmatpush3.bf16.msra.mxu0 %v8856_v10  ;;  %4829 = vmatprep.mubr.bf16.mxu1 %v7754_v19 }
 0x209   : > { %4926 = vmatprep.mubr.bf16.mxu0 %v7756_v4  ;;  %7158 = vmatprep.subr.bf16.mxu0 %v7808_v25  ;;  %v7768_v4 = vld [vmem:[%s7987_s10 + $0x774] ss:$84 sps:$4 sm:$0xff]  }
 0x20a   : > { %v6454_v31 = vpop.f32.mrb[136].mxu1  ;;  %v6518_v39 = vpop.f32.mrb[136].mxu0 }
 0x20b   : > { %v6455_v23 = vpop.f32.mrb[137].mxu1  ;;  %v6519_v2 = vpop.f32.mrb[137].mxu0 }
 0x20c   : > { %v6456_v58 = vadd.f32 %v6455_v23, %v6454_v31  ;;  %v6520_v1 = vadd.f32 %v6519_v2, %v6518_v39  ;;  %v6457_v38 = vpop.f32.mrb[138].mxu1  ;;  %v6521_v40 = vpop.f32.mrb[138].mxu0  ;;  %7159 = vmatpush3.bf16.msra.mxu0 %v7808_v25  ;;  %v7770_v25 = vld [vmem:[%s7987_s10 + $0x23c] ss:$84 sps:$4 sm:$0xff]  }
 0x20d   : > { %v6458_v48 = vpop.f32.mrb[139].mxu1  ;;  %v6522_v9 = vpop.f32.mrb[139].mxu0 }
 0x20e   : > { %v9121_v10 = vadd.f32 %v6456_v58, %v8959_v45  ;;  %v9124_v63 = vadd.f32 %v6520_v1, %v8962_v43  ;;  %v6459_v32 = vadd.f32 %v6458_v48, %v6457_v38  ;;  %v6523_v8 = vadd.f32 %v6522_v9, %v6521_v40  ;;  %v7764_v43 = vld [vmem:[%s7987_s10 + $0x6c8] ss:$84 sps:$4 sm:$0xff]   ;;  %v7773_v1 = vld [vmem:[%s7987_s10 + $0x238] ss:$84 sps:$4 sm:$0xff]  }
 0x20f   : > { %4830 = vmatmul.mubr.bf16.gmra.mrb[244].mxu1 %v7758_v17  ;;  %4927 = vmatmul.mubr.bf16.gmra.mrb[244].mxu0 %v7759_v55  ;;  %v7776_v48 = vld [vmem:[%s7987_s10 + $0x81c] ss:$84 sps:$4 sm:$0xff]   ;;  %v7779_v9 = vld [vmem:[%s7987_s10 + $0x2e4] ss:$84 sps:$4 sm:$0xff]  }
 0x210   : > { %v9127_v41 = vadd.f32 %v6459_v32, %v8968_v56  ;;  %v9130_v29 = vadd.f32 %v6523_v8, %v8971_v22  ;;  %4837 = vmatprep.mubr.bf16.mxu1 %v7760_v62  ;;  %4934 = vmatprep.mubr.bf16.mxu0 %v7762_v5 }
 0x212   : > { %v6460_v33 = vpop.f32.mrb[140].mxu1  ;;  %v6524_v45 = vpop.f32.mrb[140].mxu0 }
 0x213   : > { %v6461_v7 = vpop.f32.mrb[141].mxu1  ;;  %v6525_v6 = vpop.f32.mrb[141].mxu0 }
 0x214   : > { %v6462_v18 = vadd.f32 %v6461_v7, %v6460_v33  ;;  %v6526_v19 = vadd.f32 %v6525_v6, %v6524_v45  ;;  %v6463_v36 = vpop.f32.mrb[142].mxu1  ;;  %v6527_v37 = vpop.f32.mrb[142].mxu0 }
 0x215   : > { %v6464_v3 = vpop.f32.mrb[143].mxu1  ;;  %v6528_v56 = vpop.f32.mrb[143].mxu0 }
 0x216   : > { %v9137_v22 = vadd.f32 %v6462_v18, %v8987_v13  ;;  %v9140_v30 = vadd.f32 %v6526_v19, %v8990_v47  ;;  %v6465_v31 = vadd.f32 %v6464_v3, %v6463_v36  ;;  %v6529_v39 = vadd.f32 %v6528_v56, %v6527_v37  ;;  %v7772_v47 = vld [vmem:[%s7987_s10 + $0x770] ss:$84 sps:$4 sm:$0xff]   ;;  %v7777_v19 = vld [vmem:[%s7987_s10 + $0x2e0] ss:$84 sps:$4 sm:$0xff]  }
 0x217   : > { %4838 = vmatmul.mubr.bf16.gmra.mrb[248].mxu1 %v7764_v43  ;;  %4935 = vmatmul.mubr.bf16.gmra.mrb[248].mxu0 %v7765_v35  ;;  %v7784_v3 = vld [vmem:[%s7987_s10 + $0x8c4] ss:$84 sps:$4 sm:$0xff]   ;;  %v7787_v56 = vld [vmem:[%s7987_s10 + $0x38c] ss:$84 sps:$4 sm:$0xff]  }
 0x218   : > { %v9143_v23 = vadd.f32 %v6465_v31, %v8996_v27  ;;  %v9146_v2 = vadd.f32 %v6529_v39, %v8999_v14  ;;  %4845 = vmatprep.mubr.bf16.mxu1 %v7768_v4  ;;  %4942 = vmatprep.mubr.bf16.mxu0 %v7770_v25 }
 0x21a   : > { %v6530_v17 = vpop.f32.mrb[144].mxu0  ;;  %v6594_v13 = vpop.f32.mrb[144].mxu1 }
 0x21b   : > { %v6531_v55 = vpop.f32.mrb[145].mxu0  ;;  %v6595_v58 = vpop.f32.mrb[145].mxu1 }
 0x21c   : > { %v6532_v38 = vadd.f32 %v6531_v55, %v6530_v17  ;;  %v6596_v40 = vadd.f32 %v6595_v58, %v6594_v13  ;;  %v6533_v62 = vpop.f32.mrb[146].mxu0  ;;  %v6597_v5 = vpop.f32.mrb[146].mxu1 }
 0x21d   : > { %v6534_v32 = vpop.f32.mrb[147].mxu0  ;;  %v6598_v27 = vpop.f32.mrb[147].mxu1 }
 0x21e   : > { %v9153_v14 = vadd.f32 %v6532_v38, %v9015_v44  ;;  %v9156_v8 = vadd.f32 %v6596_v40, %v9018_v54  ;;  %v6535_v33 = vadd.f32 %v6534_v32, %v6533_v62  ;;  %v6599_v45 = vadd.f32 %v6598_v27, %v6597_v5  ;;  %v7774_v54 = vld [vmem:[%s7987_s10 + $0x818] ss:$84 sps:$4 sm:$0xff]   ;;  %v7785_v40 = vld [vmem:[%s7987_s10 + $0x388] ss:$84 sps:$4 sm:$0xff]  }
 0x21f   : > { %4846 = vmatmul.mubr.bf16.gmra.mrb[252].mxu1 %v7772_v47  ;;  %4943 = vmatmul.mubr.bf16.gmra.mrb[252].mxu0 %v7773_v1  ;;  %v7790_v32 = vld [vmem:[%s7987_s10 + $0x96c] ss:$84 sps:$4 sm:$0xff]   ;;  %v7793_v27 = vld [vmem:[%s7987_s10 + $0x434] ss:$84 sps:$4 sm:$0xff]  }
 0x220   : > { %v9159_v7 = vadd.f32 %v6535_v33, %v9024_v11  ;;  %v9162_v6 = vadd.f32 %v6599_v45, %v9027_v24  ;;  %4853 = vmatprep.mubr.bf16.mxu1 %v7776_v48  ;;  %4950 = vmatprep.mubr.bf16.mxu0 %v7779_v9 }
 0x222   : > { %v6536_v43 = vpop.f32.mrb[148].mxu0  ;;  %v6600_v44 = vpop.f32.mrb[148].mxu1 }
 0x223   : > { %v6537_v35 = vpop.f32.mrb[149].mxu0  ;;  %v6601_v18 = vpop.f32.mrb[149].mxu1 }
 0x224   : > { %v6538_v36 = vadd.f32 %v6537_v35, %v6536_v43  ;;  %v6602_v37 = vadd.f32 %v6601_v18, %v6600_v44  ;;  %v6539_v4 = vpop.f32.mrb[150].mxu0  ;;  %v6603_v25 = vpop.f32.mrb[150].mxu1 }
 0x225   : > { %v6540_v31 = vpop.f32.mrb[151].mxu0  ;;  %v6604_v11 = vpop.f32.mrb[151].mxu1 }
 0x226   : > { %v9169_v24 = vadd.f32 %v6538_v36, %v9037_v34  ;;  %v9172_v39 = vadd.f32 %v6602_v37, %v9040_v26  ;;  %v6541_v17 = vadd.f32 %v6540_v31, %v6539_v4  ;;  %v6605_v13 = vadd.f32 %v6604_v11, %v6603_v25  ;;  %v7782_v26 = vld [vmem:[%s7987_s10 + $0x8c0] ss:$84 sps:$4 sm:$0xff]   ;;  %v7791_v37 = vld [vmem:[%s7987_s10 + $0x430] ss:$84 sps:$4 sm:$0xff]  }
 0x227   : > { %4854 = vmatmul.mubr.bf16.gmra.mrb[0].mxu1 %v7774_v54  ;;  %4951 = vmatmul.mubr.bf16.gmra.mrb[0].mxu0 %v7777_v19  ;;  %v7798_v31 = vld [vmem:[%s7987_s10 + $0xa14] ss:$84 sps:$4 sm:$0xff]   ;;  %v7801_v11 = vld [vmem:[%s7987_s10 + $0x4dc] ss:$84 sps:$4 sm:$0xff]  }
 0x228   : > { %v9175_v55 = vadd.f32 %v6541_v17, %v9043_v50  ;;  %v9178_v58 = vadd.f32 %v6605_v13, %v9046_v52  ;;  %4861 = vmatprep.mubr.bf16.mxu1 %v7784_v3  ;;  %4958 = vmatprep.mubr.bf16.mxu0 %v7787_v56 }
 0x22a   : > { %v6542_v47 = vpop.f32.mrb[152].mxu0  ;;  %v6606_v34 = vpop.f32.mrb[152].mxu1 }
 0x22b   : > { %v6543_v1 = vpop.f32.mrb[153].mxu0  ;;  %v6607_v38 = vpop.f32.mrb[153].mxu1 }
 0x22c   : > { %v6544_v62 = vadd.f32 %v6543_v1, %v6542_v47  ;;  %v6608_v5 = vadd.f32 %v6607_v38, %v6606_v34  ;;  %v6545_v48 = vpop.f32.mrb[154].mxu0  ;;  %v6609_v9 = vpop.f32.mrb[154].mxu1 }
 0x22d   : > { %v6546_v33 = vpop.f32.mrb[155].mxu0  ;;  %v6610_v50 = vpop.f32.mrb[155].mxu1 }
 0x22e   : > { %v9185_v52 = vadd.f32 %v6544_v62, %v9053_v21  ;;  %v9188_v45 = vadd.f32 %v6608_v5, %v9056_v12  ;;  %v6547_v43 = vadd.f32 %v6546_v33, %v6545_v48  ;;  %v6611_v44 = vadd.f32 %v6610_v50, %v6609_v9  ;;  %v7788_v12 = vld [vmem:[%s7987_s10 + $0x968] ss:$84 sps:$4 sm:$0xff]   ;;  %v7799_v5 = vld [vmem:[%s7987_s10 + $0x4d8] ss:$84 sps:$4 sm:$0xff]  }
 0x22f   : > { %4862 = vmatmul.mubr.bf16.gmra.mrb[4].mxu1 %v7782_v26  ;;  %4959 = vmatmul.mubr.bf16.gmra.mrb[4].mxu0 %v7785_v40  ;;  %v7804_v33 = vld [vmem:[%s7987_s10 + $0x584] ss:$84 sps:$4 sm:$0xff]   ;;  %v7807_v50 = vld [vmem:[%s7987_s10 + $0x4c] ss:$84 sps:$4 sm:$0xff]  }
 0x230   : > { %v9191_v35 = vadd.f32 %v6547_v43, %v9059_v61  ;;  %v9194_v18 = vadd.f32 %v6611_v44, %v9062_v0  ;;  %4869 = vmatprep.mubr.bf16.mxu1 %v7790_v32  ;;  %4966 = vmatprep.mubr.bf16.mxu0 %v7793_v27 }
 0x232   : > { %v6548_v54 = vpop.f32.mrb[156].mxu0  ;;  %v6612_v21 = vpop.f32.mrb[156].mxu1 }
 0x233   : > { %v6549_v19 = vpop.f32.mrb[157].mxu0  ;;  %v6613_v36 = vpop.f32.mrb[157].mxu1 }
 0x234   : > { %v6550_v4 = vadd.f32 %v6549_v19, %v6548_v54  ;;  %v6614_v25 = vadd.f32 %v6613_v36, %v6612_v21  ;;  %v6551_v3 = vpop.f32.mrb[158].mxu0  ;;  %v6615_v56 = vpop.f32.mrb[158].mxu1 }
 0x235   : > { %v6552_v17 = vpop.f32.mrb[159].mxu0  ;;  %v6616_v61 = vpop.f32.mrb[159].mxu1 }
 0x236   : > { %v9201_v0 = vadd.f32 %v6550_v4, %v9069_v59  ;;  %v9204_v13 = vadd.f32 %v6614_v25, %v9072_v60  ;;  %v6553_v47 = vadd.f32 %v6552_v17, %v6551_v3  ;;  %v6617_v34 = vadd.f32 %v6616_v61, %v6615_v56  ;;  %v7796_v60 = vld [vmem:[%s7987_s10 + $0xa10] ss:$84 sps:$4 sm:$0xff]   ;;  %v7805_v25 = vld [vmem:[%s7987_s10 + $0x48] ss:$84 sps:$4 sm:$0xff]   ;;  %v7811_v17 = vld [vmem:[%s7987_s10 + $0x62c] ss:$84 sps:$4 sm:$0xff]  }
 0x237   : > { %4870 = vmatmul.mubr.bf16.gmra.mrb[8].mxu1 %v7788_v12  ;;  %4967 = vmatmul.mubr.bf16.gmra.mrb[8].mxu0 %v7791_v37  ;;  %v7814_v61 = vld [vmem:[%s7987_s10 + $0xf4] ss:$84 sps:$4 sm:$0xff]  }
 0x238   : > { %v9207_v1 = vadd.f32 %v6553_v47, %v9075_v57  ;;  %v9210_v38 = vadd.f32 %v6617_v34, %v9078_v53  ;;  %4877 = vmatprep.mubr.bf16.mxu1 %v7798_v31  ;;  %4974 = vmatprep.mubr.bf16.mxu0 %v7801_v11 }
 0x23a   : > { %v6554_v26 = vpop.f32.mrb[160].mxu0  ;;  %v6618_v59 = vpop.f32.mrb[160].mxu1 }
 0x23b   : > { %v6555_v40 = vpop.f32.mrb[161].mxu0  ;;  %v6619_v62 = vpop.f32.mrb[161].mxu1 }
 0x23c   : > { %v6556_v48 = vadd.f32 %v6555_v40, %v6554_v26  ;;  %v6620_v9 = vadd.f32 %v6619_v62, %v6618_v59  ;;  %v6557_v32 = vpop.f32.mrb[162].mxu0  ;;  %v6621_v27 = vpop.f32.mrb[162].mxu1 }
 0x23d   : > { %v6558_v43 = vpop.f32.mrb[163].mxu0  ;;  %v6622_v57 = vpop.f32.mrb[163].mxu1 }
 0x23e   : > { %v9217_v53 = vadd.f32 %v6556_v48, %v9085_v42  ;;  %v9220_v44 = vadd.f32 %v6620_v9, %v9088_v16  ;;  %v6559_v54 = vadd.f32 %v6558_v43, %v6557_v32  ;;  %v6623_v21 = vadd.f32 %v6622_v57, %v6621_v27  ;;  %v7802_v16 = vld [vmem:[%s7987_s10 + $0x580] ss:$84 sps:$4 sm:$0xff]   ;;  %v7812_v9 = vld [vmem:[%s7987_s10 + $0xf0] ss:$84 sps:$4 sm:$0xff]  }
 0x23f   : > { %4878 = vmatmul.mubr.bf16.gmra.mrb[12].mxu1 %v7796_v60  ;;  %4975 = vmatmul.mubr.bf16.gmra.mrb[12].mxu0 %v7799_v5  ;;  %v7817_v43 = vld [vmem:[%s7987_s10 + $0x6d4] ss:$84 sps:$4 sm:$0xff]   ;;  %v7820_v57 = vld [vmem:[%s7987_s10 + $0x19c] ss:$84 sps:$4 sm:$0xff]  }
 0x240   : > { %v9223_v19 = vadd.f32 %v6559_v54, %v9091_v49  ;;  %v9226_v36 = vadd.f32 %v6623_v21, %v9094_v15  ;;  %4982 = vmatprep.mubr.bf16.mxu0 %v7804_v33  ;;  %5079 = vmatprep.mubr.bf16.mxu1 %v7807_v50 }
 0x242   : > { %v6560_v12 = vpop.f32.mrb[164].mxu0  ;;  %v6624_v42 = vpop.f32.mrb[164].mxu1 }
 0x243   : > { %v6561_v37 = vpop.f32.mrb[165].mxu0  ;;  %v6625_v4 = vpop.f32.mrb[165].mxu1 }
 0x244   : > { %v6562_v3 = vadd.f32 %v6561_v37, %v6560_v12  ;;  %v6626_v56 = vadd.f32 %v6625_v4, %v6624_v42  ;;  %v6563_v31 = vpop.f32.mrb[166].mxu0  ;;  %v6627_v11 = vpop.f32.mrb[166].mxu1 }
 0x245   : > { %v6564_v47 = vpop.f32.mrb[167].mxu0  ;;  %v6628_v49 = vpop.f32.mrb[167].mxu1 }
 0x246   : > { %v9233_v15 = vadd.f32 %v6562_v3, %v9104_v28  ;;  %v9236_v34 = vadd.f32 %v6626_v56, %v9107_v46  ;;  %v6565_v26 = vadd.f32 %v6564_v47, %v6563_v31  ;;  %v6629_v59 = vadd.f32 %v6628_v49, %v6627_v11  ;;  %v7809_v46 = vld [vmem:[%s7987_s10 + $0x628] ss:$84 sps:$4 sm:$0xff]   ;;  %v7818_v56 = vld [vmem:[%s7987_s10 + $0x198] ss:$84 sps:$4 sm:$0xff]  }
 0x247   : > { %4983 = vmatmul.mubr.bf16.gmra.mrb[16].mxu0 %v7802_v16  ;;  %5080 = vmatmul.mubr.bf16.vlgmr.msra.gmra.mrb[16].mxu1 %v7805_v25  ;;  %v7823_v47 = vld [vmem:[%s7987_s10 + $0x77c] ss:$84 sps:$4 sm:$0xff]   ;;  %v7826_v49 = vld [vmem:[%s7987_s10 + $0x244] ss:$84 sps:$4 sm:$0xff]  }
 0x248   : > { %v9239_v40 = vadd.f32 %v6565_v26, %v9110_v51  ;;  %v9242_v62 = vadd.f32 %v6629_v59, %v9113_v20  ;;  %4990 = vmatprep.mubr.bf16.mxu0 %v7811_v17  ;;  %5087 = vmatprep.mubr.bf16.mxu1 %v7814_v61 }
 0x24a   : > { %v6566_v60 = vpop.f32.mrb[168].mxu0  ;;  %v6630_v28 = vpop.f32.mrb[168].mxu1 }
 0x24b   : > { %v6567_v5 = vpop.f32.mrb[169].mxu0  ;;  %v6631_v48 = vpop.f32.mrb[169].mxu1 }
 0x24c   : > { %v6568_v32 = vadd.f32 %v6567_v5, %v6566_v60  ;;  %v6632_v27 = vadd.f32 %v6631_v48, %v6630_v28  ;;  %v6569_v33 = vpop.f32.mrb[170].mxu0  ;;  %v6633_v50 = vpop.f32.mrb[170].mxu1 }
 0x24d   : > { %v6570_v54 = vpop.f32.mrb[171].mxu0  ;;  %v6634_v51 = vpop.f32.mrb[171].mxu1 }
 0x24e   : > { %v9249_v20 = vadd.f32 %v6568_v32, %v9121_v10  ;;  %v9252_v21 = vadd.f32 %v6632_v27, %v9124_v63  ;;  %v6571_v12 = vadd.f32 %v6570_v54, %v6569_v33  ;;  %v6635_v42 = vadd.f32 %v6634_v51, %v6633_v50  ;;  %v7815_v63 = vld [vmem:[%s7987_s10 + $0x6d0] ss:$84 sps:$4 sm:$0xff]   ;;  %v7824_v27 = vld [vmem:[%s7987_s10 + $0x240] ss:$84 sps:$4 sm:$0xff]  }
 0x24f   : > { %4991 = vmatmul.mubr.bf16.gmra.mrb[20].mxu0 %v7809_v46  ;;  %5088 = vmatmul.mubr.bf16.gmra.mrb[20].mxu1 %v7812_v9  ;;  %v7829_v54 = vld [vmem:[%s7987_s10 + $0x824] ss:$84 sps:$4 sm:$0xff]   ;;  %v7832_v51 = vld [vmem:[%s7987_s10 + $0x2ec] ss:$84 sps:$4 sm:$0xff]  }
 0x250   : > { %v9255_v37 = vadd.f32 %v6571_v12, %v9127_v41  ;;  %v9258_v4 = vadd.f32 %v6635_v42, %v9130_v29  ;;  %4998 = vmatprep.mubr.bf16.mxu0 %v7817_v43  ;;  %5095 = vmatprep.mubr.bf16.mxu1 %v7820_v57 }
 0x252   : > { %v6572_v16 = vpop.f32.mrb[172].mxu0  ;;  %v6636_v10 = vpop.f32.mrb[172].mxu1 }
 0x253   : > { %v6573_v25 = vpop.f32.mrb[173].mxu0  ;;  %v6637_v3 = vpop.f32.mrb[173].mxu1 }
 0x254   : > { %v6574_v31 = vadd.f32 %v6573_v25, %v6572_v16  ;;  %v6638_v11 = vadd.f32 %v6637_v3, %v6636_v10  ;;  %v6575_v17 = vpop.f32.mrb[174].mxu0  ;;  %v6639_v61 = vpop.f32.mrb[174].mxu1 }
 0x255   : > { %v6576_v26 = vpop.f32.mrb[175].mxu0  ;;  %v6640_v41 = vpop.f32.mrb[175].mxu1 }
 0x256   : > { %v9265_v29 = vadd.f32 %v6574_v31, %v9137_v22  ;;  %v9268_v59 = vadd.f32 %v6638_v11, %v9140_v30  ;;  %v6577_v60 = vadd.f32 %v6576_v26, %v6575_v17  ;;  %v6641_v28 = vadd.f32 %v6640_v41, %v6639_v61  ;;  %v7821_v30 = vld [vmem:[%s7987_s10 + $0x778] ss:$84 sps:$4 sm:$0xff]   ;;  %v7830_v11 = vld [vmem:[%s7987_s10 + $0x2e8] ss:$84 sps:$4 sm:$0xff]  }
 0x257   : > { %4999 = vmatmul.mubr.bf16.gmra.mrb[24].mxu0 %v7815_v63  ;;  %5096 = vmatmul.mubr.bf16.gmra.mrb[24].mxu1 %v7818_v56  ;;  %v7835_v26 = vld [vmem:[%s7987_s10 + $0x8cc] ss:$84 sps:$4 sm:$0xff]   ;;  %v7838_v41 = vld [vmem:[%s7987_s10 + $0x394] ss:$84 sps:$4 sm:$0xff]  }
 0x258   : > { %v9271_v5 = vadd.f32 %v6577_v60, %v9143_v23  ;;  %v9274_v48 = vadd.f32 %v6641_v28, %v9146_v2  ;;  %5006 = vmatprep.mubr.bf16.mxu0 %v7823_v47  ;;  %5103 = vmatprep.mubr.bf16.mxu1 %v7826_v49 }
 0x25a   : > { %v6642_v46 = vpop.f32.mrb[176].mxu1  ;;  %v6706_v22 = vpop.f32.mrb[176].mxu0 }
 0x25b   : > { %v6643_v9 = vpop.f32.mrb[177].mxu1  ;;  %v6707_v32 = vpop.f32.mrb[177].mxu0 }
 0x25c   : > { %v6644_v33 = vadd.f32 %v6643_v9, %v6642_v46  ;;  %v6708_v50 = vadd.f32 %v6707_v32, %v6706_v22  ;;  %v6645_v43 = vpop.f32.mrb[178].mxu1  ;;  %v6709_v57 = vpop.f32.mrb[178].mxu0 }
 0x25d   : > { %v6646_v12 = vpop.f32.mrb[179].mxu1  ;;  %v6710_v23 = vpop.f32.mrb[179].mxu0 }
 0x25e   : > { %v9281_v2 = vadd.f32 %v6644_v33, %v9153_v14  ;;  %v9284_v42 = vadd.f32 %v6708_v50, %v9156_v8  ;;  %v6647_v16 = vadd.f32 %v6646_v12, %v6645_v43  ;;  %v6711_v10 = vadd.f32 %v6710_v23, %v6709_v57  ;;  %v7827_v8 = vld [vmem:[%s7987_s10 + $0x820] ss:$84 sps:$4 sm:$0xff]   ;;  %v7836_v50 = vld [vmem:[%s7987_s10 + $0x390] ss:$84 sps:$4 sm:$0xff]  }
 0x25f   : > { %5007 = vmatmul.mubr.bf16.gmra.mrb[28].mxu0 %v7821_v30  ;;  %5104 = vmatmul.mubr.bf16.gmra.mrb[28].mxu1 %v7824_v27  ;;  %v7841_v12 = vld [vmem:[%s7987_s10 + $0x974] ss:$84 sps:$4 sm:$0xff]   ;;  %v7844_v23 = vld [vmem:[%s7987_s10 + $0x43c] ss:$84 sps:$4 sm:$0xff]  }
 0x260   : > { %v9287_v25 = vadd.f32 %v6647_v16, %v9159_v7  ;;  %v9290_v3 = vadd.f32 %v6711_v10, %v9162_v6  ;;  %5014 = vmatprep.mubr.bf16.mxu0 %v7829_v54  ;;  %5111 = vmatprep.mubr.bf16.mxu1 %v7832_v51 }
 0x262   : > { %v6648_v63 = vpop.f32.mrb[180].mxu1  ;;  %v6712_v14 = vpop.f32.mrb[180].mxu0 }
 0x263   : > { %v6649_v56 = vpop.f32.mrb[181].mxu1  ;;  %v6713_v31 = vpop.f32.mrb[181].mxu0 }
 0x264   : > { %v6650_v17 = vadd.f32 %v6649_v56, %v6648_v63  ;;  %v6714_v61 = vadd.f32 %v6713_v31, %v6712_v14  ;;  %v6651_v47 = vpop.f32.mrb[182].mxu1  ;;  %v6715_v49 = vpop.f32.mrb[182].mxu0 }
 0x265   : > { %v6652_v60 = vpop.f32.mrb[183].mxu1  ;;  %v6716_v7 = vpop.f32.mrb[183].mxu0 }
 0x266   : > { %v9297_v6 = vadd.f32 %v6650_v17, %v9169_v24  ;;  %v9300_v28 = vadd.f32 %v6714_v61, %v9172_v39  ;;  %v6653_v46 = vadd.f32 %v6652_v60, %v6651_v47  ;;  %v6717_v22 = vadd.f32 %v6716_v7, %v6715_v49  ;;  %v7833_v39 = vld [vmem:[%s7987_s10 + $0x8c8] ss:$84 sps:$4 sm:$0xff]   ;;  %v7842_v61 = vld [vmem:[%s7987_s10 + $0x438] ss:$84 sps:$4 sm:$0xff]  }
 0x267   : > { %5015 = vmatmul.mubr.bf16.gmra.mrb[32].mxu0 %v7827_v8  ;;  %5112 = vmatmul.mubr.bf16.gmra.mrb[32].mxu1 %v7830_v11  ;;  %v7847_v60 = vld [vmem:[%s7987_s10 + $0xa1c] ss:$84 sps:$4 sm:$0xff]   ;;  %v7850_v7 = vld [vmem:[%s7987_s10 + $0x4e4] ss:$84 sps:$4 sm:$0xff]  }
 0x268   : > { %v9303_v9 = vadd.f32 %v6653_v46, %v9175_v55  ;;  %v9306_v32 = vadd.f32 %v6717_v22, %v9178_v58  ;;  %5022 = vmatprep.mubr.bf16.mxu0 %v7835_v26  ;;  %5119 = vmatprep.mubr.bf16.mxu1 %v7838_v41 }
 0x26a   : > { %v6654_v30 = vpop.f32.mrb[184].mxu1  ;;  %v6718_v24 = vpop.f32.mrb[184].mxu0 }
 0x26b   : > { %v6655_v27 = vpop.f32.mrb[185].mxu1  ;;  %v6719_v33 = vpop.f32.mrb[185].mxu0 }
 0x26c   : > { %v6656_v43 = vadd.f32 %v6655_v27, %v6654_v30  ;;  %v6720_v57 = vadd.f32 %v6719_v33, %v6718_v24  ;;  %v6657_v54 = vpop.f32.mrb[186].mxu1  ;;  %v6721_v51 = vpop.f32.mrb[186].mxu0 }
 0x26d   : > { %v6658_v16 = vpop.f32.mrb[187].mxu1  ;;  %v6722_v55 = vpop.f32.mrb[187].mxu0 }
 0x26e   : > { %v9313_v58 = vadd.f32 %v6656_v43, %v9185_v52  ;;  %v9316_v10 = vadd.f32 %v6720_v57, %v9188_v45  ;;  %v6659_v63 = vadd.f32 %v6658_v16, %v6657_v54  ;;  %v6723_v14 = vadd.f32 %v6722_v55, %v6721_v51  ;;  %v7839_v45 = vld [vmem:[%s7987_s10 + $0x970] ss:$84 sps:$4 sm:$0xff]   ;;  %v7848_v57 = vld [vmem:[%s7987_s10 + $0x4e0] ss:$84 sps:$4 sm:$0xff]  }
 0x26f   : > { %5023 = vmatmul.mubr.bf16.gmra.mrb[36].mxu0 %v7833_v39  ;;  %5120 = vmatmul.mubr.bf16.gmra.mrb[36].mxu1 %v7836_v50  ;;  %v7853_v16 = vld [vmem:[%s7987_s10 + $0x58c] ss:$84 sps:$4 sm:$0xff]   ;;  %v7854_v55 = vld [vmem:[%s7987_s10 + $0x50] ss:$84 sps:$4 sm:$0xff]  }
 0x270   : > { %v9319_v56 = vadd.f32 %v6659_v63, %v9191_v35  ;;  %v9322_v31 = vadd.f32 %v6723_v14, %v9194_v18  ;;  %5030 = vmatprep.mubr.bf16.mxu0 %v7841_v12  ;;  %5127 = vmatprep.mubr.bf16.mxu1 %v7844_v23 }
 0x272   : > { %v6660_v8 = vpop.f32.mrb[188].mxu1  ;;  %v6724_v52 = vpop.f32.mrb[188].mxu0 }
 0x273   : > { %v6661_v11 = vpop.f32.mrb[189].mxu1  ;;  %v6725_v17 = vpop.f32.mrb[189].mxu0 }
 0x274   : > { %v6662_v47 = vadd.f32 %v6661_v11, %v6660_v8  ;;  %v6726_v49 = vadd.f32 %v6725_v17, %v6724_v52  ;;  %v6663_v26 = vpop.f32.mrb[190].mxu1  ;;  %v6727_v41 = vpop.f32.mrb[190].mxu0 }
 0x275   : > { %v6664_v46 = vpop.f32.mrb[191].mxu1  ;;  %v6728_v35 = vpop.f32.mrb[191].mxu0 }
 0x276   : > { %v9329_v18 = vadd.f32 %v6662_v47, %v9201_v0  ;;  %v9332_v22 = vadd.f32 %v6726_v49, %v9204_v13  ;;  %v6665_v30 = vadd.f32 %v6664_v46, %v6663_v26  ;;  %v6729_v24 = vadd.f32 %v6728_v35, %v6727_v41  ;;  %v7845_v13 = vld [vmem:[%s7987_s10 + $0xa18] ss:$84 sps:$4 sm:$0xff]   ;;  %v7851_v47 = vld [vmem:[%s7987_s10 + $0x588] ss:$84 sps:$4 sm:$0xff]   ;;  %v7859_v35 = vld [vmem:[%s7987_s10 + $0x1a0] ss:$84 sps:$4 sm:$0xff]  }
 0x277   : > { %5031 = vmatmul.mubr.bf16.gmra.mrb[40].mxu0 %v7839_v45  ;;  %5128 = vmatmul.mubr.bf16.gmra.mrb[40].mxu1 %v7842_v61  ;;  %v7855_v49 = vld [vmem:[%s7987_s10 + $0xf8] ss:$84 sps:$4 sm:$0xff]   ;;  %v7858_v46 = vld [vmem:[%s7987_s10 + $0x634] ss:$84 sps:$4 sm:$0xff]  }
 0x278   : > { %v9335_v27 = vadd.f32 %v6665_v30, %v9207_v1  ;;  %v9338_v33 = vadd.f32 %v6729_v24, %v9210_v38  ;;  %5038 = vmatprep.mubr.bf16.mxu0 %v7847_v60  ;;  %5135 = vmatprep.mubr.bf16.mxu1 %v7850_v7 }
 0x27a   : > { %v6666_v39 = vpop.f32.mrb[192].mxu1  ;;  %v6730_v0 = vpop.f32.mrb[192].mxu0 }
 0x27b   : > { %v6667_v50 = vpop.f32.mrb[193].mxu1  ;;  %v6731_v43 = vpop.f32.mrb[193].mxu0 }
 0x27c   : > { %v6668_v54 = vadd.f32 %v6667_v50, %v6666_v39  ;;  %v6732_v51 = vadd.f32 %v6731_v43, %v6730_v0  ;;  %v6669_v12 = vpop.f32.mrb[194].mxu1  ;;  %v6733_v23 = vpop.f32.mrb[194].mxu0 }
 0x27d   : > { %v6670_v63 = vpop.f32.mrb[195].mxu1  ;;  %v6734_v1 = vpop.f32.mrb[195].mxu0 }
 0x27e   : > { %v9345_v38 = vadd.f32 %v6668_v54, %v9217_v53  ;;  %v9348_v14 = vadd.f32 %v6732_v51, %v9220_v44  ;;  %v6671_v8 = vadd.f32 %v6670_v63, %v6669_v12  ;;  %v6735_v52 = vadd.f32 %v6734_v1, %v6733_v23  ;;  %v7856_v54 = vld [vmem:[%s7987_s10 + $0x630] ss:$84 sps:$4 sm:$0xff]   ;;  %v7860_v51 = vld [vmem:[%s7987_s10 + $0x248] ss:$84 sps:$4 sm:$0xff]  }
 0x27f   : > { %5039 = vmatmul.mubr.bf16.gmra.mrb[44].mxu0 %v7845_v13  ;;  %5136 = vmatmul.mubr.bf16.gmra.mrb[44].mxu1 %v7848_v57  ;;  %v7863_v63 = vld [vmem:[%s7987_s10 + $0x6dc] ss:$84 sps:$4 sm:$0xff]  }
 0x280   : > { %v9351_v11 = vadd.f32 %v6671_v8, %v9223_v19  ;;  %v9354_v17 = vadd.f32 %v6735_v52, %v9226_v36  ;;  %5143 = vmatprep.mubr.bf16.mxu1 %v7853_v16  ;;  %7160 = vmatprep.mubr.msk.bf16.mxu0 %vm3549_vm0, %v7854_v55  ;;  %v7864_v1 = vld [vmem:[%s7987_s10 + $0x2f0] ss:$84 sps:$4 sm:$0xff]  }
 0x282   : > { %v6672_v53 = vpop.f32.mrb[196].mxu1  ;;  %v6736_v45 = vpop.f32.mrb[196].mxu0 }
 0x283   : > { %v6673_v61 = vpop.f32.mrb[197].mxu1  ;;  %v6737_v44 = vpop.f32.mrb[197].mxu0 }
 0x284   : > { %v6674_v26 = vadd.f32 %v6673_v61, %v6672_v53  ;;  %v6738_v41 = vadd.f32 %v6737_v44, %v6736_v45  ;;  %v6675_v60 = vpop.f32.mrb[198].mxu1  ;;  %v6739_v7 = vpop.f32.mrb[198].mxu0 }
 0x285   : > { %v6676_v19 = vpop.f32.mrb[199].mxu1  ;;  %v6740_v30 = vpop.f32.mrb[199].mxu0 }
 0x286   : > { %v9362_v36 = vadd.f32 %v6674_v26, %v9233_v15  ;;  %v9365_v24 = vadd.f32 %v6738_v41, %v9236_v34  ;;  %v6677_v39 = vadd.f32 %v6676_v19, %v6675_v60  ;;  %v6741_v0 = vadd.f32 %v6740_v30, %v6739_v7  ;;  %v7861_v26 = vld [vmem:[%s7987_s10 + $0x6d8] ss:$84 sps:$4 sm:$0xff]   ;;  %v7869_v30 = vld [vmem:[%s7987_s10 + $0x440] ss:$84 sps:$4 sm:$0xff]  }
 0x287   : > { %5144 = vmatmul.mubr.bf16.gmra.mrb[48].mxu1 %v7851_v47  ;;  %7161 = vmatmul.mubr.msk.bf16.vlgmr.msra.gmra.mrb[48].mxu0 %vm3549_vm0, %v7855_v49  ;;  %v7865_v41 = vld [vmem:[%s7987_s10 + $0x398] ss:$84 sps:$4 sm:$0xff]  }
 0x288   : > { %v9369_v50 = vadd.f32 %v6677_v39, %v9239_v40  ;;  %v9372_v43 = vadd.f32 %v6741_v0, %v9242_v62  ;;  %5151 = vmatprep.mubr.bf16.mxu1 %v7858_v46  ;;  %7164 = vmatprep.mubr.msk.bf16.mxu0 %vm3549_vm0, %v7859_v35  ;;  %v7868_v19 = vld [vmem:[%s7987_s10 + $0x784] ss:$84 sps:$4 sm:$0xff]  }
 0x28a   : > { %v6678_v15 = vpop.f32.mrb[200].mxu1  ;;  %v6742_v13 = vpop.f32.mrb[200].mxu0 }
 0x28b   : > { %v6679_v34 = vpop.f32.mrb[201].mxu1  ;;  %v6743_v57 = vpop.f32.mrb[201].mxu0 }
 0x28c   : > { %v6680_v12 = vadd.f32 %v6679_v34, %v6678_v15  ;;  %v6744_v23 = vadd.f32 %v6743_v57, %v6742_v13  ;;  %v6681_v16 = vpop.f32.mrb[202].mxu1  ;;  %v6745_v55 = vpop.f32.mrb[202].mxu0 }
 0x28d   : > { %v6682_v40 = vpop.f32.mrb[203].mxu1  ;;  %v6746_v8 = vpop.f32.mrb[203].mxu0 }
 0x28e   : > { %v9380_v62 = vadd.f32 %v6680_v12, %v9249_v20  ;;  %v9383_v52 = vadd.f32 %v6744_v23, %v9252_v21  ;;  %v6683_v53 = vadd.f32 %v6682_v40, %v6681_v16  ;;  %v6747_v45 = vadd.f32 %v6746_v8, %v6745_v55  ;;  %v7866_v12 = vld [vmem:[%s7987_s10 + $0x780] ss:$84 sps:$4 sm:$0xff]   ;;  %v7870_v23 = vld [vmem:[%s7987_s10 + $0x4e8] ss:$84 sps:$4 sm:$0xff]   ;;  %v7874_v8 = vld [vmem:[%s7987_s10 + $0x590] ss:$84 sps:$4 sm:$0xff]  }
 0x28f   : > { %5152 = vmatmul.mubr.bf16.gmra.mrb[52].mxu1 %v7856_v54  ;;  %7165 = vmatmul.mubr.msk.bf16.gmra.mrb[52].mxu0 %vm3549_vm0, %v7860_v51  ;;  %v7873_v40 = vld [vmem:[%s7987_s10 + $0x82c] ss:$84 sps:$4 sm:$0xff]  }
 0x290   : > { %v9387_v61 = vadd.f32 %v6683_v53, %v9255_v37  ;;  %v9390_v44 = vadd.f32 %v6747_v45, %v9258_v4  ;;  %5159 = vmatprep.mubr.bf16.mxu1 %v7863_v63  ;;  %7168 = vmatprep.mubr.msk.bf16.mxu0 %vm3549_vm0, %v7864_v1 }
 0x292   : > { %v6684_v20 = vpop.f32.mrb[204].mxu1  ;;  %v6748_v47 = vpop.f32.mrb[204].mxu0 }
 0x293   : > { %v6685_v21 = vpop.f32.mrb[205].mxu1  ;;  %v6749_v49 = vpop.f32.mrb[205].mxu0 }
 0x294   : > { %v6686_v60 = vadd.f32 %v6685_v21, %v6684_v20  ;;  %v6750_v7 = vadd.f32 %v6749_v49, %v6748_v47  ;;  %v6687_v46 = vpop.f32.mrb[206].mxu1  ;;  %v6751_v35 = vpop.f32.mrb[206].mxu0 }
 0x295   : > { %v6688_v37 = vpop.f32.mrb[207].mxu1  ;;  %v6752_v39 = vpop.f32.mrb[207].mxu0 }
 0x296   : > { %v9398_v4 = vadd.f32 %v6686_v60, %v9265_v29  ;;  %v9401_v0 = vadd.f32 %v6750_v7, %v9268_v59  ;;  %v6689_v15 = vadd.f32 %v6688_v37, %v6687_v46  ;;  %v6753_v13 = vadd.f32 %v6752_v39, %v6751_v35  ;;  %v7871_v60 = vld [vmem:[%s7987_s10 + $0x828] ss:$84 sps:$4 sm:$0xff]   ;;  %v7875_v7 = vld [vmem:[%s7987_s10 + $0x638] ss:$84 sps:$4 sm:$0xff]   ;;  %v7879_v39 = vld [vmem:[%s7987_s10 + $0x6e0] ss:$84 sps:$4 sm:$0xff]  }
 0x297   : > { %5160 = vmatmul.mubr.bf16.gmra.mrb[56].mxu1 %v7861_v26  ;;  %7169 = vmatmul.mubr.msk.bf16.gmra.mrb[56].mxu0 %vm3549_vm0, %v7865_v41  ;;  %v7878_v37 = vld [vmem:[%s7987_s10 + $0x8d4] ss:$84 sps:$4 sm:$0xff]  }
 0x298   : > { %v9405_v34 = vadd.f32 %v6689_v15, %v9271_v5  ;;  %v9408_v57 = vadd.f32 %v6753_v13, %v9274_v48  ;;  %5167 = vmatprep.mubr.bf16.mxu1 %v7868_v19  ;;  %7172 = vmatprep.mubr.msk.bf16.mxu0 %vm3549_vm0, %v7869_v30 }
 0x29a   : > { %v6754_v29 = vpop.f32.mrb[208].mxu0  ;;  %v6818_v54 = vpop.f32.mrb[208].mxu1 }
 0x29b   : > { %v6755_v59 = vpop.f32.mrb[209].mxu0  ;;  %v6819_v51 = vpop.f32.mrb[209].mxu1 }
 0x29c   : > { %v6756_v16 = vadd.f32 %v6755_v59, %v6754_v29  ;;  %v6820_v55 = vadd.f32 %v6819_v51, %v6818_v54  ;;  %v6757_v63 = vpop.f32.mrb[210].mxu0  ;;  %v6821_v1 = vpop.f32.mrb[210].mxu1 }
 0x29d   : > { %v6758_v5 = vpop.f32.mrb[211].mxu0  ;;  %v6822_v53 = vpop.f32.mrb[211].mxu1 }
 0x29e   : > { %v9416_v48 = vadd.f32 %v6756_v16, %v9281_v2  ;;  %v9419_v45 = vadd.f32 %v6820_v55, %v9284_v42  ;;  %v6759_v20 = vadd.f32 %v6758_v5, %v6757_v63  ;;  %v6823_v47 = vadd.f32 %v6822_v53, %v6821_v1  ;;  %v7876_v16 = vld [vmem:[%s7987_s10 + $0x8d0] ss:$84 sps:$4 sm:$0xff]   ;;  %v7880_v55 = vld [vmem:[%s7987_s10 + $0x788] ss:$84 sps:$4 sm:$0xff]  }
 0x29f   : > { %5168 = vmatmul.mubr.bf16.gmra.mrb[60].mxu1 %v7866_v12  ;;  %7173 = vmatmul.mubr.msk.bf16.gmra.mrb[60].mxu0 %vm3549_vm0, %v7870_v23  ;;  %v7883_v5 = vld [vmem:[%s7987_s10 + $0x97c] ss:$84 sps:$4 sm:$0xff]  }
 0x2a0   : > { %v9423_v21 = vadd.f32 %v6759_v20, %v9287_v25  ;;  %v9426_v49 = vadd.f32 %v6823_v47, %v9290_v3  ;;  %5175 = vmatprep.mubr.bf16.mxu1 %v7873_v40  ;;  %7176 = vmatprep.mubr.msk.bf16.mxu0 %vm3549_vm0, %v7874_v8  ;;  %v7884_v53 = vld [vmem:[%s7987_s10 + $0x830] ss:$84 sps:$4 sm:$0xff]  }
 0x2a2   : > { %v6760_v2 = vpop.f32.mrb[212].mxu0  ;;  %v6824_v26 = vpop.f32.mrb[212].mxu1 }
 0x2a3   : > { %v6761_v42 = vpop.f32.mrb[213].mxu0  ;;  %v6825_v41 = vpop.f32.mrb[213].mxu1 }
 0x2a4   : > { %v6762_v46 = vadd.f32 %v6761_v42, %v6760_v2  ;;  %v6826_v35 = vadd.f32 %v6825_v41, %v6824_v26  ;;  %v6763_v19 = vpop.f32.mrb[214].mxu0  ;;  %v6827_v30 = vpop.f32.mrb[214].mxu1 }
 0x2a5   : > { %v6764_v25 = vpop.f32.mrb[215].mxu0  ;;  %v6828_v15 = vpop.f32.mrb[215].mxu1 }
 0x2a6   : > { %v9434_v3 = vadd.f32 %v6762_v46, %v9297_v6  ;;  %v9437_v13 = vadd.f32 %v6826_v35, %v9300_v28  ;;  %v6765_v29 = vadd.f32 %v6764_v25, %v6763_v19  ;;  %v6829_v54 = vadd.f32 %v6828_v15, %v6827_v30  ;;  %v7881_v46 = vld [vmem:[%s7987_s10 + $0x978] ss:$84 sps:$4 sm:$0xff]   ;;  %v7889_v15 = vld [vmem:[%s7987_s10 + $0x980] ss:$84 sps:$4 sm:$0xff]  }
 0x2a7   : > { %5176 = vmatmul.mubr.bf16.gmra.mrb[64].mxu1 %v7871_v60  ;;  %7177 = vmatmul.mubr.msk.bf16.gmra.mrb[64].mxu0 %vm3549_vm0, %v7875_v7  ;;  %v7885_v35 = vld [vmem:[%s7987_s10 + $0x8d8] ss:$84 sps:$4 sm:$0xff]  }
 0x2a8   : > { %v9441_v59 = vadd.f32 %v6765_v29, %v9303_v9  ;;  %v9444_v51 = vadd.f32 %v6829_v54, %v9306_v32  ;;  %5183 = vmatprep.mubr.bf16.mxu1 %v7878_v37  ;;  %7180 = vmatprep.mubr.msk.bf16.mxu0 %vm3549_vm0, %v7879_v39  ;;  %v7888_v25 = vld [vmem:[%s7987_s10 + $0xa24] ss:$84 sps:$4 sm:$0xff]  }
 0x2aa   : > { %v6766_v6 = vpop.f32.mrb[216].mxu0  ;;  %v6830_v12 = vpop.f32.mrb[216].mxu1 }
 0x2ab   : > { %v6767_v28 = vpop.f32.mrb[217].mxu0  ;;  %v6831_v23 = vpop.f32.mrb[217].mxu1 }
 0x2ac   : > { %v6768_v63 = vadd.f32 %v6767_v28, %v6766_v6  ;;  %v6832_v1 = vadd.f32 %v6831_v23, %v6830_v12  ;;  %v6769_v40 = vpop.f32.mrb[218].mxu0  ;;  %v6833_v8 = vpop.f32.mrb[218].mxu1 }
 0x2ad   : > { %v6770_v9 = vpop.f32.mrb[219].mxu0  ;;  %v6834_v20 = vpop.f32.mrb[219].mxu1 }
 0x2ae   : > { %v9452_v32 = vadd.f32 %v6768_v63, %v9313_v58  ;;  %v9455_v47 = vadd.f32 %v6832_v1, %v9316_v10  ;;  %v6771_v2 = vadd.f32 %v6770_v9, %v6769_v40  ;;  %v6835_v26 = vadd.f32 %v6834_v20, %v6833_v8  ;;  %v7890_v1 = vld [vmem:[%s7987_s10 + $0xa28] ss:$84 sps:$4 sm:$0xff]  }
 0x2af   : > { %5184 = vmatmul.mubr.bf16.gmra.mrb[68].mxu1 %v7876_v16  ;;  %7181 = vmatmul.mubr.msk.bf16.gmra.mrb[68].mxu0 %vm3549_vm0, %v7880_v55 }
 0x2b0   : > { %v9459_v42 = vadd.f32 %v6771_v2, %v9319_v56  ;;  %v9462_v41 = vadd.f32 %v6835_v26, %v9322_v31  ;;  %5191 = vmatprep.mubr.bf16.mxu1 %v7883_v5  ;;  %7184 = vmatprep.mubr.msk.bf16.mxu0 %vm3549_vm0, %v7884_v53 }
 0x2b2   : > { %v6772_v58 = vpop.f32.mrb[220].mxu0  ;;  %v6836_v60 = vpop.f32.mrb[220].mxu1 }
 0x2b3   : > { %v6773_v10 = vpop.f32.mrb[221].mxu0  ;;  %v6837_v7 = vpop.f32.mrb[221].mxu1 }
 0x2b4   : > { %v6774_v19 = vadd.f32 %v6773_v10, %v6772_v58  ;;  %v6838_v30 = vadd.f32 %v6837_v7, %v6836_v60  ;;  %v6775_v37 = vpop.f32.mrb[222].mxu0  ;;  %v6839_v39 = vpop.f32.mrb[222].mxu1 }
 0x2b5   : > { %v6776_v56 = vpop.f32.mrb[223].mxu0  ;;  %v6840_v29 = vpop.f32.mrb[223].mxu1 }
 0x2b6   : > { %v9470_v31 = vadd.f32 %v6774_v19, %v9329_v18  ;;  %v9473_v54 = vadd.f32 %v6838_v30, %v9332_v22  ;;  %v6777_v6 = vadd.f32 %v6776_v56, %v6775_v37  ;;  %v6841_v12 = vadd.f32 %v6840_v29, %v6839_v39  ;;  %v7886_v22 = vld [vmem:[%s7987_s10 + $0xa20] ss:$84 sps:$4 sm:$0xff]   ;;  %s6017_s10 = sshll.u32 %s9852_s12, 8 }
 0x2b7   : > { %5192 = vmatmul.mubr.bf16.gmra.mrb[72].mxu1 %v7881_v46  ;;  %7185 = vmatmul.mubr.msk.bf16.gmra.mrb[72].mxu0 %vm3549_vm0, %v7885_v35  ;;  %s9730_s19 = scalar_lea.vmem %s9846_s3, %s6017_s10 }
 0x2b8   : > { %v9477_v28 = vadd.f32 %v6777_v6, %v9335_v27  ;;  %v9480_v23 = vadd.f32 %v6841_v12, %v9338_v33  ;;  %5199 = vmatprep.mubr.bf16.mxu1 %v7888_v25  ;;  %7188 = vmatprep.mubr.msk.bf16.mxu0 %vm3549_vm0, %v7889_v15 }
 0x2ba   : > { %v6778_v16 = vpop.f32.mrb[224].mxu0  ;;  %v6842_v18 = vpop.f32.mrb[224].mxu1 }
 0x2bb   : > { %v6779_v55 = vpop.f32.mrb[225].mxu0  ;;  %v6843_v63 = vpop.f32.mrb[225].mxu1 }
 0x2bc   : > { %v6780_v40 = vadd.f32 %v6779_v55, %v6778_v16  ;;  %v6844_v8 = vadd.f32 %v6843_v63, %v6842_v18  ;;  %v6781_v5 = vpop.f32.mrb[226].mxu0  ;;  %v6845_v53 = vpop.f32.mrb[226].mxu1 }
 0x2bd   : > { %v6782_v9 = vpop.f32.mrb[227].mxu0  ;;  %v6846_v20 = vpop.f32.mrb[227].mxu1 }
 0x2be   : > { %v9486_v27 = vadd.f32 %v6780_v40, %v9345_v38  ;;  %v9489_v33 = vadd.f32 %v6844_v8, %v9348_v14  ;;  %v6783_v2 = vadd.f32 %v6782_v9, %v6781_v5  ;;  %v6847_v26 = vadd.f32 %v6846_v20, %v6845_v53 }
 0x2bf   : > { %5200 = vmatmul.mubr.bf16.gmra.mrb[76].mxu1 %v7886_v22  ;;  %7189 = vmatmul.mubr.msk.bf16.gmra.mrb[76].mxu0 %vm3549_vm0, %v7890_v1 }
 0x2c0   : > { %v9493_v58 = vadd.f32 %v6783_v2, %v9351_v11  ;;  %v9496_v60 = vadd.f32 %v6847_v26, %v9354_v17 }
 0x2c2   : > { %v6784_v10 = vpop.f32.mrb[228].mxu0  ;;  %v6848_v7 = vpop.f32.mrb[228].mxu1 }
 0x2c3   : > { %v6785_v46 = vpop.f32.mrb[229].mxu0  ;;  %v6849_v35 = vpop.f32.mrb[229].mxu1 }
 0x2c4   : > { %v6786_v38 = vadd.f32 %v6785_v46, %v6784_v10  ;;  %v6850_v19 = vadd.f32 %v6849_v35, %v6848_v7  ;;  %v6787_v30 = vpop.f32.mrb[230].mxu0  ;;  %v6851_v14 = vpop.f32.mrb[230].mxu1 }
 0x2c5   : > { %v6788_v37 = vpop.f32.mrb[231].mxu0  ;;  %v6852_v39 = vpop.f32.mrb[231].mxu1 }
 0x2c6   : > { %v9499_v25 = vadd.f32 %v6786_v38, %v9362_v36  ;;  %v9502_v15 = vadd.f32 %v6850_v19, %v9365_v24  ;;  %v6789_v11 = vadd.f32 %v6788_v37, %v6787_v30  ;;  %v6853_v56 = vadd.f32 %v6852_v39, %v6851_v14 }
 0x2c8   : > { %v9505_v17 = vadd.f32 %v6789_v11, %v9369_v50  ;;  %v9508_v29 = vadd.f32 %v6853_v56, %v9372_v43 }
 0x2ca   : > { %v6790_v6 = vpop.f32.mrb[232].mxu0  ;;  %v6854_v12 = vpop.f32.mrb[232].mxu1 }
 0x2cb   : > { %v6791_v16 = vpop.f32.mrb[233].mxu0  ;;  %v6855_v18 = vpop.f32.mrb[233].mxu1 }
 0x2cc   : > { %v6792_v55 = vadd.f32 %v6791_v16, %v6790_v6  ;;  %v6856_v63 = vadd.f32 %v6855_v18, %v6854_v12  ;;  %v6793_v22 = vpop.f32.mrb[234].mxu0  ;;  %v6857_v36 = vpop.f32.mrb[234].mxu1 }
 0x2cd   : > { %v6794_v1 = vpop.f32.mrb[235].mxu0  ;;  %v6858_v40 = vpop.f32.mrb[235].mxu1 }
 0x2ce   : > { %v9511_v24 = vadd.f32 %v6792_v55, %v9380_v62  ;;  %v9514_v8 = vadd.f32 %v6856_v63, %v9383_v52  ;;  %v6795_v50 = vadd.f32 %v6794_v1, %v6793_v22  ;;  %v6859_v5 = vadd.f32 %v6858_v40, %v6857_v36 }
 0x2d0   : > { %v9517_v43 = vadd.f32 %v6795_v50, %v9387_v61  ;;  %v9520_v53 = vadd.f32 %v6859_v5, %v9390_v44 }
 0x2d2   : > { %v6796_v9 = vpop.f32.mrb[236].mxu0  ;;  %v6860_v20 = vpop.f32.mrb[236].mxu1 }
 0x2d3   : > { %v6797_v2 = vpop.f32.mrb[237].mxu0  ;;  %v6861_v26 = vpop.f32.mrb[237].mxu1 }
 0x2d4   : > { %v6798_v10 = vadd.f32 %v6797_v2, %v6796_v9  ;;  %v6862_v7 = vadd.f32 %v6861_v26, %v6860_v20  ;;  %v6799_v46 = vpop.f32.mrb[238].mxu0  ;;  %v6863_v62 = vpop.f32.mrb[238].mxu1 }
 0x2d5   : > { %v6800_v35 = vpop.f32.mrb[239].mxu0  ;;  %v6864_v38 = vpop.f32.mrb[239].mxu1 }
 0x2d6   : > { %v9523_v52 = vadd.f32 %v6798_v10, %v9398_v4  ;;  %v9526_v19 = vadd.f32 %v6862_v7, %v9401_v0  ;;  %v6801_v61 = vadd.f32 %v6800_v35, %v6799_v46  ;;  %v6865_v30 = vadd.f32 %v6864_v38, %v6863_v62 }
 0x2d8   : > { %v9529_v44 = vadd.f32 %v6801_v61, %v9405_v34  ;;  %v9532_v14 = vadd.f32 %v6865_v30, %v9408_v57 }
 0x2da   : > { %v6866_v37 = vpop.f32.mrb[240].mxu1  ;;  %v6930_v39 = vpop.f32.mrb[240].mxu0 }
 0x2db   : > { %v6867_v11 = vpop.f32.mrb[241].mxu1  ;;  %v6931_v56 = vpop.f32.mrb[241].mxu0 }
 0x2dc   : > { %v6868_v6 = vadd.f32 %v6867_v11, %v6866_v37  ;;  %v6932_v12 = vadd.f32 %v6931_v56, %v6930_v39  ;;  %v6869_v16 = vpop.f32.mrb[242].mxu1  ;;  %v6933_v4 = vpop.f32.mrb[242].mxu0 }
 0x2dd   : > { %v6870_v18 = vpop.f32.mrb[243].mxu1  ;;  %v6934_v55 = vpop.f32.mrb[243].mxu0 }
 0x2de   : > { %v9535_v0 = vadd.f32 %v6868_v6, %v9416_v48  ;;  %v9538_v63 = vadd.f32 %v6932_v12, %v9419_v45  ;;  %v6871_v34 = vadd.f32 %v6870_v18, %v6869_v16  ;;  %v6935_v22 = vadd.f32 %v6934_v55, %v6933_v4 }
 0x2e0   : > { %v9541_v57 = vadd.f32 %v6871_v34, %v9423_v21  ;;  %v9544_v36 = vadd.f32 %v6935_v22, %v9426_v49 }
 0x2e2   : > { %v6872_v1 = vpop.f32.mrb[244].mxu1  ;;  %v6936_v40 = vpop.f32.mrb[244].mxu0 }
 0x2e3   : > { %v6873_v50 = vpop.f32.mrb[245].mxu1  ;;  %v6937_v5 = vpop.f32.mrb[245].mxu0 }
 0x2e4   : > { %v6874_v9 = vadd.f32 %v6873_v50, %v6872_v1  ;;  %v6938_v20 = vadd.f32 %v6937_v5, %v6936_v40  ;;  %v6875_v2 = vpop.f32.mrb[246].mxu1  ;;  %v6939_v48 = vpop.f32.mrb[246].mxu0 }
 0x2e5   : > { %v6876_v26 = vpop.f32.mrb[247].mxu1  ;;  %v6940_v10 = vpop.f32.mrb[247].mxu0 }
 0x2e6   : > { %v9547_v45 = vadd.f32 %v6874_v9, %v9434_v3  ;;  %v9550_v7 = vadd.f32 %v6938_v20, %v9437_v13  ;;  %v6877_v21 = vadd.f32 %v6876_v26, %v6875_v2  ;;  %v6941_v46 = vadd.f32 %v6940_v10, %v6939_v48 }
 0x2e8   : > { %v9553_v49 = vadd.f32 %v6877_v21, %v9441_v59  ;;  %v9556_v62 = vadd.f32 %v6941_v46, %v9444_v51 }
 0x2ea   : > { %v6878_v35 = vpop.f32.mrb[248].mxu1  ;;  %v6942_v38 = vpop.f32.mrb[248].mxu0 }
 0x2eb   : > { %v6879_v61 = vpop.f32.mrb[249].mxu1  ;;  %v6943_v30 = vpop.f32.mrb[249].mxu0 }
 0x2ec   : > { %v6880_v37 = vadd.f32 %v6879_v61, %v6878_v35  ;;  %v6944_v39 = vadd.f32 %v6943_v30, %v6942_v38  ;;  %v6881_v11 = vpop.f32.mrb[250].mxu1  ;;  %v6945_v3 = vpop.f32.mrb[250].mxu0 }
 0x2ed   : > { %v6882_v56 = vpop.f32.mrb[251].mxu1  ;;  %v6946_v6 = vpop.f32.mrb[251].mxu0 }
 0x2ee   : > { %v9559_v13 = vadd.f32 %v6880_v37, %v9452_v32  ;;  %v9562_v12 = vadd.f32 %v6944_v39, %v9455_v47  ;;  %v6883_v59 = vadd.f32 %v6882_v56, %v6881_v11  ;;  %v6947_v16 = vadd.f32 %v6946_v6, %v6945_v3 }
 0x2f0   : > { %v9565_v51 = vadd.f32 %v6883_v59, %v9459_v42  ;;  %v9568_v4 = vadd.f32 %v6947_v16, %v9462_v41 }
 0x2f2   : > { %v6884_v18 = vpop.f32.mrb[252].mxu1  ;;  %v6948_v55 = vpop.f32.mrb[252].mxu0 }
 0x2f3   : > { %v6885_v34 = vpop.f32.mrb[253].mxu1  ;;  %v6949_v22 = vpop.f32.mrb[253].mxu0 }
 0x2f4   : > { %v6886_v1 = vadd.f32 %v6885_v34, %v6884_v18  ;;  %v6950_v40 = vadd.f32 %v6949_v22, %v6948_v55  ;;  %v6887_v50 = vpop.f32.mrb[254].mxu1  ;;  %v6951_v32 = vpop.f32.mrb[254].mxu0 }
 0x2f5   : > { %v6888_v5 = vpop.f32.mrb[255].mxu1  ;;  %v6952_v9 = vpop.f32.mrb[255].mxu0 }
 0x2f6   : > { %v9571_v47 = vadd.f32 %v6886_v1, %v9470_v31  ;;  %v9574_v20 = vadd.f32 %v6950_v40, %v9473_v54  ;;  %v6889_v42 = vadd.f32 %v6888_v5, %v6887_v50  ;;  %v6953_v2 = vadd.f32 %v6952_v9, %v6951_v32 }
 0x2f8   : > { %v9577_v41 = vadd.f32 %v6889_v42, %v9477_v28  ;;  %v9580_v48 = vadd.f32 %v6953_v2, %v9480_v23 }
 0x2fa   : > { %v6890_v26 = vpop.f32.mrb[0].mxu1  ;;  %v6954_v10 = vpop.f32.mrb[0].mxu0 }
 0x2fb   : > { %v6891_v21 = vpop.f32.mrb[1].mxu1  ;;  %v6955_v46 = vpop.f32.mrb[1].mxu0 }
 0x2fc   : > { %v6892_v35 = vadd.f32 %v6891_v21, %v6890_v26  ;;  %v6956_v38 = vadd.f32 %v6955_v46, %v6954_v10  ;;  %v6893_v61 = vpop.f32.mrb[2].mxu1  ;;  %v6957_v31 = vpop.f32.mrb[2].mxu0 }
 0x2fd   : > { %v6894_v30 = vpop.f32.mrb[3].mxu1  ;;  %v6958_v37 = vpop.f32.mrb[3].mxu0 }
 0x2fe   : > { %v9583_v54 = vadd.f32 %v6892_v35, %v9486_v27  ;;  %v9586_v39 = vadd.f32 %v6956_v38, %v9489_v33  ;;  %v6895_v28 = vadd.f32 %v6894_v30, %v6893_v61  ;;  %v6959_v11 = vadd.f32 %v6958_v37, %v6957_v31 }
 0x300   : > { %v9589_v23 = vadd.f32 %v6895_v28, %v9493_v58  ;;  %v9592_v3 = vadd.f32 %v6959_v11, %v9496_v60 }
 0x302   : > { %v6896_v56 = vpop.f32.mrb[4].mxu1  ;;  %v6960_v6 = vpop.f32.mrb[4].mxu0 }
 0x303   : > { %v6897_v59 = vpop.f32.mrb[5].mxu1  ;;  %v6961_v16 = vpop.f32.mrb[5].mxu0 }
 0x304   : > { %v6898_v18 = vadd.f32 %v6897_v59, %v6896_v56  ;;  %v6962_v55 = vadd.f32 %v6961_v16, %v6960_v6  ;;  %v6899_v34 = vpop.f32.mrb[6].mxu1  ;;  %v6963_v27 = vpop.f32.mrb[6].mxu0 }
 0x305   : > { %v6900_v22 = vpop.f32.mrb[7].mxu1  ;;  %v6964_v1 = vpop.f32.mrb[7].mxu0 }
 0x306   : > { %v9595_v33 = vadd.f32 %v6898_v18, %v9499_v25  ;;  %v9598_v40 = vadd.f32 %v6962_v55, %v9502_v15  ;;  %v6901_v58 = vadd.f32 %v6900_v22, %v6899_v34  ;;  %v6965_v50 = vadd.f32 %v6964_v1, %v6963_v27 }
 0x308   : > { %v9601_v60 = vadd.f32 %v6901_v58, %v9505_v17  ;;  %v9604_v32 = vadd.f32 %v6965_v50, %v9508_v29 }
 0x30a   : > { %v6902_v5 = vpop.f32.mrb[8].mxu1  ;;  %v6966_v9 = vpop.f32.mrb[8].mxu0 }
 0x30b   : > { %v6903_v42 = vpop.f32.mrb[9].mxu1  ;;  %v6967_v2 = vpop.f32.mrb[9].mxu0 }
 0x30c   : > { %v6904_v26 = vadd.f32 %v6903_v42, %v6902_v5  ;;  %v6968_v10 = vadd.f32 %v6967_v2, %v6966_v9  ;;  %v6905_v21 = vpop.f32.mrb[10].mxu1  ;;  %v6969_v25 = vpop.f32.mrb[10].mxu0 }
 0x30d   : > { %v6906_v46 = vpop.f32.mrb[11].mxu1  ;;  %v6970_v35 = vpop.f32.mrb[11].mxu0 }
 0x30e   : > { %v9607_v15 = vadd.f32 %v6904_v26, %v9511_v24  ;;  %v9610_v38 = vadd.f32 %v6968_v10, %v9514_v8  ;;  %v6907_v17 = vadd.f32 %v6906_v46, %v6905_v21  ;;  %v6971_v61 = vadd.f32 %v6970_v35, %v6969_v25 }
 0x310   : > { %v9613_v29 = vadd.f32 %v6907_v17, %v9517_v43  ;;  %v9616_v31 = vadd.f32 %v6971_v61, %v9520_v53 }
 0x312   : > { %v6908_v30 = vpop.f32.mrb[12].mxu1  ;;  %v6972_v37 = vpop.f32.mrb[12].mxu0 }
 0x313   : > { %v6909_v28 = vpop.f32.mrb[13].mxu1  ;;  %v6973_v11 = vpop.f32.mrb[13].mxu0 }
 0x314   : > { %v6910_v56 = vadd.f32 %v6909_v28, %v6908_v30  ;;  %v6974_v6 = vadd.f32 %v6973_v11, %v6972_v37  ;;  %v6911_v59 = vpop.f32.mrb[14].mxu1  ;;  %v6975_v24 = vpop.f32.mrb[14].mxu0 }
 0x315   : > { %v6912_v16 = vpop.f32.mrb[15].mxu1  ;;  %v6976_v18 = vpop.f32.mrb[15].mxu0 }
 0x316   : > { %v9619_v8 = vadd.f32 %v6910_v56, %v9523_v52  ;;  %v9622_v55 = vadd.f32 %v6974_v6, %v9526_v19  ;;  %v6913_v43 = vadd.f32 %v6912_v16, %v6911_v59  ;;  %v6977_v34 = vadd.f32 %v6976_v18, %v6975_v24 }
 0x318   : > { %v9625_v53 = vadd.f32 %v6913_v43, %v9529_v44  ;;  %v9628_v27 = vadd.f32 %v6977_v34, %v9532_v14 }
 0x31a   : > { %v6978_v22 = vpop.f32.mrb[16].mxu0  ;;  %v7042_v1 = vpop.f32.mrb[16].mxu1 }
 0x31b   : > { %v6979_v58 = vpop.f32.mrb[17].mxu0  ;;  %v7043_v50 = vpop.f32.mrb[17].mxu1 }
 0x31c   : > { %v6980_v5 = vadd.f32 %v6979_v58, %v6978_v22  ;;  %v7044_v9 = vadd.f32 %v7043_v50, %v7042_v1  ;;  %v6981_v42 = vpop.f32.mrb[18].mxu0  ;;  %v7045_v52 = vpop.f32.mrb[18].mxu1 }
 0x31d   : > { %v6982_v2 = vpop.f32.mrb[19].mxu0  ;;  %v7046_v26 = vpop.f32.mrb[19].mxu1 }
 0x31e   : > { %v9631_v19 = vadd.f32 %v6980_v5, %v9535_v0  ;;  %v6983_v10 = vadd.f32 %v6982_v2, %v6981_v42  ;;  %v7047_v21 = vadd.f32 %v7046_v26, %v7045_v52  ;;  %v9634_v44 = vadd.f32 %v7044_v9, %v9538_v63 }
 0x320   : > { %v9637_v14 = vadd.f32 %v6983_v10, %v9541_v57  ;;  %v9640_v25 = vadd.f32 %v7047_v21, %v9544_v36 }
 0x322   : > { %v6984_v46 = vpop.f32.mrb[20].mxu0  ;;  %v7048_v35 = vpop.f32.mrb[20].mxu1 }
 0x323   : > { %v6985_v17 = vpop.f32.mrb[21].mxu0  ;;  %v7049_v61 = vpop.f32.mrb[21].mxu1 }
 0x324   : > { %v6986_v30 = vadd.f32 %v6985_v17, %v6984_v46  ;;  %v7050_v37 = vadd.f32 %v7049_v61, %v7048_v35  ;;  %v6987_v28 = vpop.f32.mrb[22].mxu0  ;;  %v7051_v0 = vpop.f32.mrb[22].mxu1 }
 0x325   : > { %v6988_v11 = vpop.f32.mrb[23].mxu0  ;;  %v7052_v56 = vpop.f32.mrb[23].mxu1 }
 0x326   : > { %v9643_v6 = vadd.f32 %v6986_v30, %v9547_v45  ;;  %v6989_v63 = vadd.f32 %v6988_v11, %v6987_v28  ;;  %v7053_v59 = vadd.f32 %v7052_v56, %v7051_v0  ;;  %v9646_v57 = vadd.f32 %v7050_v37, %v9550_v7 }
 0x328   : > { %v9649_v36 = vadd.f32 %v6989_v63, %v9553_v49  ;;  %v9652_v24 = vadd.f32 %v7053_v59, %v9556_v62 }
 0x32a   : > { %v6990_v16 = vpop.f32.mrb[24].mxu0  ;;  %v7054_v18 = vpop.f32.mrb[24].mxu1 }
 0x32b   : > { %v6991_v43 = vpop.f32.mrb[25].mxu0  ;;  %v7055_v34 = vpop.f32.mrb[25].mxu1 }
 0x32c   : > { %v6992_v22 = vadd.f32 %v6991_v43, %v6990_v16  ;;  %v7056_v1 = vadd.f32 %v7055_v34, %v7054_v18  ;;  %v6993_v58 = vpop.f32.mrb[26].mxu0  ;;  %v7057_v45 = vpop.f32.mrb[26].mxu1 }
 0x32d   : > { %v6994_v50 = vpop.f32.mrb[27].mxu0  ;;  %v7058_v5 = vpop.f32.mrb[27].mxu1 }
 0x32e   : > { %v9655_v9 = vadd.f32 %v6992_v22, %v9559_v13  ;;  %v6995_v7 = vadd.f32 %v6994_v50, %v6993_v58  ;;  %v7059_v42 = vadd.f32 %v7058_v5, %v7057_v45  ;;  %v9658_v49 = vadd.f32 %v7056_v1, %v9562_v12 }
 0x330   : > { %v9661_v62 = vadd.f32 %v6995_v7, %v9565_v51  ;;  %v9664_v52 = vadd.f32 %v7059_v42, %v9568_v4 }
 0x332   : > { %v6996_v2 = vpop.f32.mrb[28].mxu0  ;;  %v7060_v26 = vpop.f32.mrb[28].mxu1 }
 0x333   : > { %v6997_v10 = vpop.f32.mrb[29].mxu0  ;;  %v7061_v21 = vpop.f32.mrb[29].mxu1 }
 0x334   : > { %v6998_v46 = vadd.f32 %v6997_v10, %v6996_v2  ;;  %v7062_v35 = vadd.f32 %v7061_v21, %v7060_v26  ;;  %v6999_v17 = vpop.f32.mrb[30].mxu0  ;;  %v7063_v13 = vpop.f32.mrb[30].mxu1 }
 0x335   : > { %v7000_v61 = vpop.f32.mrb[31].mxu0  ;;  %v7064_v30 = vpop.f32.mrb[31].mxu1 }
 0x336   : > { %v9667_v37 = vadd.f32 %v6998_v46, %v9571_v47  ;;  %v7001_v12 = vadd.f32 %v7000_v61, %v6999_v17  ;;  %v7065_v28 = vadd.f32 %v7064_v30, %v7063_v13  ;;  %v9670_v51 = vadd.f32 %v7062_v35, %v9574_v20 }
 0x338   : > { %v9673_v4 = vadd.f32 %v7001_v12, %v9577_v41  ;;  %v9676_v0 = vadd.f32 %v7065_v28, %v9580_v48 }
 0x33a   : > { %v7002_v11 = vpop.f32.mrb[32].mxu0  ;;  %v7066_v56 = vpop.f32.mrb[32].mxu1 }
 0x33b   : > { %v7003_v63 = vpop.f32.mrb[33].mxu0  ;;  %v7067_v59 = vpop.f32.mrb[33].mxu1 }
 0x33c   : > { %v7004_v16 = vadd.f32 %v7003_v63, %v7002_v11  ;;  %v7068_v18 = vadd.f32 %v7067_v59, %v7066_v56  ;;  %v7005_v43 = vpop.f32.mrb[34].mxu0  ;;  %v7069_v47 = vpop.f32.mrb[34].mxu1 }
 0x33d   : > { %v7006_v34 = vpop.f32.mrb[35].mxu0  ;;  %v7070_v22 = vpop.f32.mrb[35].mxu1 }
 0x33e   : > { %v9679_v1 = vadd.f32 %v7004_v16, %v9583_v54  ;;  %v7007_v20 = vadd.f32 %v7006_v34, %v7005_v43  ;;  %v7071_v58 = vadd.f32 %v7070_v22, %v7069_v47  ;;  %v9682_v41 = vadd.f32 %v7068_v18, %v9586_v39 }
 0x340   : > { %v9685_v48 = vadd.f32 %v7007_v20, %v9589_v23  ;;  %v9688_v45 = vadd.f32 %v7071_v58, %v9592_v3 }
 0x342   : > { %v7008_v50 = vpop.f32.mrb[36].mxu0  ;;  %v7072_v5 = vpop.f32.mrb[36].mxu1 }
 0x343   : > { %v7009_v7 = vpop.f32.mrb[37].mxu0  ;;  %v7073_v42 = vpop.f32.mrb[37].mxu1 }
 0x344   : > { %v7010_v2 = vadd.f32 %v7009_v7, %v7008_v50  ;;  %v7074_v26 = vadd.f32 %v7073_v42, %v7072_v5  ;;  %v7011_v10 = vpop.f32.mrb[38].mxu0  ;;  %v7075_v54 = vpop.f32.mrb[38].mxu1 }
 0x345   : > { %v7012_v21 = vpop.f32.mrb[39].mxu0  ;;  %v7076_v46 = vpop.f32.mrb[39].mxu1 }
 0x346   : > { %v9691_v35 = vadd.f32 %v7010_v2, %v9595_v33  ;;  %v7013_v39 = vadd.f32 %v7012_v21, %v7011_v10  ;;  %v7077_v17 = vadd.f32 %v7076_v46, %v7075_v54  ;;  %v9694_v23 = vadd.f32 %v7074_v26, %v9598_v40 }
 0x348   : > { %v9697_v3 = vadd.f32 %v7013_v39, %v9601_v60  ;;  %v9700_v13 = vadd.f32 %v7077_v17, %v9604_v32 }
 0x34a   : > { %v7014_v61 = vpop.f32.mrb[40].mxu0  ;;  %v7078_v30 = vpop.f32.mrb[40].mxu1 }
 0x34b   : > { %v7015_v12 = vpop.f32.mrb[41].mxu0  ;;  %v7079_v28 = vpop.f32.mrb[41].mxu1 }
 0x34c   : > { %v7016_v11 = vadd.f32 %v7015_v12, %v7014_v61  ;;  %v7080_v56 = vadd.f32 %v7079_v28, %v7078_v30  ;;  %v7017_v63 = vpop.f32.mrb[42].mxu0  ;;  %v7081_v33 = vpop.f32.mrb[42].mxu1 }
 0x34d   : > { %v7018_v59 = vpop.f32.mrb[43].mxu0  ;;  %v7082_v16 = vpop.f32.mrb[43].mxu1 }
 0x34e   : > { %v9703_v18 = vadd.f32 %v7016_v11, %v9607_v15  ;;  %v7019_v40 = vadd.f32 %v7018_v59, %v7017_v63  ;;  %v7083_v43 = vadd.f32 %v7082_v16, %v7081_v33  ;;  %v9706_v60 = vadd.f32 %v7080_v56, %v9610_v38 }
 0x350   : > { %v9709_v32 = vadd.f32 %v7019_v40, %v9613_v29  ;;  %v9712_v47 = vadd.f32 %v7083_v43, %v9616_v31 }
 0x352   : > { %v7020_v34 = vpop.f32.mrb[44].mxu0  ;;  %v7084_v22 = vpop.f32.mrb[44].mxu1 }
 0x353   : > { %v7021_v20 = vpop.f32.mrb[45].mxu0  ;;  %v7085_v58 = vpop.f32.mrb[45].mxu1 }
 0x354   : > { %v7022_v50 = vadd.f32 %v7021_v20, %v7020_v34  ;;  %v7086_v5 = vadd.f32 %v7085_v58, %v7084_v22  ;;  %v7023_v15 = vpop.f32.mrb[46].mxu0  ;;  %v7087_v7 = vpop.f32.mrb[46].mxu1 }
 0x355   : > { %v7024_v42 = vpop.f32.mrb[47].mxu0  ;;  %v7088_v2 = vpop.f32.mrb[47].mxu1 }
 0x356   : > { %v9715_v38 = vadd.f32 %v7022_v50, %v9619_v8  ;;  %v7025_v26 = vadd.f32 %v7024_v42, %v7023_v15  ;;  %v7089_v29 = vadd.f32 %v7088_v2, %v7087_v7  ;;  %v9718_v10 = vadd.f32 %v7086_v5, %v9622_v55 }
 0x358   : > { %v9722_v31 = vadd.f32 %v7025_v26, %v9625_v53  ;;  %v9725_v54 = vadd.f32 %v7089_v29, %v9628_v27 }
 0x35a   : > { %v7090_v21 = vpop.f32.mrb[48].mxu1  ;;  %v7162_v8 = vpop.f32.mrb[48].mxu0 }
 0x35b   : > { %v5251_v55 = vadd.f32 %v7162_v8, %v9646_v57  ;;  %v7091_v46 = vpop.f32.mrb[49].mxu1  ;;  %v5242_v53 = vpop.f32.mrb[49].mxu0 }
 0x35c   : > { %v7092_v39 = vadd.f32 %v7091_v46, %v7090_v21  ;;  %v5243_v27 = vadd.f32 %v5242_v53, %v9634_v44  ;;  %v7093_v17 = vpop.f32.mrb[50].mxu1  ;;  %v7163_v61 = vpop.f32.mrb[50].mxu0 }
 0x35d   : > { %5372 = vst.msk [vmem:[%s9730_s19 + $0x10] sm:$0xff] %vm5369_vm1, %v5251_v55  ;;  %v5254_v30 = vadd.f32 %v7163_v61, %v9652_v24  ;;  %v7094_v12 = vpop.f32.mrb[51].mxu1  ;;  %v5245_v28 = vpop.f32.mrb[51].mxu0 }
 0x35e   : > { %5370 = vst.msk [vmem:[%s9730_s19] sm:$0xff] %vm5369_vm1, %v5243_v27  ;;  %v7095_v11 = vadd.f32 %v7094_v12, %v7093_v17  ;;  %v5246_v57 = vadd.f32 %v5245_v28, %v9640_v25  ;;  %v9741_v56 = vadd.f32 %v7092_v39, %v9631_v19 }
 0x35f   : > { %5373 = vst.msk [vmem:[%s9730_s19 + $0x18] sm:$0xff] %vm5369_vm1, %v5254_v30 }
 0x360   : > { %5371 = vst.msk [vmem:[%s9730_s19 + $0x8] sm:$0xff] %vm5369_vm1, %v5246_v57  ;;  %v9748_v44 = vadd.f32 %v7095_v11, %v9637_v14 }
 0x362   : > { %v7096_v24 = vpop.f32.mrb[52].mxu1  ;;  %v7166_v63 = vpop.f32.mrb[52].mxu0 }
 0x363   : > { %v5267_v33 = vadd.f32 %v7166_v63, %v9670_v51  ;;  %v7097_v59 = vpop.f32.mrb[53].mxu1  ;;  %v5258_v16 = vpop.f32.mrb[53].mxu0 }
 0x364   : > { %v7098_v25 = vadd.f32 %v7097_v59, %v7096_v24  ;;  %v5259_v19 = vadd.f32 %v5258_v16, %v9658_v49  ;;  %v7099_v40 = vpop.f32.mrb[54].mxu1  ;;  %v7167_v43 = vpop.f32.mrb[54].mxu0 }
 0x365   : > { %5376 = vst.msk [vmem:[%s9730_s19 + $0x30] sm:$0xff] %vm5369_vm1, %v5267_v33  ;;  %v5270_v34 = vadd.f32 %v7167_v43, %v9676_v0  ;;  %v7100_v22 = vpop.f32.mrb[55].mxu1  ;;  %v5261_v14 = vpop.f32.mrb[55].mxu0 }
 0x366   : > { %5374 = vst.msk [vmem:[%s9730_s19 + $0x20] sm:$0xff] %vm5369_vm1, %v5259_v19  ;;  %v7101_v20 = vadd.f32 %v7100_v22, %v7099_v40  ;;  %v5262_v51 = vadd.f32 %v5261_v14, %v9664_v52  ;;  %v5154_v58 = vadd.f32 %v7098_v25, %v9643_v6 }
 0x367   : > { %5377 = vst.msk [vmem:[%s9730_s19 + $0x38] sm:$0xff] %vm5369_vm1, %v5270_v34 }
 0x368   : > { %5375 = vst.msk [vmem:[%s9730_s19 + $0x28] sm:$0xff] %vm5369_vm1, %v5262_v51  ;;  %v5157_v49 = vadd.f32 %v7101_v20, %v9649_v36 }
 0x36a   : > { %v7102_v50 = vpop.f32.mrb[56].mxu1  ;;  %v7170_v5 = vpop.f32.mrb[56].mxu0 }
 0x36b   : > { %v5283_v0 = vadd.f32 %v7170_v5, %v9694_v23  ;;  %v7103_v15 = vpop.f32.mrb[57].mxu1  ;;  %v5274_v7 = vpop.f32.mrb[57].mxu0 }
 0x36c   : > { %v7104_v42 = vadd.f32 %v7103_v15, %v7102_v50  ;;  %v5275_v52 = vadd.f32 %v5274_v7, %v9682_v41  ;;  %v7105_v2 = vpop.f32.mrb[58].mxu1  ;;  %v7171_v6 = vpop.f32.mrb[58].mxu0 }
 0x36d   : > { %5380 = vst.msk [vmem:[%s9730_s19 + $0x50] sm:$0xff] %vm5369_vm1, %v5283_v0  ;;  %v5286_v26 = vadd.f32 %v7171_v6, %v9700_v13  ;;  %v7106_v29 = vpop.f32.mrb[59].mxu1  ;;  %v5277_v21 = vpop.f32.mrb[59].mxu0 }
 0x36e   : > { %5378 = vst.msk [vmem:[%s9730_s19 + $0x40] sm:$0xff] %vm5369_vm1, %v5275_v52  ;;  %v7107_v36 = vadd.f32 %v7106_v29, %v7105_v2  ;;  %v5278_v23 = vadd.f32 %v5277_v21, %v9688_v45  ;;  %v5162_v8 = vadd.f32 %v7104_v42, %v9655_v9 }
 0x36f   : > { %5381 = vst.msk [vmem:[%s9730_s19 + $0x58] sm:$0xff] %vm5369_vm1, %v5286_v26 }
 0x370   : > { %5379 = vst.msk [vmem:[%s9730_s19 + $0x48] sm:$0xff] %vm5369_vm1, %v5278_v23  ;;  %v5165_v41 = vadd.f32 %v7107_v36, %v9661_v62 }
 0x372   : > { %v7108_v55 = vpop.f32.mrb[60].mxu1  ;;  %v7174_v46 = vpop.f32.mrb[60].mxu0 }
 0x373   : > { %v5299_v13 = vadd.f32 %v7174_v46, %v9718_v10  ;;  %v7109_v53 = vpop.f32.mrb[61].mxu1  ;;  %v5290_v39 = vpop.f32.mrb[61].mxu0 }
 0x374   : > { %v7110_v27 = vadd.f32 %v7109_v53, %v7108_v55  ;;  %v5291_v45 = vadd.f32 %v5290_v39, %v9706_v60  ;;  %v7111_v17 = vpop.f32.mrb[62].mxu1  ;;  %v7175_v9 = vpop.f32.mrb[62].mxu0 }
 0x375   : > { %5384 = vst.msk [vmem:[%s9730_s19 + $0x70] sm:$0xff] %vm5369_vm1, %v5299_v13  ;;  %v5302_v61 = vadd.f32 %v7175_v9, %v9725_v54  ;;  %v7112_v30 = vpop.f32.mrb[63].mxu1  ;;  %v5293_v12 = vpop.f32.mrb[63].mxu0 }
 0x376   : > { %5382 = vst.msk [vmem:[%s9730_s19 + $0x60] sm:$0xff] %vm5369_vm1, %v5291_v45  ;;  %v7113_v62 = vadd.f32 %v7112_v30, %v7111_v17  ;;  %v5294_v10 = vadd.f32 %v5293_v12, %v9712_v47  ;;  %v5170_v28 = vadd.f32 %v7110_v27, %v9667_v37 }
 0x377   : > { %5385 = vst.msk [vmem:[%s9730_s19 + $0x78] sm:$0xff] %vm5369_vm1, %v5302_v61 }
 0x378   : > { %5383 = vst.msk [vmem:[%s9730_s19 + $0x68] sm:$0xff] %vm5369_vm1, %v5294_v10  ;;  %v5173_v60 = vadd.f32 %v7113_v62, %v9673_v4 }
 0x37a   : > { %v7114_v11 = vpop.f32.mrb[64].mxu1  ;;  %v7178_v57 = vpop.f32.mrb[64].mxu0 }
 0x37b   : > { %v5315_v54 = vadd.f32 %v7178_v57, %v5154_v58  ;;  %v7115_v24 = vpop.f32.mrb[65].mxu1  ;;  %v5306_v63 = vpop.f32.mrb[65].mxu0 }
 0x37c   : > { %v7116_v33 = vadd.f32 %v7115_v24, %v7114_v11  ;;  %v5307_v59 = vadd.f32 %v5306_v63, %v9741_v56  ;;  %v7117_v47 = vpop.f32.mrb[66].mxu1  ;;  %v7179_v16 = vpop.f32.mrb[66].mxu0 }
 0x37d   : > { %5388 = vst.msk [vmem:[%s9730_s19 + $0x90] sm:$0xff] %vm5369_vm1, %v5315_v54  ;;  %v5318_v37 = vadd.f32 %v7179_v16, %v5157_v49  ;;  %v7118_v25 = vpop.f32.mrb[67].mxu1  ;;  %v5309_v19 = vpop.f32.mrb[67].mxu0 }
 0x37e   : > { %5386 = vst.msk [vmem:[%s9730_s19 + $0x80] sm:$0xff] %vm5369_vm1, %v5307_v59  ;;  %v7119_v4 = vadd.f32 %v7118_v25, %v7117_v47  ;;  %v5310_v40 = vadd.f32 %v5309_v19, %v9748_v44  ;;  %v5178_v43 = vadd.f32 %v7116_v33, %v9679_v1 }
 0x37f   : > { %5389 = vst.msk [vmem:[%s9730_s19 + $0x98] sm:$0xff] %vm5369_vm1, %v5318_v37 }
 0x380   : > { %5387 = vst.msk [vmem:[%s9730_s19 + $0x88] sm:$0xff] %vm5369_vm1, %v5310_v40  ;;  %v5181_v56 = vadd.f32 %v7119_v4, %v9685_v48 }
 0x382   : > { %v7120_v34 = vpop.f32.mrb[68].mxu1  ;;  %v7182_v22 = vpop.f32.mrb[68].mxu0 }
 0x383   : > { %v5331_v14 = vadd.f32 %v7182_v22, %v5170_v28  ;;  %v7121_v20 = vpop.f32.mrb[69].mxu1  ;;  %v5322_v51 = vpop.f32.mrb[69].mxu0 }
 0x384   : > { %v7122_v58 = vadd.f32 %v7121_v20, %v7120_v34  ;;  %v5323_v49 = vadd.f32 %v5322_v51, %v5162_v8  ;;  %v7123_v50 = vpop.f32.mrb[70].mxu1  ;;  %v7183_v44 = vpop.f32.mrb[70].mxu0 }
 0x385   : > { %5392 = vst.msk [vmem:[%s9730_s19 + $0xb0] sm:$0xff] %vm5369_vm1, %v5331_v14  ;;  %v5334_v1 = vadd.f32 %v7183_v44, %v5173_v60  ;;  %v7124_v5 = vpop.f32.mrb[71].mxu1  ;;  %v5325_v0 = vpop.f32.mrb[71].mxu0 }
 0x386   : > { %5390 = vst.msk [vmem:[%s9730_s19 + $0xa0] sm:$0xff] %vm5369_vm1, %v5323_v49  ;;  %v7125_v48 = vadd.f32 %v7124_v5, %v7123_v50  ;;  %v5326_v15 = vadd.f32 %v5325_v0, %v5165_v41  ;;  %v5186_v7 = vadd.f32 %v7122_v58, %v9691_v35 }
 0x387   : > { %5393 = vst.msk [vmem:[%s9730_s19 + $0xb8] sm:$0xff] %vm5369_vm1, %v5334_v1 }
 0x388   : > { %5391 = vst.msk [vmem:[%s9730_s19 + $0xa8] sm:$0xff] %vm5369_vm1, %v5326_v15  ;;  %v5189_v42 = vadd.f32 %v7125_v48, %v9697_v3 }
 0x38a   : > { %v7126_v52 = vpop.f32.mrb[72].mxu1  ;;  %v7186_v2 = vpop.f32.mrb[72].mxu0 }
 0x38b   : > { %v5347_v6 = vadd.f32 %v7186_v2, %v5186_v7  ;;  %v7127_v26 = vpop.f32.mrb[73].mxu1  ;;  %v5338_v29 = vpop.f32.mrb[73].mxu0 }
 0x38c   : > { %v7128_v21 = vadd.f32 %v7127_v26, %v7126_v52  ;;  %v5339_v36 = vadd.f32 %v5338_v29, %v5178_v43  ;;  %v7129_v23 = vpop.f32.mrb[74].mxu1  ;;  %v7187_v8 = vpop.f32.mrb[74].mxu0 }
 0x38d   : > { %5396 = vst.msk [vmem:[%s9730_s19 + $0xd0] sm:$0xff] %vm5369_vm1, %v5347_v6  ;;  %v5350_v35 = vadd.f32 %v7187_v8, %v5189_v42  ;;  %v7130_v41 = vpop.f32.mrb[75].mxu1  ;;  %v5341_v55 = vpop.f32.mrb[75].mxu0 }
 0x38e   : > { %5394 = vst.msk [vmem:[%s9730_s19 + $0xc0] sm:$0xff] %vm5369_vm1, %v5339_v36  ;;  %v7131_v46 = vadd.f32 %v7130_v41, %v7129_v23  ;;  %v5342_v3 = vadd.f32 %v5341_v55, %v5181_v56  ;;  %v5194_v13 = vadd.f32 %v7128_v21, %v9703_v18 }
 0x38f   : > { %5397 = vst.msk [vmem:[%s9730_s19 + $0xd8] sm:$0xff] %vm5369_vm1, %v5350_v35 }
 0x390   : > { %5395 = vst.msk [vmem:[%s9730_s19 + $0xc8] sm:$0xff] %vm5369_vm1, %v5342_v3  ;;  %v5197_v53 = vadd.f32 %v7131_v46, %v9709_v32 }
 0x392   : > { %v7132_v39 = vpop.f32.mrb[76].mxu1  ;;  %v7190_v27 = vpop.f32.mrb[76].mxu0 }
 0x393   : > { %v7133_v45 = vpop.f32.mrb[77].mxu1  ;;  %v5354_v17 = vpop.f32.mrb[77].mxu0 }
 0x394   : > { %v7134_v9 = vadd.f32 %v7133_v45, %v7132_v39  ;;  %v5355_v61 = vadd.f32 %v5354_v17, %v5194_v13  ;;  %v7135_v30 = vpop.f32.mrb[78].mxu1  ;;  %v7191_v12 = vpop.f32.mrb[78].mxu0 }
 0x395   : > { %v7136_v62 = vpop.f32.mrb[79].mxu1  ;;  %v5357_v10 = vpop.f32.mrb[79].mxu0 }
 0x396   : > { %v5202_v18 = vadd.f32 %v7134_v9, %v9715_v38  ;;  %5398 = vst.msk [vmem:[%s9730_s19 + $0xe0] sm:$0xff] %vm5369_vm1, %v5355_v61  ;;  %v7137_v28 = vadd.f32 %v7136_v62, %v7135_v30  ;;  %v5358_v60 = vadd.f32 %v5357_v10, %v5197_v53 }
 0x398   : > { %v5363_v32 = vadd.f32 %v7190_v27, %v5202_v18  ;;  %v5205_v11 = vadd.f32 %v7137_v28, %v9722_v31  ;;  %5399 = vst.msk [vmem:[%s9730_s19 + $0xe8] sm:$0xff] %vm5369_vm1, %v5358_v60 }
 0x39a   : > { %5400 = vst.msk [vmem:[%s9730_s19 + $0xf0] sm:$0xff] %vm5369_vm1, %v5363_v32  ;;  %v5366_v57 = vadd.f32 %v7191_v12, %v5205_v11 }
 0x39c   : > { %5401 = vst.msk [vmem:[%s9730_s19 + $0xf8] sm:$0xff] %vm5369_vm1, %v5366_v57 }
 0x39d PF: > { %s13_s14 = sadd.s32 1, %s7914_s14   ;;  %s9847_s12 = smov %s7910_s13 }
 0x39e   : > { %p10_p5 = scmp.ge.s32.totalorder %s13_s14, 4   ;;  %s9848_s13 = smov %s9850_s15 }
 0x3a0   :  { %12 = sbr.rel (!%p10_p5) target bundleno = 2 (0x2), region = 62 }

</bundles_post_ra>
